<compile_context>
chip_gen: v7x
topology: tpu7x:2x2x1
jax: 0.10.0
libtpu: 0.0.40
codegen_flags: <defaults>
</compile_context>

<pallas_src>
import math

import jax
import jax.numpy as jnp
from jax import lax
from jax.experimental import pallas as pl
from jax.experimental.pallas import tpu as pltpu

H = W = 28          # input spatial extent (needed so the 7x7 valid conv -> 1x1)
C1 = 64             # channels after conv1 / conv2


# ---------------------------------------------------------------------------
# The single fused kernel (one grid step == one batch element)
# ---------------------------------------------------------------------------
def _network_kernel(x_ref, b1m_ref, b1t_ref, w2_ref, b2_ref, wh_ref, bh_ref,
                    o_ref,
                    ev_ref, od_ref, vps_ref, xp2_ref, c2_ref, m_ref, flat_ref):
    f32 = jnp.float32

    # ---- layer 1: split the image into even / odd height-padded rows -------
    # padded row 0 and 29 are zero; even[i] = padded row 2i, odd[i] = 2i+1.
    ev_ref[...] = jnp.zeros((16, 28), f32)
    od_ref[...] = jnp.zeros((16, 28), f32)
    for i in range(14):
        od_ref[i, :] = x_ref[0, 2 * i, :]
        ev_ref[i + 1, :] = x_ref[0, 2 * i + 1, :]

    # conv1 as 3 banded matmuls per output-row parity:
    #   out[h, w*64 + c] = sum_kh  x_pad_row[h + kh] @ B1[kh]     B1[kh]: (28, 1792)
    def conv1(r0, r1, r2):
        acc = jnp.dot(r0, b1m_ref[0], preferred_element_type=f32)
        acc = acc + jnp.dot(r1, b1m_ref[1], preferred_element_type=f32)
        acc = acc + jnp.dot(r2, b1m_ref[2], preferred_element_type=f32)
        return jnp.maximum(acc + b1t_ref[...], 0.0)          # bias + ReLU

    out_even = conv1(ev_ref[pl.ds(0, 14), :], od_ref[pl.ds(0, 14), :],
                     ev_ref[pl.ds(1, 14), :])                # rows 0,2,...,26
    out_odd = conv1(od_ref[pl.ds(0, 14), :], ev_ref[pl.ds(1, 14), :],
                    od_ref[pl.ds(1, 14), :])                 # rows 1,3,...,27
    vps_ref[...] = jnp.maximum(out_even, out_odd)            # vertical 2x1 max

    # horizontal 1x2 max + scatter into the zero-padded, column-major flat
    # layer-2 input:  xp2[w2*16 + h2, c]  (interior = pooled1, border = 0).
    xp2_ref[...] = jnp.zeros((272, 64), f32)
    for wo in range(14):
        a = vps_ref[:, pl.ds(128 * wo, 64)]                  # col 2*wo
        b = vps_ref[:, pl.ds(128 * wo + 64, 64)]             # col 2*wo + 1
        xp2_ref[pl.ds(16 * (wo + 1) + 1, 14), :] = jnp.maximum(a, b)

    # ---- layer 2: 9 accumulating matmuls, M = 224 flat output positions ----
    # position q = w*16 + h; rows with h >= 14 are don't-care (never pooled).
    acc2 = jnp.zeros((224, 64), f32)
    for kh in range(3):
        for kw in range(3):
            patch = xp2_ref[pl.ds(kw * 16 + kh, 224), :]
            acc2 = acc2 + jnp.dot(patch, w2_ref[kh, kw],
                                  preferred_element_type=f32)
    c2_ref[pl.ds(224, 16), :] = jnp.zeros((16, 64), f32)
    c2_ref[pl.ds(0, 224), :] = jnp.maximum(acc2 + b2_ref[...], 0.0)

    # 2x2 max pool: pooled2[ho, wo] = max of flat rows 32*wo + 2*ho + {0,1,16,17}
    m_ref[...] = jnp.maximum(
        jnp.maximum(c2_ref[pl.ds(0, 208), :], c2_ref[pl.ds(1, 208), :]),
        jnp.maximum(c2_ref[pl.ds(16, 208), :], c2_ref[pl.ds(17, 208), :]))

    # ---- fused head: flatten pooled2 (7,7,64) -> (1, 3136), one matmul -----
    for ho in range(7):
        for wo in range(7):
            flat_ref[0, pl.ds(64 * (ho * 7 + wo), 64)] = m_ref[32 * wo + 2 * ho, :]

    out = jnp.dot(flat_ref[...], wh_ref[...], preferred_element_type=f32)
    o_ref[0] = (out + bh_ref[...]).astype(o_ref.dtype)


# ---------------------------------------------------------------------------
# Wrapper: weight preprocessing (tiny, weight-only) + pallas_call
# ---------------------------------------------------------------------------
def _prepare_constants(params, feature_size, num_classes):
    w1, b1, w2, b2, w3, b3, w4, b4 = params
    # banded conv-1 weights: B1[kh, wu, w*64 + c] = w1[kh, wu - w + 1, 0, c]
    wu = jnp.arange(W)[:, None]          # input column
    wc = jnp.arange(W)[None, :]          # output column
    b1m = jnp.zeros((3, W, W, C1), jnp.float32)
    for dw in range(3):
        mask = (wc == wu + 1 - dw).astype(jnp.float32)               # (28, 28)
        b1m = b1m + mask[None, :, :, None] * w1[:, dw, 0, :][:, None, None, :]
    b1m = b1m.reshape(3, W, W * C1)
    b1t = jnp.tile(b1, W).reshape(1, W * C1)
    # algebraically fused head (no nonlinearity between conv3 and conv4)
    wh = w3.reshape(7 * 7 * C1, feature_size) @ w4                   # (3136, C)
    bh = (b3 @ w4 + b4).reshape(1, num_classes)
    return b1m, b1t, w2, b2.reshape(1, C1), wh, bh


def network_forward(x_nchw, params, feature_size, num_classes):
    N, Cin, Hx, Wx = x_nchw.shape
    assert Cin == 1 and Hx == H and Wx == W
    b1m, b1t, w2, b2r, wh, bh = _prepare_constants(params, feature_size, num_classes)
    xs = x_nchw.reshape(N, H, W).astype(jnp.float32)   # free reshape (Cin == 1)

    out = pl.pallas_call(
        _network_kernel,
        out_shape=jax.ShapeDtypeStruct((N, 1, num_classes), jnp.float32),
        grid_spec=pltpu.PrefetchScalarGridSpec(
            num_scalar_prefetch=0,
            grid=(N,),
            in_specs=[
                pl.BlockSpec((1, H, W), lambda n: (n, 0, 0)),
                pl.BlockSpec((3, W, W * C1), lambda n: (0, 0, 0)),
                pl.BlockSpec((1, W * C1), lambda n: (0, 0)),
                pl.BlockSpec((3, 3, C1, C1), lambda n: (0, 0, 0, 0)),
                pl.BlockSpec((1, C1), lambda n: (0, 0)),
                pl.BlockSpec((7 * 7 * C1, num_classes), lambda n: (0, 0)),
                pl.BlockSpec((1, num_classes), lambda n: (0, 0)),
            ],
            out_specs=pl.BlockSpec((1, 1, num_classes), lambda n: (n, 0, 0)),
            scratch_shapes=[
                pltpu.VMEM((16, 28), jnp.float32),          # even padded rows
                pltpu.VMEM((16, 28), jnp.float32),          # odd padded rows
                pltpu.VMEM((14, W * C1), jnp.float32),      # vertically-pooled conv1
                pltpu.VMEM((272, C1), jnp.float32),         # padded flat layer-2 input
                pltpu.VMEM((240, C1), jnp.float32),         # flat conv2 output
                pltpu.VMEM((208, C1), jnp.float32),         # 2x2-pooled conv2 (sparse rows)
                pltpu.VMEM((1, 7 * 7 * C1), jnp.float32),   # flattened head input
            ],
        ),
        compiler_params=pltpu.CompilerParams(
            dimension_semantics=("parallel",)),
    )(xs, b1m, b1t, w2, b2r, wh, bh)
    return out.reshape(N, num_classes)


# ---------------------------------------------------------------------------
# Parameters (deterministic, PyTorch-conv-style uniform init)
# ---------------------------------------------------------------------------
def init_params(key, feature_size, num_classes):
    ks = jax.random.split(key, 4)

    def conv_init(k, kh, kw, cin, cout):
        fan_in = cin * kh * kw
        bound = 1.0 / math.sqrt(fan_in)
        kwkey, kbkey = jax.random.split(k)
        w = jax.random.uniform(kwkey, (kh, kw, cin, cout), jnp.float32, -bound, bound)
        b = jax.random.uniform(kbkey, (cout,), jnp.float32, -bound, bound)
        return w, b

    w1, b1 = conv_init(ks[0], 3, 3, 1, 64)
    w2, b2 = conv_init(ks[1], 3, 3, 64, 64)
    w3, b3 = conv_init(ks[2], 7, 7, 64, feature_size)
    w4, b4 = conv_init(ks[3], 1, 1, feature_size, num_classes)
    return (w1, b1, w2, b2, w3, b3,
            w4.reshape(feature_size, num_classes), b4)


# ---------------------------------------------------------------------------
# Pure-JAX reference
# ---------------------------------------------------------------------------
def reference_forward(x_nchw, params):
    w1, b1, w2, b2, w3, b3, w4, b4 = params
    x = jnp.transpose(x_nchw, (0, 2, 3, 1))
    dn = ("NHWC", "HWIO", "NHWC")

    def conv(x, w, b):
        y = lax.conv_general_dilated(x, w, (1, 1), [(1, 1), (1, 1)],
                                     dimension_numbers=dn)
        return y + b.reshape(1, 1, 1, -1)

    def pool(y):
        return lax.reduce_window(y, -jnp.inf, lax.max,
                                 (1, 2, 2, 1), (1, 2, 2, 1), "VALID")

    y = pool(jax.nn.relu(conv(x, w1, b1)))
    y = pool(jax.nn.relu(conv(y, w2, b2)))
    y = jnp.einsum("nijc,ijcf->nf", y, w3) + b3
    y = y @ w4 + b4
    return y


if __name__ == "__main__":
    key = jax.random.PRNGKey(0)
    kx, kp = jax.random.split(key)

    N = 2
    feature_size, num_classes = 32, 10

    x = jax.random.normal(kx, (N, 1, H, W), jnp.float32)
    params = init_params(kp, feature_size, num_classes)

    out = network_forward(x, params, feature_size, num_classes)
    out = jax.block_until_ready(out)

    ref = reference_forward(x, params)
    assert out.shape == (N, num_classes), out.shape
    if not bool(jnp.allclose(out, ref, atol=1e-3, rtol=1e-3)):
        raise AssertionError("Pallas output mismatch vs JAX reference")

    print("KERNEL_OK")
</pallas_src>

<mosaic_0001>
module attributes {stable_mosaic.version = 11 : i64} {
  func.func @_network_kernel(%arg0: i32, %arg1: memref<1x28x28xf32, #tpu.memory_space<vmem>>, %arg2: memref<3x28x1792xf32, #tpu.memory_space<vmem>>, %arg3: memref<1x1792xf32, #tpu.memory_space<vmem>>, %arg4: memref<3x3x64x64xf32, #tpu.memory_space<vmem>>, %arg5: memref<1x64xf32, #tpu.memory_space<vmem>>, %arg6: memref<3136x10xf32, #tpu.memory_space<vmem>>, %arg7: memref<1x10xf32, #tpu.memory_space<vmem>>, %arg8: memref<1x1x10xf32, #tpu.memory_space<vmem>>, %arg9: memref<16x28xf32, #tpu.memory_space<vmem>>, %arg10: memref<16x28xf32, #tpu.memory_space<vmem>>, %arg11: memref<14x1792xf32, #tpu.memory_space<vmem>>, %arg12: memref<272x64xf32, #tpu.memory_space<vmem>>, %arg13: memref<240x64xf32, #tpu.memory_space<vmem>>, %arg14: memref<208x64xf32, #tpu.memory_space<vmem>>, %arg15: memref<1x3136xf32, #tpu.memory_space<vmem>>) attributes {dimension_semantics = [#tpu.dimension_semantics<parallel>], iteration_bounds = array<i64: 2>, scalar_prefetch = 0 : i64, scratch_operands = 7 : i64, tpu.core_type = #tpu.core_type<tc>, window_params = [{transform_indices = @transform_0, window_bounds = array<i64: 1, 28, 28>}, {pipeline_mode = #tpu.pipeline_mode<synchronous>, transform_indices = @transform_1, window_bounds = array<i64: 3, 28, 1792>}, {pipeline_mode = #tpu.pipeline_mode<synchronous>, transform_indices = @transform_2, window_bounds = array<i64: 1, 1792>}, {pipeline_mode = #tpu.pipeline_mode<synchronous>, transform_indices = @transform_3, window_bounds = array<i64: 3, 3, 64, 64>}, {pipeline_mode = #tpu.pipeline_mode<synchronous>, transform_indices = @transform_4, window_bounds = array<i64: 1, 64>}, {pipeline_mode = #tpu.pipeline_mode<synchronous>, transform_indices = @transform_5, window_bounds = array<i64: 3136, 10>}, {pipeline_mode = #tpu.pipeline_mode<synchronous>, transform_indices = @transform_6, window_bounds = array<i64: 1, 10>}, {transform_indices = @transform_7, window_bounds = array<i64: 1, 1, 10>}]} {
    %cst = arith.constant 0.000000e+00 : f32
    %0 = vector.broadcast %cst : f32 to vector<16x28xf32>
    %c0 = arith.constant 0 : index
    %c0_0 = arith.constant 0 : index
    %1 = vector.load %arg9[%c0, %c0_0] : memref<16x28xf32, #tpu.memory_space<vmem>>, vector<16x28xf32>
    tpu.vector_store %arg9[%c0, %c0_0], %0 {strides = array<i32>} : memref<16x28xf32, #tpu.memory_space<vmem>>, vector<16x28xf32>,
    %cst_1 = arith.constant 0.000000e+00 : f32
    %2 = vector.broadcast %cst_1 : f32 to vector<16x28xf32>
    %c0_2 = arith.constant 0 : index
    %c0_3 = arith.constant 0 : index
    %3 = vector.load %arg10[%c0_2, %c0_3] : memref<16x28xf32, #tpu.memory_space<vmem>>, vector<16x28xf32>
    tpu.vector_store %arg10[%c0_2, %c0_3], %2 {strides = array<i32>} : memref<16x28xf32, #tpu.memory_space<vmem>>, vector<16x28xf32>,
    %c0_4 = arith.constant 0 : index
    %c0_5 = arith.constant 0 : index
    %c0_6 = arith.constant 0 : index
    %4 = vector.load %arg1[%c0_4, %c0_5, %c0_6] : memref<1x28x28xf32, #tpu.memory_space<vmem>>, vector<1x1x28xf32>
    %5 = vector.shape_cast %4 : vector<1x1x28xf32> to vector<28xf32>
    %c0_7 = arith.constant 0 : index
    %c0_8 = arith.constant 0 : index
    %6 = vector.load %arg10[%c0_7, %c0_8] : memref<16x28xf32, #tpu.memory_space<vmem>>, vector<1x28xf32>
    %7 = vector.shape_cast %6 : vector<1x28xf32> to vector<28xf32>
    %8 = vector.shape_cast %5 : vector<28xf32> to vector<1x28xf32>
    tpu.vector_store %arg10[%c0_7, %c0_8], %8 {strides = array<i32>} : memref<16x28xf32, #tpu.memory_space<vmem>>, vector<1x28xf32>,
    %c0_9 = arith.constant 0 : index
    %c1 = arith.constant 1 : index
    %c0_10 = arith.constant 0 : index
    %9 = vector.load %arg1[%c0_9, %c1, %c0_10] : memref<1x28x28xf32, #tpu.memory_space<vmem>>, vector<1x1x28xf32>
    %10 = vector.shape_cast %9 : vector<1x1x28xf32> to vector<28xf32>
    %c1_11 = arith.constant 1 : index
    %c0_12 = arith.constant 0 : index
    %11 = vector.load %arg9[%c1_11, %c0_12] : memref<16x28xf32, #tpu.memory_space<vmem>>, vector<1x28xf32>
    %12 = vector.shape_cast %11 : vector<1x28xf32> to vector<28xf32>
    %13 = vector.shape_cast %10 : vector<28xf32> to vector<1x28xf32>
    tpu.vector_store %arg9[%c1_11, %c0_12], %13 {strides = array<i32>} : memref<16x28xf32, #tpu.memory_space<vmem>>, vector<1x28xf32>,
    %c0_13 = arith.constant 0 : index
    %c2 = arith.constant 2 : index
    %c0_14 = arith.constant 0 : index
    %14 = vector.load %arg1[%c0_13, %c2, %c0_14] : memref<1x28x28xf32, #tpu.memory_space<vmem>>, vector<1x1x28xf32>
    %15 = vector.shape_cast %14 : vector<1x1x28xf32> to vector<28xf32>
    %c1_15 = arith.constant 1 : index
    %c0_16 = arith.constant 0 : index
    %16 = vector.load %arg10[%c1_15, %c0_16] : memref<16x28xf32, #tpu.memory_space<vmem>>, vector<1x28xf32>
    %17 = vector.shape_cast %16 : vector<1x28xf32> to vector<28xf32>
    %18 = vector.shape_cast %15 : vector<28xf32> to vector<1x28xf32>
    tpu.vector_store %arg10[%c1_15, %c0_16], %18 {strides = array<i32>} : memref<16x28xf32, #tpu.memory_space<vmem>>, vector<1x28xf32>,
    %c0_17 = arith.constant 0 : index
    %c3 = arith.constant 3 : index
    %c0_18 = arith.constant 0 : index
    %19 = vector.load %arg1[%c0_17, %c3, %c0_18] : memref<1x28x28xf32, #tpu.memory_space<vmem>>, vector<1x1x28xf32>
    %20 = vector.shape_cast %19 : vector<1x1x28xf32> to vector<28xf32>
    %c2_19 = arith.constant 2 : index
    %c0_20 = arith.constant 0 : index
    %21 = vector.load %arg9[%c2_19, %c0_20] : memref<16x28xf32, #tpu.memory_space<vmem>>, vector<1x28xf32>
    %22 = vector.shape_cast %21 : vector<1x28xf32> to vector<28xf32>
    %23 = vector.shape_cast %20 : vector<28xf32> to vector<1x28xf32>
    tpu.vector_store %arg9[%c2_19, %c0_20], %23 {strides = array<i32>} : memref<16x28xf32, #tpu.memory_space<vmem>>, vector<1x28xf32>,
    %c0_21 = arith.constant 0 : index
    %c4 = arith.constant 4 : index
    %c0_22 = arith.constant 0 : index
    %24 = vector.load %arg1[%c0_21, %c4, %c0_22] : memref<1x28x28xf32, #tpu.memory_space<vmem>>, vector<1x1x28xf32>
    %25 = vector.shape_cast %24 : vector<1x1x28xf32> to vector<28xf32>
    %c2_23 = arith.constant 2 : index
    %c0_24 = arith.constant 0 : index
    %26 = vector.load %arg10[%c2_23, %c0_24] : memref<16x28xf32, #tpu.memory_space<vmem>>, vector<1x28xf32>
    %27 = vector.shape_cast %26 : vector<1x28xf32> to vector<28xf32>
    %28 = vector.shape_cast %25 : vector<28xf32> to vector<1x28xf32>
    tpu.vector_store %arg10[%c2_23, %c0_24], %28 {strides = array<i32>} : memref<16x28xf32, #tpu.memory_space<vmem>>, vector<1x28xf32>,
    %c0_25 = arith.constant 0 : index
    %c5 = arith.constant 5 : index
    %c0_26 = arith.constant 0 : index
    %29 = vector.load %arg1[%c0_25, %c5, %c0_26] : memref<1x28x28xf32, #tpu.memory_space<vmem>>, vector<1x1x28xf32>
    %30 = vector.shape_cast %29 : vector<1x1x28xf32> to vector<28xf32>
    %c3_27 = arith.constant 3 : index
    %c0_28 = arith.constant 0 : index
    %31 = vector.load %arg9[%c3_27, %c0_28] : memref<16x28xf32, #tpu.memory_space<vmem>>, vector<1x28xf32>
    %32 = vector.shape_cast %31 : vector<1x28xf32> to vector<28xf32>
    %33 = vector.shape_cast %30 : vector<28xf32> to vector<1x28xf32>
    tpu.vector_store %arg9[%c3_27, %c0_28], %33 {strides = array<i32>} : memref<16x28xf32, #tpu.memory_space<vmem>>, vector<1x28xf32>,
    %c0_29 = arith.constant 0 : index
    %c6 = arith.constant 6 : index
    %c0_30 = arith.constant 0 : index
    %34 = vector.load %arg1[%c0_29, %c6, %c0_30] : memref<1x28x28xf32, #tpu.memory_space<vmem>>, vector<1x1x28xf32>
    %35 = vector.shape_cast %34 : vector<1x1x28xf32> to vector<28xf32>
    %c3_31 = arith.constant 3 : index
    %c0_32 = arith.constant 0 : index
    %36 = vector.load %arg10[%c3_31, %c0_32] : memref<16x28xf32, #tpu.memory_space<vmem>>, vector<1x28xf32>
    %37 = vector.shape_cast %36 : vector<1x28xf32> to vector<28xf32>
    %38 = vector.shape_cast %35 : vector<28xf32> to vector<1x28xf32>
    tpu.vector_store %arg10[%c3_31, %c0_32], %38 {strides = array<i32>} : memref<16x28xf32, #tpu.memory_space<vmem>>, vector<1x28xf32>,
    %c0_33 = arith.constant 0 : index
    %c7 = arith.constant 7 : index
    %c0_34 = arith.constant 0 : index
    %39 = vector.load %arg1[%c0_33, %c7, %c0_34] : memref<1x28x28xf32, #tpu.memory_space<vmem>>, vector<1x1x28xf32>
    %40 = vector.shape_cast %39 : vector<1x1x28xf32> to vector<28xf32>
    %c4_35 = arith.constant 4 : index
    %c0_36 = arith.constant 0 : index
    %41 = vector.load %arg9[%c4_35, %c0_36] : memref<16x28xf32, #tpu.memory_space<vmem>>, vector<1x28xf32>
    %42 = vector.shape_cast %41 : vector<1x28xf32> to vector<28xf32>
    %43 = vector.shape_cast %40 : vector<28xf32> to vector<1x28xf32>
    tpu.vector_store %arg9[%c4_35, %c0_36], %43 {strides = array<i32>} : memref<16x28xf32, #tpu.memory_space<vmem>>, vector<1x28xf32>,
    %c0_37 = arith.constant 0 : index
    %c8 = arith.constant 8 : index
    %c0_38 = arith.constant 0 : index
    %44 = vector.load %arg1[%c0_37, %c8, %c0_38] : memref<1x28x28xf32, #tpu.memory_space<vmem>>, vector<1x1x28xf32>
    %45 = vector.shape_cast %44 : vector<1x1x28xf32> to vector<28xf32>
    %c4_39 = arith.constant 4 : index
    %c0_40 = arith.constant 0 : index
    %46 = vector.load %arg10[%c4_39, %c0_40] : memref<16x28xf32, #tpu.memory_space<vmem>>, vector<1x28xf32>
    %47 = vector.shape_cast %46 : vector<1x28xf32> to vector<28xf32>
    %48 = vector.shape_cast %45 : vector<28xf32> to vector<1x28xf32>
    tpu.vector_store %arg10[%c4_39, %c0_40], %48 {strides = array<i32>} : memref<16x28xf32, #tpu.memory_space<vmem>>, vector<1x28xf32>,
    %c0_41 = arith.constant 0 : index
    %c9 = arith.constant 9 : index
    %c0_42 = arith.constant 0 : index
    %49 = vector.load %arg1[%c0_41, %c9, %c0_42] : memref<1x28x28xf32, #tpu.memory_space<vmem>>, vector<1x1x28xf32>
    %50 = vector.shape_cast %49 : vector<1x1x28xf32> to vector<28xf32>
    %c5_43 = arith.constant 5 : index
    %c0_44 = arith.constant 0 : index
    %51 = vector.load %arg9[%c5_43, %c0_44] : memref<16x28xf32, #tpu.memory_space<vmem>>, vector<1x28xf32>
    %52 = vector.shape_cast %51 : vector<1x28xf32> to vector<28xf32>
    %53 = vector.shape_cast %50 : vector<28xf32> to vector<1x28xf32>
    tpu.vector_store %arg9[%c5_43, %c0_44], %53 {strides = array<i32>} : memref<16x28xf32, #tpu.memory_space<vmem>>, vector<1x28xf32>,
    %c0_45 = arith.constant 0 : index
    %c10 = arith.constant 10 : index
    %c0_46 = arith.constant 0 : index
    %54 = vector.load %arg1[%c0_45, %c10, %c0_46] : memref<1x28x28xf32, #tpu.memory_space<vmem>>, vector<1x1x28xf32>
    %55 = vector.shape_cast %54 : vector<1x1x28xf32> to vector<28xf32>
    %c5_47 = arith.constant 5 : index
    %c0_48 = arith.constant 0 : index
    %56 = vector.load %arg10[%c5_47, %c0_48] : memref<16x28xf32, #tpu.memory_space<vmem>>, vector<1x28xf32>
    %57 = vector.shape_cast %56 : vector<1x28xf32> to vector<28xf32>
    %58 = vector.shape_cast %55 : vector<28xf32> to vector<1x28xf32>
    tpu.vector_store %arg10[%c5_47, %c0_48], %58 {strides = array<i32>} : memref<16x28xf32, #tpu.memory_space<vmem>>, vector<1x28xf32>,
    %c0_49 = arith.constant 0 : index
    %c11 = arith.constant 11 : index
    %c0_50 = arith.constant 0 : index
    %59 = vector.load %arg1[%c0_49, %c11, %c0_50] : memref<1x28x28xf32, #tpu.memory_space<vmem>>, vector<1x1x28xf32>
    %60 = vector.shape_cast %59 : vector<1x1x28xf32> to vector<28xf32>
    %c6_51 = arith.constant 6 : index
    %c0_52 = arith.constant 0 : index
    %61 = vector.load %arg9[%c6_51, %c0_52] : memref<16x28xf32, #tpu.memory_space<vmem>>, vector<1x28xf32>
    %62 = vector.shape_cast %61 : vector<1x28xf32> to vector<28xf32>
    %63 = vector.shape_cast %60 : vector<28xf32> to vector<1x28xf32>
    tpu.vector_store %arg9[%c6_51, %c0_52], %63 {strides = array<i32>} : memref<16x28xf32, #tpu.memory_space<vmem>>, vector<1x28xf32>,
    %c0_53 = arith.constant 0 : index
    %c12 = arith.constant 12 : index
    %c0_54 = arith.constant 0 : index
    %64 = vector.load %arg1[%c0_53, %c12, %c0_54] : memref<1x28x28xf32, #tpu.memory_space<vmem>>, vector<1x1x28xf32>
    %65 = vector.shape_cast %64 : vector<1x1x28xf32> to vector<28xf32>
    %c6_55 = arith.constant 6 : index
    %c0_56 = arith.constant 0 : index
    %66 = vector.load %arg10[%c6_55, %c0_56] : memref<16x28xf32, #tpu.memory_space<vmem>>, vector<1x28xf32>
    %67 = vector.shape_cast %66 : vector<1x28xf32> to vector<28xf32>
    %68 = vector.shape_cast %65 : vector<28xf32> to vector<1x28xf32>
    tpu.vector_store %arg10[%c6_55, %c0_56], %68 {strides = array<i32>} : memref<16x28xf32, #tpu.memory_space<vmem>>, vector<1x28xf32>,
    %c0_57 = arith.constant 0 : index
    %c13 = arith.constant 13 : index
    %c0_58 = arith.constant 0 : index
    %69 = vector.load %arg1[%c0_57, %c13, %c0_58] : memref<1x28x28xf32, #tpu.memory_space<vmem>>, vector<1x1x28xf32>
    %70 = vector.shape_cast %69 : vector<1x1x28xf32> to vector<28xf32>
    %c7_59 = arith.constant 7 : index
    %c0_60 = arith.constant 0 : index
    %71 = vector.load %arg9[%c7_59, %c0_60] : memref<16x28xf32, #tpu.memory_space<vmem>>, vector<1x28xf32>
    %72 = vector.shape_cast %71 : vector<1x28xf32> to vector<28xf32>
    %73 = vector.shape_cast %70 : vector<28xf32> to vector<1x28xf32>
    tpu.vector_store %arg9[%c7_59, %c0_60], %73 {strides = array<i32>} : memref<16x28xf32, #tpu.memory_space<vmem>>, vector<1x28xf32>,
    %c0_61 = arith.constant 0 : index
    %c14 = arith.constant 14 : index
    %c0_62 = arith.constant 0 : index
    %74 = vector.load %arg1[%c0_61, %c14, %c0_62] : memref<1x28x28xf32, #tpu.memory_space<vmem>>, vector<1x1x28xf32>
    %75 = vector.shape_cast %74 : vector<1x1x28xf32> to vector<28xf32>
    %c7_63 = arith.constant 7 : index
    %c0_64 = arith.constant 0 : index
    %76 = vector.load %arg10[%c7_63, %c0_64] : memref<16x28xf32, #tpu.memory_space<vmem>>, vector<1x28xf32>
    %77 = vector.shape_cast %76 : vector<1x28xf32> to vector<28xf32>
    %78 = vector.shape_cast %75 : vector<28xf32> to vector<1x28xf32>
    tpu.vector_store %arg10[%c7_63, %c0_64], %78 {strides = array<i32>} : memref<16x28xf32, #tpu.memory_space<vmem>>, vector<1x28xf32>,
    %c0_65 = arith.constant 0 : index
    %c15 = arith.constant 15 : index
    %c0_66 = arith.constant 0 : index
    %79 = vector.load %arg1[%c0_65, %c15, %c0_66] : memref<1x28x28xf32, #tpu.memory_space<vmem>>, vector<1x1x28xf32>
    %80 = vector.shape_cast %79 : vector<1x1x28xf32> to vector<28xf32>
    %c8_67 = arith.constant 8 : index
    %c0_68 = arith.constant 0 : index
    %81 = vector.load %arg9[%c8_67, %c0_68] : memref<16x28xf32, #tpu.memory_space<vmem>>, vector<1x28xf32>
    %82 = vector.shape_cast %81 : vector<1x28xf32> to vector<28xf32>
    %83 = vector.shape_cast %80 : vector<28xf32> to vector<1x28xf32>
    tpu.vector_store %arg9[%c8_67, %c0_68], %83 {strides = array<i32>} : memref<16x28xf32, #tpu.memory_space<vmem>>, vector<1x28xf32>,
    %c0_69 = arith.constant 0 : index
    %c16 = arith.constant 16 : index
    %c0_70 = arith.constant 0 : index
    %84 = vector.load %arg1[%c0_69, %c16, %c0_70] : memref<1x28x28xf32, #tpu.memory_space<vmem>>, vector<1x1x28xf32>
    %85 = vector.shape_cast %84 : vector<1x1x28xf32> to vector<28xf32>
    %c8_71 = arith.constant 8 : index
    %c0_72 = arith.constant 0 : index
    %86 = vector.load %arg10[%c8_71, %c0_72] : memref<16x28xf32, #tpu.memory_space<vmem>>, vector<1x28xf32>
    %87 = vector.shape_cast %86 : vector<1x28xf32> to vector<28xf32>
    %88 = vector.shape_cast %85 : vector<28xf32> to vector<1x28xf32>
    tpu.vector_store %arg10[%c8_71, %c0_72], %88 {strides = array<i32>} : memref<16x28xf32, #tpu.memory_space<vmem>>, vector<1x28xf32>,
    %c0_73 = arith.constant 0 : index
    %c17 = arith.constant 17 : index
    %c0_74 = arith.constant 0 : index
    %89 = vector.load %arg1[%c0_73, %c17, %c0_74] : memref<1x28x28xf32, #tpu.memory_space<vmem>>, vector<1x1x28xf32>
    %90 = vector.shape_cast %89 : vector<1x1x28xf32> to vector<28xf32>
    %c9_75 = arith.constant 9 : index
    %c0_76 = arith.constant 0 : index
    %91 = vector.load %arg9[%c9_75, %c0_76] : memref<16x28xf32, #tpu.memory_space<vmem>>, vector<1x28xf32>
    %92 = vector.shape_cast %91 : vector<1x28xf32> to vector<28xf32>
    %93 = vector.shape_cast %90 : vector<28xf32> to vector<1x28xf32>
    tpu.vector_store %arg9[%c9_75, %c0_76], %93 {strides = array<i32>} : memref<16x28xf32, #tpu.memory_space<vmem>>, vector<1x28xf32>,
    %c0_77 = arith.constant 0 : index
    %c18 = arith.constant 18 : index
    %c0_78 = arith.constant 0 : index
    %94 = vector.load %arg1[%c0_77, %c18, %c0_78] : memref<1x28x28xf32, #tpu.memory_space<vmem>>, vector<1x1x28xf32>
    %95 = vector.shape_cast %94 : vector<1x1x28xf32> to vector<28xf32>
    %c9_79 = arith.constant 9 : index
    %c0_80 = arith.constant 0 : index
    %96 = vector.load %arg10[%c9_79, %c0_80] : memref<16x28xf32, #tpu.memory_space<vmem>>, vector<1x28xf32>
    %97 = vector.shape_cast %96 : vector<1x28xf32> to vector<28xf32>
    %98 = vector.shape_cast %95 : vector<28xf32> to vector<1x28xf32>
    tpu.vector_store %arg10[%c9_79, %c0_80], %98 {strides = array<i32>} : memref<16x28xf32, #tpu.memory_space<vmem>>, vector<1x28xf32>,
    %c0_81 = arith.constant 0 : index
    %c19 = arith.constant 19 : index
    %c0_82 = arith.constant 0 : index
    %99 = vector.load %arg1[%c0_81, %c19, %c0_82] : memref<1x28x28xf32, #tpu.memory_space<vmem>>, vector<1x1x28xf32>
    %100 = vector.shape_cast %99 : vector<1x1x28xf32> to vector<28xf32>
    %c10_83 = arith.constant 10 : index
    %c0_84 = arith.constant 0 : index
    %101 = vector.load %arg9[%c10_83, %c0_84] : memref<16x28xf32, #tpu.memory_space<vmem>>, vector<1x28xf32>
    %102 = vector.shape_cast %101 : vector<1x28xf32> to vector<28xf32>
    %103 = vector.shape_cast %100 : vector<28xf32> to vector<1x28xf32>
    tpu.vector_store %arg9[%c10_83, %c0_84], %103 {strides = array<i32>} : memref<16x28xf32, #tpu.memory_space<vmem>>, vector<1x28xf32>,
    %c0_85 = arith.constant 0 : index
    %c20 = arith.constant 20 : index
    %c0_86 = arith.constant 0 : index
    %104 = vector.load %arg1[%c0_85, %c20, %c0_86] : memref<1x28x28xf32, #tpu.memory_space<vmem>>, vector<1x1x28xf32>
    %105 = vector.shape_cast %104 : vector<1x1x28xf32> to vector<28xf32>
    %c10_87 = arith.constant 10 : index
    %c0_88 = arith.constant 0 : index
    %106 = vector.load %arg10[%c10_87, %c0_88] : memref<16x28xf32, #tpu.memory_space<vmem>>, vector<1x28xf32>
    %107 = vector.shape_cast %106 : vector<1x28xf32> to vector<28xf32>
    %108 = vector.shape_cast %105 : vector<28xf32> to vector<1x28xf32>
    tpu.vector_store %arg10[%c10_87, %c0_88], %108 {strides = array<i32>} : memref<16x28xf32, #tpu.memory_space<vmem>>, vector<1x28xf32>,
    %c0_89 = arith.constant 0 : index
    %c21 = arith.constant 21 : index
    %c0_90 = arith.constant 0 : index
    %109 = vector.load %arg1[%c0_89, %c21, %c0_90] : memref<1x28x28xf32, #tpu.memory_space<vmem>>, vector<1x1x28xf32>
    %110 = vector.shape_cast %109 : vector<1x1x28xf32> to vector<28xf32>
    %c11_91 = arith.constant 11 : index
    %c0_92 = arith.constant 0 : index
    %111 = vector.load %arg9[%c11_91, %c0_92] : memref<16x28xf32, #tpu.memory_space<vmem>>, vector<1x28xf32>
    %112 = vector.shape_cast %111 : vector<1x28xf32> to vector<28xf32>
    %113 = vector.shape_cast %110 : vector<28xf32> to vector<1x28xf32>
    tpu.vector_store %arg9[%c11_91, %c0_92], %113 {strides = array<i32>} : memref<16x28xf32, #tpu.memory_space<vmem>>, vector<1x28xf32>,
    %c0_93 = arith.constant 0 : index
    %c22 = arith.constant 22 : index
    %c0_94 = arith.constant 0 : index
    %114 = vector.load %arg1[%c0_93, %c22, %c0_94] : memref<1x28x28xf32, #tpu.memory_space<vmem>>, vector<1x1x28xf32>
    %115 = vector.shape_cast %114 : vector<1x1x28xf32> to vector<28xf32>
    %c11_95 = arith.constant 11 : index
    %c0_96 = arith.constant 0 : index
    %116 = vector.load %arg10[%c11_95, %c0_96] : memref<16x28xf32, #tpu.memory_space<vmem>>, vector<1x28xf32>
    %117 = vector.shape_cast %116 : vector<1x28xf32> to vector<28xf32>
    %118 = vector.shape_cast %115 : vector<28xf32> to vector<1x28xf32>
    tpu.vector_store %arg10[%c11_95, %c0_96], %118 {strides = array<i32>} : memref<16x28xf32, #tpu.memory_space<vmem>>, vector<1x28xf32>,
    %c0_97 = arith.constant 0 : index
    %c23 = arith.constant 23 : index
    %c0_98 = arith.constant 0 : index
    %119 = vector.load %arg1[%c0_97, %c23, %c0_98] : memref<1x28x28xf32, #tpu.memory_space<vmem>>, vector<1x1x28xf32>
    %120 = vector.shape_cast %119 : vector<1x1x28xf32> to vector<28xf32>
    %c12_99 = arith.constant 12 : index
    %c0_100 = arith.constant 0 : index
    %121 = vector.load %arg9[%c12_99, %c0_100] : memref<16x28xf32, #tpu.memory_space<vmem>>, vector<1x28xf32>
    %122 = vector.shape_cast %121 : vector<1x28xf32> to vector<28xf32>
    %123 = vector.shape_cast %120 : vector<28xf32> to vector<1x28xf32>
    tpu.vector_store %arg9[%c12_99, %c0_100], %123 {strides = array<i32>} : memref<16x28xf32, #tpu.memory_space<vmem>>, vector<1x28xf32>,
    %c0_101 = arith.constant 0 : index
    %c24 = arith.constant 24 : index
    %c0_102 = arith.constant 0 : index
    %124 = vector.load %arg1[%c0_101, %c24, %c0_102] : memref<1x28x28xf32, #tpu.memory_space<vmem>>, vector<1x1x28xf32>
    %125 = vector.shape_cast %124 : vector<1x1x28xf32> to vector<28xf32>
    %c12_103 = arith.constant 12 : index
    %c0_104 = arith.constant 0 : index
    %126 = vector.load %arg10[%c12_103, %c0_104] : memref<16x28xf32, #tpu.memory_space<vmem>>, vector<1x28xf32>
    %127 = vector.shape_cast %126 : vector<1x28xf32> to vector<28xf32>
    %128 = vector.shape_cast %125 : vector<28xf32> to vector<1x28xf32>
    tpu.vector_store %arg10[%c12_103, %c0_104], %128 {strides = array<i32>} : memref<16x28xf32, #tpu.memory_space<vmem>>, vector<1x28xf32>,
    %c0_105 = arith.constant 0 : index
    %c25 = arith.constant 25 : index
    %c0_106 = arith.constant 0 : index
    %129 = vector.load %arg1[%c0_105, %c25, %c0_106] : memref<1x28x28xf32, #tpu.memory_space<vmem>>, vector<1x1x28xf32>
    %130 = vector.shape_cast %129 : vector<1x1x28xf32> to vector<28xf32>
    %c13_107 = arith.constant 13 : index
    %c0_108 = arith.constant 0 : index
    %131 = vector.load %arg9[%c13_107, %c0_108] : memref<16x28xf32, #tpu.memory_space<vmem>>, vector<1x28xf32>
    %132 = vector.shape_cast %131 : vector<1x28xf32> to vector<28xf32>
    %133 = vector.shape_cast %130 : vector<28xf32> to vector<1x28xf32>
    tpu.vector_store %arg9[%c13_107, %c0_108], %133 {strides = array<i32>} : memref<16x28xf32, #tpu.memory_space<vmem>>, vector<1x28xf32>,
    %c0_109 = arith.constant 0 : index
    %c26 = arith.constant 26 : index
    %c0_110 = arith.constant 0 : index
    %134 = vector.load %arg1[%c0_109, %c26, %c0_110] : memref<1x28x28xf32, #tpu.memory_space<vmem>>, vector<1x1x28xf32>
    %135 = vector.shape_cast %134 : vector<1x1x28xf32> to vector<28xf32>
    %c13_111 = arith.constant 13 : index
    %c0_112 = arith.constant 0 : index
    %136 = vector.load %arg10[%c13_111, %c0_112] : memref<16x28xf32, #tpu.memory_space<vmem>>, vector<1x28xf32>
    %137 = vector.shape_cast %136 : vector<1x28xf32> to vector<28xf32>
    %138 = vector.shape_cast %135 : vector<28xf32> to vector<1x28xf32>
    tpu.vector_store %arg10[%c13_111, %c0_112], %138 {strides = array<i32>} : memref<16x28xf32, #tpu.memory_space<vmem>>, vector<1x28xf32>,
    %c0_113 = arith.constant 0 : index
    %c27 = arith.constant 27 : index
    %c0_114 = arith.constant 0 : index
    %139 = vector.load %arg1[%c0_113, %c27, %c0_114] : memref<1x28x28xf32, #tpu.memory_space<vmem>>, vector<1x1x28xf32>
    %140 = vector.shape_cast %139 : vector<1x1x28xf32> to vector<28xf32>
    %c14_115 = arith.constant 14 : index
    %c0_116 = arith.constant 0 : index
    %141 = vector.load %arg9[%c14_115, %c0_116] : memref<16x28xf32, #tpu.memory_space<vmem>>, vector<1x28xf32>
    %142 = vector.shape_cast %141 : vector<1x28xf32> to vector<28xf32>
    %143 = vector.shape_cast %140 : vector<28xf32> to vector<1x28xf32>
    tpu.vector_store %arg9[%c14_115, %c0_116], %143 {strides = array<i32>} : memref<16x28xf32, #tpu.memory_space<vmem>>, vector<1x28xf32>,
    %c0_117 = arith.constant 0 : index
    %c0_118 = arith.constant 0 : index
    %144 = vector.load %arg9[%c0_117, %c0_118] : memref<16x28xf32, #tpu.memory_space<vmem>>, vector<14x28xf32>
    %c0_119 = arith.constant 0 : index
    %c0_120 = arith.constant 0 : index
    %145 = vector.load %arg10[%c0_119, %c0_120] : memref<16x28xf32, #tpu.memory_space<vmem>>, vector<14x28xf32>
    %c1_121 = arith.constant 1 : index
    %c0_122 = arith.constant 0 : index
    %146 = vector.load %arg9[%c1_121, %c0_122] : memref<16x28xf32, #tpu.memory_space<vmem>>, vector<14x28xf32>
    %c0_123 = arith.constant 0 : index
    %c0_124 = arith.constant 0 : index
    %c0_125 = arith.constant 0 : index
    %147 = vector.load %arg2[%c0_123, %c0_124, %c0_125] : memref<3x28x1792xf32, #tpu.memory_space<vmem>>, vector<1x28x1792xf32>
    %148 = vector.shape_cast %147 : vector<1x28x1792xf32> to vector<28x1792xf32>
    %cst_126 = arith.constant dense<0.000000e+00> : vector<14x1792xf32>
    %149 = tpu.matmul %144, %148, %cst_126 {dimension_numbers = #tpu.dot_dimension_numbers<[1], [0], [0], [1], [0, 0, 1, 1], [], []>} : vector<14x28xf32>, vector<28x1792xf32>, vector<14x1792xf32> -> vector<14x1792xf32>
    %c1_127 = arith.constant 1 : index
    %c0_128 = arith.constant 0 : index
    %c0_129 = arith.constant 0 : index
    %150 = vector.load %arg2[%c1_127, %c0_128, %c0_129] : memref<3x28x1792xf32, #tpu.memory_space<vmem>>, vector<1x28x1792xf32>
    %151 = vector.shape_cast %150 : vector<1x28x1792xf32> to vector<28x1792xf32>
    %cst_130 = arith.constant dense<0.000000e+00> : vector<14x1792xf32>
    %152 = tpu.matmul %145, %151, %cst_130 {dimension_numbers = #tpu.dot_dimension_numbers<[1], [0], [0], [1], [0, 0, 1, 1], [], []>} : vector<14x28xf32>, vector<28x1792xf32>, vector<14x1792xf32> -> vector<14x1792xf32>
    %153 = arith.addf %149, %152 : vector<14x1792xf32>
    %c2_131 = arith.constant 2 : index
    %c0_132 = arith.constant 0 : index
    %c0_133 = arith.constant 0 : index
    %154 = vector.load %arg2[%c2_131, %c0_132, %c0_133] : memref<3x28x1792xf32, #tpu.memory_space<vmem>>, vector<1x28x1792xf32>
    %155 = vector.shape_cast %154 : vector<1x28x1792xf32> to vector<28x1792xf32>
    %cst_134 = arith.constant dense<0.000000e+00> : vector<14x1792xf32>
    %156 = tpu.matmul %146, %155, %cst_134 {dimension_numbers = #tpu.dot_dimension_numbers<[1], [0], [0], [1], [0, 0, 1, 1], [], []>} : vector<14x28xf32>, vector<28x1792xf32>, vector<14x1792xf32> -> vector<14x1792xf32>
    %157 = arith.addf %153, %156 : vector<14x1792xf32>
    %c0_135 = arith.constant 0 : index
    %c0_136 = arith.constant 0 : index
    %158 = vector.load %arg3[%c0_135, %c0_136] : memref<1x1792xf32, #tpu.memory_space<vmem>>, vector<1x1792xf32>
    %159 = vector.broadcast %158 : vector<1x1792xf32> to vector<14x1792xf32>
    %160 = arith.addf %157, %159 : vector<14x1792xf32>
    %cst_137 = arith.constant 0.000000e+00 : f32
    %161 = vector.broadcast %cst_137 : f32 to vector<14x1792xf32>
    %162 = arith.maximumf %160, %161 : vector<14x1792xf32>
    %c0_138 = arith.constant 0 : index
    %c0_139 = arith.constant 0 : index
    %163 = vector.load %arg10[%c0_138, %c0_139] : memref<16x28xf32, #tpu.memory_space<vmem>>, vector<14x28xf32>
    %c1_140 = arith.constant 1 : index
    %c0_141 = arith.constant 0 : index
    %164 = vector.load %arg9[%c1_140, %c0_141] : memref<16x28xf32, #tpu.memory_space<vmem>>, vector<14x28xf32>
    %c1_142 = arith.constant 1 : index
    %c0_143 = arith.constant 0 : index
    %165 = vector.load %arg10[%c1_142, %c0_143] : memref<16x28xf32, #tpu.memory_space<vmem>>, vector<14x28xf32>
    %c0_144 = arith.constant 0 : index
    %c0_145 = arith.constant 0 : index
    %c0_146 = arith.constant 0 : index
    %166 = vector.load %arg2[%c0_144, %c0_145, %c0_146] : memref<3x28x1792xf32, #tpu.memory_space<vmem>>, vector<1x28x1792xf32>
    %167 = vector.shape_cast %166 : vector<1x28x1792xf32> to vector<28x1792xf32>
    %cst_147 = arith.constant dense<0.000000e+00> : vector<14x1792xf32>
    %168 = tpu.matmul %163, %167, %cst_147 {dimension_numbers = #tpu.dot_dimension_numbers<[1], [0], [0], [1], [0, 0, 1, 1], [], []>} : vector<14x28xf32>, vector<28x1792xf32>, vector<14x1792xf32> -> vector<14x1792xf32>
    %c1_148 = arith.constant 1 : index
    %c0_149 = arith.constant 0 : index
    %c0_150 = arith.constant 0 : index
    %169 = vector.load %arg2[%c1_148, %c0_149, %c0_150] : memref<3x28x1792xf32, #tpu.memory_space<vmem>>, vector<1x28x1792xf32>
    %170 = vector.shape_cast %169 : vector<1x28x1792xf32> to vector<28x1792xf32>
    %cst_151 = arith.constant dense<0.000000e+00> : vector<14x1792xf32>
    %171 = tpu.matmul %164, %170, %cst_151 {dimension_numbers = #tpu.dot_dimension_numbers<[1], [0], [0], [1], [0, 0, 1, 1], [], []>} : vector<14x28xf32>, vector<28x1792xf32>, vector<14x1792xf32> -> vector<14x1792xf32>
    %172 = arith.addf %168, %171 : vector<14x1792xf32>
    %c2_152 = arith.constant 2 : index
    %c0_153 = arith.constant 0 : index
    %c0_154 = arith.constant 0 : index
    %173 = vector.load %arg2[%c2_152, %c0_153, %c0_154] : memref<3x28x1792xf32, #tpu.memory_space<vmem>>, vector<1x28x1792xf32>
    %174 = vector.shape_cast %173 : vector<1x28x1792xf32> to vector<28x1792xf32>
    %cst_155 = arith.constant dense<0.000000e+00> : vector<14x1792xf32>
    %175 = tpu.matmul %165, %174, %cst_155 {dimension_numbers = #tpu.dot_dimension_numbers<[1], [0], [0], [1], [0, 0, 1, 1], [], []>} : vector<14x28xf32>, vector<28x1792xf32>, vector<14x1792xf32> -> vector<14x1792xf32>
    %176 = arith.addf %172, %175 : vector<14x1792xf32>
    %c0_156 = arith.constant 0 : index
    %c0_157 = arith.constant 0 : index
    %177 = vector.load %arg3[%c0_156, %c0_157] : memref<1x1792xf32, #tpu.memory_space<vmem>>, vector<1x1792xf32>
    %178 = vector.broadcast %177 : vector<1x1792xf32> to vector<14x1792xf32>
    %179 = arith.addf %176, %178 : vector<14x1792xf32>
    %cst_158 = arith.constant 0.000000e+00 : f32
    %180 = vector.broadcast %cst_158 : f32 to vector<14x1792xf32>
    %181 = arith.maximumf %179, %180 : vector<14x1792xf32>
    %182 = arith.maximumf %162, %181 : vector<14x1792xf32>
    %c0_159 = arith.constant 0 : index
    %c0_160 = arith.constant 0 : index
    %183 = vector.load %arg11[%c0_159, %c0_160] : memref<14x1792xf32, #tpu.memory_space<vmem>>, vector<14x1792xf32>
    tpu.vector_store %arg11[%c0_159, %c0_160], %182 {strides = array<i32>} : memref<14x1792xf32, #tpu.memory_space<vmem>>, vector<14x1792xf32>,
    %cst_161 = arith.constant 0.000000e+00 : f32
    %184 = vector.broadcast %cst_161 : f32 to vector<272x64xf32>
    %c0_162 = arith.constant 0 : index
    %c0_163 = arith.constant 0 : index
    %185 = vector.load %arg12[%c0_162, %c0_163] : memref<272x64xf32, #tpu.memory_space<vmem>>, vector<272x64xf32>
    tpu.vector_store %arg12[%c0_162, %c0_163], %184 {strides = array<i32>} : memref<272x64xf32, #tpu.memory_space<vmem>>, vector<272x64xf32>,
    %c0_164 = arith.constant 0 : index
    %c0_165 = arith.constant 0 : index
    %186 = vector.load %arg11[%c0_164, %c0_165] : memref<14x1792xf32, #tpu.memory_space<vmem>>, vector<14x64xf32>
    %c0_166 = arith.constant 0 : index
    %c64 = arith.constant 64 : index
    %187 = vector.load %arg11[%c0_166, %c64] : memref<14x1792xf32, #tpu.memory_space<vmem>>, vector<14x64xf32>
    %188 = arith.maximumf %186, %187 : vector<14x64xf32>
    %c17_167 = arith.constant 17 : index
    %c0_168 = arith.constant 0 : index
    %189 = vector.load %arg12[%c17_167, %c0_168] : memref<272x64xf32, #tpu.memory_space<vmem>>, vector<14x64xf32>
    tpu.vector_store %arg12[%c17_167, %c0_168], %188 {strides = array<i32>} : memref<272x64xf32, #tpu.memory_space<vmem>>, vector<14x64xf32>,
    %c0_169 = arith.constant 0 : index
    %c128 = arith.constant 128 : index
    %190 = vector.load %arg11[%c0_169, %c128] : memref<14x1792xf32, #tpu.memory_space<vmem>>, vector<14x64xf32>
    %c0_170 = arith.constant 0 : index
    %c192 = arith.constant 192 : index
    %191 = vector.load %arg11[%c0_170, %c192] : memref<14x1792xf32, #tpu.memory_space<vmem>>, vector<14x64xf32>
    %192 = arith.maximumf %190, %191 : vector<14x64xf32>
    %c33 = arith.constant 33 : index
    %c0_171 = arith.constant 0 : index
    %193 = vector.load %arg12[%c33, %c0_171] : memref<272x64xf32, #tpu.memory_space<vmem>>, vector<14x64xf32>
    tpu.vector_store %arg12[%c33, %c0_171], %192 {strides = array<i32>} : memref<272x64xf32, #tpu.memory_space<vmem>>, vector<14x64xf32>,
    %c0_172 = arith.constant 0 : index
    %c256 = arith.constant 256 : index
    %194 = vector.load %arg11[%c0_172, %c256] : memref<14x1792xf32, #tpu.memory_space<vmem>>, vector<14x64xf32>
    %c0_173 = arith.constant 0 : index
    %c320 = arith.constant 320 : index
    %195 = vector.load %arg11[%c0_173, %c320] : memref<14x1792xf32, #tpu.memory_space<vmem>>, vector<14x64xf32>
    %196 = arith.maximumf %194, %195 : vector<14x64xf32>
    %c49 = arith.constant 49 : index
    %c0_174 = arith.constant 0 : index
    %197 = vector.load %arg12[%c49, %c0_174] : memref<272x64xf32, #tpu.memory_space<vmem>>, vector<14x64xf32>
    tpu.vector_store %arg12[%c49, %c0_174], %196 {strides = array<i32>} : memref<272x64xf32, #tpu.memory_space<vmem>>, vector<14x64xf32>,
    %c0_175 = arith.constant 0 : index
    %c384 = arith.constant 384 : index
    %198 = vector.load %arg11[%c0_175, %c384] : memref<14x1792xf32, #tpu.memory_space<vmem>>, vector<14x64xf32>
    %c0_176 = arith.constant 0 : index
    %c448 = arith.constant 448 : index
    %199 = vector.load %arg11[%c0_176, %c448] : memref<14x1792xf32, #tpu.memory_space<vmem>>, vector<14x64xf32>
    %200 = arith.maximumf %198, %199 : vector<14x64xf32>
    %c65 = arith.constant 65 : index
    %c0_177 = arith.constant 0 : index
    %201 = vector.load %arg12[%c65, %c0_177] : memref<272x64xf32, #tpu.memory_space<vmem>>, vector<14x64xf32>
    tpu.vector_store %arg12[%c65, %c0_177], %200 {strides = array<i32>} : memref<272x64xf32, #tpu.memory_space<vmem>>, vector<14x64xf32>,
    %c0_178 = arith.constant 0 : index
    %c512 = arith.constant 512 : index
    %202 = vector.load %arg11[%c0_178, %c512] : memref<14x1792xf32, #tpu.memory_space<vmem>>, vector<14x64xf32>
    %c0_179 = arith.constant 0 : index
    %c576 = arith.constant 576 : index
    %203 = vector.load %arg11[%c0_179, %c576] : memref<14x1792xf32, #tpu.memory_space<vmem>>, vector<14x64xf32>
    %204 = arith.maximumf %202, %203 : vector<14x64xf32>
    %c81 = arith.constant 81 : index
    %c0_180 = arith.constant 0 : index
    %205 = vector.load %arg12[%c81, %c0_180] : memref<272x64xf32, #tpu.memory_space<vmem>>, vector<14x64xf32>
    tpu.vector_store %arg12[%c81, %c0_180], %204 {strides = array<i32>} : memref<272x64xf32, #tpu.memory_space<vmem>>, vector<14x64xf32>,
    %c0_181 = arith.constant 0 : index
    %c640 = arith.constant 640 : index
    %206 = vector.load %arg11[%c0_181, %c640] : memref<14x1792xf32, #tpu.memory_space<vmem>>, vector<14x64xf32>
    %c0_182 = arith.constant 0 : index
    %c704 = arith.constant 704 : index
    %207 = vector.load %arg11[%c0_182, %c704] : memref<14x1792xf32, #tpu.memory_space<vmem>>, vector<14x64xf32>
    %208 = arith.maximumf %206, %207 : vector<14x64xf32>
    %c97 = arith.constant 97 : index
    %c0_183 = arith.constant 0 : index
    %209 = vector.load %arg12[%c97, %c0_183] : memref<272x64xf32, #tpu.memory_space<vmem>>, vector<14x64xf32>
    tpu.vector_store %arg12[%c97, %c0_183], %208 {strides = array<i32>} : memref<272x64xf32, #tpu.memory_space<vmem>>, vector<14x64xf32>,
    %c0_184 = arith.constant 0 : index
    %c768 = arith.constant 768 : index
    %210 = vector.load %arg11[%c0_184, %c768] : memref<14x1792xf32, #tpu.memory_space<vmem>>, vector<14x64xf32>
    %c0_185 = arith.constant 0 : index
    %c832 = arith.constant 832 : index
    %211 = vector.load %arg11[%c0_185, %c832] : memref<14x1792xf32, #tpu.memory_space<vmem>>, vector<14x64xf32>
    %212 = arith.maximumf %210, %211 : vector<14x64xf32>
    %c113 = arith.constant 113 : index
    %c0_186 = arith.constant 0 : index
    %213 = vector.load %arg12[%c113, %c0_186] : memref<272x64xf32, #tpu.memory_space<vmem>>, vector<14x64xf32>
    tpu.vector_store %arg12[%c113, %c0_186], %212 {strides = array<i32>} : memref<272x64xf32, #tpu.memory_space<vmem>>, vector<14x64xf32>,
    %c0_187 = arith.constant 0 : index
    %c896 = arith.constant 896 : index
    %214 = vector.load %arg11[%c0_187, %c896] : memref<14x1792xf32, #tpu.memory_space<vmem>>, vector<14x64xf32>
    %c0_188 = arith.constant 0 : index
    %c960 = arith.constant 960 : index
    %215 = vector.load %arg11[%c0_188, %c960] : memref<14x1792xf32, #tpu.memory_space<vmem>>, vector<14x64xf32>
    %216 = arith.maximumf %214, %215 : vector<14x64xf32>
    %c129 = arith.constant 129 : index
    %c0_189 = arith.constant 0 : index
    %217 = vector.load %arg12[%c129, %c0_189] : memref<272x64xf32, #tpu.memory_space<vmem>>, vector<14x64xf32>
    tpu.vector_store %arg12[%c129, %c0_189], %216 {strides = array<i32>} : memref<272x64xf32, #tpu.memory_space<vmem>>, vector<14x64xf32>,
    %c0_190 = arith.constant 0 : index
    %c1024 = arith.constant 1024 : index
    %218 = vector.load %arg11[%c0_190, %c1024] : memref<14x1792xf32, #tpu.memory_space<vmem>>, vector<14x64xf32>
    %c0_191 = arith.constant 0 : index
    %c1088 = arith.constant 1088 : index
    %219 = vector.load %arg11[%c0_191, %c1088] : memref<14x1792xf32, #tpu.memory_space<vmem>>, vector<14x64xf32>
    %220 = arith.maximumf %218, %219 : vector<14x64xf32>
    %c145 = arith.constant 145 : index
    %c0_192 = arith.constant 0 : index
    %221 = vector.load %arg12[%c145, %c0_192] : memref<272x64xf32, #tpu.memory_space<vmem>>, vector<14x64xf32>
    tpu.vector_store %arg12[%c145, %c0_192], %220 {strides = array<i32>} : memref<272x64xf32, #tpu.memory_space<vmem>>, vector<14x64xf32>,
    %c0_193 = arith.constant 0 : index
    %c1152 = arith.constant 1152 : index
    %222 = vector.load %arg11[%c0_193, %c1152] : memref<14x1792xf32, #tpu.memory_space<vmem>>, vector<14x64xf32>
    %c0_194 = arith.constant 0 : index
    %c1216 = arith.constant 1216 : index
    %223 = vector.load %arg11[%c0_194, %c1216] : memref<14x1792xf32, #tpu.memory_space<vmem>>, vector<14x64xf32>
    %224 = arith.maximumf %222, %223 : vector<14x64xf32>
    %c161 = arith.constant 161 : index
    %c0_195 = arith.constant 0 : index
    %225 = vector.load %arg12[%c161, %c0_195] : memref<272x64xf32, #tpu.memory_space<vmem>>, vector<14x64xf32>
    tpu.vector_store %arg12[%c161, %c0_195], %224 {strides = array<i32>} : memref<272x64xf32, #tpu.memory_space<vmem>>, vector<14x64xf32>,
    %c0_196 = arith.constant 0 : index
    %c1280 = arith.constant 1280 : index
    %226 = vector.load %arg11[%c0_196, %c1280] : memref<14x1792xf32, #tpu.memory_space<vmem>>, vector<14x64xf32>
    %c0_197 = arith.constant 0 : index
    %c1344 = arith.constant 1344 : index
    %227 = vector.load %arg11[%c0_197, %c1344] : memref<14x1792xf32, #tpu.memory_space<vmem>>, vector<14x64xf32>
    %228 = arith.maximumf %226, %227 : vector<14x64xf32>
    %c177 = arith.constant 177 : index
    %c0_198 = arith.constant 0 : index
    %229 = vector.load %arg12[%c177, %c0_198] : memref<272x64xf32, #tpu.memory_space<vmem>>, vector<14x64xf32>
    tpu.vector_store %arg12[%c177, %c0_198], %228 {strides = array<i32>} : memref<272x64xf32, #tpu.memory_space<vmem>>, vector<14x64xf32>,
    %c0_199 = arith.constant 0 : index
    %c1408 = arith.constant 1408 : index
    %230 = vector.load %arg11[%c0_199, %c1408] : memref<14x1792xf32, #tpu.memory_space<vmem>>, vector<14x64xf32>
    %c0_200 = arith.constant 0 : index
    %c1472 = arith.constant 1472 : index
    %231 = vector.load %arg11[%c0_200, %c1472] : memref<14x1792xf32, #tpu.memory_space<vmem>>, vector<14x64xf32>
    %232 = arith.maximumf %230, %231 : vector<14x64xf32>
    %c193 = arith.constant 193 : index
    %c0_201 = arith.constant 0 : index
    %233 = vector.load %arg12[%c193, %c0_201] : memref<272x64xf32, #tpu.memory_space<vmem>>, vector<14x64xf32>
    tpu.vector_store %arg12[%c193, %c0_201], %232 {strides = array<i32>} : memref<272x64xf32, #tpu.memory_space<vmem>>, vector<14x64xf32>,
    %c0_202 = arith.constant 0 : index
    %c1536 = arith.constant 1536 : index
    %234 = vector.load %arg11[%c0_202, %c1536] : memref<14x1792xf32, #tpu.memory_space<vmem>>, vector<14x64xf32>
    %c0_203 = arith.constant 0 : index
    %c1600 = arith.constant 1600 : index
    %235 = vector.load %arg11[%c0_203, %c1600] : memref<14x1792xf32, #tpu.memory_space<vmem>>, vector<14x64xf32>
    %236 = arith.maximumf %234, %235 : vector<14x64xf32>
    %c209 = arith.constant 209 : index
    %c0_204 = arith.constant 0 : index
    %237 = vector.load %arg12[%c209, %c0_204] : memref<272x64xf32, #tpu.memory_space<vmem>>, vector<14x64xf32>
    tpu.vector_store %arg12[%c209, %c0_204], %236 {strides = array<i32>} : memref<272x64xf32, #tpu.memory_space<vmem>>, vector<14x64xf32>,
    %c0_205 = arith.constant 0 : index
    %c1664 = arith.constant 1664 : index
    %238 = vector.load %arg11[%c0_205, %c1664] : memref<14x1792xf32, #tpu.memory_space<vmem>>, vector<14x64xf32>
    %c0_206 = arith.constant 0 : index
    %c1728 = arith.constant 1728 : index
    %239 = vector.load %arg11[%c0_206, %c1728] : memref<14x1792xf32, #tpu.memory_space<vmem>>, vector<14x64xf32>
    %240 = arith.maximumf %238, %239 : vector<14x64xf32>
    %c225 = arith.constant 225 : index
    %c0_207 = arith.constant 0 : index
    %241 = vector.load %arg12[%c225, %c0_207] : memref<272x64xf32, #tpu.memory_space<vmem>>, vector<14x64xf32>
    tpu.vector_store %arg12[%c225, %c0_207], %240 {strides = array<i32>} : memref<272x64xf32, #tpu.memory_space<vmem>>, vector<14x64xf32>,
    %cst_208 = arith.constant 0.000000e+00 : f32
    %242 = vector.broadcast %cst_208 : f32 to vector<224x64xf32>
    %c0_209 = arith.constant 0 : index
    %c0_210 = arith.constant 0 : index
    %243 = vector.load %arg12[%c0_209, %c0_210] : memref<272x64xf32, #tpu.memory_space<vmem>>, vector<224x64xf32>
    %c0_211 = arith.constant 0 : index
    %c0_212 = arith.constant 0 : index
    %c0_213 = arith.constant 0 : index
    %c0_214 = arith.constant 0 : index
    %244 = vector.load %arg4[%c0_211, %c0_212, %c0_213, %c0_214] : memref<3x3x64x64xf32, #tpu.memory_space<vmem>>, vector<1x1x64x64xf32>
    %245 = vector.shape_cast %244 : vector<1x1x64x64xf32> to vector<64x64xf32>
    %cst_215 = arith.constant dense<0.000000e+00> : vector<224x64xf32>
    %246 = tpu.matmul %243, %245, %cst_215 {dimension_numbers = #tpu.dot_dimension_numbers<[1], [0], [0], [1], [0, 0, 1, 1], [], []>} : vector<224x64xf32>, vector<64x64xf32>, vector<224x64xf32> -> vector<224x64xf32>
    %247 = arith.addf %242, %246 : vector<224x64xf32>
    %c16_216 = arith.constant 16 : index
    %c0_217 = arith.constant 0 : index
    %248 = vector.load %arg12[%c16_216, %c0_217] : memref<272x64xf32, #tpu.memory_space<vmem>>, vector<224x64xf32>
    %c0_218 = arith.constant 0 : index
    %c1_219 = arith.constant 1 : index
    %c0_220 = arith.constant 0 : index
    %c0_221 = arith.constant 0 : index
    %249 = vector.load %arg4[%c0_218, %c1_219, %c0_220, %c0_221] : memref<3x3x64x64xf32, #tpu.memory_space<vmem>>, vector<1x1x64x64xf32>
    %250 = vector.shape_cast %249 : vector<1x1x64x64xf32> to vector<64x64xf32>
    %cst_222 = arith.constant dense<0.000000e+00> : vector<224x64xf32>
    %251 = tpu.matmul %248, %250, %cst_222 {dimension_numbers = #tpu.dot_dimension_numbers<[1], [0], [0], [1], [0, 0, 1, 1], [], []>} : vector<224x64xf32>, vector<64x64xf32>, vector<224x64xf32> -> vector<224x64xf32>
    %252 = arith.addf %247, %251 : vector<224x64xf32>
    %c32 = arith.constant 32 : index
    %c0_223 = arith.constant 0 : index
    %253 = vector.load %arg12[%c32, %c0_223] : memref<272x64xf32, #tpu.memory_space<vmem>>, vector<224x64xf32>
    %c0_224 = arith.constant 0 : index
    %c2_225 = arith.constant 2 : index
    %c0_226 = arith.constant 0 : index
    %c0_227 = arith.constant 0 : index
    %254 = vector.load %arg4[%c0_224, %c2_225, %c0_226, %c0_227] : memref<3x3x64x64xf32, #tpu.memory_space<vmem>>, vector<1x1x64x64xf32>
    %255 = vector.shape_cast %254 : vector<1x1x64x64xf32> to vector<64x64xf32>
    %cst_228 = arith.constant dense<0.000000e+00> : vector<224x64xf32>
    %256 = tpu.matmul %253, %255, %cst_228 {dimension_numbers = #tpu.dot_dimension_numbers<[1], [0], [0], [1], [0, 0, 1, 1], [], []>} : vector<224x64xf32>, vector<64x64xf32>, vector<224x64xf32> -> vector<224x64xf32>
    %257 = arith.addf %252, %256 : vector<224x64xf32>
    %c1_229 = arith.constant 1 : index
    %c0_230 = arith.constant 0 : index
    %258 = vector.load %arg12[%c1_229, %c0_230] : memref<272x64xf32, #tpu.memory_space<vmem>>, vector<224x64xf32>
    %c1_231 = arith.constant 1 : index
    %c0_232 = arith.constant 0 : index
    %c0_233 = arith.constant 0 : index
    %c0_234 = arith.constant 0 : index
    %259 = vector.load %arg4[%c1_231, %c0_232, %c0_233, %c0_234] : memref<3x3x64x64xf32, #tpu.memory_space<vmem>>, vector<1x1x64x64xf32>
    %260 = vector.shape_cast %259 : vector<1x1x64x64xf32> to vector<64x64xf32>
    %cst_235 = arith.constant dense<0.000000e+00> : vector<224x64xf32>
    %261 = tpu.matmul %258, %260, %cst_235 {dimension_numbers = #tpu.dot_dimension_numbers<[1], [0], [0], [1], [0, 0, 1, 1], [], []>} : vector<224x64xf32>, vector<64x64xf32>, vector<224x64xf32> -> vector<224x64xf32>
    %262 = arith.addf %257, %261 : vector<224x64xf32>
    %c17_236 = arith.constant 17 : index
    %c0_237 = arith.constant 0 : index
    %263 = vector.load %arg12[%c17_236, %c0_237] : memref<272x64xf32, #tpu.memory_space<vmem>>, vector<224x64xf32>
    %c1_238 = arith.constant 1 : index
    %c1_239 = arith.constant 1 : index
    %c0_240 = arith.constant 0 : index
    %c0_241 = arith.constant 0 : index
    %264 = vector.load %arg4[%c1_238, %c1_239, %c0_240, %c0_241] : memref<3x3x64x64xf32, #tpu.memory_space<vmem>>, vector<1x1x64x64xf32>
    %265 = vector.shape_cast %264 : vector<1x1x64x64xf32> to vector<64x64xf32>
    %cst_242 = arith.constant dense<0.000000e+00> : vector<224x64xf32>
    %266 = tpu.matmul %263, %265, %cst_242 {dimension_numbers = #tpu.dot_dimension_numbers<[1], [0], [0], [1], [0, 0, 1, 1], [], []>} : vector<224x64xf32>, vector<64x64xf32>, vector<224x64xf32> -> vector<224x64xf32>
    %267 = arith.addf %262, %266 : vector<224x64xf32>
    %c33_243 = arith.constant 33 : index
    %c0_244 = arith.constant 0 : index
    %268 = vector.load %arg12[%c33_243, %c0_244] : memref<272x64xf32, #tpu.memory_space<vmem>>, vector<224x64xf32>
    %c1_245 = arith.constant 1 : index
    %c2_246 = arith.constant 2 : index
    %c0_247 = arith.constant 0 : index
    %c0_248 = arith.constant 0 : index
    %269 = vector.load %arg4[%c1_245, %c2_246, %c0_247, %c0_248] : memref<3x3x64x64xf32, #tpu.memory_space<vmem>>, vector<1x1x64x64xf32>
    %270 = vector.shape_cast %269 : vector<1x1x64x64xf32> to vector<64x64xf32>
    %cst_249 = arith.constant dense<0.000000e+00> : vector<224x64xf32>
    %271 = tpu.matmul %268, %270, %cst_249 {dimension_numbers = #tpu.dot_dimension_numbers<[1], [0], [0], [1], [0, 0, 1, 1], [], []>} : vector<224x64xf32>, vector<64x64xf32>, vector<224x64xf32> -> vector<224x64xf32>
    %272 = arith.addf %267, %271 : vector<224x64xf32>
    %c2_250 = arith.constant 2 : index
    %c0_251 = arith.constant 0 : index
    %273 = vector.load %arg12[%c2_250, %c0_251] : memref<272x64xf32, #tpu.memory_space<vmem>>, vector<224x64xf32>
    %c2_252 = arith.constant 2 : index
    %c0_253 = arith.constant 0 : index
    %c0_254 = arith.constant 0 : index
    %c0_255 = arith.constant 0 : index
    %274 = vector.load %arg4[%c2_252, %c0_253, %c0_254, %c0_255] : memref<3x3x64x64xf32, #tpu.memory_space<vmem>>, vector<1x1x64x64xf32>
    %275 = vector.shape_cast %274 : vector<1x1x64x64xf32> to vector<64x64xf32>
    %cst_256 = arith.constant dense<0.000000e+00> : vector<224x64xf32>
    %276 = tpu.matmul %273, %275, %cst_256 {dimension_numbers = #tpu.dot_dimension_numbers<[1], [0], [0], [1], [0, 0, 1, 1], [], []>} : vector<224x64xf32>, vector<64x64xf32>, vector<224x64xf32> -> vector<224x64xf32>
    %277 = arith.addf %272, %276 : vector<224x64xf32>
    %c18_257 = arith.constant 18 : index
    %c0_258 = arith.constant 0 : index
    %278 = vector.load %arg12[%c18_257, %c0_258] : memref<272x64xf32, #tpu.memory_space<vmem>>, vector<224x64xf32>
    %c2_259 = arith.constant 2 : index
    %c1_260 = arith.constant 1 : index
    %c0_261 = arith.constant 0 : index
    %c0_262 = arith.constant 0 : index
    %279 = vector.load %arg4[%c2_259, %c1_260, %c0_261, %c0_262] : memref<3x3x64x64xf32, #tpu.memory_space<vmem>>, vector<1x1x64x64xf32>
    %280 = vector.shape_cast %279 : vector<1x1x64x64xf32> to vector<64x64xf32>
    %cst_263 = arith.constant dense<0.000000e+00> : vector<224x64xf32>
    %281 = tpu.matmul %278, %280, %cst_263 {dimension_numbers = #tpu.dot_dimension_numbers<[1], [0], [0], [1], [0, 0, 1, 1], [], []>} : vector<224x64xf32>, vector<64x64xf32>, vector<224x64xf32> -> vector<224x64xf32>
    %282 = arith.addf %277, %281 : vector<224x64xf32>
    %c34 = arith.constant 34 : index
    %c0_264 = arith.constant 0 : index
    %283 = vector.load %arg12[%c34, %c0_264] : memref<272x64xf32, #tpu.memory_space<vmem>>, vector<224x64xf32>
    %c2_265 = arith.constant 2 : index
    %c2_266 = arith.constant 2 : index
    %c0_267 = arith.constant 0 : index
    %c0_268 = arith.constant 0 : index
    %284 = vector.load %arg4[%c2_265, %c2_266, %c0_267, %c0_268] : memref<3x3x64x64xf32, #tpu.memory_space<vmem>>, vector<1x1x64x64xf32>
    %285 = vector.shape_cast %284 : vector<1x1x64x64xf32> to vector<64x64xf32>
    %cst_269 = arith.constant dense<0.000000e+00> : vector<224x64xf32>
    %286 = tpu.matmul %283, %285, %cst_269 {dimension_numbers = #tpu.dot_dimension_numbers<[1], [0], [0], [1], [0, 0, 1, 1], [], []>} : vector<224x64xf32>, vector<64x64xf32>, vector<224x64xf32> -> vector<224x64xf32>
    %287 = arith.addf %282, %286 : vector<224x64xf32>
    %cst_270 = arith.constant 0.000000e+00 : f32
    %288 = vector.broadcast %cst_270 : f32 to vector<16x64xf32>
    %c224 = arith.constant 224 : index
    %c0_271 = arith.constant 0 : index
    %289 = vector.load %arg13[%c224, %c0_271] : memref<240x64xf32, #tpu.memory_space<vmem>>, vector<16x64xf32>
    tpu.vector_store %arg13[%c224, %c0_271], %288 {strides = array<i32>} : memref<240x64xf32, #tpu.memory_space<vmem>>, vector<16x64xf32>,
    %c0_272 = arith.constant 0 : index
    %c0_273 = arith.constant 0 : index
    %290 = vector.load %arg5[%c0_272, %c0_273] : memref<1x64xf32, #tpu.memory_space<vmem>>, vector<1x64xf32>
    %291 = vector.broadcast %290 : vector<1x64xf32> to vector<224x64xf32>
    %292 = arith.addf %287, %291 : vector<224x64xf32>
    %cst_274 = arith.constant 0.000000e+00 : f32
    %293 = vector.broadcast %cst_274 : f32 to vector<224x64xf32>
    %294 = arith.maximumf %292, %293 : vector<224x64xf32>
    %c0_275 = arith.constant 0 : index
    %c0_276 = arith.constant 0 : index
    %295 = vector.load %arg13[%c0_275, %c0_276] : memref<240x64xf32, #tpu.memory_space<vmem>>, vector<224x64xf32>
    tpu.vector_store %arg13[%c0_275, %c0_276], %294 {strides = array<i32>} : memref<240x64xf32, #tpu.memory_space<vmem>>, vector<224x64xf32>,
    %c0_277 = arith.constant 0 : index
    %c0_278 = arith.constant 0 : index
    %296 = vector.load %arg13[%c0_277, %c0_278] : memref<240x64xf32, #tpu.memory_space<vmem>>, vector<208x64xf32>
    %c1_279 = arith.constant 1 : index
    %c0_280 = arith.constant 0 : index
    %297 = vector.load %arg13[%c1_279, %c0_280] : memref<240x64xf32, #tpu.memory_space<vmem>>, vector<208x64xf32>
    %298 = arith.maximumf %296, %297 : vector<208x64xf32>
    %c16_281 = arith.constant 16 : index
    %c0_282 = arith.constant 0 : index
    %299 = vector.load %arg13[%c16_281, %c0_282] : memref<240x64xf32, #tpu.memory_space<vmem>>, vector<208x64xf32>
    %c17_283 = arith.constant 17 : index
    %c0_284 = arith.constant 0 : index
    %300 = vector.load %arg13[%c17_283, %c0_284] : memref<240x64xf32, #tpu.memory_space<vmem>>, vector<208x64xf32>
    %301 = arith.maximumf %299, %300 : vector<208x64xf32>
    %302 = arith.maximumf %298, %301 : vector<208x64xf32>
    %c0_285 = arith.constant 0 : index
    %c0_286 = arith.constant 0 : index
    %303 = vector.load %arg14[%c0_285, %c0_286] : memref<208x64xf32, #tpu.memory_space<vmem>>, vector<208x64xf32>
    tpu.vector_store %arg14[%c0_285, %c0_286], %302 {strides = array<i32>} : memref<208x64xf32, #tpu.memory_space<vmem>>, vector<208x64xf32>,
    %c0_287 = arith.constant 0 : index
    %c0_288 = arith.constant 0 : index
    %304 = vector.load %arg14[%c0_287, %c0_288] : memref<208x64xf32, #tpu.memory_space<vmem>>, vector<1x64xf32>
    %305 = vector.shape_cast %304 : vector<1x64xf32> to vector<64xf32>
    %c0_289 = arith.constant 0 : index
    %c0_290 = arith.constant 0 : index
    %306 = vector.load %arg15[%c0_289, %c0_290] : memref<1x3136xf32, #tpu.memory_space<vmem>>, vector<1x64xf32>
    %307 = vector.shape_cast %306 : vector<1x64xf32> to vector<64xf32>
    %308 = vector.shape_cast %305 : vector<64xf32> to vector<1x64xf32>
    tpu.vector_store %arg15[%c0_289, %c0_290], %308 {strides = array<i32>} : memref<1x3136xf32, #tpu.memory_space<vmem>>, vector<1x64xf32>,
    %c32_291 = arith.constant 32 : index
    %c0_292 = arith.constant 0 : index
    %309 = vector.load %arg14[%c32_291, %c0_292] : memref<208x64xf32, #tpu.memory_space<vmem>>, vector<1x64xf32>
    %310 = vector.shape_cast %309 : vector<1x64xf32> to vector<64xf32>
    %c0_293 = arith.constant 0 : index
    %c64_294 = arith.constant 64 : index
    %311 = vector.load %arg15[%c0_293, %c64_294] : memref<1x3136xf32, #tpu.memory_space<vmem>>, vector<1x64xf32>
    %312 = vector.shape_cast %311 : vector<1x64xf32> to vector<64xf32>
    %313 = vector.shape_cast %310 : vector<64xf32> to vector<1x64xf32>
    tpu.vector_store %arg15[%c0_293, %c64_294], %313 {strides = array<i32>} : memref<1x3136xf32, #tpu.memory_space<vmem>>, vector<1x64xf32>,
    %c64_295 = arith.constant 64 : index
    %c0_296 = arith.constant 0 : index
    %314 = vector.load %arg14[%c64_295, %c0_296] : memref<208x64xf32, #tpu.memory_space<vmem>>, vector<1x64xf32>
    %315 = vector.shape_cast %314 : vector<1x64xf32> to vector<64xf32>
    %c0_297 = arith.constant 0 : index
    %c128_298 = arith.constant 128 : index
    %316 = vector.load %arg15[%c0_297, %c128_298] : memref<1x3136xf32, #tpu.memory_space<vmem>>, vector<1x64xf32>
    %317 = vector.shape_cast %316 : vector<1x64xf32> to vector<64xf32>
    %318 = vector.shape_cast %315 : vector<64xf32> to vector<1x64xf32>
    tpu.vector_store %arg15[%c0_297, %c128_298], %318 {strides = array<i32>} : memref<1x3136xf32, #tpu.memory_space<vmem>>, vector<1x64xf32>,
    %c96 = arith.constant 96 : index
    %c0_299 = arith.constant 0 : index
    %319 = vector.load %arg14[%c96, %c0_299] : memref<208x64xf32, #tpu.memory_space<vmem>>, vector<1x64xf32>
    %320 = vector.shape_cast %319 : vector<1x64xf32> to vector<64xf32>
    %c0_300 = arith.constant 0 : index
    %c192_301 = arith.constant 192 : index
    %321 = vector.load %arg15[%c0_300, %c192_301] : memref<1x3136xf32, #tpu.memory_space<vmem>>, vector<1x64xf32>
    %322 = vector.shape_cast %321 : vector<1x64xf32> to vector<64xf32>
    %323 = vector.shape_cast %320 : vector<64xf32> to vector<1x64xf32>
    tpu.vector_store %arg15[%c0_300, %c192_301], %323 {strides = array<i32>} : memref<1x3136xf32, #tpu.memory_space<vmem>>, vector<1x64xf32>,
    %c128_302 = arith.constant 128 : index
    %c0_303 = arith.constant 0 : index
    %324 = vector.load %arg14[%c128_302, %c0_303] : memref<208x64xf32, #tpu.memory_space<vmem>>, vector<1x64xf32>
    %325 = vector.shape_cast %324 : vector<1x64xf32> to vector<64xf32>
    %c0_304 = arith.constant 0 : index
    %c256_305 = arith.constant 256 : index
    %326 = vector.load %arg15[%c0_304, %c256_305] : memref<1x3136xf32, #tpu.memory_space<vmem>>, vector<1x64xf32>
    %327 = vector.shape_cast %326 : vector<1x64xf32> to vector<64xf32>
    %328 = vector.shape_cast %325 : vector<64xf32> to vector<1x64xf32>
    tpu.vector_store %arg15[%c0_304, %c256_305], %328 {strides = array<i32>} : memref<1x3136xf32, #tpu.memory_space<vmem>>, vector<1x64xf32>,
    %c160 = arith.constant 160 : index
    %c0_306 = arith.constant 0 : index
    %329 = vector.load %arg14[%c160, %c0_306] : memref<208x64xf32, #tpu.memory_space<vmem>>, vector<1x64xf32>
    %330 = vector.shape_cast %329 : vector<1x64xf32> to vector<64xf32>
    %c0_307 = arith.constant 0 : index
    %c320_308 = arith.constant 320 : index
    %331 = vector.load %arg15[%c0_307, %c320_308] : memref<1x3136xf32, #tpu.memory_space<vmem>>, vector<1x64xf32>
    %332 = vector.shape_cast %331 : vector<1x64xf32> to vector<64xf32>
    %333 = vector.shape_cast %330 : vector<64xf32> to vector<1x64xf32>
    tpu.vector_store %arg15[%c0_307, %c320_308], %333 {strides = array<i32>} : memref<1x3136xf32, #tpu.memory_space<vmem>>, vector<1x64xf32>,
    %c192_309 = arith.constant 192 : index
    %c0_310 = arith.constant 0 : index
    %334 = vector.load %arg14[%c192_309, %c0_310] : memref<208x64xf32, #tpu.memory_space<vmem>>, vector<1x64xf32>
    %335 = vector.shape_cast %334 : vector<1x64xf32> to vector<64xf32>
    %c0_311 = arith.constant 0 : index
    %c384_312 = arith.constant 384 : index
    %336 = vector.load %arg15[%c0_311, %c384_312] : memref<1x3136xf32, #tpu.memory_space<vmem>>, vector<1x64xf32>
    %337 = vector.shape_cast %336 : vector<1x64xf32> to vector<64xf32>
    %338 = vector.shape_cast %335 : vector<64xf32> to vector<1x64xf32>
    tpu.vector_store %arg15[%c0_311, %c384_312], %338 {strides = array<i32>} : memref<1x3136xf32, #tpu.memory_space<vmem>>, vector<1x64xf32>,
    %c2_313 = arith.constant 2 : index
    %c0_314 = arith.constant 0 : index
    %339 = vector.load %arg14[%c2_313, %c0_314] : memref<208x64xf32, #tpu.memory_space<vmem>>, vector<1x64xf32>
    %340 = vector.shape_cast %339 : vector<1x64xf32> to vector<64xf32>
    %c0_315 = arith.constant 0 : index
    %c448_316 = arith.constant 448 : index
    %341 = vector.load %arg15[%c0_315, %c448_316] : memref<1x3136xf32, #tpu.memory_space<vmem>>, vector<1x64xf32>
    %342 = vector.shape_cast %341 : vector<1x64xf32> to vector<64xf32>
    %343 = vector.shape_cast %340 : vector<64xf32> to vector<1x64xf32>
    tpu.vector_store %arg15[%c0_315, %c448_316], %343 {strides = array<i32>} : memref<1x3136xf32, #tpu.memory_space<vmem>>, vector<1x64xf32>,
    %c34_317 = arith.constant 34 : index
    %c0_318 = arith.constant 0 : index
    %344 = vector.load %arg14[%c34_317, %c0_318] : memref<208x64xf32, #tpu.memory_space<vmem>>, vector<1x64xf32>
    %345 = vector.shape_cast %344 : vector<1x64xf32> to vector<64xf32>
    %c0_319 = arith.constant 0 : index
    %c512_320 = arith.constant 512 : index
    %346 = vector.load %arg15[%c0_319, %c512_320] : memref<1x3136xf32, #tpu.memory_space<vmem>>, vector<1x64xf32>
    %347 = vector.shape_cast %346 : vector<1x64xf32> to vector<64xf32>
    %348 = vector.shape_cast %345 : vector<64xf32> to vector<1x64xf32>
    tpu.vector_store %arg15[%c0_319, %c512_320], %348 {strides = array<i32>} : memref<1x3136xf32, #tpu.memory_space<vmem>>, vector<1x64xf32>,
    %c66 = arith.constant 66 : index
    %c0_321 = arith.constant 0 : index
    %349 = vector.load %arg14[%c66, %c0_321] : memref<208x64xf32, #tpu.memory_space<vmem>>, vector<1x64xf32>
    %350 = vector.shape_cast %349 : vector<1x64xf32> to vector<64xf32>
    %c0_322 = arith.constant 0 : index
    %c576_323 = arith.constant 576 : index
    %351 = vector.load %arg15[%c0_322, %c576_323] : memref<1x3136xf32, #tpu.memory_space<vmem>>, vector<1x64xf32>
    %352 = vector.shape_cast %351 : vector<1x64xf32> to vector<64xf32>
    %353 = vector.shape_cast %350 : vector<64xf32> to vector<1x64xf32>
    tpu.vector_store %arg15[%c0_322, %c576_323], %353 {strides = array<i32>} : memref<1x3136xf32, #tpu.memory_space<vmem>>, vector<1x64xf32>,
    %c98 = arith.constant 98 : index
    %c0_324 = arith.constant 0 : index
    %354 = vector.load %arg14[%c98, %c0_324] : memref<208x64xf32, #tpu.memory_space<vmem>>, vector<1x64xf32>
    %355 = vector.shape_cast %354 : vector<1x64xf32> to vector<64xf32>
    %c0_325 = arith.constant 0 : index
    %c640_326 = arith.constant 640 : index
    %356 = vector.load %arg15[%c0_325, %c640_326] : memref<1x3136xf32, #tpu.memory_space<vmem>>, vector<1x64xf32>
    %357 = vector.shape_cast %356 : vector<1x64xf32> to vector<64xf32>
    %358 = vector.shape_cast %355 : vector<64xf32> to vector<1x64xf32>
    tpu.vector_store %arg15[%c0_325, %c640_326], %358 {strides = array<i32>} : memref<1x3136xf32, #tpu.memory_space<vmem>>, vector<1x64xf32>,
    %c130 = arith.constant 130 : index
    %c0_327 = arith.constant 0 : index
    %359 = vector.load %arg14[%c130, %c0_327] : memref<208x64xf32, #tpu.memory_space<vmem>>, vector<1x64xf32>
    %360 = vector.shape_cast %359 : vector<1x64xf32> to vector<64xf32>
    %c0_328 = arith.constant 0 : index
    %c704_329 = arith.constant 704 : index
    %361 = vector.load %arg15[%c0_328, %c704_329] : memref<1x3136xf32, #tpu.memory_space<vmem>>, vector<1x64xf32>
    %362 = vector.shape_cast %361 : vector<1x64xf32> to vector<64xf32>
    %363 = vector.shape_cast %360 : vector<64xf32> to vector<1x64xf32>
    tpu.vector_store %arg15[%c0_328, %c704_329], %363 {strides = array<i32>} : memref<1x3136xf32, #tpu.memory_space<vmem>>, vector<1x64xf32>,
    %c162 = arith.constant 162 : index
    %c0_330 = arith.constant 0 : index
    %364 = vector.load %arg14[%c162, %c0_330] : memref<208x64xf32, #tpu.memory_space<vmem>>, vector<1x64xf32>
    %365 = vector.shape_cast %364 : vector<1x64xf32> to vector<64xf32>
    %c0_331 = arith.constant 0 : index
    %c768_332 = arith.constant 768 : index
    %366 = vector.load %arg15[%c0_331, %c768_332] : memref<1x3136xf32, #tpu.memory_space<vmem>>, vector<1x64xf32>
    %367 = vector.shape_cast %366 : vector<1x64xf32> to vector<64xf32>
    %368 = vector.shape_cast %365 : vector<64xf32> to vector<1x64xf32>
    tpu.vector_store %arg15[%c0_331, %c768_332], %368 {strides = array<i32>} : memref<1x3136xf32, #tpu.memory_space<vmem>>, vector<1x64xf32>,
    %c194 = arith.constant 194 : index
    %c0_333 = arith.constant 0 : index
    %369 = vector.load %arg14[%c194, %c0_333] : memref<208x64xf32, #tpu.memory_space<vmem>>, vector<1x64xf32>
    %370 = vector.shape_cast %369 : vector<1x64xf32> to vector<64xf32>
    %c0_334 = arith.constant 0 : index
    %c832_335 = arith.constant 832 : index
    %371 = vector.load %arg15[%c0_334, %c832_335] : memref<1x3136xf32, #tpu.memory_space<vmem>>, vector<1x64xf32>
    %372 = vector.shape_cast %371 : vector<1x64xf32> to vector<64xf32>
    %373 = vector.shape_cast %370 : vector<64xf32> to vector<1x64xf32>
    tpu.vector_store %arg15[%c0_334, %c832_335], %373 {strides = array<i32>} : memref<1x3136xf32, #tpu.memory_space<vmem>>, vector<1x64xf32>,
    %c4_336 = arith.constant 4 : index
    %c0_337 = arith.constant 0 : index
    %374 = vector.load %arg14[%c4_336, %c0_337] : memref<208x64xf32, #tpu.memory_space<vmem>>, vector<1x64xf32>
    %375 = vector.shape_cast %374 : vector<1x64xf32> to vector<64xf32>
    %c0_338 = arith.constant 0 : index
    %c896_339 = arith.constant 896 : index
    %376 = vector.load %arg15[%c0_338, %c896_339] : memref<1x3136xf32, #tpu.memory_space<vmem>>, vector<1x64xf32>
    %377 = vector.shape_cast %376 : vector<1x64xf32> to vector<64xf32>
    %378 = vector.shape_cast %375 : vector<64xf32> to vector<1x64xf32>
    tpu.vector_store %arg15[%c0_338, %c896_339], %378 {strides = array<i32>} : memref<1x3136xf32, #tpu.memory_space<vmem>>, vector<1x64xf32>,
    %c36 = arith.constant 36 : index
    %c0_340 = arith.constant 0 : index
    %379 = vector.load %arg14[%c36, %c0_340] : memref<208x64xf32, #tpu.memory_space<vmem>>, vector<1x64xf32>
    %380 = vector.shape_cast %379 : vector<1x64xf32> to vector<64xf32>
    %c0_341 = arith.constant 0 : index
    %c960_342 = arith.constant 960 : index
    %381 = vector.load %arg15[%c0_341, %c960_342] : memref<1x3136xf32, #tpu.memory_space<vmem>>, vector<1x64xf32>
    %382 = vector.shape_cast %381 : vector<1x64xf32> to vector<64xf32>
    %383 = vector.shape_cast %380 : vector<64xf32> to vector<1x64xf32>
    tpu.vector_store %arg15[%c0_341, %c960_342], %383 {strides = array<i32>} : memref<1x3136xf32, #tpu.memory_space<vmem>>, vector<1x64xf32>,
    %c68 = arith.constant 68 : index
    %c0_343 = arith.constant 0 : index
    %384 = vector.load %arg14[%c68, %c0_343] : memref<208x64xf32, #tpu.memory_space<vmem>>, vector<1x64xf32>
    %385 = vector.shape_cast %384 : vector<1x64xf32> to vector<64xf32>
    %c0_344 = arith.constant 0 : index
    %c1024_345 = arith.constant 1024 : index
    %386 = vector.load %arg15[%c0_344, %c1024_345] : memref<1x3136xf32, #tpu.memory_space<vmem>>, vector<1x64xf32>
    %387 = vector.shape_cast %386 : vector<1x64xf32> to vector<64xf32>
    %388 = vector.shape_cast %385 : vector<64xf32> to vector<1x64xf32>
    tpu.vector_store %arg15[%c0_344, %c1024_345], %388 {strides = array<i32>} : memref<1x3136xf32, #tpu.memory_space<vmem>>, vector<1x64xf32>,
    %c100 = arith.constant 100 : index
    %c0_346 = arith.constant 0 : index
    %389 = vector.load %arg14[%c100, %c0_346] : memref<208x64xf32, #tpu.memory_space<vmem>>, vector<1x64xf32>
    %390 = vector.shape_cast %389 : vector<1x64xf32> to vector<64xf32>
    %c0_347 = arith.constant 0 : index
    %c1088_348 = arith.constant 1088 : index
    %391 = vector.load %arg15[%c0_347, %c1088_348] : memref<1x3136xf32, #tpu.memory_space<vmem>>, vector<1x64xf32>
    %392 = vector.shape_cast %391 : vector<1x64xf32> to vector<64xf32>
    %393 = vector.shape_cast %390 : vector<64xf32> to vector<1x64xf32>
    tpu.vector_store %arg15[%c0_347, %c1088_348], %393 {strides = array<i32>} : memref<1x3136xf32, #tpu.memory_space<vmem>>, vector<1x64xf32>,
    %c132 = arith.constant 132 : index
    %c0_349 = arith.constant 0 : index
    %394 = vector.load %arg14[%c132, %c0_349] : memref<208x64xf32, #tpu.memory_space<vmem>>, vector<1x64xf32>
    %395 = vector.shape_cast %394 : vector<1x64xf32> to vector<64xf32>
    %c0_350 = arith.constant 0 : index
    %c1152_351 = arith.constant 1152 : index
    %396 = vector.load %arg15[%c0_350, %c1152_351] : memref<1x3136xf32, #tpu.memory_space<vmem>>, vector<1x64xf32>
    %397 = vector.shape_cast %396 : vector<1x64xf32> to vector<64xf32>
    %398 = vector.shape_cast %395 : vector<64xf32> to vector<1x64xf32>
    tpu.vector_store %arg15[%c0_350, %c1152_351], %398 {strides = array<i32>} : memref<1x3136xf32, #tpu.memory_space<vmem>>, vector<1x64xf32>,
    %c164 = arith.constant 164 : index
    %c0_352 = arith.constant 0 : index
    %399 = vector.load %arg14[%c164, %c0_352] : memref<208x64xf32, #tpu.memory_space<vmem>>, vector<1x64xf32>
    %400 = vector.shape_cast %399 : vector<1x64xf32> to vector<64xf32>
    %c0_353 = arith.constant 0 : index
    %c1216_354 = arith.constant 1216 : index
    %401 = vector.load %arg15[%c0_353, %c1216_354] : memref<1x3136xf32, #tpu.memory_space<vmem>>, vector<1x64xf32>
    %402 = vector.shape_cast %401 : vector<1x64xf32> to vector<64xf32>
    %403 = vector.shape_cast %400 : vector<64xf32> to vector<1x64xf32>
    tpu.vector_store %arg15[%c0_353, %c1216_354], %403 {strides = array<i32>} : memref<1x3136xf32, #tpu.memory_space<vmem>>, vector<1x64xf32>,
    %c196 = arith.constant 196 : index
    %c0_355 = arith.constant 0 : index
    %404 = vector.load %arg14[%c196, %c0_355] : memref<208x64xf32, #tpu.memory_space<vmem>>, vector<1x64xf32>
    %405 = vector.shape_cast %404 : vector<1x64xf32> to vector<64xf32>
    %c0_356 = arith.constant 0 : index
    %c1280_357 = arith.constant 1280 : index
    %406 = vector.load %arg15[%c0_356, %c1280_357] : memref<1x3136xf32, #tpu.memory_space<vmem>>, vector<1x64xf32>
    %407 = vector.shape_cast %406 : vector<1x64xf32> to vector<64xf32>
    %408 = vector.shape_cast %405 : vector<64xf32> to vector<1x64xf32>
    tpu.vector_store %arg15[%c0_356, %c1280_357], %408 {strides = array<i32>} : memref<1x3136xf32, #tpu.memory_space<vmem>>, vector<1x64xf32>,
    %c6_358 = arith.constant 6 : index
    %c0_359 = arith.constant 0 : index
    %409 = vector.load %arg14[%c6_358, %c0_359] : memref<208x64xf32, #tpu.memory_space<vmem>>, vector<1x64xf32>
    %410 = vector.shape_cast %409 : vector<1x64xf32> to vector<64xf32>
    %c0_360 = arith.constant 0 : index
    %c1344_361 = arith.constant 1344 : index
    %411 = vector.load %arg15[%c0_360, %c1344_361] : memref<1x3136xf32, #tpu.memory_space<vmem>>, vector<1x64xf32>
    %412 = vector.shape_cast %411 : vector<1x64xf32> to vector<64xf32>
    %413 = vector.shape_cast %410 : vector<64xf32> to vector<1x64xf32>
    tpu.vector_store %arg15[%c0_360, %c1344_361], %413 {strides = array<i32>} : memref<1x3136xf32, #tpu.memory_space<vmem>>, vector<1x64xf32>,
    %c38 = arith.constant 38 : index
    %c0_362 = arith.constant 0 : index
    %414 = vector.load %arg14[%c38, %c0_362] : memref<208x64xf32, #tpu.memory_space<vmem>>, vector<1x64xf32>
    %415 = vector.shape_cast %414 : vector<1x64xf32> to vector<64xf32>
    %c0_363 = arith.constant 0 : index
    %c1408_364 = arith.constant 1408 : index
    %416 = vector.load %arg15[%c0_363, %c1408_364] : memref<1x3136xf32, #tpu.memory_space<vmem>>, vector<1x64xf32>
    %417 = vector.shape_cast %416 : vector<1x64xf32> to vector<64xf32>
    %418 = vector.shape_cast %415 : vector<64xf32> to vector<1x64xf32>
    tpu.vector_store %arg15[%c0_363, %c1408_364], %418 {strides = array<i32>} : memref<1x3136xf32, #tpu.memory_space<vmem>>, vector<1x64xf32>,
    %c70 = arith.constant 70 : index
    %c0_365 = arith.constant 0 : index
    %419 = vector.load %arg14[%c70, %c0_365] : memref<208x64xf32, #tpu.memory_space<vmem>>, vector<1x64xf32>
    %420 = vector.shape_cast %419 : vector<1x64xf32> to vector<64xf32>
    %c0_366 = arith.constant 0 : index
    %c1472_367 = arith.constant 1472 : index
    %421 = vector.load %arg15[%c0_366, %c1472_367] : memref<1x3136xf32, #tpu.memory_space<vmem>>, vector<1x64xf32>
    %422 = vector.shape_cast %421 : vector<1x64xf32> to vector<64xf32>
    %423 = vector.shape_cast %420 : vector<64xf32> to vector<1x64xf32>
    tpu.vector_store %arg15[%c0_366, %c1472_367], %423 {strides = array<i32>} : memref<1x3136xf32, #tpu.memory_space<vmem>>, vector<1x64xf32>,
    %c102 = arith.constant 102 : index
    %c0_368 = arith.constant 0 : index
    %424 = vector.load %arg14[%c102, %c0_368] : memref<208x64xf32, #tpu.memory_space<vmem>>, vector<1x64xf32>
    %425 = vector.shape_cast %424 : vector<1x64xf32> to vector<64xf32>
    %c0_369 = arith.constant 0 : index
    %c1536_370 = arith.constant 1536 : index
    %426 = vector.load %arg15[%c0_369, %c1536_370] : memref<1x3136xf32, #tpu.memory_space<vmem>>, vector<1x64xf32>
    %427 = vector.shape_cast %426 : vector<1x64xf32> to vector<64xf32>
    %428 = vector.shape_cast %425 : vector<64xf32> to vector<1x64xf32>
    tpu.vector_store %arg15[%c0_369, %c1536_370], %428 {strides = array<i32>} : memref<1x3136xf32, #tpu.memory_space<vmem>>, vector<1x64xf32>,
    %c134 = arith.constant 134 : index
    %c0_371 = arith.constant 0 : index
    %429 = vector.load %arg14[%c134, %c0_371] : memref<208x64xf32, #tpu.memory_space<vmem>>, vector<1x64xf32>
    %430 = vector.shape_cast %429 : vector<1x64xf32> to vector<64xf32>
    %c0_372 = arith.constant 0 : index
    %c1600_373 = arith.constant 1600 : index
    %431 = vector.load %arg15[%c0_372, %c1600_373] : memref<1x3136xf32, #tpu.memory_space<vmem>>, vector<1x64xf32>
    %432 = vector.shape_cast %431 : vector<1x64xf32> to vector<64xf32>
    %433 = vector.shape_cast %430 : vector<64xf32> to vector<1x64xf32>
    tpu.vector_store %arg15[%c0_372, %c1600_373], %433 {strides = array<i32>} : memref<1x3136xf32, #tpu.memory_space<vmem>>, vector<1x64xf32>,
    %c166 = arith.constant 166 : index
    %c0_374 = arith.constant 0 : index
    %434 = vector.load %arg14[%c166, %c0_374] : memref<208x64xf32, #tpu.memory_space<vmem>>, vector<1x64xf32>
    %435 = vector.shape_cast %434 : vector<1x64xf32> to vector<64xf32>
    %c0_375 = arith.constant 0 : index
    %c1664_376 = arith.constant 1664 : index
    %436 = vector.load %arg15[%c0_375, %c1664_376] : memref<1x3136xf32, #tpu.memory_space<vmem>>, vector<1x64xf32>
    %437 = vector.shape_cast %436 : vector<1x64xf32> to vector<64xf32>
    %438 = vector.shape_cast %435 : vector<64xf32> to vector<1x64xf32>
    tpu.vector_store %arg15[%c0_375, %c1664_376], %438 {strides = array<i32>} : memref<1x3136xf32, #tpu.memory_space<vmem>>, vector<1x64xf32>,
    %c198 = arith.constant 198 : index
    %c0_377 = arith.constant 0 : index
    %439 = vector.load %arg14[%c198, %c0_377] : memref<208x64xf32, #tpu.memory_space<vmem>>, vector<1x64xf32>
    %440 = vector.shape_cast %439 : vector<1x64xf32> to vector<64xf32>
    %c0_378 = arith.constant 0 : index
    %c1728_379 = arith.constant 1728 : index
    %441 = vector.load %arg15[%c0_378, %c1728_379] : memref<1x3136xf32, #tpu.memory_space<vmem>>, vector<1x64xf32>
    %442 = vector.shape_cast %441 : vector<1x64xf32> to vector<64xf32>
    %443 = vector.shape_cast %440 : vector<64xf32> to vector<1x64xf32>
    tpu.vector_store %arg15[%c0_378, %c1728_379], %443 {strides = array<i32>} : memref<1x3136xf32, #tpu.memory_space<vmem>>, vector<1x64xf32>,
    %c8_380 = arith.constant 8 : index
    %c0_381 = arith.constant 0 : index
    %444 = vector.load %arg14[%c8_380, %c0_381] : memref<208x64xf32, #tpu.memory_space<vmem>>, vector<1x64xf32>
    %445 = vector.shape_cast %444 : vector<1x64xf32> to vector<64xf32>
    %c0_382 = arith.constant 0 : index
    %c1792 = arith.constant 1792 : index
    %446 = vector.load %arg15[%c0_382, %c1792] : memref<1x3136xf32, #tpu.memory_space<vmem>>, vector<1x64xf32>
    %447 = vector.shape_cast %446 : vector<1x64xf32> to vector<64xf32>
    %448 = vector.shape_cast %445 : vector<64xf32> to vector<1x64xf32>
    tpu.vector_store %arg15[%c0_382, %c1792], %448 {strides = array<i32>} : memref<1x3136xf32, #tpu.memory_space<vmem>>, vector<1x64xf32>,
    %c40 = arith.constant 40 : index
    %c0_383 = arith.constant 0 : index
    %449 = vector.load %arg14[%c40, %c0_383] : memref<208x64xf32, #tpu.memory_space<vmem>>, vector<1x64xf32>
    %450 = vector.shape_cast %449 : vector<1x64xf32> to vector<64xf32>
    %c0_384 = arith.constant 0 : index
    %c1856 = arith.constant 1856 : index
    %451 = vector.load %arg15[%c0_384, %c1856] : memref<1x3136xf32, #tpu.memory_space<vmem>>, vector<1x64xf32>
    %452 = vector.shape_cast %451 : vector<1x64xf32> to vector<64xf32>
    %453 = vector.shape_cast %450 : vector<64xf32> to vector<1x64xf32>
    tpu.vector_store %arg15[%c0_384, %c1856], %453 {strides = array<i32>} : memref<1x3136xf32, #tpu.memory_space<vmem>>, vector<1x64xf32>,
    %c72 = arith.constant 72 : index
    %c0_385 = arith.constant 0 : index
    %454 = vector.load %arg14[%c72, %c0_385] : memref<208x64xf32, #tpu.memory_space<vmem>>, vector<1x64xf32>
    %455 = vector.shape_cast %454 : vector<1x64xf32> to vector<64xf32>
    %c0_386 = arith.constant 0 : index
    %c1920 = arith.constant 1920 : index
    %456 = vector.load %arg15[%c0_386, %c1920] : memref<1x3136xf32, #tpu.memory_space<vmem>>, vector<1x64xf32>
    %457 = vector.shape_cast %456 : vector<1x64xf32> to vector<64xf32>
    %458 = vector.shape_cast %455 : vector<64xf32> to vector<1x64xf32>
    tpu.vector_store %arg15[%c0_386, %c1920], %458 {strides = array<i32>} : memref<1x3136xf32, #tpu.memory_space<vmem>>, vector<1x64xf32>,
    %c104 = arith.constant 104 : index
    %c0_387 = arith.constant 0 : index
    %459 = vector.load %arg14[%c104, %c0_387] : memref<208x64xf32, #tpu.memory_space<vmem>>, vector<1x64xf32>
    %460 = vector.shape_cast %459 : vector<1x64xf32> to vector<64xf32>
    %c0_388 = arith.constant 0 : index
    %c1984 = arith.constant 1984 : index
    %461 = vector.load %arg15[%c0_388, %c1984] : memref<1x3136xf32, #tpu.memory_space<vmem>>, vector<1x64xf32>
    %462 = vector.shape_cast %461 : vector<1x64xf32> to vector<64xf32>
    %463 = vector.shape_cast %460 : vector<64xf32> to vector<1x64xf32>
    tpu.vector_store %arg15[%c0_388, %c1984], %463 {strides = array<i32>} : memref<1x3136xf32, #tpu.memory_space<vmem>>, vector<1x64xf32>,
    %c136 = arith.constant 136 : index
    %c0_389 = arith.constant 0 : index
    %464 = vector.load %arg14[%c136, %c0_389] : memref<208x64xf32, #tpu.memory_space<vmem>>, vector<1x64xf32>
    %465 = vector.shape_cast %464 : vector<1x64xf32> to vector<64xf32>
    %c0_390 = arith.constant 0 : index
    %c2048 = arith.constant 2048 : index
    %466 = vector.load %arg15[%c0_390, %c2048] : memref<1x3136xf32, #tpu.memory_space<vmem>>, vector<1x64xf32>
    %467 = vector.shape_cast %466 : vector<1x64xf32> to vector<64xf32>
    %468 = vector.shape_cast %465 : vector<64xf32> to vector<1x64xf32>
    tpu.vector_store %arg15[%c0_390, %c2048], %468 {strides = array<i32>} : memref<1x3136xf32, #tpu.memory_space<vmem>>, vector<1x64xf32>,
    %c168 = arith.constant 168 : index
    %c0_391 = arith.constant 0 : index
    %469 = vector.load %arg14[%c168, %c0_391] : memref<208x64xf32, #tpu.memory_space<vmem>>, vector<1x64xf32>
    %470 = vector.shape_cast %469 : vector<1x64xf32> to vector<64xf32>
    %c0_392 = arith.constant 0 : index
    %c2112 = arith.constant 2112 : index
    %471 = vector.load %arg15[%c0_392, %c2112] : memref<1x3136xf32, #tpu.memory_space<vmem>>, vector<1x64xf32>
    %472 = vector.shape_cast %471 : vector<1x64xf32> to vector<64xf32>
    %473 = vector.shape_cast %470 : vector<64xf32> to vector<1x64xf32>
    tpu.vector_store %arg15[%c0_392, %c2112], %473 {strides = array<i32>} : memref<1x3136xf32, #tpu.memory_space<vmem>>, vector<1x64xf32>,
    %c200 = arith.constant 200 : index
    %c0_393 = arith.constant 0 : index
    %474 = vector.load %arg14[%c200, %c0_393] : memref<208x64xf32, #tpu.memory_space<vmem>>, vector<1x64xf32>
    %475 = vector.shape_cast %474 : vector<1x64xf32> to vector<64xf32>
    %c0_394 = arith.constant 0 : index
    %c2176 = arith.constant 2176 : index
    %476 = vector.load %arg15[%c0_394, %c2176] : memref<1x3136xf32, #tpu.memory_space<vmem>>, vector<1x64xf32>
    %477 = vector.shape_cast %476 : vector<1x64xf32> to vector<64xf32>
    %478 = vector.shape_cast %475 : vector<64xf32> to vector<1x64xf32>
    tpu.vector_store %arg15[%c0_394, %c2176], %478 {strides = array<i32>} : memref<1x3136xf32, #tpu.memory_space<vmem>>, vector<1x64xf32>,
    %c10_395 = arith.constant 10 : index
    %c0_396 = arith.constant 0 : index
    %479 = vector.load %arg14[%c10_395, %c0_396] : memref<208x64xf32, #tpu.memory_space<vmem>>, vector<1x64xf32>
    %480 = vector.shape_cast %479 : vector<1x64xf32> to vector<64xf32>
    %c0_397 = arith.constant 0 : index
    %c2240 = arith.constant 2240 : index
    %481 = vector.load %arg15[%c0_397, %c2240] : memref<1x3136xf32, #tpu.memory_space<vmem>>, vector<1x64xf32>
    %482 = vector.shape_cast %481 : vector<1x64xf32> to vector<64xf32>
    %483 = vector.shape_cast %480 : vector<64xf32> to vector<1x64xf32>
    tpu.vector_store %arg15[%c0_397, %c2240], %483 {strides = array<i32>} : memref<1x3136xf32, #tpu.memory_space<vmem>>, vector<1x64xf32>,
    %c42 = arith.constant 42 : index
    %c0_398 = arith.constant 0 : index
    %484 = vector.load %arg14[%c42, %c0_398] : memref<208x64xf32, #tpu.memory_space<vmem>>, vector<1x64xf32>
    %485 = vector.shape_cast %484 : vector<1x64xf32> to vector<64xf32>
    %c0_399 = arith.constant 0 : index
    %c2304 = arith.constant 2304 : index
    %486 = vector.load %arg15[%c0_399, %c2304] : memref<1x3136xf32, #tpu.memory_space<vmem>>, vector<1x64xf32>
    %487 = vector.shape_cast %486 : vector<1x64xf32> to vector<64xf32>
    %488 = vector.shape_cast %485 : vector<64xf32> to vector<1x64xf32>
    tpu.vector_store %arg15[%c0_399, %c2304], %488 {strides = array<i32>} : memref<1x3136xf32, #tpu.memory_space<vmem>>, vector<1x64xf32>,
    %c74 = arith.constant 74 : index
    %c0_400 = arith.constant 0 : index
    %489 = vector.load %arg14[%c74, %c0_400] : memref<208x64xf32, #tpu.memory_space<vmem>>, vector<1x64xf32>
    %490 = vector.shape_cast %489 : vector<1x64xf32> to vector<64xf32>
    %c0_401 = arith.constant 0 : index
    %c2368 = arith.constant 2368 : index
    %491 = vector.load %arg15[%c0_401, %c2368] : memref<1x3136xf32, #tpu.memory_space<vmem>>, vector<1x64xf32>
    %492 = vector.shape_cast %491 : vector<1x64xf32> to vector<64xf32>
    %493 = vector.shape_cast %490 : vector<64xf32> to vector<1x64xf32>
    tpu.vector_store %arg15[%c0_401, %c2368], %493 {strides = array<i32>} : memref<1x3136xf32, #tpu.memory_space<vmem>>, vector<1x64xf32>,
    %c106 = arith.constant 106 : index
    %c0_402 = arith.constant 0 : index
    %494 = vector.load %arg14[%c106, %c0_402] : memref<208x64xf32, #tpu.memory_space<vmem>>, vector<1x64xf32>
    %495 = vector.shape_cast %494 : vector<1x64xf32> to vector<64xf32>
    %c0_403 = arith.constant 0 : index
    %c2432 = arith.constant 2432 : index
    %496 = vector.load %arg15[%c0_403, %c2432] : memref<1x3136xf32, #tpu.memory_space<vmem>>, vector<1x64xf32>
    %497 = vector.shape_cast %496 : vector<1x64xf32> to vector<64xf32>
    %498 = vector.shape_cast %495 : vector<64xf32> to vector<1x64xf32>
    tpu.vector_store %arg15[%c0_403, %c2432], %498 {strides = array<i32>} : memref<1x3136xf32, #tpu.memory_space<vmem>>, vector<1x64xf32>,
    %c138 = arith.constant 138 : index
    %c0_404 = arith.constant 0 : index
    %499 = vector.load %arg14[%c138, %c0_404] : memref<208x64xf32, #tpu.memory_space<vmem>>, vector<1x64xf32>
    %500 = vector.shape_cast %499 : vector<1x64xf32> to vector<64xf32>
    %c0_405 = arith.constant 0 : index
    %c2496 = arith.constant 2496 : index
    %501 = vector.load %arg15[%c0_405, %c2496] : memref<1x3136xf32, #tpu.memory_space<vmem>>, vector<1x64xf32>
    %502 = vector.shape_cast %501 : vector<1x64xf32> to vector<64xf32>
    %503 = vector.shape_cast %500 : vector<64xf32> to vector<1x64xf32>
    tpu.vector_store %arg15[%c0_405, %c2496], %503 {strides = array<i32>} : memref<1x3136xf32, #tpu.memory_space<vmem>>, vector<1x64xf32>,
    %c170 = arith.constant 170 : index
    %c0_406 = arith.constant 0 : index
    %504 = vector.load %arg14[%c170, %c0_406] : memref<208x64xf32, #tpu.memory_space<vmem>>, vector<1x64xf32>
    %505 = vector.shape_cast %504 : vector<1x64xf32> to vector<64xf32>
    %c0_407 = arith.constant 0 : index
    %c2560 = arith.constant 2560 : index
    %506 = vector.load %arg15[%c0_407, %c2560] : memref<1x3136xf32, #tpu.memory_space<vmem>>, vector<1x64xf32>
    %507 = vector.shape_cast %506 : vector<1x64xf32> to vector<64xf32>
    %508 = vector.shape_cast %505 : vector<64xf32> to vector<1x64xf32>
    tpu.vector_store %arg15[%c0_407, %c2560], %508 {strides = array<i32>} : memref<1x3136xf32, #tpu.memory_space<vmem>>, vector<1x64xf32>,
    %c202 = arith.constant 202 : index
    %c0_408 = arith.constant 0 : index
    %509 = vector.load %arg14[%c202, %c0_408] : memref<208x64xf32, #tpu.memory_space<vmem>>, vector<1x64xf32>
    %510 = vector.shape_cast %509 : vector<1x64xf32> to vector<64xf32>
    %c0_409 = arith.constant 0 : index
    %c2624 = arith.constant 2624 : index
    %511 = vector.load %arg15[%c0_409, %c2624] : memref<1x3136xf32, #tpu.memory_space<vmem>>, vector<1x64xf32>
    %512 = vector.shape_cast %511 : vector<1x64xf32> to vector<64xf32>
    %513 = vector.shape_cast %510 : vector<64xf32> to vector<1x64xf32>
    tpu.vector_store %arg15[%c0_409, %c2624], %513 {strides = array<i32>} : memref<1x3136xf32, #tpu.memory_space<vmem>>, vector<1x64xf32>,
    %c12_410 = arith.constant 12 : index
    %c0_411 = arith.constant 0 : index
    %514 = vector.load %arg14[%c12_410, %c0_411] : memref<208x64xf32, #tpu.memory_space<vmem>>, vector<1x64xf32>
    %515 = vector.shape_cast %514 : vector<1x64xf32> to vector<64xf32>
    %c0_412 = arith.constant 0 : index
    %c2688 = arith.constant 2688 : index
    %516 = vector.load %arg15[%c0_412, %c2688] : memref<1x3136xf32, #tpu.memory_space<vmem>>, vector<1x64xf32>
    %517 = vector.shape_cast %516 : vector<1x64xf32> to vector<64xf32>
    %518 = vector.shape_cast %515 : vector<64xf32> to vector<1x64xf32>
    tpu.vector_store %arg15[%c0_412, %c2688], %518 {strides = array<i32>} : memref<1x3136xf32, #tpu.memory_space<vmem>>, vector<1x64xf32>,
    %c44 = arith.constant 44 : index
    %c0_413 = arith.constant 0 : index
    %519 = vector.load %arg14[%c44, %c0_413] : memref<208x64xf32, #tpu.memory_space<vmem>>, vector<1x64xf32>
    %520 = vector.shape_cast %519 : vector<1x64xf32> to vector<64xf32>
    %c0_414 = arith.constant 0 : index
    %c2752 = arith.constant 2752 : index
    %521 = vector.load %arg15[%c0_414, %c2752] : memref<1x3136xf32, #tpu.memory_space<vmem>>, vector<1x64xf32>
    %522 = vector.shape_cast %521 : vector<1x64xf32> to vector<64xf32>
    %523 = vector.shape_cast %520 : vector<64xf32> to vector<1x64xf32>
    tpu.vector_store %arg15[%c0_414, %c2752], %523 {strides = array<i32>} : memref<1x3136xf32, #tpu.memory_space<vmem>>, vector<1x64xf32>,
    %c76 = arith.constant 76 : index
    %c0_415 = arith.constant 0 : index
    %524 = vector.load %arg14[%c76, %c0_415] : memref<208x64xf32, #tpu.memory_space<vmem>>, vector<1x64xf32>
    %525 = vector.shape_cast %524 : vector<1x64xf32> to vector<64xf32>
    %c0_416 = arith.constant 0 : index
    %c2816 = arith.constant 2816 : index
    %526 = vector.load %arg15[%c0_416, %c2816] : memref<1x3136xf32, #tpu.memory_space<vmem>>, vector<1x64xf32>
    %527 = vector.shape_cast %526 : vector<1x64xf32> to vector<64xf32>
    %528 = vector.shape_cast %525 : vector<64xf32> to vector<1x64xf32>
    tpu.vector_store %arg15[%c0_416, %c2816], %528 {strides = array<i32>} : memref<1x3136xf32, #tpu.memory_space<vmem>>, vector<1x64xf32>,
    %c108 = arith.constant 108 : index
    %c0_417 = arith.constant 0 : index
    %529 = vector.load %arg14[%c108, %c0_417] : memref<208x64xf32, #tpu.memory_space<vmem>>, vector<1x64xf32>
    %530 = vector.shape_cast %529 : vector<1x64xf32> to vector<64xf32>
    %c0_418 = arith.constant 0 : index
    %c2880 = arith.constant 2880 : index
    %531 = vector.load %arg15[%c0_418, %c2880] : memref<1x3136xf32, #tpu.memory_space<vmem>>, vector<1x64xf32>
    %532 = vector.shape_cast %531 : vector<1x64xf32> to vector<64xf32>
    %533 = vector.shape_cast %530 : vector<64xf32> to vector<1x64xf32>
    tpu.vector_store %arg15[%c0_418, %c2880], %533 {strides = array<i32>} : memref<1x3136xf32, #tpu.memory_space<vmem>>, vector<1x64xf32>,
    %c140 = arith.constant 140 : index
    %c0_419 = arith.constant 0 : index
    %534 = vector.load %arg14[%c140, %c0_419] : memref<208x64xf32, #tpu.memory_space<vmem>>, vector<1x64xf32>
    %535 = vector.shape_cast %534 : vector<1x64xf32> to vector<64xf32>
    %c0_420 = arith.constant 0 : index
    %c2944 = arith.constant 2944 : index
    %536 = vector.load %arg15[%c0_420, %c2944] : memref<1x3136xf32, #tpu.memory_space<vmem>>, vector<1x64xf32>
    %537 = vector.shape_cast %536 : vector<1x64xf32> to vector<64xf32>
    %538 = vector.shape_cast %535 : vector<64xf32> to vector<1x64xf32>
    tpu.vector_store %arg15[%c0_420, %c2944], %538 {strides = array<i32>} : memref<1x3136xf32, #tpu.memory_space<vmem>>, vector<1x64xf32>,
    %c172 = arith.constant 172 : index
    %c0_421 = arith.constant 0 : index
    %539 = vector.load %arg14[%c172, %c0_421] : memref<208x64xf32, #tpu.memory_space<vmem>>, vector<1x64xf32>
    %540 = vector.shape_cast %539 : vector<1x64xf32> to vector<64xf32>
    %c0_422 = arith.constant 0 : index
    %c3008 = arith.constant 3008 : index
    %541 = vector.load %arg15[%c0_422, %c3008] : memref<1x3136xf32, #tpu.memory_space<vmem>>, vector<1x64xf32>
    %542 = vector.shape_cast %541 : vector<1x64xf32> to vector<64xf32>
    %543 = vector.shape_cast %540 : vector<64xf32> to vector<1x64xf32>
    tpu.vector_store %arg15[%c0_422, %c3008], %543 {strides = array<i32>} : memref<1x3136xf32, #tpu.memory_space<vmem>>, vector<1x64xf32>,
    %c204 = arith.constant 204 : index
    %c0_423 = arith.constant 0 : index
    %544 = vector.load %arg14[%c204, %c0_423] : memref<208x64xf32, #tpu.memory_space<vmem>>, vector<1x64xf32>
    %545 = vector.shape_cast %544 : vector<1x64xf32> to vector<64xf32>
    %c0_424 = arith.constant 0 : index
    %c3072 = arith.constant 3072 : index
    %546 = vector.load %arg15[%c0_424, %c3072] : memref<1x3136xf32, #tpu.memory_space<vmem>>, vector<1x64xf32>
    %547 = vector.shape_cast %546 : vector<1x64xf32> to vector<64xf32>
    %548 = vector.shape_cast %545 : vector<64xf32> to vector<1x64xf32>
    tpu.vector_store %arg15[%c0_424, %c3072], %548 {strides = array<i32>} : memref<1x3136xf32, #tpu.memory_space<vmem>>, vector<1x64xf32>,
    %c0_425 = arith.constant 0 : index
    %c0_426 = arith.constant 0 : index
    %549 = vector.load %arg15[%c0_425, %c0_426] : memref<1x3136xf32, #tpu.memory_space<vmem>>, vector<1x3136xf32>
    %c0_427 = arith.constant 0 : index
    %c0_428 = arith.constant 0 : index
    %550 = vector.load %arg6[%c0_427, %c0_428] : memref<3136x10xf32, #tpu.memory_space<vmem>>, vector<3136x10xf32>
    %cst_429 = arith.constant dense<0.000000e+00> : vector<1x10xf32>
    %551 = tpu.matmul %549, %550, %cst_429 {dimension_numbers = #tpu.dot_dimension_numbers<[1], [0], [0], [1], [0, 0, 1, 1], [], []>} : vector<1x3136xf32>, vector<3136x10xf32>, vector<1x10xf32> -> vector<1x10xf32>
    %c0_430 = arith.constant 0 : index
    %c0_431 = arith.constant 0 : index
    %552 = vector.load %arg7[%c0_430, %c0_431] : memref<1x10xf32, #tpu.memory_space<vmem>>, vector<1x10xf32>
    %553 = arith.addf %551, %552 : vector<1x10xf32>
    %c0_432 = arith.constant 0 : index
    %c0_433 = arith.constant 0 : index
    %c0_434 = arith.constant 0 : index
    %554 = vector.load %arg8[%c0_432, %c0_433, %c0_434] : memref<1x1x10xf32, #tpu.memory_space<vmem>>, vector<1x1x10xf32>
    %555 = vector.shape_cast %554 : vector<1x1x10xf32> to vector<1x10xf32>
    %556 = vector.shape_cast %553 : vector<1x10xf32> to vector<1x1x10xf32>
    tpu.vector_store %arg8[%c0_432, %c0_433, %c0_434], %556 {strides = array<i32>} : memref<1x1x10xf32, #tpu.memory_space<vmem>>, vector<1x1x10xf32>,
    return
  }
  func.func @transform_0(%arg0: i32) -> (i32, i32, i32) {
    %c0_i32 = arith.constant 0 : i32
    %c0_i32_0 = arith.constant 0 : i32
    %c0_i32_1 = arith.constant 0 : i32
    return %arg0, %c0_i32, %c0_i32_0 : i32, i32, i32
  }
  func.func @transform_1(%arg0: i32) -> (i32, i32, i32) {
    %c0_i32 = arith.constant 0 : i32
    %c0_i32_0 = arith.constant 0 : i32
    %c0_i32_1 = arith.constant 0 : i32
    %c0_i32_2 = arith.constant 0 : i32
    return %c0_i32, %c0_i32_0, %c0_i32_1 : i32, i32, i32
  }
  func.func @transform_2(%arg0: i32) -> (i32, i32) {
    %c0_i32 = arith.constant 0 : i32
    %c0_i32_0 = arith.constant 0 : i32
    %c0_i32_1 = arith.constant 0 : i32
    return %c0_i32, %c0_i32_0 : i32, i32
  }
  func.func @transform_3(%arg0: i32) -> (i32, i32, i32, i32) {
    %c0_i32 = arith.constant 0 : i32
    %c0_i32_0 = arith.constant 0 : i32
    %c0_i32_1 = arith.constant 0 : i32
    %c0_i32_2 = arith.constant 0 : i32
    %c0_i32_3 = arith.constant 0 : i32
    return %c0_i32, %c0_i32_0, %c0_i32_1, %c0_i32_2 : i32, i32, i32, i32
  }
  func.func @transform_4(%arg0: i32) -> (i32, i32) {
    %c0_i32 = arith.constant 0 : i32
    %c0_i32_0 = arith.constant 0 : i32
    %c0_i32_1 = arith.constant 0 : i32
    return %c0_i32, %c0_i32_0 : i32, i32
  }
  func.func @transform_5(%arg0: i32) -> (i32, i32) {
    %c0_i32 = arith.constant 0 : i32
    %c0_i32_0 = arith.constant 0 : i32
    %c0_i32_1 = arith.constant 0 : i32
    return %c0_i32, %c0_i32_0 : i32, i32
  }
  func.func @transform_6(%arg0: i32) -> (i32, i32) {
    %c0_i32 = arith.constant 0 : i32
    %c0_i32_0 = arith.constant 0 : i32
    %c0_i32_1 = arith.constant 0 : i32
    return %c0_i32, %c0_i32_0 : i32, i32
  }
  func.func @transform_7(%arg0: i32) -> (i32, i32, i32) {
    %c0_i32 = arith.constant 0 : i32
    %c0_i32_0 = arith.constant 0 : i32
    %c0_i32_1 = arith.constant 0 : i32
    return %arg0, %c0_i32, %c0_i32_0 : i32, i32, i32
  }
}

</mosaic_0001>

<bundles_post_ra>
// kernel: tpu_custom_call.1
= control target key start
LH: loop header
LB: loop body
LE: loop exit
PB: predicated region body
PF: predicated region fallthrough
CT: control target
= control target key end

     0   :  { %12 = vsyncpa [#allocation10], 0  ;;  %s17357_s0 = inlined_call_operand.vmem [shape: f32[2,28,28], index: 0, kind: input, shape index: {}]   ;;  %s17358_s1 = inlined_call_operand.vmem [shape: f32[3,28,1792], index: 1, kind: input, shape index: {}]   ;;  %s17359_s2 = inlined_call_operand.vmem [shape: f32[1,1792], index: 2, kind: input, shape index: {}]   ;;  %s17360_s3 = inlined_call_operand.vmem [shape: f32[3,3,64,64], index: 3, kind: input, shape index: {}]   ;;  %s17361_s4 = inlined_call_operand.vmem [shape: f32[1,64], index: 4, kind: input, shape index: {}]   ;;  %s17362_s5 = inlined_call_operand.vmem [shape: f32[3136,10], index: 5, kind: input, shape index: {}]   ;;  %s17363_s6 = inlined_call_operand.vmem [shape: f32[1,10], index: 6, kind: input, shape index: {}]   ;;  %s17364_s7 = inlined_call_operand.hbm [shape: f32[2,1,10], index: 7, kind: output, shape index: {}]  }
   0x1   :  { %14 = vsyncpa [#allocation10 + $0x1], 0  ;;  %s13117_s24 = smov 0   ;;  %s13119_s25 = smov 0  }
   0x2   :  { %s13121_s26 = smov 0   ;;  %s13123_s27 = smov 0  }
   0x3 LB: > { %s13138_s28 = sadd.s32 4294967295, %s13068_s27   ;;  %s9729_s29 = sadd.s32 4294967294, %s13068_s27   ;;  %s13068_s27 = sphi %s13123_s27, %s17452_s27   ;;  %s13064_s26 = sphi %s13121_s26, %s17451_s26   ;;  %s13060_s25 = sphi %s13119_s25, %s17450_s25   ;;  %s13056_s24 = sphi %s13117_s24, %s17449_s24  }
   0x4   : > { %s13142_s30 = sadd.s32 1, %s13068_s27   ;;  %s179_s8 = sadd.s32 1, %s13064_s26 }
   0x5   : > { %s176_s9 = ssub.s32 %s13068_s27, %s13142_s30  ;;  %p189_p0 = scmp.ne.s32.totalorder %s13064_s26, %s13060_s25 }
   0x6   : > { %p177_p1 = scmp.eq.s32.totalorder %s176_s9, 0  ;;  %p190_p2 = scmp.eq.s32.totalorder %s13138_s28, 1 }
   0x7   : > { %p195_p3 = scmp.ne.s32.totalorder %s13060_s25, %s13056_s24  ;;  %p196_p4 = scmp.eq.s32.totalorder %s9729_s29, 1 }
   0x8   : > { %s13153_s10 = scalar_select %p177_p1, %s13064_s26, %s179_s8  }
   0x9   : > { %p13155_p5 = por %p190_p2, %p189_p0  ;;  %p13159_p6 = por %p196_p4, %p195_p3 }
   0xa   : > { %p9732_p7 = scmp.ge.s32.totalorder %s13068_s27, 1  ;;  %p240_p8 = scmp.lt.s32.totalorder %s13068_s27, 3 }
   0xc   : > { %p241_p9 = pnand %p9732_p7, %p240_p8 }
   0xe   : > { %244 = sbr.rel (%p241_p9) target bundleno = 1977 (0x7b9), region = 48 }
  0x15   : > { %v9738_v0 = vld [vmem:[%s17358_s1 + $0x1d8] sm:$0xff]  ;;  %v9752_v1 = vld [vmem:[%s17358_s1 + $0x248] sm:$0xff]  ;;  %vm463_vm0 = vcmask 1043456   ;;  %v9737_v5 = vld [vmem:[%s17358_s1 + $0x1d0] sm:$0xff]  ;;  %v17366_v7 = vmov 0.0   ;;  %p271_p10 = scmp.lt.s32.totalorder %s13138_s28, 1 }
  0x16   : > { %v9736_v2 = vld [vmem:[%s17358_s1 + $0x1c8] sm:$0xff]  ;;  %v13174_v3 = vpack.c.bf16 %v9752_v1, %v9738_v0  ;;  %v9750_v4 = vld [vmem:[%s17358_s1 + $0x238] sm:$0xff]  ;;  %v9751_v6 = vld [vmem:[%s17358_s1 + $0x240] sm:$0xff]  ;;  %570 = vmatprep.mubr.f32.mxu0 %v17366_v7  ;;  %647 = vmatprep.mubr.f32.mxu1 %v17366_v7  ;;  %vm276_vm1 = vcmask 228352   ;;  %vm13071_vm2 = vmmov 1   ;;  %vm282_vm4 = vcmask 221184  }
  0x17   : > { %v13188_v8 = vpack.c.bf16 %v9750_v4, %v9736_v2  ;;  %v13190_v9 = vpack.c.bf16 %v9751_v6, %v9737_v5  ;;  %v9735_v10 = vld [vmem:[%s17358_s1 + $0x1c0] sm:$0xff]  ;;  %v9749_v11 = vld [vmem:[%s17358_s1 + $0x230] sm:$0xff]  ;;  %v9766_v12 = vld [vmem:[%s17358_s1 + $0x2b8] sm:$0xff]  ;;  %279 = vst.msk [vmem:[#allocation3] sm:$0xff] %vm276_vm1, %v17366_v7  ;;  %s272_s21 = scalar_select %p271_p10, %s13138_s28, 1  ;;  %vm4199_vm5 = vcmask 523264  }
  0x18   : > { %277 = vst.msk [vmem:[#allocation2] sm:$0xff] %vm276_vm1, %v17366_v7  ;;  %278 = vst.msk [vmem:[#allocation2 + $0x8] sm:$0xff] %vm276_vm1, %v17366_v7  ;;  %11667 = vmatprep.subr.bf16.mxu1 %v13174_v3  ;;  %v13210_v13 = vpack.c.bf16 %v9749_v11, %v9735_v10  ;;  %v9780_v14 = vld [vmem:[%s17358_s1 + $0x328] sm:$0xf]  ;;  %v9778_v18 = vld [vmem:[%s17358_s1 + $0x318] sm:$0xf] }
  0x19   : > { %280 = vst.msk [vmem:[#allocation3 + $0x8] sm:$0xff] %vm276_vm1, %v17366_v7  ;;  %vm13216_vm3 = vmpackc.low %vm463_vm0, %vm13071_vm2  ;;  %v9764_v16 = vld [vmem:[%s17358_s1 + $0x2a8] sm:$0xff]  ;;  %11657 = vmatprep.subr.bf16.mxu0 %v13188_v8  ;;  %11669 = vmatpush1.bf16.msra.mxu1 %v13190_v9  ;;  %v13228_v17 = vpack.c.bf16 %v9780_v14, %v9766_v12  ;;  %v9765_v19 = vld [vmem:[%s17358_s1 + $0x2b0] sm:$0xff]  ;;  %s10361_s20 = sshll.u32 %s272_s21, 5  ;;  %s13072_s21 = smov 64   ;;  %vm4247_vm6 = vcmask 521216  }
  0x1a   : > { %v9779_v20 = vld [vmem:[%s17358_s1 + $0x320] sm:$0xf]  ;;  %11659 = vmatpush1.bf16.msra.mxu0 %v13210_v13  ;;  %v13240_v21 = vpack.c.bf16 %v9778_v18, %v9764_v16  ;;  %v9777_v24 = vld [vmem:[%s17358_s1 + $0x310] sm:$0xf]  ;;  %v9742_v25 = vld [vmem:[%s17358_s1 + $0x1f8] sm:$0xff]  ;;  %s13264_s9 = scalar_lea.vmem %s17357_s0, %s10361_s20  ;;  %vm13075_vm11 = vmmov 0  }
  0x1b   : > { %v13242_v22 = vpack.c.bf16 %v9779_v20, %v9765_v19  ;;  %v9763_v23 = vld [vmem:[%s17358_s1 + $0x2a0] sm:$0xff]  ;;  %11672 = vmatprep.subr.msk.bf16.mxu1 %vm13216_vm3, %v13228_v17  ;;  %v9756_v27 = vld [vmem:[%s17358_s1 + $0x268] sm:$0xff]  ;;  %v9754_v29 = vld [vmem:[%s17358_s1 + $0x258] sm:$0xff]  ;;  %s269_s8 = sand.u32 1, %s13060_s25   ;;  %s10358_s13 = sshll.u32 %s13138_s28, 4  ;;  %vm9659_vm12 = vcmask 73728  }
  0x1c   : > { %v13256_v26 = vpack.c.bf16 %v9777_v24, %v9763_v23  ;;  %v9740_v28 = vld [vmem:[%s17358_s1 + $0x1e8] sm:$0xff]  ;;  %11662 = vmatprep.subr.msk.bf16.mxu0 %vm13216_vm3, %v13240_v21  ;;  %v13275_v30 = vpack.c.bf16 %v9756_v27, %v9742_v25  ;;  %v281_v31 = vld [vmem:[%s13264_s9] sm:$0x1]  ;;  %v286_v32 = vld [vmem:[%s13264_s9 + $0x2] sm:$0x1]  ;;  %s270_s14 = scalar_lea.vmem [#allocation9], %s269_s8  ;;  %s17315_s17 = scalar_lea.hbm %s17364_s7, %s10358_s13 }
  0x1d   : > { %v290_v33 = vld [vmem:[%s13264_s9 + $0x4] sm:$0x1]  ;;  %v13280_v34 = vpack.c.bf16 %v9754_v29, %v9740_v28  ;;  %11675 = vmatpush1.bf16.msk.msra.mxu1 %vm13216_vm3, %v13242_v22  ;;  %283 = vst.msk [vmem:[#allocation3] sm:$0x1] %vm282_vm4, %v281_v31  ;;  %287 = vst.msk [vmem:[#allocation3 + $0x1] sm:$0x1] %vm282_vm4, %v286_v32 }
  0x1e   : > { %291 = vst.msk [vmem:[#allocation3 + $0x2] sm:$0x1] %vm282_vm4, %v290_v33  ;;  %v294_v35 = vld [vmem:[%s13264_s9 + $0x6] sm:$0x1]  ;;  %v298_v36 = vld [vmem:[%s13264_s9 + $0x8] sm:$0x1]  ;;  %11665 = vmatpush1.bf16.msk.msra.mxu0 %vm13216_vm3, %v13256_v26  ;;  %11687 = vmatprep.subr.bf16.mxu1 %v13275_v30 }
  0x1f   : > { %v302_v37 = vld [vmem:[%s13264_s9 + $0xa] sm:$0x1]  ;;  %295 = vst.msk [vmem:[#allocation3 + $0x3] sm:$0x1] %vm282_vm4, %v294_v35  ;;  %299 = vst.msk [vmem:[#allocation3 + $0x4] sm:$0x1] %vm282_vm4, %v298_v36  ;;  %11677 = vmatprep.subr.bf16.mxu0 %v13280_v34 }
  0x20   : > { %303 = vst.msk [vmem:[#allocation3 + $0x5] sm:$0x1] %vm282_vm4, %v302_v37  ;;  %v306_v38 = vld [vmem:[%s13264_s9 + $0xc] sm:$0x1]  ;;  %v310_v39 = vld [vmem:[%s13264_s9 + $0xe] sm:$0x1] }
  0x21   : > { %307 = vst.msk [vmem:[#allocation3 + $0x6] sm:$0x1] %vm282_vm4, %v306_v38  ;;  %311 = vst.msk [vmem:[#allocation3 + $0x7] sm:$0x1] %vm282_vm4, %v310_v39  ;;  %v9741_v40 = vld [vmem:[%s17358_s1 + $0x1f0] sm:$0xff]  ;;  %v9755_v41 = vld [vmem:[%s17358_s1 + $0x260] sm:$0xff] }
  0x22   : > { %v9739_v42 = vld [vmem:[%s17358_s1 + $0x1e0] sm:$0xff]  ;;  %v9753_v43 = vld [vmem:[%s17358_s1 + $0x250] sm:$0xff]  ;;  %v9770_v48 = vld [vmem:[%s17358_s1 + $0x2d8] sm:$0xff]  ;;  %v13339_v54 = vpack.c.bf16 %v9755_v41, %v9741_v40  ;;  %s9674_s15 = sshll.u32 %s270_s14, 4  ;;  %s9662_s18 = scalar_lea.sflag [#allocation10], %s269_s8  ;;  %s17317_s15 = int_to_ptr.vmem [resolvable:$true] %s9674_s15 }
  0x23   : > { %v314_v44 = vld [vmem:[%s13264_s9 + $0x10] sm:$0x1]  ;;  %v318_v45 = vld [vmem:[%s13264_s9 + $0x12] sm:$0x1]  ;;  %v322_v46 = vld [vmem:[%s13264_s9 + $0x14] sm:$0x1]  ;;  %v13341_v55 = vpack.c.bf16 %v9753_v43, %v9739_v42 }
  0x24   : > { %315 = vst.msk [vmem:[#allocation3 + $0x8] sm:$0x1] %vm282_vm4, %v314_v44  ;;  %v326_v47 = vld [vmem:[%s13264_s9 + $0x16] sm:$0x1]  ;;  %319 = vst.msk [vmem:[#allocation3 + $0x9] sm:$0x1] %vm282_vm4, %v318_v45 }
  0x25   : > { %323 = vst.msk [vmem:[#allocation3 + $0xa] sm:$0x1] %vm282_vm4, %v322_v46  ;;  %327 = vst.msk [vmem:[#allocation3 + $0xb] sm:$0x1] %vm282_vm4, %v326_v47  ;;  %v330_v49 = vld [vmem:[%s13264_s9 + $0x18] sm:$0x1] }
  0x26   : > { %v334_v50 = vld [vmem:[%s13264_s9 + $0x1a] sm:$0x1]  ;;  %v9784_v51 = vld [vmem:[%s17358_s1 + $0x348] sm:$0xf]  ;;  %331 = vst.msk [vmem:[#allocation3 + $0xc] sm:$0x1] %vm282_vm4, %v330_v49 }
  0x27   : > { %335 = vst.msk [vmem:[#allocation3 + $0xd] sm:$0x1] %vm282_vm4, %v334_v50  ;;  %v9768_v52 = vld [vmem:[%s17358_s1 + $0x2c8] sm:$0xff]  ;;  %v9782_v53 = vld [vmem:[%s17358_s1 + $0x338] sm:$0xf]  ;;  %v9769_v56 = vld [vmem:[%s17358_s1 + $0x2d0] sm:$0xff]  ;;  %v13357_v61 = vpack.c.bf16 %v9784_v51, %v9770_v48 }
  0x28   : > { %v9783_v57 = vld [vmem:[%s17358_s1 + $0x340] sm:$0xf]  ;;  %v9781_v59 = vld [vmem:[%s17358_s1 + $0x330] sm:$0xf]  ;;  %v13359_v62 = vpack.c.bf16 %v9782_v53, %v9768_v52  ;;  %v9746_v63 = vld [vmem:[%s17358_s1 + $0x218] sm:$0xff]  ;;  %s13006_s19 = scalar_lea.vmem %s17317_s15, 16 }
  0x29   : > { %v9767_v58 = vld [vmem:[%s17358_s1 + $0x2c0] sm:$0xff]  ;;  %v13355_v60 = vld [vmem:[#allocation3] sm:$0xff]  ;;  %v9760_v0 = vld [vmem:[%s17358_s1 + $0x288] sm:$0xff]  ;;  %v13379_v4 = vpack.c.bf16 %v9783_v57, %v9769_v56  ;;  %p13007_p11 = scmp.ne.s32.totalorder %s17317_s15, %s13006_s19  ;;  %s13076_s28 = smov [#allocation9]  }
  0x2a   : > { %9793 = vmatmul.mubr.msk.f32.vlgmr.msra.gmra.mrb[0].mxu0 %vm276_vm1, %v13355_v60  ;;  %9797 = vmatmul.mubr.msk.f32.vlgmr.msra.gmra.mrb[0].mxu1 %vm276_vm1, %v13355_v60  ;;  %v9744_v1 = vld [vmem:[%s17358_s1 + $0x208] sm:$0xff]  ;;  %v9758_v2 = vld [vmem:[%s17358_s1 + $0x278] sm:$0xff]  ;;  %v13381_v5 = vpack.c.bf16 %v9781_v59, %v9767_v58  ;;  %v9745_v6 = vld [vmem:[%s17358_s1 + $0x210] sm:$0xff]  ;;  %v13405_v16 = vpack.c.bf16 %v9760_v0, %v9746_v63  ;;  %s13010_s20 = sshll.u32 %s13076_s28, 4  ;;  %s13011_s20 = int_to_ptr.vmem [resolvable:$false] %s13010_s20 }
  0x2b   : > { %11689 = vmatpush1.bf16.msra.mxu1 %v13339_v54  ;;  %11679 = vmatpush1.bf16.msra.mxu0 %v13341_v55  ;;  %v9759_v10 = vld [vmem:[%s17358_s1 + $0x280] sm:$0xff]  ;;  %v9757_v12 = vld [vmem:[%s17358_s1 + $0x270] sm:$0xff]  ;;  %v13407_v18 = vpack.c.bf16 %v9758_v2, %v9744_v1  ;;  %v9774_v19 = vld [vmem:[%s17358_s1 + $0x2f8] sm:$0xff]  ;;  %p13008_p12 = pnand %p13007_p11, %p13155_p5  ;;  %p13013_p0 = scmp.lt.s32.totalorder %s17317_s15, %s13011_s20 }
  0x2c   : > { %576 = vmatprep.mubr.f32.mxu0 %v17366_v7  ;;  %653 = vmatprep.mubr.f32.mxu1 %v17366_v7  ;;  %v9743_v11 = vld [vmem:[%s17358_s1 + $0x200] sm:$0xff]  ;;  %v9788_v20 = vld [vmem:[%s17358_s1 + $0x368] sm:$0xf]  ;;  %v9786_v24 = vld [vmem:[%s17358_s1 + $0x358] sm:$0xf]  ;;  %v13431_v25 = vpack.c.bf16 %v9759_v10, %v9745_v6 }
  0x2d   : > { %11692 = vmatprep.subr.msk.bf16.mxu1 %vm13216_vm3, %v13357_v61  ;;  %11682 = vmatprep.subr.msk.bf16.mxu0 %vm13216_vm3, %v13359_v62  ;;  %v9772_v23 = vld [vmem:[%s17358_s1 + $0x2e8] sm:$0xff]  ;;  %v13433_v27 = vpack.c.bf16 %v9757_v12, %v9743_v11  ;;  %v9773_v28 = vld [vmem:[%s17358_s1 + $0x2f0] sm:$0xff]  ;;  %v9787_v29 = vld [vmem:[%s17358_s1 + $0x360] sm:$0xf]  ;;  %v13451_v33 = vpack.c.bf16 %v9788_v20, %v9774_v19  ;;  %p13009_p13 = pneg %p13008_p12 }
  0x2e   : > { %v13400_v14 = vld [vmem:[#allocation3 + $0x8] sm:$0x3f]  ;;  %v9771_v31 = vld [vmem:[%s17358_s1 + $0x2e0] sm:$0xff]  ;;  %v9785_v32 = vld [vmem:[%s17358_s1 + $0x350] sm:$0xf]  ;;  %v13453_v35 = vpack.c.bf16 %v9786_v24, %v9772_v23  ;;  %v13476_v41 = vpack.c.bf16 %v9787_v29, %v9773_v28 }
  0x2f   : > { %17396 = vst [vmem:[#allocation12_spill] sm:$0xff] %v13400_v14  ;;  %9794 = vmatmul.mubr.msk.f32.gmra.mrb[2].mxu0 %vm276_vm1, %v13400_v14  ;;  %9798 = vmatmul.mubr.msk.f32.gmra.mrb[2].mxu1 %vm276_vm1, %v13400_v14  ;;  %v347_v36 = vld [vmem:[%s17358_s1 + $0x18] sm:$0xff]  ;;  %v361_v37 = vld [vmem:[%s17358_s1 + $0x88] sm:$0xff]  ;;  %v346_v40 = vld [vmem:[%s17358_s1 + $0x10] sm:$0xff]  ;;  %v13478_v42 = vpack.c.bf16 %v9785_v32, %v9771_v31 }
  0x30   : > { %11695 = vmatpush1.bf16.msk.msra.mxu1 %vm13216_vm3, %v13379_v4  ;;  %11685 = vmatpush1.bf16.msk.msra.mxu0 %vm13216_vm3, %v13381_v5  ;;  %v9748_v38 = vld [vmem:[%s17358_s1 + $0x228] sm:$0xff]  ;;  %v9762_v39 = vld [vmem:[%s17358_s1 + $0x298] sm:$0xff]  ;;  %v360_v43 = vld [vmem:[%s17358_s1 + $0x80] sm:$0xff]  ;;  %v13511_v52 = vpack.c.bf16 %v361_v37, %v347_v36 }
  0x31   : > { %724 = vmatprep.mubr.f32.mxu0 %v17366_v7  ;;  %801 = vmatprep.mubr.f32.mxu1 %v17366_v7  ;;  %v9747_v44 = vld [vmem:[%s17358_s1 + $0x220] sm:$0xff]  ;;  %v9761_v45 = vld [vmem:[%s17358_s1 + $0x290] sm:$0xff]  ;;  %v375_v46 = vld [vmem:[%s17358_s1 + $0xf8] sm:$0xff]  ;;  %v13513_v53 = vpack.c.bf16 %v9762_v39, %v9748_v38  ;;  %v13538_v1 = vpack.c.bf16 %v360_v43, %v346_v40 }
  0x32   : > { %11707 = vmatprep.subr.bf16.mxu1 %v13405_v16  ;;  %11697 = vmatprep.subr.bf16.mxu0 %v13407_v18  ;;  %v389_v47 = vld [vmem:[%s17358_s1 + $0x168] sm:$0xf]  ;;  %v9790_v49 = vld [vmem:[%s17358_s1 + $0x378] sm:$0xf]  ;;  %v284_v50 = vld [vmem:[%s13264_s9 + $0x1] sm:$0x1]  ;;  %v13540_v2 = vpack.c.bf16 %v9761_v45, %v9747_v44 }
  0x33   : > { %9801 = vmatmul.mubr.msk.f32.vlgmr.msra.gmra.mrb[4].mxu0 %vm276_vm1, %v13355_v60  ;;  %9805 = vmatmul.mubr.msk.f32.vlgmr.msra.gmra.mrb[4].mxu1 %vm276_vm1, %v13355_v60  ;;  %v9776_v48 = vld [vmem:[%s17358_s1 + $0x308] sm:$0xff]  ;;  %v288_v51 = vld [vmem:[%s13264_s9 + $0x3] sm:$0x1]  ;;  %285 = vst.msk [vmem:[#allocation2 + $0x1] sm:$0x1] %vm282_vm4, %v284_v50  ;;  %v374_v59 = vld [vmem:[%s17358_s1 + $0xf0] sm:$0xff]  ;;  %v13566_v23 = vpack.c.bf16 %v389_v47, %v375_v46 }
  0x34   : > { %11709 = vmatpush1.bf16.msra.mxu1 %v13431_v25  ;;  %11699 = vmatpush1.bf16.msra.mxu0 %v13433_v27  ;;  %289 = vst.msk [vmem:[#allocation2 + $0x2] sm:$0x1] %vm282_vm4, %v288_v51  ;;  %v292_v56 = vld [vmem:[%s13264_s9 + $0x5] sm:$0x1]  ;;  %v296_v57 = vld [vmem:[%s13264_s9 + $0x7] sm:$0x1]  ;;  %v13568_v24 = vpack.c.bf16 %v9790_v49, %v9776_v48 }
  0x35   : > { %730 = vmatprep.mubr.f32.mxu0 %v17366_v7  ;;  %807 = vmatprep.mubr.f32.mxu1 %v17366_v7  ;;  %v300_v58 = vld [vmem:[%s13264_s9 + $0x9] sm:$0x1]  ;;  %293 = vst.msk [vmem:[#allocation2 + $0x3] sm:$0x1] %vm282_vm4, %v292_v56  ;;  %297 = vst.msk [vmem:[#allocation2 + $0x4] sm:$0x1] %vm282_vm4, %v296_v57 }
  0x36   : > { %11712 = vmatprep.subr.msk.bf16.mxu1 %vm13216_vm3, %v13451_v33  ;;  %11702 = vmatprep.subr.msk.bf16.mxu0 %vm13216_vm3, %v13453_v35  ;;  %301 = vst.msk [vmem:[#allocation2 + $0x5] sm:$0x1] %vm282_vm4, %v300_v58  ;;  %v304_v63 = vld [vmem:[%s13264_s9 + $0xb] sm:$0x1]  ;;  %v308_v0 = vld [vmem:[%s13264_s9 + $0xd] sm:$0x1] }
  0x37   : > { %9802 = vmatmul.mubr.msk.f32.gmra.mrb[6].mxu0 %vm276_vm1, %v13400_v14  ;;  %9806 = vmatmul.mubr.msk.f32.gmra.mrb[6].mxu1 %vm276_vm1, %v13400_v14  ;;  %v388_v6 = vld [vmem:[%s17358_s1 + $0x160] sm:$0xf]  ;;  %v9789_v11 = vld [vmem:[%s17358_s1 + $0x370] sm:$0xf]  ;;  %305 = vst.msk [vmem:[#allocation2 + $0x6] sm:$0x1] %vm282_vm4, %v304_v63 }
  0x38   : > { %11715 = vmatpush1.bf16.msk.msra.mxu1 %vm13216_vm3, %v13476_v41  ;;  %11705 = vmatpush1.bf16.msk.msra.mxu0 %vm13216_vm3, %v13478_v42  ;;  %v9775_v10 = vld [vmem:[%s17358_s1 + $0x300] sm:$0xff]  ;;  %309 = vst.msk [vmem:[#allocation2 + $0x7] sm:$0x1] %vm282_vm4, %v308_v0  ;;  %v351_v12 = vld [vmem:[%s17358_s1 + $0x38] sm:$0xff]  ;;  %v365_v19 = vld [vmem:[%s17358_s1 + $0xa8] sm:$0xff]  ;;  %v13586_v38 = vpack.c.bf16 %v388_v6, %v374_v59 }
  0x39   : > { %878 = vmatprep.mubr.f32.mxu0 %v17366_v7  ;;  %955 = vmatprep.mubr.f32.mxu1 %v17366_v7  ;;  %v345_v20 = vld [vmem:[%s17358_s1 + $0x8] sm:$0xff]  ;;  %v359_v28 = vld [vmem:[%s17358_s1 + $0x78] sm:$0xff]  ;;  %v316_v31 = vld [vmem:[%s13264_s9 + $0x11] sm:$0x1]  ;;  %v13588_v39 = vpack.c.bf16 %v9789_v11, %v9775_v10  ;;  %v13617_v48 = vpack.c.bf16 %v365_v19, %v351_v12 }
  0x3a   : > { %11737 = vmatprep.subr.bf16.mxu1 %v13511_v52  ;;  %11717 = vmatprep.subr.bf16.mxu0 %v13513_v53  ;;  %v312_v29 = vld [vmem:[%s13264_s9 + $0xf] sm:$0x1]  ;;  %317 = vst.msk [vmem:[#allocation2 + $0x9] sm:$0x1] %vm282_vm4, %v316_v31  ;;  %v320_v32 = vld [vmem:[%s13264_s9 + $0x13] sm:$0x1]  ;;  %v13619_v49 = vpack.c.bf16 %v359_v28, %v345_v20 }
  0x3b   : > { %9809 = vmatmul.mubr.msk.f32.vlgmr.msra.gmra.mrb[8].mxu0 %vm276_vm1, %v13355_v60  ;;  %9813 = vmatmul.mubr.msk.f32.vlgmr.msra.gmra.mrb[8].mxu1 %vm276_vm1, %v13355_v60  ;;  %313 = vst.msk [vmem:[#allocation2 + $0x8] sm:$0x1] %vm282_vm4, %v312_v29  ;;  %v324_v36 = vld [vmem:[%s13264_s9 + $0x15] sm:$0x1]  ;;  %v328_v37 = vld [vmem:[%s13264_s9 + $0x17] sm:$0x1] }
  0x3c   : > { %11739 = vmatpush1.bf16.msra.mxu1 %v13538_v1  ;;  %11719 = vmatpush1.bf16.msra.mxu0 %v13540_v2  ;;  %17397 = vst [vmem:[#allocation13_spill] sm:$0xff] %v13586_v38  ;;  %v350_v40 = vld [vmem:[%s17358_s1 + $0x30] sm:$0xff]  ;;  %321 = vst.msk [vmem:[#allocation2 + $0xa] sm:$0x1] %vm282_vm4, %v320_v32  ;;  %v332_v43 = vld [vmem:[%s13264_s9 + $0x19] sm:$0x1] }
  0x3d   : > { %325 = vst.msk [vmem:[#allocation2 + $0xb] sm:$0x1] %vm282_vm4, %v324_v36  ;;  %329 = vst.msk [vmem:[#allocation2 + $0xc] sm:$0x1] %vm282_vm4, %v328_v37  ;;  %v336_v44 = vld [vmem:[%s13264_s9 + $0x1b] sm:$0x1]  ;;  %884 = vmatprep.mubr.f32.mxu0 %v17366_v7  ;;  %961 = vmatprep.mubr.f32.mxu1 %v17366_v7 }
  0x3e   : > { %v364_v45 = vld [vmem:[%s17358_s1 + $0xa0] sm:$0xff]  ;;  %v358_v47 = vld [vmem:[%s17358_s1 + $0x70] sm:$0xff]  ;;  %333 = vst.msk [vmem:[#allocation2 + $0xd] sm:$0x1] %vm282_vm4, %v332_v43  ;;  %337 = vst.msk [vmem:[#allocation2 + $0xe] sm:$0x1] %vm282_vm4, %v336_v44  ;;  %11742 = vmatprep.subr.msk.bf16.mxu1 %vm13216_vm3, %v13566_v23  ;;  %11722 = vmatprep.subr.msk.bf16.mxu0 %vm13216_vm3, %v13568_v24 }
  0x3f   : > { %v344_v46 = vld [vmem:[%s17358_s1] sm:$0xff]  ;;  %v379_v50 = vld [vmem:[%s17358_s1 + $0x118] sm:$0xff]  ;;  %9810 = vmatmul.mubr.msk.f32.gmra.mrb[10].mxu0 %vm276_vm1, %v13400_v14  ;;  %9814 = vmatmul.mubr.msk.f32.gmra.mrb[10].mxu1 %vm276_vm1, %v13400_v14  ;;  %v393_v51 = vld [vmem:[%s17358_s1 + $0x188] sm:$0xf]  ;;  %v13645_v59 = vpack.c.bf16 %v364_v45, %v350_v40 }
  0x40   : > { %v373_v56 = vld [vmem:[%s17358_s1 + $0xe8] sm:$0xff]  ;;  %v387_v57 = vld [vmem:[%s17358_s1 + $0x158] sm:$0xf]  ;;  %11745 = vmatpush1.bf16.msk.msra.mxu1 %vm13216_vm3, %v13586_v38  ;;  %11725 = vmatpush1.bf16.msk.msra.mxu0 %vm13216_vm3, %v13588_v39  ;;  %v13643_v58 = vld [vmem:[#allocation2] sm:$0xff]  ;;  %v13647_v63 = vpack.c.bf16 %v358_v47, %v344_v46  ;;  %v13665_v12 = vpack.c.bf16 %v393_v51, %v379_v50 }
  0x41   : > { %v378_v0 = vld [vmem:[%s17358_s1 + $0x110] sm:$0xff]  ;;  %1032 = vmatprep.mubr.f32.mxu0 %v17366_v7  ;;  %1234 = vmatprep.mubr.f32.mxu1 %v17366_v7  ;;  %v392_v6 = vld [vmem:[%s17358_s1 + $0x180] sm:$0xf]  ;;  %v13667_v19 = vpack.c.bf16 %v387_v57, %v373_v56  ;;  %v355_v20 = vld [vmem:[%s17358_s1 + $0x58] sm:$0xff] }
  0x42   : > { %v372_v10 = vld [vmem:[%s17358_s1 + $0xe0] sm:$0xff]  ;;  %v386_v11 = vld [vmem:[%s17358_s1 + $0x150] sm:$0xf]  ;;  %11757 = vmatprep.subr.bf16.mxu1 %v13617_v48  ;;  %11727 = vmatprep.subr.bf16.mxu0 %v13619_v49  ;;  %v369_v28 = vld [vmem:[%s17358_s1 + $0xc8] sm:$0xff]  ;;  %v13689_v36 = vpack.c.bf16 %v392_v6, %v378_v0 }
  0x43   : > { %9817 = vmatmul.mubr.msk.f32.vlgmr.msra.gmra.mrb[12].mxu0 %vm276_vm1, %v13355_v60  ;;  %9825 = vmatmul.mubr.msk.f32.vlgmr.msra.gmra.mrb[0].mxu1 %vm276_vm1, %v13643_v58  ;;  %v349_v29 = vld [vmem:[%s17358_s1 + $0x28] sm:$0xff]  ;;  %v363_v31 = vld [vmem:[%s17358_s1 + $0x98] sm:$0xff]  ;;  %v13691_v37 = vpack.c.bf16 %v386_v11, %v372_v10  ;;  %v354_v40 = vld [vmem:[%s17358_s1 + $0x50] sm:$0xff]  ;;  %v13713_v46 = vpack.c.bf16 %v369_v28, %v355_v20 }
  0x44   : > { %11759 = vmatpush1.bf16.msra.mxu1 %v13645_v59  ;;  %11729 = vmatpush1.bf16.msra.mxu0 %v13647_v63  ;;  %v368_v43 = vld [vmem:[%s17358_s1 + $0xc0] sm:$0xff]  ;;  %v362_v45 = vld [vmem:[%s17358_s1 + $0x90] sm:$0xff]  ;;  %v13715_v47 = vpack.c.bf16 %v363_v31, %v349_v29  ;;  %v383_v50 = vld [vmem:[%s17358_s1 + $0x138] sm:$0xff] }
  0x45   : > { %v13687_v32 = vld [vmem:[#allocation2 + $0x8] sm:$0x3f]  ;;  %1038 = vmatprep.mubr.f32.mxu0 %v17366_v7  ;;  %1240 = vmatprep.mubr.f32.mxu1 %v17366_v7  ;;  %v348_v44 = vld [vmem:[%s17358_s1 + $0x20] sm:$0xff]  ;;  %v391_v57 = vld [vmem:[%s17358_s1 + $0x178] sm:$0xf]  ;;  %v13739_v0 = vpack.c.bf16 %v368_v43, %v354_v40 }
  0x46   : > { %11762 = vmatprep.subr.msk.bf16.mxu1 %vm13216_vm3, %v13665_v12  ;;  %11732 = vmatprep.subr.msk.bf16.mxu0 %vm13216_vm3, %v13667_v19  ;;  %17398 = vst [vmem:[#allocation14_spill] sm:$0xff] %v13715_v47  ;;  %v397_v51 = vld [vmem:[%s17358_s1 + $0x1a8] sm:$0xf]  ;;  %v13741_v6 = vpack.c.bf16 %v362_v45, %v348_v44  ;;  %v382_v10 = vld [vmem:[%s17358_s1 + $0x130] sm:$0xff]  ;;  %v396_v11 = vld [vmem:[%s17358_s1 + $0x1a0] sm:$0xf] }
  0x47   : > { %9818 = vmatmul.mubr.msk.f32.gmra.mrb[14].mxu0 %vm276_vm1, %v13400_v14  ;;  %9826 = vmatmul.mubr.msk.f32.gmra.mrb[2].mxu1 %vm276_vm1, %v13687_v32  ;;  %v377_v56 = vld [vmem:[%s17358_s1 + $0x108] sm:$0xff]  ;;  %v376_v20 = vld [vmem:[%s17358_s1 + $0x100] sm:$0xff]  ;;  %v390_v28 = vld [vmem:[%s17358_s1 + $0x170] sm:$0xf]  ;;  %v13759_v29 = vpack.c.bf16 %v397_v51, %v383_v50  ;;  %v13781_v50 = vpack.c.bf16 %v396_v11, %v382_v10 }
  0x48   : > { %11765 = vmatpush1.bf16.msk.msra.mxu1 %vm13216_vm3, %v13689_v36  ;;  %11735 = vmatpush1.bf16.msk.msra.mxu0 %vm13216_vm3, %v13691_v37  ;;  %17399 = vst [vmem:[#allocation15_spill] sm:$0xff] %v13741_v6  ;;  %v13761_v31 = vpack.c.bf16 %v391_v57, %v377_v56  ;;  %v9850_v40 = vld [vmem:[%s17358_s1 + $0x398] sm:$0xff]  ;;  %v9864_v43 = vld [vmem:[%s17358_s1 + $0x408] sm:$0xff]  ;;  %v13783_v51 = vpack.c.bf16 %v390_v28, %v376_v20  ;;  %v9849_v56 = vld [vmem:[%s17358_s1 + $0x390] sm:$0xff] }
  0x49   : > { %1157 = vmatprep.mubr.f32.mxu0 %v17366_v7  ;;  %1388 = vmatprep.mubr.f32.mxu1 %v17366_v7  ;;  %v353_v44 = vld [vmem:[%s17358_s1 + $0x48] sm:$0xff]  ;;  %v367_v45 = vld [vmem:[%s17358_s1 + $0xb8] sm:$0xff]  ;;  %17401 = vst [vmem:[#allocation17_spill] sm:$0xff] %v13781_v50  ;;  %v9863_v57 = vld [vmem:[%s17358_s1 + $0x400] sm:$0xff]  ;;  %v13805_v11 = vpack.c.bf16 %v9864_v43, %v9850_v40 }
  0x4a   : > { %11777 = vmatprep.subr.bf16.mxu1 %v13713_v46  ;;  %11747 = vmatprep.subr.bf16.mxu0 %v13715_v47  ;;  %17400 = vst [vmem:[#allocation16_spill] sm:$0xff] %v13761_v31  ;;  %17402 = vst [vmem:[#allocation18_spill] sm:$0xff] %v13783_v51  ;;  %v366_v10 = vld [vmem:[%s17358_s1 + $0xb0] sm:$0xff]  ;;  %v13807_v20 = vpack.c.bf16 %v367_v45, %v353_v44  ;;  %v9878_v28 = vld [vmem:[%s17358_s1 + $0x478] sm:$0xff]  ;;  %v13831_v44 = vpack.c.bf16 %v9863_v57, %v9849_v56  ;;  %v17407_v47 = vmov 0.0  }
  0x4b   : > { %9821 = vmatmul.mubr.msk.f32.vlgmr.msra.gmra.mrb[0].mxu0 %vm276_vm1, %v13643_v58  ;;  %9833 = vmatmul.mubr.msk.f32.vlgmr.msra.gmra.mrb[4].mxu1 %vm276_vm1, %v13643_v58  ;;  %17403 = vst [vmem:[#allocation19_spill] sm:$0xff] %v13805_v11  ;;  %v381_v40 = vld [vmem:[%s17358_s1 + $0x128] sm:$0xff]  ;;  %v395_v43 = vld [vmem:[%s17358_s1 + $0x198] sm:$0xf]  ;;  %v9867_v38 = vld [vmem:[%s17358_s1 + $0x420] sm:$0xff] }
  0x4c   : > { %11779 = vmatpush1.bf16.msra.mxu1 %v13739_v0  ;;  %11749 = vmatpush1.bf16.msra.mxu0 %v13741_v6  ;;  %v352_v6 = vld [vmem:[%s17358_s1 + $0x40] sm:$0xff]  ;;  %17404 = vst [vmem:[#allocation20_spill] sm:$0xff] %v13807_v20  ;;  %17405 = vst [vmem:[#allocation21_spill] sm:$0xff] %v13831_v44  ;;  %v13853_v57 = vpack.c.bf16 %v395_v43, %v381_v40  ;;  %v9857_v14 = vld [vmem:[%s17358_s1 + $0x3d0] sm:$0xff] }
  0x4d   : > { %1163 = vmatprep.mubr.f32.mxu0 %v17366_v7  ;;  %1394 = vmatprep.mubr.f32.mxu1 %v17366_v7  ;;  %v9892_v7 = vld [vmem:[%s17358_s1 + $0x4e8] sm:$0xf]  ;;  %v13833_v45 = vpack.c.bf16 %v366_v10, %v352_v6  ;;  %v394_v6 = vld [vmem:[%s17358_s1 + $0x190] sm:$0xf]  ;;  %v9854_v10 = vld [vmem:[%s17358_s1 + $0x3b8] sm:$0xff]  ;;  %4202 = vst.msk [vmem:[#allocation5 + $0x10] sm:$0xff] %vm4199_vm5, %v17407_v47 }
  0x4e   : > { %11782 = vmatprep.subr.msk.bf16.mxu1 %vm13216_vm3, %v13759_v29  ;;  %11752 = vmatprep.subr.msk.bf16.mxu0 %vm13216_vm3, %v13761_v31  ;;  %v9877_v31 = vld [vmem:[%s17358_s1 + $0x470] sm:$0xff]  ;;  %v13851_v56 = vpack.c.bf16 %v9892_v7, %v9878_v28  ;;  %17409 = vst [vmem:[#allocation24_spill] sm:$0xff] %v13853_v57  ;;  %v357_v7 = vld [vmem:[%s17358_s1 + $0x68] sm:$0xff]  ;;  %v371_v28 = vld [vmem:[%s17358_s1 + $0xd8] sm:$0xff] }
  0x4f   : > { %9822 = vmatmul.mubr.msk.f32.gmra.mrb[2].mxu0 %vm276_vm1, %v13687_v32  ;;  %9834 = vmatmul.mubr.msk.f32.gmra.mrb[6].mxu1 %vm276_vm1, %v13687_v32  ;;  %17406 = vst [vmem:[#allocation22_spill] sm:$0xff] %v13833_v45  ;;  %4203 = vst.msk [vmem:[#allocation5 + $0x18] sm:$0xff] %vm4199_vm5, %v17407_v47 }
  0x50   : > { %11785 = vmatpush1.bf16.msk.msra.mxu1 %vm13216_vm3, %v13781_v50  ;;  %11755 = vmatpush1.bf16.msk.msra.mxu0 %vm13216_vm3, %v13783_v51  ;;  %v9891_v50 = vld [vmem:[%s17358_s1 + $0x4e0] sm:$0xf]  ;;  %17408 = vst [vmem:[#allocation23_spill] sm:$0xff] %v13851_v56  ;;  %4200 = vst.msk [vmem:[#allocation5] sm:$0xff] %vm4199_vm5, %v17407_v47 }
  0x51   : > { %1311 = vmatprep.mubr.f32.mxu0 %v17407_v47  ;;  %1542 = vmatprep.mubr.f32.mxu1 %v17407_v47  ;;  %v380_v51 = vld [vmem:[%s17358_s1 + $0x120] sm:$0xff]  ;;  %v13873_v40 = vpack.c.bf16 %v9891_v50, %v9877_v31  ;;  %v370_v31 = vld [vmem:[%s17358_s1 + $0xd0] sm:$0xff]  ;;  %4201 = vst.msk [vmem:[#allocation5 + $0x8] sm:$0xff] %vm4199_vm5, %v17407_v47  ;;  %4204 = vst.msk [vmem:[#allocation5 + $0x20] sm:$0xff] %vm4199_vm5, %v17407_v47 }
  0x52   : > { %11807 = vmatprep.subr.bf16.mxu1 %v13805_v11  ;;  %11767 = vmatprep.subr.bf16.mxu0 %v13807_v20  ;;  %v9868_v11 = vld [vmem:[%s17358_s1 + $0x428] sm:$0xff]  ;;  %v13875_v43 = vpack.c.bf16 %v394_v6, %v380_v51  ;;  %v9853_v20 = vld [vmem:[%s17358_s1 + $0x3b0] sm:$0xff]  ;;  %v13899_v51 = vpack.c.bf16 %v371_v28, %v357_v7  ;;  %v9882_v6 = vld [vmem:[%s17358_s1 + $0x498] sm:$0xff]  ;;  %4205 = vst.msk [vmem:[#allocation5 + $0x28] sm:$0xff] %vm4199_vm5, %v17407_v47 }
  0x53   : > { %9829 = vmatmul.mubr.msk.f32.vlgmr.msra.gmra.mrb[4].mxu0 %vm276_vm1, %v13643_v58  ;;  %9841 = vmatmul.mubr.msk.f32.vlgmr.msra.gmra.mrb[8].mxu1 %vm276_vm1, %v13643_v58  ;;  %17410 = vst [vmem:[#allocation25_spill] sm:$0xff] %v13873_v40  ;;  %v13897_v50 = vpack.c.bf16 %v9868_v11, %v9854_v10  ;;  %v385_v11 = vld [vmem:[%s17358_s1 + $0x148] sm:$0xff]  ;;  %v399_v10 = vld [vmem:[%s17358_s1 + $0x1b8] sm:$0xf]  ;;  %v13925_v28 = vpack.c.bf16 %v9867_v38, %v9853_v20  ;;  %v398_v38 = vld [vmem:[%s17358_s1 + $0x1b0] sm:$0xf] }
  0x54   : > { %11809 = vmatpush1.bf16.msra.mxu1 %v13831_v44  ;;  %11769 = vmatpush1.bf16.msra.mxu0 %v13833_v45  ;;  %17411 = vst [vmem:[#allocation26_spill] sm:$0xff] %v13875_v43  ;;  %v356_v44 = vld [vmem:[%s17358_s1 + $0x60] sm:$0xff]  ;;  %17413 = vst [vmem:[#allocation28_spill] sm:$0xff] %v13899_v51  ;;  %v9881_v45 = vld [vmem:[%s17358_s1 + $0x490] sm:$0xff] }
  0x55   : > { %1317 = vmatprep.mubr.f32.mxu0 %v17407_v47  ;;  %1548 = vmatprep.mubr.f32.mxu1 %v17407_v47  ;;  %17412 = vst [vmem:[#allocation27_spill] sm:$0xff] %v13897_v50  ;;  %v13923_v7 = vld [vmem:[#allocation2 + $0x1] sm:$0xff]  ;;  %17414 = vst [vmem:[#allocation29_spill] sm:$0xff] %v13925_v28 }
  0x56   : > { %11812 = vmatprep.subr.msk.bf16.mxu1 %vm13216_vm3, %v13851_v56  ;;  %11772 = vmatprep.subr.msk.bf16.mxu0 %vm13216_vm3, %v13853_v57  ;;  %v9896_v56 = vld [vmem:[%s17358_s1 + $0x508] sm:$0xf]  ;;  %v13927_v57 = vpack.c.bf16 %v370_v31, %v356_v44  ;;  %v13947_v44 = vpack.c.bf16 %v399_v10, %v385_v11  ;;  %v9858_v31 = vld [vmem:[%s17358_s1 + $0x3d8] sm:$0xff]  ;;  %4206 = vst.msk [vmem:[#allocation5 + $0x30] sm:$0xff] %vm4199_vm5, %v17407_v47  ;;  %4207 = vst.msk [vmem:[#allocation5 + $0x38] sm:$0xff] %vm4199_vm5, %v17407_v47 }
  0x57   : > { %9830 = vmatmul.mubr.msk.f32.gmra.mrb[6].mxu0 %vm276_vm1, %v13687_v32  ;;  %9842 = vmatmul.mubr.msk.f32.gmra.mrb[10].mxu1 %vm276_vm1, %v13687_v32  ;;  %v13945_v20 = vpack.c.bf16 %v9896_v56, %v9882_v6  ;;  %v9848_v56 = vld [vmem:[%s17358_s1 + $0x388] sm:$0xff]  ;;  %v9862_v6 = vld [vmem:[%s17358_s1 + $0x3f8] sm:$0xff]  ;;  %4208 = vst.msk [vmem:[#allocation5 + $0x40] sm:$0xff] %vm4199_vm5, %v17407_v47  ;;  %4209 = vst.msk [vmem:[#allocation5 + $0x48] sm:$0xff] %vm4199_vm5, %v17407_v47 }
  0x58   : > { %11815 = vmatpush1.bf16.msk.msra.mxu1 %vm13216_vm3, %v13873_v40  ;;  %11775 = vmatpush1.bf16.msk.msra.mxu0 %vm13216_vm3, %v13875_v43  ;;  %17415 = vst [vmem:[#allocation30_spill] sm:$0xff] %v13927_v57  ;;  %v9895_v40 = vld [vmem:[%s17358_s1 + $0x500] sm:$0xf]  ;;  %17417 = vst [vmem:[#allocation32_spill] sm:$0xff] %v13947_v44  ;;  %v13967_v11 = vld [vmem:[#allocation2 + $0x9] sm:$0x3f] }
  0x59   : > { %1465 = vmatprep.mubr.f32.mxu0 %v17407_v47  ;;  %1878 = vmatprep.mubr.f32.mxu1 %v17407_v47  ;;  %v384_v43 = vld [vmem:[%s17358_s1 + $0x140] sm:$0xff]  ;;  %17416 = vst [vmem:[#allocation31_spill] sm:$0xff] %v13945_v20  ;;  %v13969_v10 = vpack.c.bf16 %v9895_v40, %v9881_v45  ;;  %v9861_v45 = vld [vmem:[%s17358_s1 + $0x3f0] sm:$0xff]  ;;  %4210 = vst.msk [vmem:[#allocation5 + $0x50] sm:$0xff] %vm4199_vm5, %v17407_v47 }
  0x5a   : > { %11827 = vmatprep.subr.bf16.mxu1 %v13897_v50  ;;  %11787 = vmatprep.subr.bf16.mxu0 %v13899_v51  ;;  %v9872_v50 = vld [vmem:[%s17358_s1 + $0x448] sm:$0xff]  ;;  %v13971_v51 = vpack.c.bf16 %v398_v38, %v384_v43  ;;  %v13995_v43 = vpack.c.bf16 %v9862_v6, %v9848_v56  ;;  %v9886_v38 = vld [vmem:[%s17358_s1 + $0x4b8] sm:$0xff]  ;;  %4211 = vst.msk [vmem:[#allocation5 + $0x58] sm:$0xff] %vm4199_vm5, %v17407_v47  ;;  %4212 = vst.msk [vmem:[#allocation5 + $0x60] sm:$0xff] %vm4199_vm5, %v17407_v47 }
  0x5b   : > { %9837 = vmatmul.mubr.msk.f32.vlgmr.msra.gmra.mrb[8].mxu0 %vm276_vm1, %v13643_v58  ;;  %9909 = vmatmul.mubr.msk.f32.vlgmr.msra.gmra.mrb[0].mxu1 %vm276_vm1, %v13923_v7  ;;  %17418 = vst [vmem:[#allocation33_spill] sm:$0xff] %v13969_v10  ;;  %v13993_v40 = vpack.c.bf16 %v9872_v50, %v9858_v31  ;;  %v9876_v50 = vld [vmem:[%s17358_s1 + $0x468] sm:$0xff]  ;;  %v9890_v31 = vld [vmem:[%s17358_s1 + $0x4d8] sm:$0xf]  ;;  %4213 = vst.msk [vmem:[#allocation5 + $0x68] sm:$0xff] %vm4199_vm5, %v17407_v47 }
  0x5c   : > { %11829 = vmatpush1.bf16.msra.mxu1 %v13925_v28  ;;  %11789 = vmatpush1.bf16.msra.mxu0 %v13927_v57  ;;  %17419 = vst [vmem:[#allocation34_spill] sm:$0xff] %v13971_v51  ;;  %v9871_v28 = vld [vmem:[%s17358_s1 + $0x440] sm:$0xff]  ;;  %4214 = vst.msk [vmem:[#allocation5 + $0x70] sm:$0xff] %vm4199_vm5, %v17407_v47 }
  0x5d   : > { %1471 = vmatprep.mubr.f32.mxu0 %v17407_v47  ;;  %1884 = vmatprep.mubr.f32.mxu1 %v17407_v47  ;;  %v9847_v57 = vld [vmem:[%s17358_s1 + $0x380] sm:$0xff]  ;;  %17420 = vst [vmem:[#allocation35_spill] sm:$0xff] %v13993_v40  ;;  %v14019_v56 = vpack.c.bf16 %v9871_v28, %v9857_v14  ;;  %v9889_v14 = vld [vmem:[%s17358_s1 + $0x4d0] sm:$0xf]  ;;  %v14041_v28 = vpack.c.bf16 %v9890_v31, %v9876_v50  ;;  %4215 = vst.msk [vmem:[#allocation5 + $0x78] sm:$0xff] %vm4199_vm5, %v17407_v47 }
  0x5e   : > { %11832 = vmatprep.subr.msk.bf16.mxu1 %vm13216_vm3, %v13945_v20  ;;  %11792 = vmatprep.subr.msk.bf16.mxu0 %vm13216_vm3, %v13947_v44  ;;  %v9900_v20 = vld [vmem:[%s17358_s1 + $0x528] sm:$0xf]  ;;  %v14021_v6 = vpack.c.bf16 %v9861_v45, %v9847_v57  ;;  %v9885_v44 = vld [vmem:[%s17358_s1 + $0x4b0] sm:$0xff]  ;;  %4216 = vst.msk [vmem:[#allocation5 + $0x80] sm:$0xff] %vm4199_vm5, %v17407_v47  ;;  %4217 = vst.msk [vmem:[#allocation5 + $0x88] sm:$0xff] %vm4199_vm5, %v17407_v47 }
  0x5f   : > { %9838 = vmatmul.mubr.msk.f32.gmra.mrb[10].mxu0 %vm276_vm1, %v13687_v32  ;;  %9910 = vmatmul.mubr.msk.f32.gmra.mrb[2].mxu1 %vm276_vm1, %v13967_v11  ;;  %v14039_v57 = vpack.c.bf16 %v9900_v20, %v9886_v38  ;;  %v9852_v45 = vld [vmem:[%s17358_s1 + $0x3a8] sm:$0xff]  ;;  %v9865_v50 = vld [vmem:[%s17358_s1 + $0x410] sm:$0xff]  ;;  %4218 = vst.msk [vmem:[#allocation5 + $0x90] sm:$0xff] %vm4199_vm5, %v17407_v47  ;;  %4219 = vst.msk [vmem:[#allocation5 + $0x98] sm:$0xff] %vm4199_vm5, %v17407_v47 }
  0x60   : > { %11835 = vmatpush1.bf16.msk.msra.mxu1 %vm13216_vm3, %v13969_v10  ;;  %11795 = vmatpush1.bf16.msk.msra.mxu0 %vm13216_vm3, %v13971_v51  ;;  %v9899_v10 = vld [vmem:[%s17358_s1 + $0x520] sm:$0xf]  ;;  %v9893_v31 = vld [vmem:[%s17358_s1 + $0x4f0] sm:$0xf]  ;;  %4220 = vst.msk [vmem:[#allocation5 + $0xa0] sm:$0xff] %vm4199_vm5, %v17407_v47  ;;  %4221 = vst.msk [vmem:[#allocation5 + $0xa8] sm:$0xff] %vm4199_vm5, %v17407_v47 }
  0x61   : > { %1619 = vmatprep.mubr.f32.mxu0 %v17407_v47  ;;  %2032 = vmatprep.mubr.f32.mxu1 %v17407_v47  ;;  %v9875_v51 = vld [vmem:[%s17358_s1 + $0x460] sm:$0xff]  ;;  %v14055_v20 = vpack.c.bf16 %v9899_v10, %v9885_v44  ;;  %v9880_v44 = vld [vmem:[%s17358_s1 + $0x488] sm:$0xff]  ;;  %v9894_v10 = vld [vmem:[%s17358_s1 + $0x4f8] sm:$0xf]  ;;  %4222 = vst.msk [vmem:[#allocation5 + $0xb0] sm:$0xff] %vm4199_vm5, %v17407_v47 }
  0x62   : > { %11847 = vmatprep.subr.bf16.mxu1 %v13993_v40  ;;  %11797 = vmatprep.subr.bf16.mxu0 %v13995_v43  ;;  %v9866_v40 = vld [vmem:[%s17358_s1 + $0x418] sm:$0xff]  ;;  %v14057_v38 = vpack.c.bf16 %v9889_v14, %v9875_v51  ;;  %v14103_v14 = vpack.c.bf16 %v9894_v10, %v9880_v44  ;;  %v9869_v44 = vld [vmem:[%s17358_s1 + $0x430] sm:$0xff]  ;;  %v9884_v10 = vld [vmem:[%s17358_s1 + $0x4a8] sm:$0xff]  ;;  %4223 = vst.msk [vmem:[#allocation5 + $0xb8] sm:$0xff] %vm4199_vm5, %v17407_v47 }
  0x63   : > { %9845 = vmatmul.mubr.msk.f32.vlgmr.msra.gmra.mrb[12].mxu0 %vm276_vm1, %v13643_v58  ;;  %9917 = vmatmul.mubr.msk.f32.vlgmr.msra.gmra.mrb[4].mxu1 %vm276_vm1, %v13923_v7  ;;  %v9851_v58 = vld [vmem:[%s17358_s1 + $0x3a0] sm:$0xff]  ;;  %v14073_v51 = vpack.c.bf16 %v9866_v40, %v9852_v45  ;;  %v9856_v45 = vld [vmem:[%s17358_s1 + $0x3c8] sm:$0xff]  ;;  %4224 = vst.msk [vmem:[#allocation5 + $0xc0] sm:$0xff] %vm4199_vm5, %v17407_v47  ;;  %4225 = vst.msk [vmem:[#allocation5 + $0xc8] sm:$0xff] %vm4199_vm5, %v17407_v47 }
  0x64   : > { %11849 = vmatpush1.bf16.msra.mxu1 %v14019_v56  ;;  %11799 = vmatpush1.bf16.msra.mxu0 %v14021_v6  ;;  %v9879_v40 = vld [vmem:[%s17358_s1 + $0x480] sm:$0xff]  ;;  %4226 = vst.msk [vmem:[#allocation5 + $0xd0] sm:$0xff] %vm4199_vm5, %v17407_v47  ;;  %4227 = vst.msk [vmem:[#allocation5 + $0xd8] sm:$0xff] %vm4199_vm5, %v17407_v47 }
  0x65   : > { %1625 = vmatprep.mubr.f32.mxu0 %v17407_v47  ;;  %2038 = vmatprep.mubr.f32.mxu1 %v17407_v47  ;;  %4228 = vst.msk [vmem:[#allocation5 + $0xe0] sm:$0xff] %vm4199_vm5, %v17407_v47  ;;  %4229 = vst.msk [vmem:[#allocation5 + $0xe8] sm:$0xff] %vm4199_vm5, %v17407_v47 }
  0x66   : > { %11852 = vmatprep.subr.msk.bf16.mxu1 %vm13216_vm3, %v14039_v57  ;;  %11802 = vmatprep.subr.msk.bf16.mxu0 %vm13216_vm3, %v14041_v28  ;;  %4230 = vst.msk [vmem:[#allocation5 + $0xf0] sm:$0xff] %vm4199_vm5, %v17407_v47  ;;  %4231 = vst.msk [vmem:[#allocation5 + $0xf8] sm:$0xff] %vm4199_vm5, %v17407_v47 }
  0x67   : > { %9846 = vmatmul.mubr.msk.f32.gmra.mrb[14].mxu0 %vm276_vm1, %v13687_v32  ;;  %9918 = vmatmul.mubr.msk.f32.gmra.mrb[6].mxu1 %vm276_vm1, %v13967_v11  ;;  %v14091_v32 = vpack.c.bf16 %v9865_v50, %v9851_v58  ;;  %v9870_v58 = vld [vmem:[%s17358_s1 + $0x438] sm:$0xff]  ;;  %v9855_v50 = vld [vmem:[%s17358_s1 + $0x3c0] sm:$0xff]  ;;  %4232 = vst.msk [vmem:[#allocation5 + $0x100] sm:$0xff] %vm4199_vm5, %v17407_v47  ;;  %7456 = vst.msk [vmem:[#allocation6 + $0xe0] sm:$0xff] %vm4199_vm5, %v17407_v47 }
  0x68   : > { %11855 = vmatpush1.bf16.msk.msra.mxu1 %vm13216_vm3, %v14055_v20  ;;  %11805 = vmatpush1.bf16.msk.msra.mxu0 %vm13216_vm3, %v14057_v38 }
  0x69   : > { %1801 = vmatprep.mubr.f32.mxu0 %v17407_v47  ;;  %2186 = vmatprep.mubr.f32.mxu1 %v17407_v47 }
  0x6a   : > { %11867 = vmatprep.subr.bf16.mxu1 %v13188_v8  ;;  %11817 = vmatprep.subr.bf16.mxu0 %v14073_v51  ;;  %v14117_v8 = vpack.c.bf16 %v9893_v31, %v9879_v40  ;;  %v14151_v40 = vpack.c.bf16 %v9869_v44, %v9855_v50  ;;  %v9883_v31 = vld [vmem:[%s17358_s1 + $0x4a0] sm:$0xff]  ;;  %v9874_v50 = vld [vmem:[%s17358_s1 + $0x458] sm:$0xff] }
  0x6b   : > { %9905 = vmatmul.mubr.msk.f32.vlgmr.msra.gmra.mrb[0].mxu0 %vm276_vm1, %v13923_v7  ;;  %9925 = vmatmul.mubr.msk.f32.vlgmr.msra.gmra.mrb[8].mxu1 %vm276_vm1, %v13923_v7  ;;  %v9859_v44 = vld [vmem:[%s17358_s1 + $0x3e0] sm:$0xff] }
  0x6c   : > { %11869 = vmatpush1.bf16.msra.mxu1 %v13210_v13  ;;  %11819 = vmatpush1.bf16.msra.mxu0 %v14091_v32  ;;  %v14133_v13 = vpack.c.bf16 %v9870_v58, %v9856_v45  ;;  %v9897_v45 = vld [vmem:[%s17358_s1 + $0x510] sm:$0xf]  ;;  %v9860_v58 = vld [vmem:[%s17358_s1 + $0x3e8] sm:$0xff] }
  0x6d   : > { %1807 = vmatprep.mubr.f32.mxu0 %v17407_v47  ;;  %2192 = vmatprep.mubr.f32.mxu1 %v17407_v47 }
  0x6e   : > { %11872 = vmatprep.subr.msk.bf16.mxu1 %vm13216_vm3, %v13240_v21  ;;  %11822 = vmatprep.subr.msk.bf16.mxu0 %vm13216_vm3, %v14103_v14  ;;  %v9898_v21 = vld [vmem:[%s17358_s1 + $0x518] sm:$0xf] }
  0x6f   : > { %9906 = vmatmul.mubr.msk.f32.gmra.mrb[2].mxu0 %vm276_vm1, %v13967_v11  ;;  %9926 = vmatmul.mubr.msk.f32.gmra.mrb[10].mxu1 %vm276_vm1, %v13967_v11 }
  0x70   : > { %11875 = vmatpush1.bf16.msk.msra.mxu1 %vm13216_vm3, %v13256_v26  ;;  %11825 = vmatpush1.bf16.msk.msra.mxu0 %vm13216_vm3, %v14117_v8  ;;  %v14163_v26 = vpack.c.bf16 %v9898_v21, %v9884_v10  ;;  %v9873_v10 = vld [vmem:[%s17358_s1 + $0x450] sm:$0xff]  ;;  %v9888_v21 = vld [vmem:[%s17358_s1 + $0x4c8] sm:$0xff] }
  0x71   : > { %1955 = vmatprep.mubr.f32.mxu0 %v17407_v47  ;;  %2500 = vmatprep.mubr.f32.mxu1 %v17407_v47 }
  0x72   : > { %11877 = vmatprep.subr.bf16.mxu1 %v13174_v3  ;;  %11837 = vmatprep.subr.bf16.mxu0 %v14133_v13  ;;  %v14177_v3 = vpack.c.bf16 %v9897_v45, %v9883_v31  ;;  %v14211_v31 = vpack.c.bf16 %v9873_v10, %v9859_v44  ;;  %v9887_v45 = vld [vmem:[%s17358_s1 + $0x4c0] sm:$0xff] }
  0x73   : > { %9913 = vmatmul.mubr.msk.f32.vlgmr.msra.gmra.mrb[4].mxu0 %vm276_vm1, %v13923_v7  ;;  %9933 = vmatmul.mubr.msk.f32.vlgmr.msra.gmra.mrb[12].mxu1 %vm276_vm1, %v13923_v7 }
  0x74   : > { %11879 = vmatpush1.bf16.msra.mxu1 %v13190_v9  ;;  %11839 = vmatpush1.bf16.msra.mxu0 %v14151_v40  ;;  %v14193_v9 = vpack.c.bf16 %v9874_v50, %v9860_v58  ;;  %v9901_v58 = vld [vmem:[%s17358_s1 + $0x530] sm:$0xf] }
  0x75   : > { %1961 = vmatprep.mubr.f32.mxu0 %v17407_v47  ;;  %2506 = vmatprep.mubr.f32.mxu1 %v17407_v47  ;;  %v14231_v50 = vpack.c.bf16 %v9901_v58, %v9887_v45 }
  0x76   : > { %11882 = vmatprep.subr.msk.bf16.mxu1 %vm13216_vm3, %v13228_v17  ;;  %11842 = vmatprep.subr.msk.bf16.mxu0 %vm13216_vm3, %v14163_v26  ;;  %v9902_v17 = vld [vmem:[%s17358_s1 + $0x538] sm:$0xf] }
  0x77   : > { %9914 = vmatmul.mubr.msk.f32.gmra.mrb[6].mxu0 %vm276_vm1, %v13967_v11  ;;  %9934 = vmatmul.mubr.msk.f32.gmra.mrb[14].mxu1 %vm276_vm1, %v13967_v11 }
  0x78   : > { %11885 = vmatpush1.bf16.msk.msra.mxu1 %vm13216_vm3, %v13242_v22  ;;  %11845 = vmatpush1.bf16.msk.msra.mxu0 %vm13216_vm3, %v14177_v3  ;;  %v14223_v22 = vpack.c.bf16 %v9902_v17, %v9888_v21  ;;  %v10016_v21 = vld [vmem:[%s17360_s3 + $0x48] sm:$0xff] }
  0x79   : > { %2109 = vmatprep.mubr.f32.mxu0 %v17407_v47  ;;  %2577 = vmatprep.mubr.f32.mxu1 %v17407_v47 }
  0x7a   : > { %11887 = vmatprep.subr.bf16.mxu1 %v13280_v34  ;;  %11857 = vmatprep.subr.bf16.mxu0 %v14193_v9  ;;  %v17422_v34 = vld [vmem:[#allocation13_spill] sm:$0xff] }
  0x7b   : > { %9921 = vmatmul.mubr.msk.f32.vlgmr.msra.gmra.mrb[8].mxu0 %vm276_vm1, %v13923_v7  ;;  %9937 = vmatmul.mubr.msk.f32.vlgmr.msra.gmra.mrb[16].mxu1 %vm276_vm1, %v13923_v7 }
  0x7c   : > { %11889 = vmatpush1.bf16.msra.mxu1 %v13341_v55  ;;  %11859 = vmatpush1.bf16.msra.mxu0 %v14211_v31  ;;  %v17424_v55 = vld [vmem:[#allocation14_spill] sm:$0xff] }
  0x7d   : > { %2115 = vmatprep.mubr.f32.mxu0 %v17407_v47  ;;  %2583 = vmatprep.mubr.f32.mxu1 %v17407_v47 }
  0x7e   : > { %11892 = vmatprep.subr.msk.bf16.mxu1 %vm13216_vm3, %v13359_v62  ;;  %11862 = vmatprep.subr.msk.bf16.mxu0 %vm13216_vm3, %v14223_v22  ;;  %v17426_v62 = vld [vmem:[#allocation15_spill] sm:$0xff] }
  0x7f   : > { %9922 = vmatmul.mubr.msk.f32.gmra.mrb[10].mxu0 %vm276_vm1, %v13967_v11  ;;  %9938 = vmatmul.mubr.msk.f32.gmra.mrb[18].mxu1 %vm276_vm1, %v13967_v11 }
  0x80   : > { %11895 = vmatpush1.bf16.msk.msra.mxu1 %vm13216_vm3, %v13381_v5  ;;  %11865 = vmatpush1.bf16.msk.msra.mxu0 %vm13216_vm3, %v14231_v50  ;;  %v17428_v5 = vld [vmem:[#allocation16_spill] sm:$0xff] }
  0x81   : > { %2263 = vmatprep.mubr.f32.mxu0 %v17407_v47  ;;  %2654 = vmatprep.mubr.f32.mxu1 %v17407_v47 }
  0x82   : > { %11907 = vmatprep.subr.bf16.mxu1 %v13407_v18  ;;  %11897 = vmatprep.subr.bf16.mxu0 %v13275_v30  ;;  %v17421_v30 = vld [vmem:[#allocation12_spill] sm:$0xff]  ;;  %v17430_v18 = vld [vmem:[#allocation18_spill] sm:$0xff] }
  0x83   : > { %9929 = vmatmul.mubr.msk.f32.vlgmr.msra.gmra.mrb[12].mxu0 %vm276_vm1, %v13923_v7  ;;  %9941 = vmatmul.mubr.msk.f32.vlgmr.msra.gmra.mrb[20].mxu1 %vm276_vm1, %v13923_v7 }
  0x84   : > { %11909 = vmatpush1.bf16.msra.mxu1 %v13433_v27  ;;  %11899 = vmatpush1.bf16.msra.mxu0 %v13339_v54  ;;  %v17423_v54 = vld [vmem:[#allocation17_spill] sm:$0xff] }
  0x85   : > { %2269 = vmatprep.mubr.f32.mxu0 %v17407_v47  ;;  %2660 = vmatprep.mubr.f32.mxu1 %v17407_v47  ;;  %v14391_v27 = vld [vmem:[#allocation3 + $0x1] sm:$0xff] }
  0x86   : > { %11912 = vmatprep.subr.msk.bf16.mxu1 %vm13216_vm3, %v13453_v35  ;;  %11902 = vmatprep.subr.msk.bf16.mxu0 %vm13216_vm3, %v13357_v61  ;;  %v17425_v61 = vld [vmem:[#allocation27_spill] sm:$0xff] }
  0x87   : > { %9930 = vmatmul.mubr.msk.f32.gmra.mrb[14].mxu0 %vm276_vm1, %v13967_v11  ;;  %9942 = vmatmul.mubr.msk.f32.gmra.mrb[22].mxu1 %vm276_vm1, %v13967_v11  ;;  %v17433_v35 = vld [vmem:[#allocation35_spill] sm:$0xff] }
  0x88   : > { %11915 = vmatpush1.bf16.msk.msra.mxu1 %vm13216_vm3, %v13478_v42  ;;  %11905 = vmatpush1.bf16.msk.msra.mxu0 %vm13216_vm3, %v13379_v4  ;;  %v17427_v4 = vld [vmem:[#allocation29_spill] sm:$0xff] }
  0x89   : > { %2731 = vmatprep.mubr.f32.mxu0 %v17407_v47  ;;  %2808 = vmatprep.mubr.f32.mxu1 %v17407_v47  ;;  %v14403_v42 = vld [vmem:[#allocation3 + $0x9] sm:$0x3f] }
  0x8a   : > { %11927 = vmatprep.subr.bf16.mxu1 %v13513_v53  ;;  %11917 = vmatprep.subr.bf16.mxu0 %v13405_v16  ;;  %v17429_v16 = vld [vmem:[#allocation31_spill] sm:$0xff]  ;;  %v17437_v53 = vld [vmem:[#allocation28_spill] sm:$0xff] }
  0x8b   : > { %9945 = vmatmul.mubr.msk.f32.vlgmr.msra.gmra.mrb[16].mxu0 %vm276_vm1, %v13923_v7  ;;  %9949 = vmatmul.mubr.msk.f32.vlgmr.msra.gmra.mrb[24].mxu1 %vm276_vm1, %v13923_v7 }
  0x8c   : > { %11929 = vmatpush1.bf16.msra.mxu1 %v13540_v2  ;;  %11919 = vmatpush1.bf16.msra.mxu0 %v13431_v25  ;;  %v17431_v25 = vld [vmem:[#allocation33_spill] sm:$0xff]  ;;  %v17438_v2 = vld [vmem:[#allocation30_spill] sm:$0xff] }
  0x8d   : > { %2737 = vmatprep.mubr.f32.mxu0 %v17407_v47  ;;  %2814 = vmatprep.mubr.f32.mxu1 %v17407_v47 }
  0x8e   : > { %11932 = vmatprep.subr.msk.bf16.mxu1 %vm13216_vm3, %v13568_v24  ;;  %11922 = vmatprep.subr.msk.bf16.mxu0 %vm13216_vm3, %v13451_v33  ;;  %v17432_v33 = vld [vmem:[#allocation20_spill] sm:$0xff]  ;;  %v17440_v24 = vld [vmem:[#allocation34_spill] sm:$0xff] }
  0x8f   : > { %9946 = vmatmul.mubr.msk.f32.gmra.mrb[18].mxu0 %vm276_vm1, %v13967_v11  ;;  %9950 = vmatmul.mubr.msk.f32.gmra.mrb[26].mxu1 %vm276_vm1, %v13967_v11 }
  0x90   : > { %11935 = vmatpush1.bf16.msk.msra.mxu1 %vm13216_vm3, %v13588_v39  ;;  %11925 = vmatpush1.bf16.msk.msra.mxu0 %vm13216_vm3, %v13476_v41  ;;  %v17434_v41 = vld [vmem:[#allocation22_spill] sm:$0xff]  ;;  %v17441_v39 = vld [vmem:[#allocation19_spill] sm:$0xff] }
  0x91   : > { %2885 = vmatprep.mubr.f32.mxu0 %v17407_v47  ;;  %2962 = vmatprep.mubr.f32.mxu1 %v17407_v47 }
  0x92   : > { %11937 = vmatprep.subr.bf16.mxu1 %v13619_v49  ;;  %11967 = vmatprep.subr.bf16.mxu0 %v13617_v48  ;;  %v17442_v48 = vld [vmem:[#allocation21_spill] sm:$0xff]  ;;  %v17443_v49 = vld [vmem:[#allocation23_spill] sm:$0xff] }
  0x93   : > { %9953 = vmatmul.mubr.msk.f32.vlgmr.msra.gmra.mrb[20].mxu0 %vm276_vm1, %v13923_v7  ;;  %9957 = vmatmul.mubr.msk.f32.vlgmr.msra.gmra.mrb[28].mxu1 %vm276_vm1, %v13923_v7 }
  0x94   : > { %11939 = vmatpush1.bf16.msra.mxu1 %v13647_v63  ;;  %11969 = vmatpush1.bf16.msra.mxu0 %v13645_v59  ;;  %v17444_v59 = vld [vmem:[#allocation25_spill] sm:$0xff] }
  0x95   : > { %2891 = vmatprep.mubr.f32.mxu0 %v17407_v47  ;;  %2968 = vmatprep.mubr.f32.mxu1 %v17407_v47 }
  0x96   : > { %11942 = vmatprep.subr.msk.bf16.mxu1 %vm13216_vm3, %v13667_v19  ;;  %11972 = vmatprep.subr.msk.bf16.mxu0 %vm13216_vm3, %v13665_v12 }
  0x97   : > { %9954 = vmatmul.mubr.msk.f32.gmra.mrb[22].mxu0 %vm276_vm1, %v13967_v11  ;;  %9958 = vmatmul.mubr.msk.f32.gmra.mrb[30].mxu1 %vm276_vm1, %v13967_v11 }
  0x98   : > { %11945 = vmatpush1.bf16.msk.msra.mxu1 %vm13216_vm3, %v13691_v37  ;;  %11975 = vmatpush1.bf16.msk.msra.mxu0 %vm13216_vm3, %v13689_v36 }
  0x99   : > { %3039 = vmatprep.mubr.f32.mxu1 %v17407_v47  ;;  %11947 = vmatprep.subr.bf16.mxu1 %v13511_v52  ;;  %v17435_v52 = vld [vmem:[#allocation24_spill] sm:$0xff] }
  0x9a   : > { %3270 = vmatprep.mubr.f32.mxu0 %v17407_v47  ;;  %11987 = vmatprep.subr.bf16.mxu0 %v13713_v46 }
  0x9b   : > { %9961 = vmatmul.mubr.msk.f32.vlgmr.msra.gmra.mrb[12].mxu1 %vm276_vm1, %v13355_v60  ;;  %9973 = vmatmul.mubr.msk.f32.vlgmr.msra.gmra.mrb[16].mxu0 %vm276_vm1, %v13355_v60 }
  0x9c   : > { %11949 = vmatpush1.bf16.msra.mxu1 %v13538_v1  ;;  %11989 = vmatpush1.bf16.msra.mxu0 %v13739_v0  ;;  %v13005_v1 = vld [vmem:[#allocation3] sm:$0xff] }
  0x9d   : > { %3045 = vmatprep.mubr.f32.mxu1 %v17407_v47  ;;  %11952 = vmatprep.subr.msk.bf16.mxu1 %vm13216_vm3, %v13566_v23  ;;  %v17439_v23 = vld [vmem:[#allocation32_spill] sm:$0xff] }
  0x9e   : > { %3276 = vmatprep.mubr.f32.mxu0 %v17407_v47  ;;  %11992 = vmatprep.subr.msk.bf16.mxu0 %vm13216_vm3, %v13759_v29 }
  0x9f   : > { %9962 = vmatmul.mubr.msk.f32.gmra.mrb[14].mxu1 %vm276_vm1, %v17421_v30  ;;  %9974 = vmatmul.mubr.msk.f32.gmra.mrb[18].mxu0 %vm276_vm1, %v17421_v30 }
  0xa0   : > { %11955 = vmatpush1.bf16.msk.msra.mxu1 %vm13216_vm3, %v17422_v34  ;;  %11995 = vmatpush1.bf16.msk.msra.mxu0 %vm13216_vm3, %v17423_v54 }
  0xa1   : > { %3116 = vmatprep.mubr.f32.mxu1 %v17407_v47  ;;  %11957 = vmatprep.subr.bf16.mxu1 %v17424_v55 }
  0xa2   : > { %3424 = vmatprep.mubr.f32.mxu0 %v17407_v47  ;;  %12037 = vmatprep.subr.bf16.mxu0 %v17425_v61  ;;  %v14670_v61 = vld [vmem:[%s17359_s2 + $0x8] sm:$0x3f] }
  0xa3   : > { %9965 = vmatmul.mubr.msk.f32.vlgmr.msra.gmra.mrb[16].mxu1 %vm276_vm1, %v13355_v60  ;;  %9981 = vmatmul.mubr.msk.f32.vlgmr.msra.gmra.mrb[20].mxu0 %vm276_vm1, %v13355_v60 }
  0xa4   : > { %11959 = vmatpush1.bf16.msra.mxu1 %v17426_v62  ;;  %12039 = vmatpush1.bf16.msra.mxu0 %v17427_v4 }
  0xa5   : > { %3122 = vmatprep.mubr.f32.mxu1 %v17407_v47  ;;  %11962 = vmatprep.subr.msk.bf16.mxu1 %vm13216_vm3, %v17428_v5 }
  0xa6   : > { %3430 = vmatprep.mubr.f32.mxu0 %v17407_v47  ;;  %12042 = vmatprep.subr.msk.bf16.mxu0 %vm13216_vm3, %v17429_v16 }
  0xa7   : > { %9966 = vmatmul.mubr.msk.f32.gmra.mrb[18].mxu1 %vm276_vm1, %v17421_v30  ;;  %9982 = vmatmul.mubr.msk.f32.gmra.mrb[22].mxu0 %vm276_vm1, %v17421_v30 }
  0xa8   : > { %11965 = vmatpush1.bf16.msk.msra.mxu1 %vm13216_vm3, %v17430_v18  ;;  %12045 = vmatpush1.bf16.msk.msra.mxu0 %vm13216_vm3, %v17431_v25 }
  0xa9   : > { %3193 = vmatprep.mubr.f32.mxu1 %v17407_v47  ;;  %11977 = vmatprep.subr.bf16.mxu1 %v17432_v33 }
  0xaa   : > { %3815 = vmatprep.mubr.f32.mxu0 %v17407_v47  ;;  %12057 = vmatprep.subr.bf16.mxu0 %v17433_v35 }
  0xab   : > { %9969 = vmatmul.mubr.msk.f32.vlgmr.msra.gmra.mrb[20].mxu1 %vm276_vm1, %v13355_v60  ;;  %10001 = vmatmul.mubr.msk.f32.vlgmr.msra.gmra.mrb[16].mxu0 %vm276_vm1, %v14391_v27  ;;  %v17436_v60 = vld [vmem:[#allocation26_spill] sm:$0xff] }
  0xac   : > { %11979 = vmatpush1.bf16.msra.mxu1 %v17434_v41  ;;  %12059 = vmatpush1.bf16.msra.mxu0 %v14019_v56 }
  0xad   : > { %3199 = vmatprep.mubr.f32.mxu1 %v17407_v47  ;;  %11982 = vmatprep.subr.msk.bf16.mxu1 %vm13216_vm3, %v17435_v52 }
  0xae   : > { %3821 = vmatprep.mubr.f32.mxu0 %v17407_v47  ;;  %12062 = vmatprep.subr.msk.bf16.mxu0 %vm13216_vm3, %v14039_v57 }
  0xaf   : > { %9970 = vmatmul.mubr.msk.f32.gmra.mrb[22].mxu1 %vm276_vm1, %v17421_v30  ;;  %10002 = vmatmul.mubr.msk.f32.gmra.mrb[18].mxu0 %vm276_vm1, %v14403_v42 }
  0xb0   : > { %11985 = vmatpush1.bf16.msk.msra.mxu1 %vm13216_vm3, %v17436_v60  ;;  %12065 = vmatpush1.bf16.msk.msra.mxu0 %vm13216_vm3, %v14055_v20 }
  0xb1   : > { %3347 = vmatprep.mubr.f32.mxu1 %v17407_v47  ;;  %11997 = vmatprep.subr.bf16.mxu1 %v17437_v53 }
  0xb2   : > { %3969 = vmatprep.mubr.f32.mxu0 %v17407_v47 }
  0xb3   : > { %9977 = vmatmul.mubr.msk.f32.vlgmr.msra.gmra.mrb[24].mxu1 %vm276_vm1, %v13005_v1  ;;  %10009 = vmatmul.mubr.msk.f32.vlgmr.msra.gmra.mrb[20].mxu0 %vm276_vm1, %v14391_v27 }
  0xb4   : > { %11999 = vmatpush1.bf16.msra.mxu1 %v17438_v2  ;;  %3353 = vmatprep.mubr.f32.mxu1 %v17407_v47 }
  0xb5   : > { %12002 = vmatprep.subr.msk.bf16.mxu1 %vm13216_vm3, %v17439_v23  ;;  %3975 = vmatprep.mubr.f32.mxu0 %v17407_v47 }
  0xb7   : > { %9978 = vmatmul.mubr.msk.f32.gmra.mrb[26].mxu1 %vm276_vm1, %v17421_v30  ;;  %10010 = vmatmul.mubr.msk.f32.gmra.mrb[22].mxu0 %vm276_vm1, %v14403_v42 }
  0xb8   : > { %12005 = vmatpush1.bf16.msk.msra.mxu1 %vm13216_vm3, %v17440_v24  ;;  %3501 = vmatprep.mubr.f32.mxu1 %v17407_v47 }
  0xb9   : > { %12007 = vmatprep.subr.bf16.mxu1 %v13995_v43 }
  0xbb   : > { %9985 = vmatmul.mubr.msk.f32.vlgmr.msra.gmra.mrb[28].mxu1 %vm276_vm1, %v13005_v1 }
  0xbc   : > { %12009 = vmatpush1.bf16.msra.mxu1 %v14021_v6  ;;  %3507 = vmatprep.mubr.f32.mxu1 %v17407_v47 }
  0xbd   : > { %12012 = vmatprep.subr.msk.bf16.mxu1 %vm13216_vm3, %v14041_v28 }
  0xbf   : > { %9986 = vmatmul.mubr.msk.f32.gmra.mrb[30].mxu1 %vm276_vm1, %v17421_v30 }
  0xc0   : > { %12015 = vmatpush1.bf16.msk.msra.mxu1 %vm13216_vm3, %v14057_v38  ;;  %3584 = vmatprep.mubr.f32.mxu1 %v17407_v47 }
  0xc1   : > { %12017 = vmatprep.subr.bf16.mxu1 %v17441_v39 }
  0xc3   : > { %9989 = vmatmul.mubr.msk.f32.vlgmr.msra.gmra.mrb[12].mxu1 %vm276_vm1, %v14391_v27 }
  0xc4   : > { %12019 = vmatpush1.bf16.msra.mxu1 %v17442_v48  ;;  %3590 = vmatprep.mubr.f32.mxu1 %v17407_v47 }
  0xc5   : > { %12022 = vmatprep.subr.msk.bf16.mxu1 %vm13216_vm3, %v17443_v49 }
  0xc7   : > { %9990 = vmatmul.mubr.msk.f32.gmra.mrb[14].mxu1 %vm276_vm1, %v14403_v42 }
  0xc8   : > { %12025 = vmatpush1.bf16.msk.msra.mxu1 %vm13216_vm3, %v17444_v59  ;;  %3661 = vmatprep.mubr.f32.mxu1 %v17407_v47 }
  0xc9   : > { %12027 = vmatprep.subr.bf16.mxu1 %v14073_v51 }
  0xcb   : > { %9993 = vmatmul.mubr.msk.f32.vlgmr.msra.gmra.mrb[16].mxu1 %vm276_vm1, %v14391_v27 }
  0xcc   : > { %12029 = vmatpush1.bf16.msra.mxu1 %v14091_v32  ;;  %3667 = vmatprep.mubr.f32.mxu1 %v17407_v47 }
  0xcd   : > { %12032 = vmatprep.subr.msk.bf16.mxu1 %vm13216_vm3, %v14103_v14 }
  0xcf   : > { %9994 = vmatmul.mubr.msk.f32.gmra.mrb[18].mxu1 %vm276_vm1, %v14403_v42 }
  0xd0   : > { %12035 = vmatpush1.bf16.msk.msra.mxu1 %vm13216_vm3, %v14117_v8  ;;  %3738 = vmatprep.mubr.f32.mxu1 %v17407_v47 }
  0xd1   : > { %12047 = vmatprep.subr.bf16.mxu1 %v14133_v13 }
  0xd3   : > { %9997 = vmatmul.mubr.msk.f32.vlgmr.msra.gmra.mrb[20].mxu1 %vm276_vm1, %v14391_v27 }
  0xd4   : > { %12049 = vmatpush1.bf16.msra.mxu1 %v14151_v40  ;;  %3744 = vmatprep.mubr.f32.mxu1 %v17407_v47 }
  0xd5   : > { %12052 = vmatprep.subr.msk.bf16.mxu1 %vm13216_vm3, %v14163_v26 }
  0xd7   : > { %9998 = vmatmul.mubr.msk.f32.gmra.mrb[22].mxu1 %vm276_vm1, %v14403_v42 }
  0xd8   : > { %12055 = vmatpush1.bf16.msk.msra.mxu1 %vm13216_vm3, %v14177_v3  ;;  %3892 = vmatprep.mubr.f32.mxu1 %v17407_v47 }
  0xd9   : > { %12067 = vmatprep.subr.bf16.mxu1 %v14193_v9  ;;  %v10015_v9 = vld [vmem:[%s17360_s3 + $0x40] sm:$0xff] }
  0xda   : > { %v12076_v17 = vpack.c.bf16 %v10016_v21, %v10015_v9 }
  0xdb   : > { %10005 = vmatmul.mubr.msk.f32.vlgmr.msra.gmra.mrb[24].mxu1 %vm276_vm1, %v14391_v27 }
  0xdc   : > { %12069 = vmatpush1.bf16.msra.mxu1 %v14211_v31  ;;  %3898 = vmatprep.mubr.f32.mxu1 %v17407_v47  ;;  %v2308_v31 = vlaneseq }
  0xdd   : > { %12072 = vmatprep.subr.msk.bf16.mxu1 %vm13216_vm3, %v14223_v22  ;;  %12077 = vmatprep.subr.bf16.mxu0 %v12076_v17 }
  0xde   : > { %12079 = vmatpush3.bf16.msra.mxu0 %v12076_v17  ;;  %v14648_v45 = vshrl.u32 %v2308_v31, 7  ;;  %vm15849_vm7 = vcmp.lt.s32.totalorder %v2308_v31, 64  ;;  %vm7710_vm8 = vcmp.ge.s32.totalorder %v2308_v31, 64  ;;  %vm7711_vm9 = vcmp.lt.s32.totalorder %v2308_v31, 128 }
  0xdf   : > { %10006 = vmatmul.mubr.msk.f32.gmra.mrb[26].mxu1 %vm276_vm1, %v14403_v42  ;;  %vm16113_vm10 = vmand %vm7710_vm8, %vm7711_vm9 }
  0xe0   : > { %12075 = vmatpush1.bf16.msk.msra.mxu1 %vm13216_vm3, %v14231_v50  ;;  %4046 = vmatprep.mubr.f32.mxu1 %v17407_v47  ;;  %v14651_v58 = vsub.s32 6, %v14648_v45  ;;  %v14654_v22 = vsub.s32 7, %v14648_v45  ;;  %v14659_v50 = vld [vmem:[%s17359_s2] sm:$0xff]  ;;  %v14673_v4 = vsub.s32 2, %v14648_v45  ;;  %v14676_v18 = vsub.s32 3, %v14648_v45 }
  0xe1   : > { %12616 = vmatprep.subr.bf16.mxu1 %v12076_v17 }
  0xe2   : > { %v2335_v30 = vrot.slane %v14659_v50, %v14651_v58  ;;  %v2339_v34 = vrot.slane %v14659_v50, %v14654_v22  ;;  %v2351_v35 = vrot.slane %v14670_v61, %v14673_v4  ;;  %v2355_v60 = vrot.slane %v14670_v61, %v14676_v18 }
  0xe3   : > { %10013 = vmatmul.mubr.msk.f32.vlgmr.msra.gmra.mrb[28].mxu1 %vm276_vm1, %v14391_v27 }
  0xe4   : > { %4052 = vmatprep.mubr.f32.mxu1 %v17407_v47  ;;  %12620 = vmatpush3.bf16.msra.mxu1 %v12076_v17 }
  0xe7   : > { %10014 = vmatmul.mubr.msk.f32.gmra.mrb[30].mxu1 %vm276_vm1, %v14403_v42 }
 0x12e   : > { %v14517_v63 = vpop.f32.mrb[0].mxu1 }
 0x12f   : > { %v14519_v12 = vpop.f32.mrb[1].mxu1 }
 0x132   : > { %v14521_v19 = vpop.f32.mrb[2].mxu1 }
 0x133   : > { %v14523_v36 = vpop.f32.mrb[3].mxu1 }
 0x136   : > { %v14525_v15 = vpop.f32.mrb[4].mxu1 }
 0x137   : > { %v14527_v37 = vpop.f32.mrb[5].mxu1  ;;  %v2384_v54 = vadd.f32 %v2335_v30, %v14525_v15 }
 0x138   : > { %v2385_v55 = vadd.f32 %v2339_v34, %v14527_v37 }
 0x139   : > { %v2412_v27 = vmax.f32 %v2384_v54, 0.0 }
 0x13a   : > { %v14529_v46 = vpop.f32.mrb[6].mxu1  ;;  %v2413_v42 = vmax.f32 %v2385_v55, 0.0 }
 0x13b   : > { %v14531_v0 = vpop.f32.mrb[7].mxu1  ;;  %v2398_v33 = vadd.f32 %v2335_v30, %v14529_v46 }
 0x13c   : > { %v2399_v52 = vadd.f32 %v2339_v34, %v14531_v0 }
 0x13d   : > { %v2426_v49 = vmax.f32 %v2398_v33, 0.0 }
 0x13e   : > { %v14533_v29 = vpop.f32.mrb[8].mxu1  ;;  %v14535_v7 = vpop.f32.mrb[0].mxu0  ;;  %v2427_v37 = vmax.f32 %v2399_v52, 0.0 }
 0x13f   : > { %v14537_v11 = vpop.f32.mrb[9].mxu1  ;;  %v14539_v43 = vpop.f32.mrb[1].mxu0  ;;  %v2388_v59 = vadd.f32 %v2351_v35, %v14533_v29 }
 0x140   : > { %v2389_v46 = vadd.f32 %v2355_v60, %v14537_v11 }
 0x142   : > { %v14541_v56 = vpop.f32.mrb[10].mxu1  ;;  %v14543_v6 = vpop.f32.mrb[2].mxu0 }
 0x143   : > { %v14545_v57 = vpop.f32.mrb[11].mxu1  ;;  %v14547_v28 = vpop.f32.mrb[3].mxu0 }
 0x146   : > { %v14549_v20 = vpop.f32.mrb[4].mxu0 }
 0x147   : > { %v14551_v38 = vpop.f32.mrb[5].mxu0 }
 0x14a   : > { %v14553_v51 = vpop.f32.mrb[6].mxu0 }
 0x14b   : > { %v14555_v32 = vpop.f32.mrb[7].mxu0 }
 0x14e   : > { %v14557_v14 = vpop.f32.mrb[8].mxu0 }
 0x14f   : > { %v14559_v8 = vpop.f32.mrb[9].mxu0 }
 0x152   : > { %v14561_v13 = vpop.f32.mrb[10].mxu0 }
 0x153   : > { %v14563_v40 = vpop.f32.mrb[11].mxu0 }
 0x156   : > { %v14565_v26 = vpop.f32.mrb[12].mxu0 }
 0x157   : > { %v14567_v3 = vpop.f32.mrb[13].mxu0 }
 0x15a   : > { %v14569_v44 = vpop.f32.mrb[14].mxu0 }
 0x15b   : > { %v14571_v10 = vpop.f32.mrb[15].mxu0 }
 0x17e   : > { %v3817_v62 = vpop.f32.mrb[16].mxu0 }
 0x17f   : > { %v4093_v5 = vadd.f32 %v3817_v62, %v2335_v30  ;;  %v3819_v16 = vpop.f32.mrb[17].mxu0 }
 0x180   : > { %v4094_v25 = vadd.f32 %v3819_v16, %v2339_v34 }
 0x181   : > { %v4121_v41 = vmax.f32 %v4093_v5, 0.0  ;;  %v2416_v5 = vmax.f32 %v2388_v59, 0.0 }
 0x182   : > { %v4122_v53 = vmax.f32 %v4094_v25, 0.0  ;;  %v3823_v1 = vpop.f32.mrb[18].mxu0  ;;  %v2403_v25 = vadd.f32 %v2355_v60, %v14545_v57 }
 0x183   : > { %v14684_v2 = vmax.f32 %v2412_v27, %v4121_v41  ;;  %v4107_v23 = vadd.f32 %v3823_v1, %v2335_v30  ;;  %v3825_v24 = vpop.f32.mrb[19].mxu0  ;;  %v2402_v30 = vadd.f32 %v2351_v35, %v14541_v56 }
 0x184   : > { %v14686_v39 = vmax.f32 %v2413_v42, %v4122_v53  ;;  %v4108_v48 = vadd.f32 %v3825_v24, %v2339_v34  ;;  %v2417_v34 = vmax.f32 %v2389_v46, 0.0  ;;  %v14697_v53 = vsub.s32 0, %v14648_v45 }
 0x185   : > { %v4135_v15 = vmax.f32 %v4107_v23, 0.0  ;;  %v2430_v1 = vmax.f32 %v2402_v30, 0.0  ;;  %v14700_v23 = vsub.s32 1, %v14648_v45  ;;  %v2431_v24 = vmax.f32 %v2403_v25, 0.0 }
 0x186   : > { %v4136_v0 = vmax.f32 %v4108_v48, 0.0  ;;  %v3971_v9 = vpop.f32.mrb[20].mxu0  ;;  %v2311_v59 = vrot.slane %v14659_v50, %v14697_v53 }
 0x187   : > { %v4163_v21 = vmax.f32 %v2426_v49, %v4135_v15  ;;  %v4097_v17 = vadd.f32 %v3971_v9, %v2351_v35  ;;  %v3973_v54 = vpop.f32.mrb[21].mxu0  ;;  %v10018_v15 = vld [vmem:[%s17360_s3 + $0x58] sm:$0xff] }
 0x188   : > { %v4164_v55 = vmax.f32 %v2427_v37, %v4136_v0  ;;  %v4098_v62 = vadd.f32 %v3973_v54, %v2355_v60  ;;  %v2378_v46 = vadd.f32 %v2311_v59, %v14535_v7  ;;  %v2323_v7 = vrot.slane %v14659_v50, %v14676_v18 }
 0x189   : > { %4191 = vst [vmem:[#allocation4 + $0xa0] sm:$0x3f] %v4163_v21  ;;  %v4125_v16 = vmax.f32 %v4097_v17, 0.0 }
 0x18a   : > { %4192 = vst [vmem:[#allocation4 + $0xa8] sm:$0x3f] %v4164_v55  ;;  %v4126_v29 = vmax.f32 %v4098_v62, 0.0  ;;  %v3977_v27 = vpop.f32.mrb[22].mxu0  ;;  %v2319_v55 = vrot.slane %v14659_v50, %v14673_v4  ;;  %v2406_v62 = vmax.f32 %v2378_v46, 0.0 }
 0x18b   : > { %v14692_v33 = vmax.f32 %v2416_v5, %v4125_v16  ;;  %v4111_v11 = vadd.f32 %v3977_v27, %v2351_v35  ;;  %v3979_v41 = vpop.f32.mrb[23].mxu0  ;;  %v2315_v35 = vrot.slane %v14659_v50, %v14700_v23  ;;  %v2392_v5 = vadd.f32 %v2311_v59, %v14543_v6  ;;  %v10020_v6 = vld [vmem:[%s17360_s3 + $0x68] sm:$0xff] }
 0x18c   : > { %v14694_v42 = vmax.f32 %v2417_v34, %v4126_v29  ;;  %v4112_v52 = vadd.f32 %v3979_v41, %v2355_v60  ;;  %v10017_v60 = vld [vmem:[%s17360_s3 + $0x50] sm:$0xff]  ;;  %v10019_v41 = vld [vmem:[%s17360_s3 + $0x60] sm:$0xff] }
 0x18d   : > { %v4139_v56 = vmax.f32 %v4111_v11, 0.0  ;;  %v12080_v37 = vpack.c.bf16 %v10018_v15, %v10017_v60  ;;  %v2379_v0 = vadd.f32 %v2315_v35, %v14539_v43  ;;  %v2393_v43 = vadd.f32 %v2315_v35, %v14547_v28 }
 0x18e   : > { %v4140_v57 = vmax.f32 %v4112_v52, 0.0  ;;  %v2380_v28 = vadd.f32 %v2319_v55, %v14517_v63  ;;  %v14738_v60 = vsub.s32 5, %v14648_v45 }
 0x18f   : > { %v4167_v48 = vmax.f32 %v2430_v1, %v4139_v56  ;;  %12081 = vmatprep.subr.bf16.mxu0 %v12080_v37  ;;  %12617 = vmatprep.subr.bf16.mxu1 %v12080_v37  ;;  %v2407_v16 = vmax.f32 %v2379_v0, 0.0  ;;  %v12084_v56 = vpack.c.bf16 %v10020_v6, %v10019_v41  ;;  %v10021_v0 = vld [vmem:[%s17360_s3 + $0x70] sm:$0xff]  ;;  %v4459_v6 = vld [vmem:[%s17360_s3] sm:$0xff] }
 0x190   : > { %v4168_v49 = vmax.f32 %v2431_v24, %v4140_v57  ;;  %12083 = vmatpush3.bf16.msra.mxu0 %v12080_v37  ;;  %12621 = vmatpush3.bf16.msra.mxu1 %v12080_v37  ;;  %v2420_v24 = vmax.f32 %v2392_v5, 0.0  ;;  %v14732_v57 = vsub.s32 4, %v14648_v45 }
 0x191   : > { %4195 = vst [vmem:[#allocation4 + $0xc0] sm:$0x3f] %v4167_v48  ;;  %12085 = vmatprep.subr.bf16.mxu0 %v12084_v56  ;;  %12618 = vmatprep.subr.bf16.mxu1 %v12084_v56 }
 0x192   : > { %4196 = vst [vmem:[#allocation4 + $0xc8] sm:$0x3f] %v4168_v49  ;;  %v2381_v49 = vadd.f32 %v2323_v7, %v14519_v12  ;;  %v10022_v12 = vld [vmem:[%s17360_s3 + $0x78] sm:$0xff]  ;;  %v2327_v5 = vrot.slane %v14659_v50, %v14732_v57 }
 0x194   : > { %12087 = vmatpush3.bf16.msra.mxu0 %v12084_v56  ;;  %12622 = vmatpush3.bf16.msra.mxu1 %v12084_v56 }
 0x196   : > { %v3586_v9 = vpop.f32.mrb[12].mxu1 }
 0x197   : > { %v4087_v21 = vadd.f32 %v3586_v9, %v2311_v59  ;;  %v3588_v17 = vpop.f32.mrb[13].mxu1 }
 0x198   : > { %v4088_v54 = vadd.f32 %v3588_v17, %v2315_v35  ;;  %v12088_v17 = vpack.c.bf16 %v10022_v12, %v10021_v0 }
 0x199   : > { %v4115_v30 = vmax.f32 %v4087_v21, 0.0 }
 0x19a   : > { %v4116_v34 = vmax.f32 %v4088_v54, 0.0  ;;  %v3592_v25 = vpop.f32.mrb[14].mxu1  ;;  %v2408_v54 = vmax.f32 %v2380_v28, 0.0  ;;  %12089 = vmatprep.subr.bf16.mxu0 %v12088_v17  ;;  %12619 = vmatprep.subr.bf16.mxu1 %v12088_v17 }
 0x19b   : > { %v14720_v29 = vmax.f32 %v2406_v62, %v4115_v30  ;;  %v4101_v27 = vadd.f32 %v3592_v25, %v2311_v59  ;;  %v3594_v11 = vpop.f32.mrb[15].mxu1  ;;  %v2421_v59 = vmax.f32 %v2393_v43, 0.0  ;;  %v2394_v62 = vadd.f32 %v2319_v55, %v14521_v19  ;;  %12091 = vmatpush3.bf16.msra.mxu0 %v12088_v17  ;;  %12623 = vmatpush3.bf16.msra.mxu1 %v12088_v17 }
 0x19c   : > { %v14728_v52 = vmax.f32 %v2407_v16, %v4116_v34  ;;  %v4102_v1 = vadd.f32 %v3594_v11, %v2315_v35  ;;  %v2409_v16 = vmax.f32 %v2381_v49, 0.0  ;;  %v2395_v43 = vadd.f32 %v2323_v7, %v14523_v36  ;;  %v4460_v36 = vld [vmem:[%s17360_s3 + $0x8] sm:$0xff] }
 0x19d   : > { %v4129_v48 = vmax.f32 %v4101_v27, 0.0  ;;  %4238 = vrot.lane.b32.xlu0 %v14720_v29, %s13072_s21  ;;  %v2331_v34 = vrot.slane %v14659_v50, %v14738_v60  ;;  %v14764_v56 = vpack.c.bf16 %v4460_v36, %v4459_v6  ;;  %v2422_v28 = vmax.f32 %v2394_v62, 0.0 }
 0x19e   : > { %v4130_v15 = vmax.f32 %v4102_v1, 0.0  ;;  %v3663_v35 = vpop.f32.mrb[16].mxu1  ;;  %4253 = vrot.lane.b32.xlu1 %v14728_v52, %s13072_s21  ;;  %v2347_v62 = vrot.slane %v14670_v61, %v14700_v23 }
 0x19f   : > { %v4157_v63 = vmax.f32 %v2420_v24, %v4129_v48  ;;  %v4089_v37 = vadd.f32 %v3663_v35, %v2319_v55  ;;  %v3665_v46 = vpop.f32.mrb[17].mxu1  ;;  %v2382_v24 = vadd.f32 %v2327_v5, %v14549_v20  ;;  %v2423_v48 = vmax.f32 %v2395_v43, 0.0  ;;  %12093 = vmatprep.subr.bf16.mxu0 %v14764_v56 }
 0x1a0   : > { %v4158_v9 = vmax.f32 %v2421_v59, %v4130_v15  ;;  %v4090_v21 = vadd.f32 %v3665_v46, %v2323_v7  ;;  %v2383_v49 = vadd.f32 %v2331_v34, %v14551_v38  ;;  %v2343_v20 = vrot.slane %v14670_v61, %v14697_v53 }
 0x1a1   : > { %4185 = vst [vmem:[#allocation4 + $0x70] sm:$0x3f] %v4157_v63  ;;  %v4117_v30 = vmax.f32 %v4089_v37, 0.0  ;;  %v2410_v12 = vmax.f32 %v2382_v24, 0.0 }
 0x1a2   : > { %4186 = vst [vmem:[#allocation4 + $0x78] sm:$0x3f] %v4158_v9  ;;  %v4118_v25 = vmax.f32 %v4090_v21, 0.0  ;;  %v3669_v27 = vpop.f32.mrb[18].mxu1  ;;  %v2396_v9 = vadd.f32 %v2327_v5, %v14553_v51  ;;  %v2411_v17 = vmax.f32 %v2383_v49, 0.0  ;;  %v2386_v6 = vadd.f32 %v2343_v20, %v14557_v14 }
 0x1a3   : > { %v14754_v11 = vmax.f32 %v2408_v54, %v4117_v30  ;;  %v4103_v41 = vadd.f32 %v3669_v27, %v2319_v55  ;;  %v3671_v19 = vpop.f32.mrb[19].mxu1  ;;  %v2397_v54 = vadd.f32 %v2331_v34, %v14555_v32  ;;  %v2359_v14 = vrot.slane %v14670_v61, %v14732_v57 }
 0x1a4   : > { %v14762_v1 = vmax.f32 %v2409_v16, %v4118_v25  ;;  %v4104_v50 = vadd.f32 %v3671_v19, %v2323_v7  ;;  %v2424_v19 = vmax.f32 %v2396_v9, 0.0 }
 0x1a5   : > { %v4131_v55 = vmax.f32 %v4103_v41, 0.0  ;;  %v2425_v36 = vmax.f32 %v2397_v54, 0.0 }
 0x1a6   : > { %v4132_v59 = vmax.f32 %v4104_v50, 0.0  ;;  %v3740_v15 = vpop.f32.mrb[20].mxu1  ;;  %v2387_v50 = vadd.f32 %v2347_v62, %v14559_v8 }
 0x1a7   : > { %v4159_v35 = vmax.f32 %v2422_v28, %v4131_v55  ;;  %v4091_v63 = vadd.f32 %v3740_v15, %v2327_v5  ;;  %v3742_v37 = vpop.f32.mrb[21].mxu1 }
 0x1a8   : > { %v4160_v46 = vmax.f32 %v2423_v48, %v4132_v59  ;;  %v4092_v0 = vadd.f32 %v3742_v37, %v2331_v34  ;;  %v14769_v7 = vld [vmem:[#allocation4 + $0x70] sm:$0x3f]  ;;  %v2415_v8 = vmax.f32 %v2387_v50, 0.0  ;;  %v2401_v37 = vadd.f32 %v2347_v62, %v14563_v40 }
 0x1a9   : > { %4187 = vst [vmem:[#allocation4 + $0x80] sm:$0x3f] %v4159_v35  ;;  %v4119_v21 = vmax.f32 %v4091_v63, 0.0  ;;  %4240 = vrot.lane.b32.xlu0 %v14769_v7, %s13072_s21  ;;  %v14776_v38 = vld [vmem:[#allocation4 + $0x78] sm:$0x3f]  ;;  %v2400_v35 = vadd.f32 %v2343_v20, %v14561_v13 }
 0x1aa   : > { %4188 = vst [vmem:[#allocation4 + $0x88] sm:$0x3f] %v4160_v46  ;;  %v4120_v30 = vmax.f32 %v4092_v0, 0.0  ;;  %v3746_v16 = vpop.f32.mrb[22].mxu1  ;;  %4255 = vrot.lane.b32.xlu1 %v14776_v38, %s13072_s21  ;;  %v2363_v46 = vrot.slane %v14670_v61, %v14738_v60  ;;  %v2429_v40 = vmax.f32 %v2401_v37, 0.0 }
 0x1ab   : > { %v14783_v51 = vmax.f32 %v2410_v12, %v4119_v21  ;;  %v4105_v43 = vadd.f32 %v3746_v16, %v2327_v5  ;;  %v3748_v25 = vpop.f32.mrb[23].mxu1  ;;  %v2428_v16 = vmax.f32 %v2400_v35, 0.0 }
 0x1ac   : > { %v14785_v27 = vmax.f32 %v2411_v17, %v4120_v30  ;;  %v4106_v41 = vadd.f32 %v3748_v25, %v2331_v34  ;;  %v2414_v34 = vmax.f32 %v2386_v6, 0.0  ;;  %v2391_v61 = vadd.f32 %v2363_v46, %v14567_v3 }
 0x1ad   : > { %v4133_v32 = vmax.f32 %v4105_v43, 0.0  ;;  %4267 = vrot.lane.b32.xlu0 %v14754_v11, %s13072_s21  ;;  %v2390_v43 = vadd.f32 %v2359_v14, %v14565_v26 }
 0x1ae   : > { %v4134_v28 = vmax.f32 %v4106_v41, 0.0  ;;  %v3894_v24 = vpop.f32.mrb[24].mxu1  ;;  %v2419_v3 = vmax.f32 %v2391_v61, 0.0 }
 0x1af   : > { %v4161_v55 = vmax.f32 %v2424_v19, %v4133_v32  ;;  %v4095_v48 = vadd.f32 %v3894_v24, %v2343_v20  ;;  %v3896_v49 = vpop.f32.mrb[25].mxu1  ;;  %v2418_v26 = vmax.f32 %v2390_v43, 0.0  ;;  %v14863_v43 = vld [vmem:[#allocation4 + $0xc8] sm:$0x3f] }
 0x1b0   : > { %v4162_v5 = vmax.f32 %v2425_v36, %v4134_v28  ;;  %v4096_v59 = vadd.f32 %v3896_v49, %v2347_v62  ;;  %v14791_v15 = vld [vmem:[#allocation4 + $0x80] sm:$0x3f]  ;;  %v2404_v28 = vadd.f32 %v2359_v14, %v14569_v44 }
 0x1b1   : > { %4189 = vst [vmem:[#allocation4 + $0x90] sm:$0x3f] %v4161_v55  ;;  %v4123_v63 = vmax.f32 %v4095_v48, 0.0  ;;  %4281 = vrot.lane.b32.xlu0 %v14762_v1, %s13072_s21  ;;  %4269 = vrot.lane.b32.xlu1 %v14791_v15, %s13072_s21  ;;  %v14807_v30 = vld [vmem:[#allocation4 + $0x88] sm:$0x3f]  ;;  %v2405_v55 = vadd.f32 %v2363_v46, %v14571_v10 }
 0x1b2   : > { %4190 = vst [vmem:[#allocation4 + $0x98] sm:$0x3f] %v4162_v5  ;;  %v4124_v0 = vmax.f32 %v4096_v59, 0.0  ;;  %v3900_v13 = vpop.f32.mrb[26].mxu1 }
 0x1b3   : > { %v14803_v12 = vmax.f32 %v2414_v34, %v4123_v63  ;;  %v4109_v9 = vadd.f32 %v3900_v13, %v2343_v20  ;;  %v3902_v21 = vpop.f32.mrb[27].mxu1  ;;  %v2433_v10 = vmax.f32 %v2405_v55, 0.0 }
 0x1b4   : > { %v14805_v17 = vmax.f32 %v2415_v8, %v4124_v0  ;;  %v4110_v54 = vadd.f32 %v3902_v21, %v2347_v62  ;;  %v2432_v8 = vmax.f32 %v2404_v28, 0.0  ;;  %v14833_v21 = vld [vmem:[#allocation4 + $0xa0] sm:$0x3f]  ;;  %v4461_v28 = vld [vmem:[%s17360_s3 + $0x10] sm:$0xff] }
 0x1b5   : > { %v4137_v25 = vmax.f32 %v4109_v9, 0.0  ;;  %4283 = vrot.lane.b32.xlu1 %v14807_v30, %s13072_s21  ;;  %4295 = vrot.lane.b32.xlu0 %v14783_v51, %s13072_s21 }
 0x1b6   : > { %v4138_v20 = vmax.f32 %v4110_v54, 0.0  ;;  %v4048_v41 = vpop.f32.mrb[28].mxu1 }
 0x1b7   : > { %v4165_v19 = vmax.f32 %v2428_v16, %v4137_v25  ;;  %v4099_v6 = vadd.f32 %v4048_v41, %v2359_v14  ;;  %v4050_v62 = vpop.f32.mrb[29].mxu1  ;;  %v14857_v16 = vld [vmem:[#allocation4 + $0xc0] sm:$0x3f] }
 0x1b8   : > { %v4166_v32 = vmax.f32 %v2429_v40, %v4138_v20  ;;  %v4100_v36 = vadd.f32 %v4050_v62, %v2363_v46  ;;  %v14815_v50 = vld [vmem:[#allocation4 + $0x90] sm:$0x3f] }
 0x1b9   : > { %4193 = vst [vmem:[#allocation4 + $0xb0] sm:$0x3f] %v4165_v19  ;;  %v4127_v24 = vmax.f32 %v4099_v6, 0.0  ;;  %4309 = vrot.lane.b32.xlu0 %v14785_v27, %s13072_s21  ;;  %4297 = vrot.lane.b32.xlu1 %v14815_v50, %s13072_s21  ;;  %v14827_v63 = vld [vmem:[#allocation4 + $0x98] sm:$0x3f] }
 0x1ba   : > { %4194 = vst [vmem:[#allocation4 + $0xb8] sm:$0x3f] %v4166_v32  ;;  %v4128_v48 = vmax.f32 %v4100_v36, 0.0  ;;  %v4054_v49 = vpop.f32.mrb[30].mxu1 }
 0x1bb   : > { %v14823_v5 = vmax.f32 %v2418_v26, %v4127_v24  ;;  %v4113_v59 = vadd.f32 %v4054_v49, %v2359_v14  ;;  %v4056_v34 = vpop.f32.mrb[31].mxu1  ;;  %v14839_v14 = vld [vmem:[#allocation4 + $0xa8] sm:$0x3f]  ;;  %v4462_v24 = vld [vmem:[%s17360_s3 + $0x18] sm:$0xff] }
 0x1bc   : > { %v14825_v35 = vmax.f32 %v2419_v3, %v4128_v48  ;;  %v4114_v44 = vadd.f32 %v4056_v34, %v2363_v46  ;;  %v12096_v48 = vpack.c.bf16 %v4462_v24, %v4461_v28  ;;  %v10081_v28 = vld [vmem:[%s17360_s3 + $0x90] sm:$0xff] }
 0x1bd   : > { %v4141_v37 = vmax.f32 %v4113_v59, 0.0  ;;  %4311 = vrot.lane.b32.xlu1 %v14827_v63, %s13072_s21  ;;  %4323 = vrot.lane.b32.xlu0 %v14684_v2, %s13072_s21  ;;  %v4464_v59 = vld [vmem:[%s17360_s3 + $0x28] sm:$0xff] }
 0x1be   : > { %v4142_v0 = vmax.f32 %v4114_v44, 0.0 }
 0x1bf   : > { %v4169_v13 = vmax.f32 %v2432_v8, %v4141_v37 }
 0x1c0   : > { %v4170_v9 = vmax.f32 %v2433_v10, %v4142_v0  ;;  %v14845_v46 = vld [vmem:[#allocation4 + $0xb0] sm:$0x3f] }
 0x1c1   : > { %4197 = vst [vmem:[#allocation4 + $0xd0] sm:$0x3f] %v4169_v13  ;;  %4337 = vrot.lane.b32.xlu0 %v14686_v39, %s13072_s21  ;;  %4325 = vrot.lane.b32.xlu1 %v14833_v21, %s13072_s21  ;;  %v14851_v54 = vld [vmem:[#allocation4 + $0xb8] sm:$0x3f]  ;;  %v4465_v10 = vld [vmem:[%s17360_s3 + $0x30] sm:$0xff] }
 0x1c2   : > { %4198 = vst [vmem:[#allocation4 + $0xd8] sm:$0x3f] %v4170_v9 }
 0x1c5   : > { %4351 = vrot.lane.b32.xlu0 %v14803_v12, %s13072_s21  ;;  %4339 = vrot.lane.b32.xlu1 %v14839_v14, %s13072_s21 }
 0x1c8   : > { %v14869_v25 = vld [vmem:[#allocation4 + $0xd0] sm:$0x3f] }
 0x1c9   : > { %4365 = vrot.lane.b32.xlu0 %v14805_v17, %s13072_s21  ;;  %4353 = vrot.lane.b32.xlu1 %v14845_v46, %s13072_s21  ;;  %v14875_v40 = vld [vmem:[#allocation4 + $0xd8] sm:$0x3f] }
 0x1cd   : > { %4367 = vrot.lane.b32.xlu1 %v14851_v54, %s13072_s21  ;;  %4379 = vrot.lane.b32.xlu0 %v14692_v33, %s13072_s21 }
 0x1d1   : > { %4393 = vrot.lane.b32.xlu0 %v14694_v42, %s13072_s21  ;;  %4381 = vrot.lane.b32.xlu1 %v14857_v16, %s13072_s21 }
 0x1d5   : > { %4407 = vrot.lane.b32.xlu0 %v14823_v5, %s13072_s21  ;;  %4395 = vrot.lane.b32.xlu1 %v14863_v43, %s13072_s21 }
 0x1d9   : > { %4421 = vrot.lane.b32.xlu0 %v14825_v35, %s13072_s21  ;;  %4409 = vrot.lane.b32.xlu1 %v14869_v25, %s13072_s21 }
 0x1dd   : > { %4423 = vrot.lane.b32.xlu1 %v14875_v40, %s13072_s21 }
 0x20f   : > { %v4239_v61 = vpop.permute.xlu0 %4238 }
 0x210   : > { %v4244_v20 = vmax.f32 %v14720_v29, %v4239_v61  ;;  %v4254_v41 = vpop.permute.xlu1 %4253 }
 0x211   : > { %v4259_v19 = vmax.f32 %v14728_v52, %v4254_v41  ;;  %v10079_v41 = vld [vmem:[%s17360_s3 + $0x80] sm:$0xff] }
 0x212   : > { %4246 = vst.msk [vmem:[#allocation5 + $0x11] sm:$0xff] %vm4199_vm5, %v4244_v20 }
 0x213   : > { %4261 = vst.msk [vmem:[#allocation5 + $0x21] sm:$0xff] %vm4199_vm5, %v4259_v19 }
 0x219   : > { %v14883_v6 = vld [vmem:[#allocation5 + $0x10] sm:$0xff] }
 0x21a   : > { %11131 = vmatprep.mubr.msk.f32.mxu0 %vm4199_vm5, %v14883_v6 }
 0x21b   : > { %v4241_v62 = vpop.permute.xlu0 %4240 }
 0x21c   : > { %v4245_v32 = vmax.f32 %v14769_v7, %v4241_v62  ;;  %v4256_v36 = vpop.permute.xlu1 %4255 }
 0x21d   : > { %v4260_v26 = vmax.f32 %v14776_v38, %v4256_v36 }
 0x21e   : > { %4248 = vst.msk [vmem:[#allocation5 + $0x19] sm:$0x3f] %vm4247_vm6, %v4245_v32  ;;  %v10080_v32 = vld [vmem:[%s17360_s3 + $0x88] sm:$0xff] }
 0x21f   : > { %4262 = vst.msk [vmem:[#allocation5 + $0x29] sm:$0x3f] %vm4247_vm6, %v4260_v26  ;;  %v4268_v29 = vpop.permute.xlu0 %4267 }
 0x220   : > { %v4273_v52 = vmax.f32 %v14754_v11, %v4268_v29  ;;  %v4463_v11 = vld [vmem:[%s17360_s3 + $0x20] sm:$0xff] }
 0x221   : > { %v12100_v37 = vpack.c.bf16 %v4464_v59, %v4463_v11  ;;  %v4431_v29 = vld [vmem:[#allocation5] sm:$0xff] }
 0x222   : > { %4275 = vst.msk [vmem:[#allocation5 + $0x31] sm:$0xff] %vm4199_vm5, %v4273_v52  ;;  %v12108_v52 = vpack.c.bf16 %v10080_v32, %v10079_v41 }
 0x223   : > { %v4282_v7 = vpop.permute.xlu0 %4281  ;;  %v4270_v3 = vpop.permute.xlu1 %4269 }
 0x224   : > { %v4287_v38 = vmax.f32 %v14762_v1, %v4282_v7  ;;  %v4274_v55 = vmax.f32 %v14791_v15, %v4270_v3  ;;  %v14913_v1 = vld [vmem:[#allocation5 + $0x20] sm:$0xff]  ;;  %v10082_v3 = vld [vmem:[%s17360_s3 + $0x98] sm:$0xff] }
 0x225   : > { %v14901_v49 = vld [vmem:[#allocation5 + $0x18] sm:$0xff]  ;;  %v12112_v11 = vpack.c.bf16 %v10082_v3, %v10081_v28 }
 0x226   : > { %4289 = vst.msk [vmem:[#allocation5 + $0x41] sm:$0xff] %vm4199_vm5, %v4287_v38  ;;  %11132 = vmatmul.mubr.msk.f32.vlgmr.msra.gmra.mrb[24].mxu0 %vm4199_vm5, %v14901_v49  ;;  %v14923_v0 = vld [vmem:[#allocation5 + $0x28] sm:$0xff] }
 0x227   : > { %4276 = vst.msk [vmem:[#allocation5 + $0x39] sm:$0x3f] %vm4247_vm6, %v4274_v55  ;;  %12095 = vmatpush3.bf16.msra.mxu0 %v14764_v56  ;;  %11134 = vmatprep.mubr.msk.f32.mxu0 %vm4199_vm5, %v14913_v1  ;;  %v4284_v15 = vpop.permute.xlu1 %4283  ;;  %v4296_v34 = vpop.permute.xlu0 %4295  ;;  %v4466_v56 = vld [vmem:[%s17360_s3 + $0x38] sm:$0xff]  ;;  %v4432_v38 = vld [vmem:[#allocation5 + $0x8] sm:$0xff] }
 0x228   : > { %v4288_v44 = vmax.f32 %v14807_v30, %v4284_v15  ;;  %v4301_v8 = vmax.f32 %v14783_v51, %v4296_v34  ;;  %12097 = vmatprep.subr.bf16.mxu0 %v12096_v48  ;;  %v12104_v20 = vpack.c.bf16 %v4466_v56, %v4465_v10 }
 0x229   : > { %v14925_v13 = vld [vmem:[#allocation5 + $0x30] sm:$0xff] }
 0x22a   : > { %4290 = vst.msk [vmem:[#allocation5 + $0x49] sm:$0x3f] %vm4247_vm6, %v4288_v44  ;;  %11135 = vmatmul.mubr.msk.f32.gmra.mrb[26].mxu0 %vm4199_vm5, %v14923_v0 }
 0x22b   : > { %4303 = vst.msk [vmem:[#allocation5 + $0x51] sm:$0xff] %vm4199_vm5, %v4301_v8  ;;  %12099 = vmatpush3.bf16.msra.mxu0 %v12096_v48  ;;  %11137 = vmatprep.mubr.msk.f32.mxu0 %vm4199_vm5, %v14925_v13  ;;  %v4310_v51 = vpop.permute.xlu0 %4309  ;;  %v4298_v30 = vpop.permute.xlu1 %4297 }
 0x22c   : > { %v4315_v9 = vmax.f32 %v14785_v27, %v4310_v51  ;;  %v4302_v61 = vmax.f32 %v14815_v50, %v4298_v30  ;;  %12101 = vmatprep.subr.bf16.mxu0 %v12100_v37 }
 0x22d   : > { %v14943_v62 = vld [vmem:[#allocation5 + $0x40] sm:$0xff] }
 0x22e   : > { %v14941_v19 = vld [vmem:[#allocation5 + $0x38] sm:$0xff]  ;;  %4317 = vst.msk [vmem:[#allocation5 + $0x61] sm:$0xff] %vm4199_vm5, %v4315_v9 }
 0x22f   : > { %4304 = vst.msk [vmem:[#allocation5 + $0x59] sm:$0x3f] %vm4247_vm6, %v4302_v61  ;;  %11138 = vmatmul.mubr.msk.f32.gmra.mrb[28].mxu0 %vm4199_vm5, %v14941_v19  ;;  %v4312_v27 = vpop.permute.xlu1 %4311  ;;  %v4324_v50 = vpop.permute.xlu0 %4323 }
 0x230   : > { %12103 = vmatpush3.bf16.msra.mxu0 %v12100_v37  ;;  %11140 = vmatprep.mubr.msk.f32.mxu0 %vm4199_vm5, %v14943_v62  ;;  %v4316_v36 = vmax.f32 %v14827_v63, %v4312_v27  ;;  %v4329_v26 = vmax.f32 %v14684_v2, %v4324_v50 }
 0x231   : > { %12105 = vmatprep.subr.bf16.mxu0 %v12104_v20  ;;  %v14959_v24 = vld [vmem:[#allocation5 + $0x48] sm:$0xff] }
 0x232   : > { %v14961_v7 = vld [vmem:[#allocation5 + $0x50] sm:$0xff]  ;;  %4318 = vst.msk [vmem:[#allocation5 + $0x69] sm:$0x3f] %vm4247_vm6, %v4316_v36 }
 0x233   : > { %4331 = vst.msk [vmem:[#allocation5 + $0x71] sm:$0xff] %vm4199_vm5, %v4329_v26  ;;  %11141 = vmatmul.mubr.msk.f32.gmra.mrb[30].mxu0 %vm4199_vm5, %v14959_v24  ;;  %11143 = vmatprep.mubr.msk.f32.mxu1 %vm4199_vm5, %v14961_v7  ;;  %v4338_v2 = vpop.permute.xlu0 %4337  ;;  %v4326_v63 = vpop.permute.xlu1 %4325 }
 0x234   : > { %12107 = vmatpush3.bf16.msra.mxu0 %v12104_v20  ;;  %11189 = vmatprep.mubr.msk.f32.mxu0 %vm4199_vm5, %v4431_v29  ;;  %v4343_v55 = vmax.f32 %v14686_v39, %v4338_v2  ;;  %v4330_v48 = vmax.f32 %v14833_v21, %v4326_v63  ;;  %v10083_v39 = vld [vmem:[%s17360_s3 + $0xa0] sm:$0xff]  ;;  %v10084_v21 = vld [vmem:[%s17360_s3 + $0xa8] sm:$0xff] }
 0x235   : > { %12109 = vmatprep.subr.bf16.mxu0 %v12108_v52  ;;  %v14977_v15 = vld [vmem:[#allocation5 + $0x60] sm:$0xff]  ;;  %v12116_v51 = vpack.c.bf16 %v10084_v21, %v10083_v39 }
 0x236   : > { %v14975_v59 = vld [vmem:[#allocation5 + $0x58] sm:$0xff]  ;;  %4345 = vst.msk [vmem:[#allocation5 + $0x81] sm:$0xff] %vm4199_vm5, %v4343_v55 }
 0x237   : > { %4332 = vst.msk [vmem:[#allocation5 + $0x79] sm:$0x3f] %vm4247_vm6, %v4330_v48  ;;  %11144 = vmatmul.mubr.msk.f32.vlgmr.msra.gmra.mrb[32].mxu1 %vm4199_vm5, %v14975_v59  ;;  %11190 = vmatmul.mubr.msk.f32.vlgmr.msra.gmra.mrb[24].mxu0 %vm4199_vm5, %v4432_v38  ;;  %v4352_v34 = vpop.permute.xlu0 %4351  ;;  %v4340_v44 = vpop.permute.xlu1 %4339 }
 0x238   : > { %12111 = vmatpush3.bf16.msra.mxu0 %v12108_v52  ;;  %11146 = vmatprep.mubr.msk.f32.mxu1 %vm4199_vm5, %v14977_v15  ;;  %v4357_v8 = vmax.f32 %v14803_v12, %v4352_v34  ;;  %v4344_v37 = vmax.f32 %v14839_v14, %v4340_v44  ;;  %v10085_v12 = vld [vmem:[%s17360_s3 + $0xb0] sm:$0xff]  ;;  %v10086_v14 = vld [vmem:[%s17360_s3 + $0xb8] sm:$0xff] }
 0x239   : > { %11192 = vmatprep.mubr.msk.f32.mxu0 %vm4199_vm5, %v14883_v6  ;;  %12113 = vmatprep.subr.bf16.mxu0 %v12112_v11  ;;  %v14996_v10 = vld [vmem:[#allocation5 + $0x68] sm:$0xff]  ;;  %v12120_v41 = vpack.c.bf16 %v10086_v14, %v10085_v12  ;;  %v10117_v14 = vld [vmem:[%s17360_s3 + $0xd0] sm:$0xff] }
 0x23a   : > { %v14998_v56 = vld [vmem:[#allocation5 + $0x70] sm:$0xff]  ;;  %4359 = vst.msk [vmem:[#allocation5 + $0x91] sm:$0xff] %vm4199_vm5, %v4357_v8 }
 0x23b   : > { %4346 = vst.msk [vmem:[#allocation5 + $0x89] sm:$0x3f] %vm4247_vm6, %v4344_v37  ;;  %11147 = vmatmul.mubr.msk.f32.gmra.mrb[34].mxu1 %vm4199_vm5, %v14996_v10  ;;  %11193 = vmatmul.mubr.msk.f32.gmra.mrb[26].mxu0 %vm4199_vm5, %v14901_v49  ;;  %v4366_v6 = vpop.permute.xlu0 %4365  ;;  %v4354_v30 = vpop.permute.xlu1 %4353 }
 0x23c   : > { %11149 = vmatprep.mubr.msk.f32.mxu1 %vm4199_vm5, %v14998_v56  ;;  %11195 = vmatprep.mubr.msk.f32.mxu0 %vm4199_vm5, %v14913_v1  ;;  %v4371_v9 = vmax.f32 %v14805_v17, %v4366_v6  ;;  %v4358_v49 = vmax.f32 %v14845_v46, %v4354_v30  ;;  %v10115_v17 = vld [vmem:[%s17360_s3 + $0xc0] sm:$0xff]  ;;  %v10116_v46 = vld [vmem:[%s17360_s3 + $0xc8] sm:$0xff]  ;;  %v10118_v6 = vld [vmem:[%s17360_s3 + $0xd8] sm:$0xff] }
 0x23d   : > { %12115 = vmatpush3.bf16.msra.mxu0 %v12112_v11  ;;  %v15020_v20 = vld [vmem:[#allocation5 + $0x80] sm:$0xff]  ;;  %v15044_v52 = vpack.c.bf16 %v10116_v46, %v10115_v17  ;;  %v12128_v30 = vpack.c.bf16 %v10118_v6, %v10117_v14  ;;  %v10122_v17 = vld [vmem:[%s17360_s3 + $0xf8] sm:$0xff]  ;;  %v10152_v46 = vld [vmem:[%s17360_s3 + $0x108] sm:$0xff] }
 0x23e   : > { %v15018_v61 = vld [vmem:[#allocation5 + $0x78] sm:$0xff]  ;;  %12117 = vmatprep.subr.bf16.mxu0 %v12116_v51  ;;  %4373 = vst.msk [vmem:[#allocation5 + $0xa1] sm:$0xff] %vm4199_vm5, %v4371_v9  ;;  %v10119_v9 = vld [vmem:[%s17360_s3 + $0xe0] sm:$0xff]  ;;  %v10189_v6 = vld [vmem:[%s17360_s3 + $0x150] sm:$0xff] }
 0x23f   : > { %4360 = vst.msk [vmem:[#allocation5 + $0x99] sm:$0x3f] %vm4247_vm6, %v4358_v49  ;;  %11150 = vmatmul.mubr.msk.f32.gmra.mrb[36].mxu1 %vm4199_vm5, %v15018_v61  ;;  %11196 = vmatmul.mubr.msk.f32.gmra.mrb[28].mxu0 %vm4199_vm5, %v14923_v0  ;;  %v4368_v32 = vpop.permute.xlu1 %4367  ;;  %v4380_v27 = vpop.permute.xlu0 %4379  ;;  %v10120_v49 = vld [vmem:[%s17360_s3 + $0xe8] sm:$0xff] }
 0x240   : > { %11152 = vmatprep.mubr.msk.f32.mxu1 %vm4199_vm5, %v15020_v20  ;;  %11198 = vmatprep.mubr.msk.f32.mxu0 %vm4199_vm5, %v14925_v13  ;;  %v4372_v50 = vmax.f32 %v14851_v54, %v4368_v32  ;;  %v4385_v36 = vmax.f32 %v14692_v33, %v4380_v27  ;;  %v15233_v32 = vld [vmem:[#allocation5 + $0x11] sm:$0xff] }
 0x241   : > { %12119 = vmatpush3.bf16.msra.mxu0 %v12116_v51  ;;  %v15042_v29 = vld [vmem:[#allocation5 + $0x90] sm:$0xff] }
 0x242   : > { %v15040_v26 = vld [vmem:[#allocation5 + $0x88] sm:$0xff]  ;;  %12121 = vmatprep.subr.bf16.mxu0 %v12120_v41  ;;  %4374 = vst.msk [vmem:[#allocation5 + $0xa9] sm:$0x3f] %vm4247_vm6, %v4372_v50  ;;  %v15237_v50 = vld [vmem:[#allocation5 + $0x19] sm:$0xff] }
 0x243   : > { %4387 = vst.msk [vmem:[#allocation5 + $0xb1] sm:$0xff] %vm4199_vm5, %v4385_v36  ;;  %11153 = vmatmul.mubr.msk.f32.gmra.mrb[38].mxu1 %vm4199_vm5, %v15040_v26  ;;  %11199 = vmatmul.mubr.msk.f32.gmra.mrb[30].mxu0 %vm4199_vm5, %v14941_v19  ;;  %v4394_v33 = vpop.permute.xlu0 %4393  ;;  %v4382_v54 = vpop.permute.xlu1 %4381  ;;  %v10157_v36 = vld [vmem:[%s17360_s3 + $0x130] sm:$0xff] }
 0x244   : > { %11155 = vmatprep.mubr.msk.f32.mxu1 %vm4199_vm5, %v15042_v29  ;;  %11201 = vmatprep.mubr.msk.f32.mxu0 %vm4199_vm5, %v14943_v62  ;;  %v4399_v28 = vmax.f32 %v14694_v42, %v4394_v33  ;;  %v4386_v3 = vmax.f32 %v14857_v16, %v4382_v54  ;;  %v15251_v33 = vld [vmem:[#allocation5 + $0x29] sm:$0xff]  ;;  %v10187_v54 = vld [vmem:[%s17360_s3 + $0x140] sm:$0xff] }
 0x245   : > { %12123 = vmatpush3.bf16.msra.mxu0 %v12120_v41  ;;  %v15060_v63 = vld [vmem:[#allocation5 + $0xa0] sm:$0xff]  ;;  %v12132_v41 = vpack.c.bf16 %v10120_v49, %v10119_v9 }
 0x246   : > { %v15058_v2 = vld [vmem:[#allocation5 + $0x98] sm:$0xff]  ;;  %12125 = vmatprep.subr.bf16.mxu0 %v15044_v52  ;;  %4401 = vst.msk [vmem:[#allocation5 + $0xc1] sm:$0xff] %vm4199_vm5, %v4399_v28  ;;  %v10188_v28 = vld [vmem:[%s17360_s3 + $0x148] sm:$0xff]  ;;  %v10191_v49 = vld [vmem:[%s17360_s3 + $0x160] sm:$0xff] }
 0x247   : > { %4388 = vst.msk [vmem:[#allocation5 + $0xb9] sm:$0x3f] %vm4247_vm6, %v4386_v3  ;;  %11156 = vmatmul.mubr.msk.f32.gmra.mrb[40].mxu1 %vm4199_vm5, %v15058_v2  ;;  %11202 = vmatmul.mubr.msk.f32.gmra.mrb[32].mxu0 %vm4199_vm5, %v14959_v24  ;;  %v4408_v42 = vpop.permute.xlu0 %4407  ;;  %v4396_v16 = vpop.permute.xlu1 %4395  ;;  %v15261_v3 = vld [vmem:[#allocation5 + $0x31] sm:$0xff] }
 0x248   : > { %11158 = vmatprep.mubr.msk.f32.mxu1 %vm4199_vm5, %v15060_v63  ;;  %11204 = vmatprep.mubr.msk.f32.mxu0 %vm4199_vm5, %v14961_v7  ;;  %v4413_v38 = vmax.f32 %v14823_v5, %v4408_v42  ;;  %v4400_v55 = vmax.f32 %v14863_v43, %v4396_v16  ;;  %v15269_v42 = vld [vmem:[#allocation5 + $0x41] sm:$0xff]  ;;  %v15273_v16 = vld [vmem:[#allocation5 + $0x49] sm:$0xff] }
 0x249   : > { %v15075_v48 = vld [vmem:[#allocation5 + $0xa8] sm:$0xff] }
 0x24a   : > { %v15077_v11 = vld [vmem:[#allocation5 + $0xb0] sm:$0xff]  ;;  %4415 = vst.msk [vmem:[#allocation5 + $0xd1] sm:$0xff] %vm4199_vm5, %v4413_v38 }
 0x24b   : > { %4402 = vst.msk [vmem:[#allocation5 + $0xc9] sm:$0x3f] %vm4247_vm6, %v4400_v55  ;;  %11159 = vmatmul.mubr.msk.f32.gmra.mrb[42].mxu1 %vm4199_vm5, %v15075_v48  ;;  %11205 = vmatmul.mubr.msk.f32.gmra.mrb[34].mxu0 %vm4199_vm5, %v14975_v59  ;;  %v4422_v5 = vpop.permute.xlu0 %4421  ;;  %v4410_v43 = vpop.permute.xlu1 %4409  ;;  %v15277_v38 = vld [vmem:[#allocation5 + $0x51] sm:$0xff]  ;;  %v15281_v55 = vld [vmem:[#allocation5 + $0x59] sm:$0xff] }
 0x24c   : > { %11161 = vmatprep.mubr.msk.f32.mxu1 %vm4199_vm5, %v15077_v11  ;;  %11207 = vmatprep.mubr.msk.f32.mxu0 %vm4199_vm5, %v14977_v15  ;;  %v4427_v39 = vmax.f32 %v14825_v35, %v4422_v5  ;;  %v4414_v21 = vmax.f32 %v14869_v25, %v4410_v43  ;;  %v15293_v5 = vld [vmem:[#allocation5 + $0x71] sm:$0xff]  ;;  %v15297_v43 = vld [vmem:[#allocation5 + $0x79] sm:$0xff] }
 0x24d   : > { %v15093_v44 = vld [vmem:[#allocation5 + $0xc0] sm:$0xff] }
 0x24e   : > { %v15091_v34 = vld [vmem:[#allocation5 + $0xb8] sm:$0xff]  ;;  %4429 = vst.msk [vmem:[#allocation5 + $0xe1] sm:$0xff] %vm4199_vm5, %v4427_v39  ;;  %v15301_v39 = vld [vmem:[#allocation5 + $0x81] sm:$0xff] }
 0x24f   : > { %4416 = vst.msk [vmem:[#allocation5 + $0xd9] sm:$0x3f] %vm4247_vm6, %v4414_v21  ;;  %11162 = vmatmul.mubr.msk.f32.gmra.mrb[44].mxu1 %vm4199_vm5, %v15091_v34  ;;  %11208 = vmatmul.mubr.msk.f32.gmra.mrb[36].mxu0 %vm4199_vm5, %v14996_v10  ;;  %v4424_v35 = vpop.permute.xlu1 %4423  ;;  %v15305_v21 = vld [vmem:[#allocation5 + $0x89] sm:$0xff] }
 0x250   : > { %11164 = vmatprep.mubr.msk.f32.mxu1 %vm4199_vm5, %v15093_v44  ;;  %11210 = vmatprep.mubr.msk.f32.mxu0 %vm4199_vm5, %v14998_v56  ;;  %v4428_v25 = vmax.f32 %v14875_v40, %v4424_v35  ;;  %v15317_v35 = vld [vmem:[#allocation5 + $0xa1] sm:$0xff] }
 0x251   : > { %v15108_v37 = vld [vmem:[#allocation5 + $0xd0] sm:$0xff] }
 0x252   : > { %v15106_v8 = vld [vmem:[#allocation5 + $0xc8] sm:$0xff]  ;;  %4430 = vst.msk [vmem:[#allocation5 + $0xe9] sm:$0x3f] %vm4247_vm6, %v4428_v25 }
 0x253   : > { %11165 = vmatmul.mubr.msk.f32.gmra.mrb[46].mxu1 %vm4199_vm5, %v15106_v8  ;;  %11211 = vmatmul.mubr.msk.f32.gmra.mrb[38].mxu0 %vm4199_vm5, %v15018_v61  ;;  %v15321_v25 = vld [vmem:[#allocation5 + $0xa9] sm:$0xff] }
 0x254   : > { %11167 = vmatprep.mubr.msk.f32.mxu1 %vm4199_vm5, %v15108_v37  ;;  %11213 = vmatprep.mubr.msk.f32.mxu0 %vm4199_vm5, %v15020_v20 }
 0x255   : > { %v4467_v40 = vld [vmem:[#allocation5 + $0xe0] sm:$0xff] }
 0x256   : > { %v4458_v51 = vld [vmem:[#allocation5 + $0xd8] sm:$0xff] }
 0x257   : > { %11168 = vmatmul.mubr.msk.f32.gmra.mrb[48].mxu1 %vm4199_vm5, %v4458_v51  ;;  %11214 = vmatmul.mubr.msk.f32.gmra.mrb[40].mxu0 %vm4199_vm5, %v15040_v26  ;;  %v15345_v14 = vld [vmem:[#allocation5 + $0xd9] sm:$0xff] }
 0x258   : > { %11170 = vmatprep.mubr.msk.f32.mxu1 %vm4199_vm5, %v4467_v40  ;;  %11216 = vmatprep.mubr.msk.f32.mxu0 %vm4199_vm5, %v15042_v29 }
 0x259   : > { %v4468_v12 = vld [vmem:[#allocation5 + $0xe8] sm:$0xff] }
 0x25b   : > { %11171 = vmatmul.mubr.msk.f32.gmra.mrb[50].mxu1 %vm4199_vm5, %v4468_v12  ;;  %11217 = vmatmul.mubr.msk.f32.gmra.mrb[42].mxu0 %vm4199_vm5, %v15058_v2 }
 0x25c   : > { %11219 = vmatprep.mubr.msk.f32.mxu0 %vm4199_vm5, %v15060_v63 }
 0x25f   : > { %11220 = vmatmul.mubr.msk.f32.gmra.mrb[44].mxu0 %vm4199_vm5, %v15075_v48 }
 0x260   : > { %11222 = vmatprep.mubr.msk.f32.mxu0 %vm4199_vm5, %v15077_v11 }
 0x263   : > { %11223 = vmatmul.mubr.msk.f32.gmra.mrb[46].mxu0 %vm4199_vm5, %v15091_v34 }
 0x264   : > { %11225 = vmatprep.mubr.msk.f32.mxu0 %vm4199_vm5, %v15093_v44 }
 0x267   : > { %11226 = vmatmul.mubr.msk.f32.gmra.mrb[48].mxu0 %vm4199_vm5, %v15106_v8 }
 0x268   : > { %11228 = vmatprep.mubr.msk.f32.mxu0 %vm4199_vm5, %v15108_v37 }
 0x26b   : > { %11229 = vmatmul.mubr.msk.f32.gmra.mrb[50].mxu0 %vm4199_vm5, %v4458_v51 }
 0x26c   : > { %11247 = vmatprep.mubr.msk.f32.mxu0 %vm4199_vm5, %v14913_v1  ;;  %v10121_v1 = vld [vmem:[%s17360_s3 + $0xf0] sm:$0xff] }
 0x26f   : > { %11248 = vmatmul.mubr.msk.f32.vlgmr.msra.gmra.mrb[24].mxu0 %vm4199_vm5, %v14923_v0  ;;  %v12136_v0 = vpack.c.bf16 %v10122_v17, %v10121_v1  ;;  %v10193_v17 = vld [vmem:[%s17360_s3 + $0x170] sm:$0xff] }
 0x270   : > { %12127 = vmatpush3.bf16.msra.mxu0 %v15044_v52  ;;  %11250 = vmatprep.mubr.msk.f32.mxu0 %vm4199_vm5, %v14925_v13  ;;  %v10151_v13 = vld [vmem:[%s17360_s3 + $0x100] sm:$0xff] }
 0x271   : > { %12129 = vmatprep.subr.bf16.mxu0 %v12128_v30 }
 0x273   : > { %11251 = vmatmul.mubr.msk.f32.gmra.mrb[26].mxu0 %vm4199_vm5, %v14941_v19  ;;  %v12140_v19 = vpack.c.bf16 %v10152_v46, %v10151_v13  ;;  %v10223_v46 = vld [vmem:[%s17360_s3 + $0x180] sm:$0xff] }
 0x274   : > { %11253 = vmatprep.mubr.msk.f32.mxu0 %vm4199_vm5, %v14943_v62  ;;  %12131 = vmatpush3.bf16.msra.mxu0 %v12128_v30  ;;  %v5004_v62 = vld [vmem:[#allocation5 + $0xf0] sm:$0xff]  ;;  %v10190_v30 = vld [vmem:[%s17360_s3 + $0x158] sm:$0xff] }
 0x275   : > { %12133 = vmatprep.subr.bf16.mxu0 %v12132_v41  ;;  %v12160_v9 = vpack.c.bf16 %v10190_v30, %v10189_v6  ;;  %v10230_v6 = vld [vmem:[%s17360_s3 + $0x1b8] sm:$0xff] }
 0x277   : > { %11254 = vmatmul.mubr.msk.f32.gmra.mrb[28].mxu0 %vm4199_vm5, %v14959_v24  ;;  %v5005_v24 = vld [vmem:[#allocation5 + $0xf8] sm:$0xff] }
 0x278   : > { %11256 = vmatprep.mubr.msk.f32.mxu0 %vm4199_vm5, %v14961_v7  ;;  %12135 = vmatpush3.bf16.msra.mxu0 %v12132_v41  ;;  %v5332_v7 = vld [vmem:[#allocation5 + $0x1] sm:$0xff] }
 0x279   : > { %12137 = vmatprep.subr.bf16.mxu0 %v12136_v0  ;;  %v10192_v41 = vld [vmem:[%s17360_s3 + $0x168] sm:$0xff] }
 0x27a   : > { %v12164_v1 = vpack.c.bf16 %v10192_v41, %v10191_v49  ;;  %v10260_v49 = vld [vmem:[%s17360_s3 + $0x1c8] sm:$0xff] }
 0x27b   : > { %11257 = vmatmul.mubr.msk.f32.gmra.mrb[30].mxu0 %vm4199_vm5, %v14975_v59  ;;  %v10153_v59 = vld [vmem:[%s17360_s3 + $0x110] sm:$0xff] }
 0x27c   : > { %11259 = vmatprep.mubr.msk.f32.mxu0 %vm4199_vm5, %v14977_v15  ;;  %12139 = vmatpush3.bf16.msra.mxu0 %v12136_v0  ;;  %v10154_v15 = vld [vmem:[%s17360_s3 + $0x118] sm:$0xff] }
 0x27d   : > { %12141 = vmatprep.subr.bf16.mxu0 %v12140_v19  ;;  %v10194_v0 = vld [vmem:[%s17360_s3 + $0x178] sm:$0xff] }
 0x27e   : > { %v12168_v13 = vpack.c.bf16 %v10194_v0, %v10193_v17 }
 0x27f   : > { %11260 = vmatmul.mubr.msk.f32.gmra.mrb[32].mxu0 %vm4199_vm5, %v14996_v10  ;;  %v5333_v10 = vld [vmem:[#allocation5 + $0x9] sm:$0xff] }
 0x280   : > { %11262 = vmatprep.mubr.msk.f32.mxu0 %vm4199_vm5, %v14998_v56  ;;  %v12144_v56 = vpack.c.bf16 %v10154_v15, %v10153_v59 }
 0x283   : > { %11263 = vmatmul.mubr.msk.f32.gmra.mrb[34].mxu0 %vm4199_vm5, %v15018_v61  ;;  %v10155_v61 = vld [vmem:[%s17360_s3 + $0x120] sm:$0xff] }
 0x284   : > { %11265 = vmatprep.mubr.msk.f32.mxu0 %vm4199_vm5, %v15020_v20  ;;  %v10156_v20 = vld [vmem:[%s17360_s3 + $0x128] sm:$0xff] }
 0x285   : > { %v12148_v27 = vpack.c.bf16 %v10156_v20, %v10155_v61  ;;  %v15439_v61 = vld [vmem:[#allocation5 + $0xe9] sm:$0xff] }
 0x286   : > { %v10225_v20 = vld [vmem:[%s17360_s3 + $0x190] sm:$0xff] }
 0x287   : > { %11266 = vmatmul.mubr.msk.f32.gmra.mrb[36].mxu0 %vm4199_vm5, %v15040_v26  ;;  %v10158_v26 = vld [vmem:[%s17360_s3 + $0x138] sm:$0xff] }
 0x288   : > { %11268 = vmatprep.mubr.msk.f32.mxu0 %vm4199_vm5, %v15042_v29  ;;  %v15247_v29 = vld [vmem:[#allocation5 + $0x21] sm:$0xff]  ;;  %v12152_v52 = vpack.c.bf16 %v10158_v26, %v10157_v36 }
 0x289   : > { %v10227_v26 = vld [vmem:[%s17360_s3 + $0x1a0] sm:$0xff] }
 0x28b   : > { %11269 = vmatmul.mubr.msk.f32.gmra.mrb[38].mxu0 %vm4199_vm5, %v15058_v2  ;;  %v12156_v2 = vpack.c.bf16 %v10188_v28, %v10187_v54 }
 0x28c   : > { %11271 = vmatprep.mubr.msk.f32.mxu0 %vm4199_vm5, %v15060_v63  ;;  %v15265_v63 = vld [vmem:[#allocation5 + $0x39] sm:$0xff] }
 0x28f   : > { %11272 = vmatmul.mubr.msk.f32.gmra.mrb[40].mxu0 %vm4199_vm5, %v15075_v48  ;;  %v15285_v48 = vld [vmem:[#allocation5 + $0x61] sm:$0xff] }
 0x290   : > { %11274 = vmatprep.mubr.msk.f32.mxu0 %vm4199_vm5, %v15077_v11  ;;  %v15289_v11 = vld [vmem:[#allocation5 + $0x69] sm:$0xff] }
 0x293   : > { %11275 = vmatmul.mubr.msk.f32.gmra.mrb[42].mxu0 %vm4199_vm5, %v15091_v34  ;;  %v15309_v34 = vld [vmem:[#allocation5 + $0x91] sm:$0xff] }
 0x294   : > { %11277 = vmatprep.mubr.msk.f32.mxu0 %vm4199_vm5, %v15093_v44  ;;  %v15313_v44 = vld [vmem:[#allocation5 + $0x99] sm:$0xff] }
 0x297   : > { %11278 = vmatmul.mubr.msk.f32.gmra.mrb[44].mxu0 %vm4199_vm5, %v15106_v8  ;;  %v15325_v8 = vld [vmem:[#allocation5 + $0xb1] sm:$0xff] }
 0x298   : > { %11280 = vmatprep.mubr.msk.f32.mxu0 %vm4199_vm5, %v15108_v37  ;;  %v15329_v37 = vld [vmem:[#allocation5 + $0xb9] sm:$0xff] }
 0x29b   : > { %11281 = vmatmul.mubr.msk.f32.gmra.mrb[46].mxu0 %vm4199_vm5, %v4458_v51  ;;  %v15333_v51 = vld [vmem:[#allocation5 + $0xc1] sm:$0xff] }
 0x29c   : > { %11283 = vmatprep.mubr.msk.f32.mxu0 %vm4199_vm5, %v4467_v40  ;;  %v15337_v40 = vld [vmem:[#allocation5 + $0xc9] sm:$0xff] }
 0x29f   : > { %11284 = vmatmul.mubr.msk.f32.gmra.mrb[48].mxu0 %vm4199_vm5, %v4468_v12  ;;  %v15341_v12 = vld [vmem:[#allocation5 + $0xd1] sm:$0xff] }
 0x2a0   : > { %11286 = vmatprep.mubr.msk.f32.mxu0 %vm4199_vm5, %v5004_v62 }
 0x2a3   : > { %11287 = vmatmul.mubr.msk.f32.gmra.mrb[50].mxu0 %vm4199_vm5, %v5005_v24 }
 0x2a4   : > { %11305 = vmatprep.mubr.msk.f32.mxu0 %vm4199_vm5, %v5332_v7 }
 0x2a7   : > { %11306 = vmatmul.mubr.msk.f32.vlgmr.msra.gmra.mrb[24].mxu0 %vm4199_vm5, %v5333_v10  ;;  %v15433_v10 = vld [vmem:[#allocation5 + $0xe1] sm:$0xff] }
 0x2a8   : > { %12143 = vmatpush3.bf16.msra.mxu0 %v12140_v19  ;;  %11308 = vmatprep.mubr.msk.f32.mxu0 %vm4199_vm5, %v15233_v32  ;;  %v10224_v19 = vld [vmem:[%s17360_s3 + $0x188] sm:$0xff] }
 0x2a9   : > { %12145 = vmatprep.subr.bf16.mxu0 %v12144_v56  ;;  %v12172_v62 = vpack.c.bf16 %v10224_v19, %v10223_v46  ;;  %v15583_v46 = vld [vmem:[#allocation5 + $0x2a] sm:$0xff]  ;;  %v10295_v19 = vld [vmem:[%s17360_s3 + $0x200] sm:$0xff] }
 0x2ab   : > { %11309 = vmatmul.mubr.msk.f32.gmra.mrb[26].mxu0 %vm4199_vm5, %v15237_v50 }
 0x2ac   : > { %11311 = vmatprep.mubr.msk.f32.mxu0 %vm4199_vm5, %v15247_v29  ;;  %12147 = vmatpush3.bf16.msra.mxu0 %v12144_v56 }
 0x2ad   : > { %12149 = vmatprep.subr.bf16.mxu0 %v12148_v27 }
 0x2af   : > { %11312 = vmatmul.mubr.msk.f32.gmra.mrb[28].mxu0 %vm4199_vm5, %v15251_v33 }
 0x2b0   : > { %11314 = vmatprep.mubr.msk.f32.mxu0 %vm4199_vm5, %v15261_v3  ;;  %12151 = vmatpush3.bf16.msra.mxu0 %v12148_v27 }
 0x2b1   : > { %12153 = vmatprep.subr.bf16.mxu0 %v12152_v52 }
 0x2b3   : > { %11315 = vmatmul.mubr.msk.f32.gmra.mrb[30].mxu0 %vm4199_vm5, %v15265_v63 }
 0x2b4   : > { %11317 = vmatprep.mubr.msk.f32.mxu0 %vm4199_vm5, %v15269_v42  ;;  %12155 = vmatpush3.bf16.msra.mxu0 %v12152_v52  ;;  %v10228_v52 = vld [vmem:[%s17360_s3 + $0x1a8] sm:$0xff] }
 0x2b5   : > { %12157 = vmatprep.subr.bf16.mxu0 %v12156_v2 }
 0x2b7   : > { %11318 = vmatmul.mubr.msk.f32.gmra.mrb[32].mxu0 %vm4199_vm5, %v15273_v16 }
 0x2b8   : > { %11320 = vmatprep.mubr.msk.f32.mxu0 %vm4199_vm5, %v15277_v38 }
 0x2bb   : > { %11321 = vmatmul.mubr.msk.f32.gmra.mrb[34].mxu0 %vm4199_vm5, %v15281_v55 }
 0x2bc   : > { %11323 = vmatprep.mubr.msk.f32.mxu0 %vm4199_vm5, %v15285_v48 }
 0x2bf   : > { %11324 = vmatmul.mubr.msk.f32.gmra.mrb[36].mxu0 %vm4199_vm5, %v15289_v11 }
 0x2c0   : > { %11326 = vmatprep.mubr.msk.f32.mxu0 %vm4199_vm5, %v15293_v5 }
 0x2c3   : > { %11327 = vmatmul.mubr.msk.f32.gmra.mrb[38].mxu0 %vm4199_vm5, %v15297_v43 }
 0x2c4   : > { %11329 = vmatprep.mubr.msk.f32.mxu0 %vm4199_vm5, %v15301_v39 }
 0x2c7   : > { %11330 = vmatmul.mubr.msk.f32.gmra.mrb[40].mxu0 %vm4199_vm5, %v15305_v21 }
 0x2c8   : > { %11332 = vmatprep.mubr.msk.f32.mxu0 %vm4199_vm5, %v15309_v34 }
 0x2cb   : > { %11333 = vmatmul.mubr.msk.f32.gmra.mrb[42].mxu0 %vm4199_vm5, %v15313_v44 }
 0x2cc   : > { %11335 = vmatprep.mubr.msk.f32.mxu0 %vm4199_vm5, %v15317_v35 }
 0x2cf   : > { %11336 = vmatmul.mubr.msk.f32.gmra.mrb[44].mxu0 %vm4199_vm5, %v15321_v25 }
 0x2d0   : > { %11338 = vmatprep.mubr.msk.f32.mxu0 %vm4199_vm5, %v15325_v8 }
 0x2d3   : > { %11339 = vmatmul.mubr.msk.f32.gmra.mrb[46].mxu0 %vm4199_vm5, %v15329_v37 }
 0x2d4   : > { %11341 = vmatprep.mubr.msk.f32.mxu0 %vm4199_vm5, %v15333_v51 }
 0x2d7   : > { %11342 = vmatmul.mubr.msk.f32.gmra.mrb[48].mxu0 %vm4199_vm5, %v15337_v40 }
 0x2d8   : > { %11344 = vmatprep.mubr.msk.f32.mxu0 %vm4199_vm5, %v15341_v12 }
 0x2db   : > { %11345 = vmatmul.mubr.msk.f32.gmra.mrb[50].mxu0 %vm4199_vm5, %v15345_v14 }
 0x2dc   : > { %11363 = vmatprep.mubr.msk.f32.mxu0 %vm4199_vm5, %v15233_v32  ;;  %v10226_v32 = vld [vmem:[%s17360_s3 + $0x198] sm:$0xff] }
 0x2df   : > { %11364 = vmatmul.mubr.msk.f32.vlgmr.msra.gmra.mrb[24].mxu0 %vm4199_vm5, %v15237_v50  ;;  %v12176_v50 = vpack.c.bf16 %v10226_v32, %v10225_v20  ;;  %v15597_v20 = vld [vmem:[#allocation5 + $0x3a] sm:$0xff]  ;;  %v15601_v32 = vld [vmem:[#allocation5 + $0x42] sm:$0xff] }
 0x2e0   : > { %12159 = vmatpush3.bf16.msra.mxu0 %v12156_v2  ;;  %11366 = vmatprep.mubr.msk.f32.mxu0 %vm4199_vm5, %v15247_v29  ;;  %v10229_v2 = vld [vmem:[%s17360_s3 + $0x1b0] sm:$0xff] }
 0x2e1   : > { %12161 = vmatprep.subr.bf16.mxu0 %v12160_v9 }
 0x2e3   : > { %11367 = vmatmul.mubr.msk.f32.gmra.mrb[26].mxu0 %vm4199_vm5, %v15251_v33 }
 0x2e4   : > { %11369 = vmatprep.mubr.msk.f32.mxu0 %vm4199_vm5, %v15261_v3  ;;  %12163 = vmatpush3.bf16.msra.mxu0 %v12160_v9  ;;  %v10259_v9 = vld [vmem:[%s17360_s3 + $0x1c0] sm:$0xff] }
 0x2e5   : > { %12165 = vmatprep.subr.bf16.mxu0 %v12164_v1 }
 0x2e7   : > { %11370 = vmatmul.mubr.msk.f32.gmra.mrb[28].mxu0 %vm4199_vm5, %v15265_v63 }
 0x2e8   : > { %11372 = vmatprep.mubr.msk.f32.mxu0 %vm4199_vm5, %v15269_v42  ;;  %12167 = vmatpush3.bf16.msra.mxu0 %v12164_v1 }
 0x2e9   : > { %12169 = vmatprep.subr.bf16.mxu0 %v12168_v13 }
 0x2eb   : > { %11373 = vmatmul.mubr.msk.f32.gmra.mrb[30].mxu0 %vm4199_vm5, %v15273_v16 }
 0x2ec   : > { %11375 = vmatprep.mubr.msk.f32.mxu0 %vm4199_vm5, %v15277_v38  ;;  %12171 = vmatpush3.bf16.msra.mxu0 %v12168_v13 }
 0x2ed   : > { %12173 = vmatprep.subr.bf16.mxu0 %v12172_v62 }
 0x2ef   : > { %11376 = vmatmul.mubr.msk.f32.gmra.mrb[32].mxu0 %vm4199_vm5, %v15281_v55 }
 0x2f0   : > { %11378 = vmatprep.mubr.msk.f32.mxu0 %vm4199_vm5, %v15285_v48 }
 0x2f3   : > { %11379 = vmatmul.mubr.msk.f32.gmra.mrb[34].mxu0 %vm4199_vm5, %v15289_v11 }
 0x2f4   : > { %11381 = vmatprep.mubr.msk.f32.mxu0 %vm4199_vm5, %v15293_v5 }
 0x2f7   : > { %11382 = vmatmul.mubr.msk.f32.gmra.mrb[36].mxu0 %vm4199_vm5, %v15297_v43 }
 0x2f8   : > { %11384 = vmatprep.mubr.msk.f32.mxu0 %vm4199_vm5, %v15301_v39 }
 0x2fb   : > { %11385 = vmatmul.mubr.msk.f32.gmra.mrb[38].mxu0 %vm4199_vm5, %v15305_v21 }
 0x2fc   : > { %11387 = vmatprep.mubr.msk.f32.mxu0 %vm4199_vm5, %v15309_v34 }
 0x2ff   : > { %11388 = vmatmul.mubr.msk.f32.gmra.mrb[40].mxu0 %vm4199_vm5, %v15313_v44 }
 0x300   : > { %11390 = vmatprep.mubr.msk.f32.mxu0 %vm4199_vm5, %v15317_v35 }
 0x303   : > { %11391 = vmatmul.mubr.msk.f32.gmra.mrb[42].mxu0 %vm4199_vm5, %v15321_v25 }
 0x304   : > { %11393 = vmatprep.mubr.msk.f32.mxu0 %vm4199_vm5, %v15325_v8 }
 0x307   : > { %11394 = vmatmul.mubr.msk.f32.gmra.mrb[44].mxu0 %vm4199_vm5, %v15329_v37 }
 0x308   : > { %11396 = vmatprep.mubr.msk.f32.mxu0 %vm4199_vm5, %v15333_v51 }
 0x30a   : > { %v15419_v24 = vpop.f32.mrb[32].mxu1 }
 0x30b   : > { %v15421_v7 = vpop.f32.mrb[33].mxu1  ;;  %11397 = vmatmul.mubr.msk.f32.gmra.mrb[46].mxu0 %vm4199_vm5, %v15337_v40 }
 0x30c   : > { %11399 = vmatprep.mubr.msk.f32.mxu0 %vm4199_vm5, %v15341_v12 }
 0x30e   : > { %v15427_v59 = vpop.f32.mrb[34].mxu1 }
 0x30f   : > { %v15429_v15 = vpop.f32.mrb[35].mxu1  ;;  %11400 = vmatmul.mubr.msk.f32.gmra.mrb[48].mxu0 %vm4199_vm5, %v15345_v14 }
 0x310   : > { %11402 = vmatprep.mubr.msk.f32.mxu0 %vm4199_vm5, %v15433_v10 }
 0x312   : > { %v15437_v56 = vpop.f32.mrb[36].mxu1 }
 0x313   : > { %v15447_v27 = vpop.f32.mrb[37].mxu1  ;;  %11403 = vmatmul.mubr.msk.f32.gmra.mrb[50].mxu0 %vm4199_vm5, %v15439_v61 }
 0x314   : > { %11421 = vmatprep.mubr.msk.f32.mxu0 %vm4199_vm5, %v15247_v29  ;;  %v12180_v29 = vpack.c.bf16 %v10228_v52, %v10227_v26  ;;  %v15609_v26 = vld [vmem:[#allocation5 + $0x52] sm:$0xff]  ;;  %v15613_v52 = vld [vmem:[#allocation5 + $0x5a] sm:$0xff] }
 0x316   : > { %v15453_v36 = vpop.f32.mrb[38].mxu1 }
 0x317   : > { %v15461_v54 = vpop.f32.mrb[39].mxu1  ;;  %11422 = vmatmul.mubr.msk.f32.vlgmr.msra.gmra.mrb[24].mxu0 %vm4199_vm5, %v15251_v33  ;;  %v12184_v33 = vpack.c.bf16 %v10230_v6, %v10229_v2  ;;  %v15621_v2 = vld [vmem:[#allocation5 + $0x6a] sm:$0xff]  ;;  %v15625_v6 = vld [vmem:[#allocation5 + $0x72] sm:$0xff] }
 0x318   : > { %12175 = vmatpush3.bf16.msra.mxu0 %v12172_v62  ;;  %11424 = vmatprep.mubr.msk.f32.mxu0 %vm4199_vm5, %v15261_v3  ;;  %v10296_v62 = vld [vmem:[%s17360_s3 + $0x208] sm:$0xff] }
 0x319   : > { %12177 = vmatprep.subr.bf16.mxu0 %v12176_v50 }
 0x31a   : > { %v15467_v28 = vpop.f32.mrb[40].mxu1 }
 0x31b   : > { %v15475_v30 = vpop.f32.mrb[41].mxu1  ;;  %11425 = vmatmul.mubr.msk.f32.gmra.mrb[26].mxu0 %vm4199_vm5, %v15265_v63  ;;  %v12188_v63 = vpack.c.bf16 %v10260_v49, %v10259_v9  ;;  %v15633_v9 = vld [vmem:[#allocation5 + $0x82] sm:$0xff]  ;;  %v15637_v49 = vld [vmem:[#allocation5 + $0x8a] sm:$0xff] }
 0x31c   : > { %11427 = vmatprep.mubr.msk.f32.mxu0 %vm4199_vm5, %v15269_v42  ;;  %12179 = vmatpush3.bf16.msra.mxu0 %v12176_v50  ;;  %v15605_v50 = vld [vmem:[#allocation5 + $0x4a] sm:$0xff] }
 0x31d   : > { %12181 = vmatprep.subr.bf16.mxu0 %v12180_v29 }
 0x31e   : > { %v15481_v3 = vpop.f32.mrb[42].mxu1 }
 0x31f   : > { %v15489_v41 = vpop.f32.mrb[43].mxu1  ;;  %11428 = vmatmul.mubr.msk.f32.gmra.mrb[28].mxu0 %vm4199_vm5, %v15273_v16 }
 0x320   : > { %11430 = vmatprep.mubr.msk.f32.mxu0 %vm4199_vm5, %v15277_v38  ;;  %12183 = vmatpush3.bf16.msra.mxu0 %v12180_v29  ;;  %v15617_v29 = vld [vmem:[#allocation5 + $0x62] sm:$0xff] }
 0x321   : > { %12185 = vmatprep.subr.bf16.mxu0 %v12184_v33 }
 0x322   : > { %v15495_v42 = vpop.f32.mrb[44].mxu1 }
 0x323   : > { %v15497_v1 = vpop.f32.mrb[45].mxu1  ;;  %11431 = vmatmul.mubr.msk.f32.gmra.mrb[30].mxu0 %vm4199_vm5, %v15281_v55 }
 0x324   : > { %11433 = vmatprep.mubr.msk.f32.mxu0 %vm4199_vm5, %v15285_v48  ;;  %12187 = vmatpush3.bf16.msra.mxu0 %v12184_v33  ;;  %v15629_v33 = vld [vmem:[#allocation5 + $0x7a] sm:$0xff] }
 0x325   : > { %12189 = vmatprep.subr.bf16.mxu0 %v12188_v63 }
 0x326   : > { %v15503_v17 = vpop.f32.mrb[46].mxu1 }
 0x327   : > { %v15505_v16 = vpop.f32.mrb[47].mxu1  ;;  %11434 = vmatmul.mubr.msk.f32.gmra.mrb[32].mxu0 %vm4199_vm5, %v15289_v11  ;;  %v6066_v11 = vld [vmem:[#allocation5 + $0xf1] sm:$0xff] }
 0x328   : > { %11436 = vmatprep.mubr.msk.f32.mxu0 %vm4199_vm5, %v15293_v5  ;;  %v6067_v5 = vld [vmem:[#allocation5 + $0xf9] sm:$0xff] }
 0x32a   : > { %v15511_v38 = vpop.f32.mrb[48].mxu1 }
 0x32b   : > { %v15513_v0 = vpop.f32.mrb[49].mxu1  ;;  %11437 = vmatmul.mubr.msk.f32.gmra.mrb[34].mxu0 %vm4199_vm5, %v15297_v43  ;;  %v6394_v43 = vld [vmem:[#allocation5 + $0x2] sm:$0xff] }
 0x32c   : > { %11439 = vmatprep.mubr.msk.f32.mxu0 %vm4199_vm5, %v15301_v39  ;;  %v10261_v39 = vld [vmem:[%s17360_s3 + $0x1d0] sm:$0xff] }
 0x32e   : > { %v15519_v55 = vpop.f32.mrb[50].mxu1 }
 0x32f   : > { %v15521_v48 = vpop.f32.mrb[51].mxu1  ;;  %11440 = vmatmul.mubr.msk.f32.gmra.mrb[36].mxu0 %vm4199_vm5, %v15305_v21  ;;  %v10262_v21 = vld [vmem:[%s17360_s3 + $0x1d8] sm:$0xff] }
 0x330   : > { %11442 = vmatprep.mubr.msk.f32.mxu0 %vm4199_vm5, %v15309_v34  ;;  %v12192_v34 = vpack.c.bf16 %v10262_v21, %v10261_v39  ;;  %v15657_v39 = vld [vmem:[#allocation5 + $0xb2] sm:$0xff]  ;;  %v15661_v21 = vld [vmem:[#allocation5 + $0xba] sm:$0xff] }
 0x333   : > { %11443 = vmatmul.mubr.msk.f32.gmra.mrb[38].mxu0 %vm4199_vm5, %v15313_v44  ;;  %v6395_v44 = vld [vmem:[#allocation5 + $0xa] sm:$0xff] }
 0x334   : > { %11445 = vmatprep.mubr.msk.f32.mxu0 %vm4199_vm5, %v15317_v35  ;;  %v10263_v35 = vld [vmem:[%s17360_s3 + $0x1e0] sm:$0xff] }
 0x337   : > { %11446 = vmatmul.mubr.msk.f32.gmra.mrb[40].mxu0 %vm4199_vm5, %v15321_v25  ;;  %v10264_v25 = vld [vmem:[%s17360_s3 + $0x1e8] sm:$0xff] }
 0x338   : > { %11448 = vmatprep.mubr.msk.f32.mxu0 %vm4199_vm5, %v15325_v8  ;;  %v15565_v8 = vld [vmem:[#allocation5 + $0x12] sm:$0xff] }
 0x33b   : > { %11449 = vmatmul.mubr.msk.f32.gmra.mrb[42].mxu0 %vm4199_vm5, %v15329_v37  ;;  %v12196_v37 = vpack.c.bf16 %v10264_v25, %v10263_v35  ;;  %v15673_v35 = vld [vmem:[#allocation5 + $0xd2] sm:$0xff]  ;;  %v15677_v25 = vld [vmem:[#allocation5 + $0xda] sm:$0xff] }
 0x33c   : > { %11451 = vmatprep.mubr.msk.f32.mxu0 %vm4199_vm5, %v15333_v51  ;;  %v15569_v51 = vld [vmem:[#allocation5 + $0x1a] sm:$0xff] }
 0x33f   : > { %11452 = vmatmul.mubr.msk.f32.gmra.mrb[44].mxu0 %vm4199_vm5, %v15337_v40  ;;  %v10265_v40 = vld [vmem:[%s17360_s3 + $0x1f0] sm:$0xff] }
 0x340   : > { %11454 = vmatprep.mubr.msk.f32.mxu0 %vm4199_vm5, %v15341_v12  ;;  %v10266_v12 = vld [vmem:[%s17360_s3 + $0x1f8] sm:$0xff] }
 0x341   : > { %v12200_v13 = vpack.c.bf16 %v10266_v12, %v10265_v40  ;;  %v10298_v40 = vld [vmem:[%s17360_s3 + $0x218] sm:$0xff] }
 0x343   : > { %11455 = vmatmul.mubr.msk.f32.gmra.mrb[46].mxu0 %vm4199_vm5, %v15345_v14  ;;  %v15579_v14 = vld [vmem:[#allocation5 + $0x22] sm:$0xff] }
 0x344   : > { %11457 = vmatprep.mubr.msk.f32.mxu0 %vm4199_vm5, %v15433_v10  ;;  %v15593_v10 = vld [vmem:[#allocation5 + $0x32] sm:$0xff] }
 0x347   : > { %11458 = vmatmul.mubr.msk.f32.gmra.mrb[48].mxu0 %vm4199_vm5, %v15439_v61  ;;  %v12204_v61 = vpack.c.bf16 %v10296_v62, %v10295_v19  ;;  %v10300_v19 = vld [vmem:[%s17360_s3 + $0x228] sm:$0xff] }
 0x348   : > { %11460 = vmatprep.mubr.msk.f32.mxu0 %vm4199_vm5, %v6066_v11  ;;  %v15645_v11 = vld [vmem:[#allocation5 + $0x9a] sm:$0xff] }
 0x34b   : > { %11461 = vmatmul.mubr.msk.f32.gmra.mrb[50].mxu0 %vm4199_vm5, %v6067_v5  ;;  %v15649_v5 = vld [vmem:[#allocation5 + $0xa2] sm:$0xff] }
 0x34c   : > { %11479 = vmatprep.mubr.msk.f32.mxu0 %vm4199_vm5, %v6394_v43  ;;  %v15653_v43 = vld [vmem:[#allocation5 + $0xaa] sm:$0xff] }
 0x34f   : > { %11480 = vmatmul.mubr.msk.f32.vlgmr.msra.gmra.mrb[24].mxu0 %vm4199_vm5, %v6395_v44  ;;  %v15669_v44 = vld [vmem:[#allocation5 + $0xca] sm:$0xff] }
 0x350   : > { %12191 = vmatpush3.bf16.msra.mxu0 %v12188_v63  ;;  %11482 = vmatprep.mubr.msk.f32.mxu0 %vm4199_vm5, %v15565_v8  ;;  %v15641_v63 = vld [vmem:[#allocation5 + $0x92] sm:$0xff] }
 0x351   : > { %12193 = vmatprep.subr.bf16.mxu0 %v12192_v34 }
 0x353   : > { %11483 = vmatmul.mubr.msk.f32.gmra.mrb[26].mxu0 %vm4199_vm5, %v15569_v51 }
 0x354   : > { %11485 = vmatprep.mubr.msk.f32.mxu0 %vm4199_vm5, %v15579_v14  ;;  %12195 = vmatpush3.bf16.msra.mxu0 %v12192_v34  ;;  %v15665_v34 = vld [vmem:[#allocation5 + $0xc2] sm:$0xff] }
 0x355   : > { %12197 = vmatprep.subr.bf16.mxu0 %v12196_v37 }
 0x357   : > { %11486 = vmatmul.mubr.msk.f32.gmra.mrb[28].mxu0 %vm4199_vm5, %v15583_v46 }
 0x358   : > { %11488 = vmatprep.mubr.msk.f32.mxu0 %vm4199_vm5, %v15593_v10  ;;  %12199 = vmatpush3.bf16.msra.mxu0 %v12196_v37  ;;  %v10297_v37 = vld [vmem:[%s17360_s3 + $0x210] sm:$0xff] }
 0x359   : > { %12201 = vmatprep.subr.bf16.mxu0 %v12200_v13  ;;  %v12208_v12 = vpack.c.bf16 %v10298_v40, %v10297_v37  ;;  %v10302_v37 = vld [vmem:[%s17360_s3 + $0x238] sm:$0xff]  ;;  %v6775_v40 = vld [vmem:[#allocation5 + $0xea] sm:$0xff] }
 0x35b   : > { %11489 = vmatmul.mubr.msk.f32.gmra.mrb[30].mxu0 %vm4199_vm5, %v15597_v20 }
 0x35c   : > { %11491 = vmatprep.mubr.msk.f32.mxu0 %vm4199_vm5, %v15601_v32  ;;  %12203 = vmatpush3.bf16.msra.mxu0 %v12200_v13  ;;  %v10299_v13 = vld [vmem:[%s17360_s3 + $0x220] sm:$0xff] }
 0x35d   : > { %12205 = vmatprep.subr.bf16.mxu0 %v12204_v61  ;;  %v12212_v62 = vpack.c.bf16 %v10300_v19, %v10299_v13 }
 0x35f   : > { %11492 = vmatmul.mubr.msk.f32.gmra.mrb[32].mxu0 %vm4199_vm5, %v15605_v50 }
 0x360   : > { %11494 = vmatprep.mubr.msk.f32.mxu0 %vm4199_vm5, %v15609_v26 }
 0x363   : > { %11495 = vmatmul.mubr.msk.f32.gmra.mrb[34].mxu0 %vm4199_vm5, %v15613_v52 }
 0x364   : > { %11497 = vmatprep.mubr.msk.f32.mxu0 %vm4199_vm5, %v15617_v29 }
 0x367   : > { %11498 = vmatmul.mubr.msk.f32.gmra.mrb[36].mxu0 %vm4199_vm5, %v15621_v2 }
 0x368   : > { %11500 = vmatprep.mubr.msk.f32.mxu0 %vm4199_vm5, %v15625_v6 }
 0x36b   : > { %11501 = vmatmul.mubr.msk.f32.gmra.mrb[38].mxu0 %vm4199_vm5, %v15629_v33 }
 0x36c   : > { %11503 = vmatprep.mubr.msk.f32.mxu0 %vm4199_vm5, %v15633_v9 }
 0x36f   : > { %11504 = vmatmul.mubr.msk.f32.gmra.mrb[40].mxu0 %vm4199_vm5, %v15637_v49 }
 0x370   : > { %11506 = vmatprep.mubr.msk.f32.mxu0 %vm4199_vm5, %v15641_v63 }
 0x373   : > { %11507 = vmatmul.mubr.msk.f32.gmra.mrb[42].mxu0 %vm4199_vm5, %v15645_v11 }
 0x374   : > { %11509 = vmatprep.mubr.msk.f32.mxu0 %vm4199_vm5, %v15649_v5 }
 0x377   : > { %11510 = vmatmul.mubr.msk.f32.gmra.mrb[44].mxu0 %vm4199_vm5, %v15653_v43 }
 0x378   : > { %11512 = vmatprep.mubr.msk.f32.mxu0 %vm4199_vm5, %v15657_v39 }
 0x37b   : > { %11513 = vmatmul.mubr.msk.f32.gmra.mrb[46].mxu0 %vm4199_vm5, %v15661_v21 }
 0x37c   : > { %11515 = vmatprep.mubr.msk.f32.mxu0 %vm4199_vm5, %v15665_v34 }
 0x37f   : > { %11516 = vmatmul.mubr.msk.f32.gmra.mrb[48].mxu0 %vm4199_vm5, %v15669_v44 }
 0x380   : > { %11518 = vmatprep.mubr.msk.f32.mxu0 %vm4199_vm5, %v15673_v35 }
 0x383   : > { %11519 = vmatmul.mubr.msk.f32.gmra.mrb[50].mxu0 %vm4199_vm5, %v15677_v25 }
 0x384   : > { %11537 = vmatprep.mubr.msk.f32.mxu0 %vm4199_vm5, %v15565_v8  ;;  %v10301_v8 = vld [vmem:[%s17360_s3 + $0x230] sm:$0xff] }
 0x387   : > { %11538 = vmatmul.mubr.msk.f32.vlgmr.msra.gmra.mrb[24].mxu0 %vm4199_vm5, %v15569_v51  ;;  %v12216_v51 = vpack.c.bf16 %v10302_v37, %v10301_v8 }
 0x388   : > { %12207 = vmatpush3.bf16.msra.mxu0 %v12204_v61  ;;  %11540 = vmatprep.mubr.msk.f32.mxu0 %vm4199_vm5, %v15579_v14  ;;  %v6774_v61 = vld [vmem:[#allocation5 + $0xe2] sm:$0xff] }
 0x389   : > { %12209 = vmatprep.subr.bf16.mxu0 %v12208_v12 }
 0x38b   : > { %11541 = vmatmul.mubr.msk.f32.gmra.mrb[26].mxu0 %vm4199_vm5, %v15583_v46 }
 0x38c   : > { %11543 = vmatprep.mubr.msk.f32.mxu0 %vm4199_vm5, %v15593_v10  ;;  %12211 = vmatpush3.bf16.msra.mxu0 %v12208_v12 }
 0x38d   : > { %12213 = vmatprep.subr.bf16.mxu0 %v12212_v62 }
 0x38f   : > { %11544 = vmatmul.mubr.msk.f32.gmra.mrb[28].mxu0 %vm4199_vm5, %v15597_v20 }
 0x390   : > { %11546 = vmatprep.mubr.msk.f32.mxu0 %vm4199_vm5, %v15601_v32  ;;  %12215 = vmatpush3.bf16.msra.mxu0 %v12212_v62 }
 0x391   : > { %12217 = vmatprep.subr.bf16.mxu0 %v12216_v51 }
 0x393   : > { %11547 = vmatmul.mubr.msk.f32.gmra.mrb[30].mxu0 %vm4199_vm5, %v15605_v50 }
 0x394   : > { %11549 = vmatprep.mubr.msk.f32.mxu0 %vm4199_vm5, %v15609_v26  ;;  %12219 = vmatpush3.bf16.msra.mxu0 %v12216_v51 }
 0x397   : > { %11550 = vmatmul.mubr.msk.f32.gmra.mrb[32].mxu0 %vm4199_vm5, %v15613_v52 }
 0x398   : > { %11552 = vmatprep.mubr.msk.f32.mxu0 %vm4199_vm5, %v15617_v29 }
 0x39b   : > { %11553 = vmatmul.mubr.msk.f32.gmra.mrb[34].mxu0 %vm4199_vm5, %v15621_v2 }
 0x39c   : > { %11555 = vmatprep.mubr.msk.f32.mxu0 %vm4199_vm5, %v15625_v6 }
 0x39f   : > { %11556 = vmatmul.mubr.msk.f32.gmra.mrb[36].mxu0 %vm4199_vm5, %v15629_v33 }
 0x3a0   : > { %11558 = vmatprep.mubr.msk.f32.mxu0 %vm4199_vm5, %v15633_v9 }
 0x3a3   : > { %11559 = vmatmul.mubr.msk.f32.gmra.mrb[38].mxu0 %vm4199_vm5, %v15637_v49 }
 0x3a4   : > { %11561 = vmatprep.mubr.msk.f32.mxu0 %vm4199_vm5, %v15641_v63 }
 0x3a7   : > { %11562 = vmatmul.mubr.msk.f32.gmra.mrb[40].mxu0 %vm4199_vm5, %v15645_v11 }
 0x3a8   : > { %11564 = vmatprep.mubr.msk.f32.mxu0 %vm4199_vm5, %v15649_v5 }
 0x3ab   : > { %11565 = vmatmul.mubr.msk.f32.gmra.mrb[42].mxu0 %vm4199_vm5, %v15653_v43 }
 0x3ac   : > { %11567 = vmatprep.mubr.msk.f32.mxu0 %vm4199_vm5, %v15657_v39 }
 0x3af   : > { %11568 = vmatmul.mubr.msk.f32.gmra.mrb[44].mxu0 %vm4199_vm5, %v15661_v21 }
 0x3b0   : > { %11570 = vmatprep.mubr.msk.f32.mxu0 %vm4199_vm5, %v15665_v34 }
 0x3b3   : > { %11571 = vmatmul.mubr.msk.f32.gmra.mrb[46].mxu0 %vm4199_vm5, %v15669_v44 }
 0x3b4   : > { %11573 = vmatprep.mubr.msk.f32.mxu0 %vm4199_vm5, %v15673_v35 }
 0x3b7   : > { %11574 = vmatmul.mubr.msk.f32.gmra.mrb[48].mxu0 %vm4199_vm5, %v15677_v25 }
 0x3b8   : > { %11576 = vmatprep.mubr.msk.f32.mxu0 %vm4199_vm5, %v6774_v61 }
 0x3bb   : > { %11577 = vmatmul.mubr.msk.f32.gmra.mrb[50].mxu0 %vm4199_vm5, %v6775_v40 }
 0x3bc   : > { %11595 = vmatprep.mubr.msk.f32.mxu0 %vm4199_vm5, %v15579_v14  ;;  %v7128_v14 = vld [vmem:[#allocation5 + $0xf2] sm:$0xff] }
 0x3bf   : > { %11596 = vmatmul.mubr.msk.f32.vlgmr.msra.gmra.mrb[24].mxu0 %vm4199_vm5, %v15583_v46  ;;  %v7129_v46 = vld [vmem:[#allocation5 + $0xfa] sm:$0xff] }
 0x3c0   : > { %11598 = vmatprep.mubr.msk.f32.mxu0 %vm4199_vm5, %v15593_v10  ;;  %v15808_v10 = vld [vmem:[%s17361_s4] ss:$0 sm:$0xff] }
 0x3c3   : > { %11599 = vmatmul.mubr.msk.f32.gmra.mrb[26].mxu0 %vm4199_vm5, %v15597_v20 }
 0x3c4   : > { %11601 = vmatprep.mubr.msk.f32.mxu0 %vm4199_vm5, %v15601_v32 }
 0x3c7   : > { %11602 = vmatmul.mubr.msk.f32.gmra.mrb[28].mxu0 %vm4199_vm5, %v15605_v50 }
 0x3c8   : > { %11604 = vmatprep.mubr.msk.f32.mxu0 %vm4199_vm5, %v15609_v26 }
 0x3cb   : > { %11605 = vmatmul.mubr.msk.f32.gmra.mrb[30].mxu0 %vm4199_vm5, %v15613_v52 }
 0x3cc   : > { %11607 = vmatprep.mubr.msk.f32.mxu0 %vm4199_vm5, %v15617_v29 }
 0x3cf   : > { %11608 = vmatmul.mubr.msk.f32.gmra.mrb[32].mxu0 %vm4199_vm5, %v15621_v2 }
 0x3d0   : > { %11610 = vmatprep.mubr.msk.f32.mxu0 %vm4199_vm5, %v15625_v6 }
 0x3d3   : > { %11611 = vmatmul.mubr.msk.f32.gmra.mrb[34].mxu0 %vm4199_vm5, %v15629_v33 }
 0x3d4   : > { %11613 = vmatprep.mubr.msk.f32.mxu0 %vm4199_vm5, %v15633_v9 }
 0x3d7   : > { %11614 = vmatmul.mubr.msk.f32.gmra.mrb[36].mxu0 %vm4199_vm5, %v15637_v49 }
 0x3d8   : > { %11616 = vmatprep.mubr.msk.f32.mxu0 %vm4199_vm5, %v15641_v63 }
 0x3db   : > { %11617 = vmatmul.mubr.msk.f32.gmra.mrb[38].mxu0 %vm4199_vm5, %v15645_v11 }
 0x3dc   : > { %11619 = vmatprep.mubr.msk.f32.mxu0 %vm4199_vm5, %v15649_v5 }
 0x3df   : > { %11620 = vmatmul.mubr.msk.f32.gmra.mrb[40].mxu0 %vm4199_vm5, %v15653_v43 }
 0x3e0   : > { %11622 = vmatprep.mubr.msk.f32.mxu0 %vm4199_vm5, %v15657_v39 }
 0x3e3   : > { %11623 = vmatmul.mubr.msk.f32.gmra.mrb[42].mxu0 %vm4199_vm5, %v15661_v21 }
 0x3e4   : > { %11625 = vmatprep.mubr.msk.f32.mxu0 %vm4199_vm5, %v15665_v34 }
 0x3e7   : > { %11626 = vmatmul.mubr.msk.f32.gmra.mrb[44].mxu0 %vm4199_vm5, %v15669_v44 }
 0x3e8   : > { %11628 = vmatprep.mubr.msk.f32.mxu0 %vm4199_vm5, %v15673_v35 }
 0x3eb   : > { %11629 = vmatmul.mubr.msk.f32.gmra.mrb[46].mxu0 %vm4199_vm5, %v15677_v25 }
 0x3ec   : > { %11631 = vmatprep.mubr.msk.f32.mxu0 %vm4199_vm5, %v6774_v61 }
 0x3ef   : > { %11632 = vmatmul.mubr.msk.f32.gmra.mrb[48].mxu0 %vm4199_vm5, %v6775_v40 }
 0x3f0   : > { %11634 = vmatprep.mubr.msk.f32.mxu0 %vm4199_vm5, %v7128_v14 }
 0x3f3   : > { %11635 = vmatmul.mubr.msk.f32.gmra.mrb[50].mxu0 %vm4199_vm5, %v7129_v46  ;;  %v13073_v46 = vmov 1966171168  }
 0x492   : > { %v11597_v20 = vpop.f32.mrb[24].mxu0 }
 0x493   : > { %v7466_v32 = vadd.f32 %v11597_v20, %v15808_v10  ;;  %v7289_v50 = vpop.f32.mrb[25].mxu0  ;;  %v7701_v20 = vunpack.c.l.s4 %v13073_v46 }
 0x494   : > { %v7465_v26 = vadd.f32 %v15808_v10, %v7289_v50 }
 0x495   : > { %v7494_v52 = vmax.f32 %v7466_v32, 0.0 }
 0x496   : > { %v7493_v29 = vmax.f32 %v7465_v26, 0.0  ;;  %v11600_v2 = vpop.f32.mrb[26].mxu0 }
 0x497   : > { %7522 = vst.msk [vmem:[#allocation6 + $0x8] sm:$0xff] %vm4199_vm5, %v7494_v52  ;;  %v7468_v6 = vadd.f32 %v11600_v2, %v15808_v10  ;;  %v7299_v33 = vpop.f32.mrb[27].mxu0 }
 0x498   : > { %7521 = vst.msk [vmem:[#allocation6] sm:$0xff] %vm4199_vm5, %v7493_v29  ;;  %v7467_v9 = vadd.f32 %v15808_v10, %v7299_v33 }
 0x499   : > { %v7496_v49 = vmax.f32 %v7468_v6, 0.0 }
 0x49a   : > { %v7495_v63 = vmax.f32 %v7467_v9, 0.0  ;;  %v11603_v11 = vpop.f32.mrb[28].mxu0 }
 0x49b   : > { %7524 = vst.msk [vmem:[#allocation6 + $0x18] sm:$0xff] %vm4199_vm5, %v7496_v49  ;;  %v7470_v5 = vadd.f32 %v11603_v11, %v15808_v10  ;;  %v7309_v43 = vpop.f32.mrb[29].mxu0 }
 0x49c   : > { %7523 = vst.msk [vmem:[#allocation6 + $0x10] sm:$0xff] %vm4199_vm5, %v7495_v63  ;;  %v7469_v39 = vadd.f32 %v15808_v10, %v7309_v43 }
 0x49d   : > { %v7498_v21 = vmax.f32 %v7470_v5, 0.0 }
 0x49e   : > { %v7497_v34 = vmax.f32 %v7469_v39, 0.0  ;;  %v11606_v44 = vpop.f32.mrb[30].mxu0  ;;  %v7550_v2 = vld [vmem:[#allocation6 + $0x8] sm:$0xff] }
 0x49f   : > { %7526 = vst.msk [vmem:[#allocation6 + $0x28] sm:$0xff] %vm4199_vm5, %v7498_v21  ;;  %v7472_v35 = vadd.f32 %v11606_v44, %v15808_v10  ;;  %v7319_v25 = vpop.f32.mrb[31].mxu0  ;;  %v7549_v13 = vld [vmem:[#allocation6] sm:$0xff] }
 0x4a0   : > { %7525 = vst.msk [vmem:[#allocation6 + $0x20] sm:$0xff] %vm4199_vm5, %v7497_v34  ;;  %v7471_v12 = vadd.f32 %v15808_v10, %v7319_v25  ;;  %v7575_v19 = vld [vmem:[#allocation6 + $0x1] sm:$0xff]  ;;  %v7702_v34 = vunpack.c.0.s8 %v7701_v20 }
 0x4a1   : > { %v7500_v62 = vmax.f32 %v7472_v35, 0.0  ;;  %v7601_v32 = vmax.f32 %v7549_v13, %v7575_v19 }
 0x4a2   : > { %v7499_v8 = vmax.f32 %v7471_v12, 0.0  ;;  %v11609_v37 = vpop.f32.mrb[32].mxu0  ;;  %v7552_v6 = vld [vmem:[#allocation6 + $0x18] sm:$0xff] }
 0x4a3   : > { %v7551_v51 = vld [vmem:[#allocation6 + $0x10] sm:$0xff]  ;;  %7528 = vst.msk [vmem:[#allocation6 + $0x38] sm:$0xff] %vm4199_vm5, %v7500_v62  ;;  %v12624_v40 = vadd.f32 %v11609_v37, %v15419_v24  ;;  %v7329_v14 = vpop.f32.mrb[33].mxu0 }
 0x4a4   : > { %v7577_v61 = vld [vmem:[#allocation6 + $0x11] sm:$0xff]  ;;  %v7576_v50 = vld [vmem:[#allocation6 + $0x9] sm:$0xff]  ;;  %7527 = vst.msk [vmem:[#allocation6 + $0x30] sm:$0xff] %vm4199_vm5, %v7499_v8  ;;  %v12625_v52 = vadd.f32 %v7329_v14, %v15421_v7 }
 0x4a5   : > { %v7603_v26 = vmax.f32 %v7551_v51, %v7577_v61  ;;  %v7474_v29 = vadd.f32 %v12624_v40, %v15808_v10  ;;  %v7602_v63 = vmax.f32 %v7550_v2, %v7576_v50 }
 0x4a6   : > { %v7473_v9 = vadd.f32 %v12625_v52, %v15808_v10  ;;  %v11612_v49 = vpop.f32.mrb[34].mxu0  ;;  %v7554_v13 = vld [vmem:[#allocation6 + $0x28] sm:$0xff] }
 0x4a7   : > { %v7633_v33 = vmax.f32 %v7601_v32, %v7603_v26  ;;  %v7553_v24 = vld [vmem:[#allocation6 + $0x20] sm:$0xff]  ;;  %v7502_v43 = vmax.f32 %v7474_v29, 0.0  ;;  %v12626_v39 = vadd.f32 %v11612_v49, %v15427_v59  ;;  %v7339_v21 = vpop.f32.mrb[35].mxu0 }
 0x4a8   : > { %v7578_v11 = vld [vmem:[#allocation6 + $0x19] sm:$0xff]  ;;  %v7579_v5 = vld [vmem:[#allocation6 + $0x21] sm:$0xff]  ;;  %v7501_v35 = vmax.f32 %v7473_v9, 0.0  ;;  %v12627_v25 = vadd.f32 %v7339_v21, %v15429_v15  ;;  %v15839_v15 = vsub.s32 %v7702_v34, %v14648_v45 }
 0x4a9   : > { %7659 = vst.msk [vmem:[#allocation7] sm:$0xff] %vm4199_vm5, %v7633_v33  ;;  %v7604_v7 = vmax.f32 %v7552_v6, %v7578_v11  ;;  %v7605_v44 = vmax.f32 %v7553_v24, %v7579_v5  ;;  %7530 = vst.msk [vmem:[#allocation6 + $0x48] sm:$0xff] %vm4199_vm5, %v7502_v43  ;;  %v7476_v12 = vadd.f32 %v12626_v39, %v15808_v10 }
 0x4aa   : > { %7529 = vst.msk [vmem:[#allocation6 + $0x40] sm:$0xff] %vm4199_vm5, %v7501_v35  ;;  %v7475_v62 = vadd.f32 %v12627_v25, %v15808_v10  ;;  %v11615_v59 = vpop.f32.mrb[36].mxu0 }
 0x4ab   : > { %v7634_v19 = vmax.f32 %v7602_v63, %v7604_v7  ;;  %v7555_v8 = vld [vmem:[#allocation6 + $0x30] sm:$0xff]  ;;  %v7504_v61 = vmax.f32 %v7476_v12, 0.0  ;;  %v12628_v40 = vadd.f32 %v11615_v59, %v15437_v56  ;;  %v7349_v14 = vpop.f32.mrb[37].mxu0 }
 0x4ac   : > { %v7580_v37 = vld [vmem:[#allocation6 + $0x29] sm:$0xff]  ;;  %v7581_v51 = vld [vmem:[#allocation6 + $0x31] sm:$0xff]  ;;  %v7503_v32 = vmax.f32 %v7475_v62, 0.0  ;;  %v12629_v50 = vadd.f32 %v7349_v14, %v15447_v27 }
 0x4ad   : > { %7660 = vst.msk [vmem:[#allocation7 + $0x8] sm:$0xff] %vm4199_vm5, %v7634_v19  ;;  %v7606_v46 = vmax.f32 %v7554_v13, %v7580_v37  ;;  %v7607_v20 = vmax.f32 %v7555_v8, %v7581_v51  ;;  %7532 = vst.msk [vmem:[#allocation6 + $0x58] sm:$0xff] %vm4199_vm5, %v7504_v61  ;;  %v7478_v26 = vadd.f32 %v12628_v40, %v15808_v10  ;;  %v7556_v27 = vld [vmem:[#allocation6 + $0x38] sm:$0xff] }
 0x4ae   : > { %7531 = vst.msk [vmem:[#allocation6 + $0x50] sm:$0xff] %vm4199_vm5, %v7503_v32  ;;  %v7477_v56 = vadd.f32 %v12629_v50, %v15808_v10  ;;  %v11618_v29 = vpop.f32.mrb[38].mxu0 }
 0x4af   : > { %v7637_v52 = vmax.f32 %v7605_v44, %v7607_v20  ;;  %v7506_v2 = vmax.f32 %v7478_v26, 0.0  ;;  %v12630_v45 = vadd.f32 %v11618_v29, %v15453_v36  ;;  %v7359_v6 = vpop.f32.mrb[39].mxu0 }
 0x4b0   : > { %v10335_v33 = vld.sshfl [vmem:[#allocation7 + $0x2] sm:$0x1 pattern:$0x75316420]  ;;  %v7505_v49 = vmax.f32 %v7477_v56, 0.0  ;;  %v12631_v63 = vadd.f32 %v7359_v6, %v15461_v54  ;;  %v7558_v13 = vld [vmem:[#allocation6 + $0x48] sm:$0xff] }
 0x4b1   : > { %7663 = vst.msk [vmem:[#allocation7 + $0x20] sm:$0xff] %vm4199_vm5, %v7637_v52  ;;  %v7775_v24 = vrot.slane %v10335_v33, %v15839_v15  ;;  %v7557_v11 = vld [vmem:[#allocation6 + $0x40] sm:$0xff]  ;;  %7534 = vst.msk [vmem:[#allocation6 + $0x68] sm:$0xff] %vm4199_vm5, %v7506_v2  ;;  %v7480_v36 = vadd.f32 %v12630_v45, %v15808_v10  ;;  %v7685_v44 = vld [vmem:[#allocation7] sm:$0x1] }
 0x4b2   : > { %v7582_v5 = vld [vmem:[#allocation6 + $0x39] sm:$0xff]  ;;  %v7583_v43 = vld [vmem:[#allocation6 + $0x41] sm:$0xff]  ;;  %7533 = vst.msk [vmem:[#allocation6 + $0x60] sm:$0xff] %vm4199_vm5, %v7505_v49  ;;  %v7479_v34 = vadd.f32 %v12631_v63, %v15808_v10  ;;  %v11621_v7 = vpop.f32.mrb[40].mxu0  ;;  %v7846_v54 = vld [vmem:[#allocation7 + $0x4] sm:$0x1] }
 0x4b3   : > { %v7608_v39 = vmax.f32 %v7556_v27, %v7582_v5  ;;  %v7609_v21 = vmax.f32 %v7557_v11, %v7583_v43  ;;  %7776 = vrot.lane.b32.xlu1 %v7775_v24, %s13072_s21  ;;  %v7508_v35 = vmax.f32 %v7480_v36, 0.0  ;;  %v12632_v25 = vadd.f32 %v11621_v7, %v15467_v28  ;;  %v7369_v12 = vpop.f32.mrb[41].mxu0  ;;  %7690 = vst.msk [vmem:[#allocation8] sm:$0x1] %vm15849_vm7, %v7685_v44  ;;  %v8242_v43 = vld [vmem:[%s17362_s5 + $0x80] sm:$0xff]  ;;  %v8243_v36 = vld [vmem:[%s17362_s5 + $0x88] sm:$0xff] }
 0x4b4   : > { %7847 = vst.msk [vmem:[#allocation8 + $0x7] sm:$0x1] %vm15849_vm7, %v7846_v54  ;;  %v7507_v19 = vmax.f32 %v7479_v34, 0.0  ;;  %v12633_v62 = vadd.f32 %v7369_v12, %v15475_v30  ;;  %v8154_v59 = vld [vmem:[#allocation7 + $0xc] sm:$0x1]  ;;  %v12220_v7 = vpack.c.bf16 %v8243_v36, %v8242_v43  ;;  %v8226_v44 = vld [vmem:[%s17362_s5] sm:$0xff] }
 0x4b5   : > { %v8000_v8 = vld [vmem:[#allocation7 + $0x8] sm:$0x1]  ;;  %v7559_v37 = vld [vmem:[#allocation6 + $0x50] sm:$0xff]  ;;  %7536 = vst.msk [vmem:[#allocation6 + $0x78] sm:$0xff] %vm4199_vm5, %v7508_v35  ;;  %v7482_v28 = vadd.f32 %v12632_v25, %v15808_v10  ;;  %v7638_v40 = vmax.f32 %v7606_v46, %v7608_v39  ;;  %v8244_v35 = vld [vmem:[%s17362_s5 + $0x90] sm:$0xff] }
 0x4b6   : > { %v7584_v51 = vld [vmem:[#allocation6 + $0x49] sm:$0xff]  ;;  %v7585_v61 = vld [vmem:[#allocation6 + $0x51] sm:$0xff]  ;;  %8155 = vst.msk [vmem:[#allocation8 + $0x15] sm:$0x1] %vm15849_vm7, %v8154_v59  ;;  %8001 = vst.msk [vmem:[#allocation8 + $0xe] sm:$0x1] %vm15849_vm7, %v8000_v8  ;;  %v7481_v30 = vadd.f32 %v12633_v62, %v15808_v10  ;;  %12221 = vmatprep.subr.bf16.mxu1 %v12220_v7 }
 0x4b7   : > { %v7610_v14 = vmax.f32 %v7558_v13, %v7584_v51  ;;  %v7611_v20 = vmax.f32 %v7559_v37, %v7585_v61  ;;  %7535 = vst.msk [vmem:[#allocation6 + $0x70] sm:$0xff] %vm4199_vm5, %v7507_v19  ;;  %v11624_v32 = vpop.f32.mrb[42].mxu0  ;;  %v7510_v50 = vmax.f32 %v7482_v28, 0.0  ;;  %7664 = vst.msk [vmem:[#allocation7 + $0x28] sm:$0xff] %vm4199_vm5, %v7638_v40  ;;  %v7560_v46 = vld [vmem:[#allocation6 + $0x58] sm:$0xff]  ;;  %v8245_v19 = vld [vmem:[%s17362_s5 + $0x98] sm:$0xff] }
 0x4b8   : > { %v12634_v26 = vadd.f32 %v11624_v32, %v15481_v3  ;;  %v7379_v52 = vpop.f32.mrb[43].mxu0  ;;  %v10332_v56 = vld.sshfl [vmem:[#allocation7 + $0x20] sm:$0x1 pattern:$0x75316420]  ;;  %v7509_v29 = vmax.f32 %v7481_v30, 0.0  ;;  %v12224_v28 = vpack.c.bf16 %v8245_v19, %v8244_v35 }
 0x4b9   : > { %v12635_v2 = vadd.f32 %v7379_v52, %v15489_v41  ;;  %v7706_v45 = vrot.slane %v10332_v56, %v15839_v15  ;;  %v7561_v6 = vld [vmem:[#allocation6 + $0x60] sm:$0xff]  ;;  %7538 = vst.msk [vmem:[#allocation6 + $0x88] sm:$0xff] %vm4199_vm5, %v7510_v50  ;;  %v7641_v63 = vmax.f32 %v7609_v21, %v7611_v20  ;;  %v7780_v41 = vld [vmem:[#allocation7 + $0x22] sm:$0x1]  ;;  %v8227_v54 = vld [vmem:[%s17362_s5 + $0x8] sm:$0xff] }
 0x4ba   : > { %v7586_v33 = vld [vmem:[#allocation6 + $0x59] sm:$0xff]  ;;  %v7587_v27 = vld [vmem:[#allocation6 + $0x61] sm:$0xff]  ;;  %v7484_v49 = vadd.f32 %v12634_v26, %v15808_v10  ;;  %7537 = vst.msk [vmem:[#allocation6 + $0x80] sm:$0xff] %vm4199_vm5, %v7509_v29  ;;  %v11627_v5 = vpop.f32.mrb[44].mxu0  ;;  %v7934_v62 = vld [vmem:[#allocation7 + $0x26] sm:$0x1]  ;;  %v12222_v61 = vpack.c.bf16 %v8227_v54, %v8226_v44 }
 0x4bb   : > { %v7612_v24 = vmax.f32 %v7560_v46, %v7586_v33  ;;  %v7613_v3 = vmax.f32 %v7561_v6, %v7587_v27  ;;  %v7483_v11 = vadd.f32 %v12635_v2, %v15808_v10  ;;  %7707 = vrot.lane.b32.xlu0 %v7706_v45, %s13072_s21  ;;  %v12636_v21 = vadd.f32 %v11627_v5, %v15495_v42  ;;  %v7389_v34 = vpop.f32.mrb[45].mxu0  ;;  %v15903_v42 = vld [vmem:[#allocation6 + $0x68] sm:$0xff]  ;;  %v8228_v29 = vld [vmem:[%s17362_s5 + $0x10] sm:$0xff]  ;;  %v8247_v44 = vld [vmem:[%s17362_s5 + $0xa8] sm:$0xff] }
 0x4bc   : > { %v7512_v39 = vmax.f32 %v7484_v49, 0.0  ;;  %7667 = vst.msk [vmem:[#allocation7 + $0x40] sm:$0xff] %vm4199_vm5, %v7641_v63  ;;  %v12637_v12 = vadd.f32 %v7389_v34, %v15497_v1  ;;  %12223 = vmatpush3.bf16.msra.mxu1 %v12222_v61  ;;  %v7564_v26 = vld [vmem:[#allocation6 + $0x78] sm:$0xff]  ;;  %v8229_v2 = vld [vmem:[%s17362_s5 + $0x18] sm:$0xff] }
 0x4bd   : > { %7781 = vst.msk [vmem:[#allocation8 + $0x4] sm:$0x1] %vm15849_vm7, %v7780_v41  ;;  %v7511_v25 = vmax.f32 %v7483_v11, 0.0  ;;  %v7642_v13 = vmax.f32 %v7610_v14, %v7612_v24  ;;  %v7486_v51 = vadd.f32 %v12636_v21, %v15808_v10  ;;  %7935 = vst.msk [vmem:[#allocation8 + $0xb] sm:$0x1] %vm15849_vm7, %v7934_v62  ;;  %12225 = vmatprep.subr.bf16.mxu1 %v12224_v28  ;;  %v8246_v11 = vld [vmem:[%s17362_s5 + $0xa0] sm:$0xff] }
 0x4be   : > { %v7563_v59 = vld [vmem:[#allocation6 + $0x70] sm:$0xff]  ;;  %7540 = vst.msk [vmem:[#allocation6 + $0x98] sm:$0xff] %vm4199_vm5, %v7512_v39  ;;  %v7485_v14 = vadd.f32 %v12637_v12, %v15808_v10  ;;  %v11630_v20 = vpop.f32.mrb[46].mxu0  ;;  %v12226_v27 = vpack.c.bf16 %v8229_v2, %v8228_v29  ;;  %v12228_v12 = vpack.c.bf16 %v8247_v44, %v8246_v11  ;;  %v8231_v61 = vld [vmem:[%s17362_s5 + $0x28] sm:$0xff] }
 0x4bf   : > { %v7588_v8 = vld [vmem:[#allocation6 + $0x69] sm:$0xff]  ;;  %v7589_v37 = vld [vmem:[#allocation6 + $0x71] sm:$0xff]  ;;  %7539 = vst.msk [vmem:[#allocation6 + $0x90] sm:$0xff] %vm4199_vm5, %v7511_v25  ;;  %7668 = vst.msk [vmem:[#allocation7 + $0x48] sm:$0xff] %vm4199_vm5, %v7642_v13  ;;  %v7514_v30 = vmax.f32 %v7486_v51, 0.0  ;;  %v12638_v32 = vadd.f32 %v11630_v20, %v15503_v17  ;;  %v7399_v50 = vpop.f32.mrb[47].mxu0 }
 0x4c0   : > { %v7614_v1 = vmax.f32 %v15903_v42, %v7588_v8  ;;  %v7615_v40 = vmax.f32 %v7563_v59, %v7589_v37  ;;  %v7513_v52 = vmax.f32 %v7485_v14, 0.0  ;;  %v12639_v56 = vadd.f32 %v7399_v50, %v15505_v16  ;;  %12227 = vmatpush3.bf16.msra.mxu1 %v12226_v27  ;;  %v7566_v39 = vld [vmem:[#allocation6 + $0x88] sm:$0xff]  ;;  %v8230_v59 = vld [vmem:[%s17362_s5 + $0x20] sm:$0xff]  ;;  %v8232_v27 = vld [vmem:[%s17362_s5 + $0x30] sm:$0xff] }
 0x4c1   : > { %v7565_v45 = vld [vmem:[#allocation6 + $0x80] sm:$0xff]  ;;  %7542 = vst.msk [vmem:[#allocation6 + $0xa8] sm:$0xff] %vm4199_vm5, %v7514_v30  ;;  %v7488_v17 = vadd.f32 %v12638_v32, %v15808_v10  ;;  %12229 = vmatprep.subr.bf16.mxu1 %v12228_v12 }
 0x4c2   : > { %v7645_v46 = vmax.f32 %v7613_v3, %v7615_v40  ;;  %v7590_v6 = vld [vmem:[#allocation6 + $0x79] sm:$0xff]  ;;  %v7591_v33 = vld [vmem:[#allocation6 + $0x81] sm:$0xff]  ;;  %7541 = vst.msk [vmem:[#allocation6 + $0xa0] sm:$0xff] %vm4199_vm5, %v7513_v52  ;;  %v7487_v63 = vadd.f32 %v12639_v56, %v15808_v10  ;;  %v11633_v24 = vpop.f32.mrb[48].mxu0 }
 0x4c3   : > { %v7616_v49 = vmax.f32 %v7564_v26, %v7590_v6  ;;  %v7617_v16 = vmax.f32 %v7565_v45, %v7591_v33  ;;  %v10336_v3 = vld.sshfl [vmem:[#allocation7 + $0x42] sm:$0x1 pattern:$0x75316420]  ;;  %v7516_v5 = vmax.f32 %v7488_v17, 0.0  ;;  %v12640_v41 = vadd.f32 %v11633_v24, %v15511_v38  ;;  %v7409_v43 = vpop.f32.mrb[49].mxu0 }
 0x4c4   : > { %7671 = vst.msk [vmem:[#allocation7 + $0x60] sm:$0xff] %vm4199_vm5, %v7645_v46  ;;  %v7797_v36 = vrot.slane %v10336_v3, %v15839_v15  ;;  %v7515_v21 = vmax.f32 %v7487_v63, 0.0  ;;  %v12641_v34 = vadd.f32 %v7409_v43, %v15513_v0  ;;  %v7714_v7 = vld [vmem:[#allocation7 + $0x40] sm:$0x1]  ;;  %v8248_v30 = vld [vmem:[%s17362_s5 + $0xb0] sm:$0xff] }
 0x4c5   : > { %7544 = vst.msk [vmem:[#allocation6 + $0xb8] sm:$0xff] %vm4199_vm5, %v7516_v5  ;;  %v7490_v38 = vadd.f32 %v12640_v41, %v15808_v10  ;;  %v7646_v25 = vmax.f32 %v7614_v1, %v7616_v49  ;;  %v7568_v1 = vld [vmem:[#allocation6 + $0x98] sm:$0xff]  ;;  %v8250_v24 = vld [vmem:[%s17362_s5 + $0xc0] sm:$0xff] }
 0x4c6   : > { %v7567_v54 = vld [vmem:[#allocation6 + $0x90] sm:$0xff]  ;;  %7798 = vrot.lane.b32.xlu0 %v7797_v36, %s13072_s21  ;;  %7715 = vst.msk [vmem:[#allocation8 + $0x1] sm:$0x1] %vm15849_vm7, %v7714_v7  ;;  %v7489_v19 = vadd.f32 %v12641_v34, %v15808_v10  ;;  %v11636_v62 = vpop.f32.mrb[50].mxu0  ;;  %v8022_v28 = vld [vmem:[#allocation7 + $0x48] sm:$0x1] }
 0x4c7   : > { %v7592_v35 = vld [vmem:[#allocation6 + $0x89] sm:$0xff]  ;;  %v7593_v42 = vld [vmem:[#allocation6 + $0x91] sm:$0xff]  ;;  %7543 = vst.msk [vmem:[#allocation6 + $0xb0] sm:$0xff] %vm4199_vm5, %v7515_v21  ;;  %v7518_v8 = vmax.f32 %v7490_v38, 0.0  ;;  %v12642_v37 = vadd.f32 %v11636_v62, %v15519_v55  ;;  %v7419_v51 = vpop.f32.mrb[51].mxu0  ;;  %7672 = vst.msk [vmem:[#allocation7 + $0x68] sm:$0xff] %vm4199_vm5, %v7646_v25 }
 0x4c8   : > { %v7618_v0 = vmax.f32 %v7566_v39, %v7592_v35  ;;  %v7619_v13 = vmax.f32 %v7567_v54, %v7593_v42  ;;  %v7517_v40 = vmax.f32 %v7489_v19, 0.0  ;;  %v12643_v14 = vadd.f32 %v7419_v51, %v15521_v48  ;;  %v8249_v55 = vld [vmem:[%s17362_s5 + $0xb8] sm:$0xff]  ;;  %8023 = vst.msk [vmem:[#allocation8 + $0xf] sm:$0x1] %vm15849_vm7, %v8022_v28  ;;  %v8251_v39 = vld [vmem:[%s17362_s5 + $0xc8] sm:$0xff]  ;;  %v8234_v21 = vld [vmem:[%s17362_s5 + $0x40] sm:$0xff] }
 0x4c9   : > { %v7569_v32 = vld [vmem:[#allocation6 + $0xa0] sm:$0xff]  ;;  %7546 = vst.msk [vmem:[#allocation6 + $0xc8] sm:$0xff] %vm4199_vm5, %v7518_v8  ;;  %v7492_v52 = vadd.f32 %v12642_v37, %v15808_v10  ;;  %v12230_v48 = vpack.c.bf16 %v8231_v61, %v8230_v59  ;;  %v12232_v56 = vpack.c.bf16 %v8249_v55, %v8248_v30  ;;  %v7570_v49 = vld [vmem:[#allocation6 + $0xa8] sm:$0xff]  ;;  %v12236_v34 = vpack.c.bf16 %v8251_v39, %v8250_v24  ;;  %v8235_v7 = vld [vmem:[%s17362_s5 + $0x48] sm:$0xff] }
 0x4ca   : > { %v7649_v20 = vmax.f32 %v7617_v16, %v7619_v13  ;;  %v7594_v50 = vld [vmem:[#allocation6 + $0x99] sm:$0xff]  ;;  %v7595_v26 = vld [vmem:[#allocation6 + $0xa1] sm:$0xff]  ;;  %7545 = vst.msk [vmem:[#allocation6 + $0xc0] sm:$0xff] %vm4199_vm5, %v7517_v40  ;;  %v7491_v2 = vadd.f32 %v12643_v14, %v15808_v10  ;;  %v12238_v35 = vpack.c.bf16 %v8235_v7, %v8234_v21 }
 0x4cb   : > { %v7620_v46 = vmax.f32 %v7568_v1, %v7594_v50  ;;  %v7621_v29 = vmax.f32 %v7569_v32, %v7595_v26  ;;  %v10333_v45 = vld.sshfl [vmem:[#allocation7 + $0x60] sm:$0x1 pattern:$0x75316420]  ;;  %v7802_v6 = vld [vmem:[#allocation7 + $0x62] sm:$0x1]  ;;  %12231 = vmatpush3.bf16.msra.mxu1 %v12230_v48 }
 0x4cc   : > { %7675 = vst.msk [vmem:[#allocation7 + $0x80] sm:$0xff] %vm4199_vm5, %v7649_v20  ;;  %v7520_v33 = vmax.f32 %v7492_v52, 0.0  ;;  %v7731_v17 = vrot.slane %v10333_v45, %v15839_v15  ;;  %v7519_v16 = vmax.f32 %v7491_v2, 0.0  ;;  %12233 = vmatprep.subr.bf16.mxu1 %v12232_v56  ;;  %v8233_v10 = vld [vmem:[%s17362_s5 + $0x38] sm:$0xff]  ;;  %v7572_v44 = vld [vmem:[#allocation6 + $0xb8] sm:$0xff]  ;;  %v8252_v42 = vld [vmem:[%s17362_s5 + $0xd0] sm:$0xff] }
 0x4cd   : > { %7803 = vst.msk [vmem:[#allocation8 + $0x5] sm:$0x1] %vm15849_vm7, %v7802_v6  ;;  %v7650_v63 = vmax.f32 %v7618_v0, %v7620_v46  ;;  %v12234_v41 = vpack.c.bf16 %v8233_v10, %v8232_v27  ;;  %v8253_v38 = vld [vmem:[%s17362_s5 + $0xd8] sm:$0xff]  ;;  %v8236_v20 = vld [vmem:[%s17362_s5 + $0x50] sm:$0xff]  ;;  %v7956_v45 = vld [vmem:[#allocation7 + $0x66] sm:$0x1] }
 0x4ce   : > { %v7571_v3 = vld [vmem:[#allocation6 + $0xb0] sm:$0xff]  ;;  %7548 = vst.msk [vmem:[#allocation6 + $0xd8] sm:$0xff] %vm4199_vm5, %v7520_v33  ;;  %7732 = vrot.lane.b32.xlu1 %v7731_v17, %s13072_s21  ;;  %7547 = vst.msk [vmem:[#allocation6 + $0xd0] sm:$0xff] %vm4199_vm5, %v7519_v16  ;;  %v12240_v13 = vpack.c.bf16 %v8253_v38, %v8252_v42  ;;  %v8237_v48 = vld [vmem:[%s17362_s5 + $0x58] sm:$0xff] }
 0x4cf   : > { %v7596_v11 = vld [vmem:[#allocation6 + $0xa9] sm:$0xff]  ;;  %v7597_v5 = vld [vmem:[#allocation6 + $0xb1] sm:$0xff]  ;;  %7676 = vst.msk [vmem:[#allocation7 + $0x88] sm:$0xff] %vm4199_vm5, %v7650_v63  ;;  %12235 = vmatpush3.bf16.msra.mxu1 %v12234_v41  ;;  %v12242_v46 = vpack.c.bf16 %v8237_v48, %v8236_v20  ;;  %v8110_v2 = vld [vmem:[#allocation7 + $0x6a] sm:$0x1] }
 0x4d0   : > { %v7622_v43 = vmax.f32 %v7570_v49, %v7596_v11  ;;  %v7623_v36 = vmax.f32 %v7571_v3, %v7597_v5  ;;  %12237 = vmatprep.subr.bf16.mxu1 %v12236_v34  ;;  %v10339_v8 = vld.sshfl [vmem:[#allocation7 + $0x24] sm:$0x1 pattern:$0x75316420]  ;;  %v7574_v51 = vld [vmem:[#allocation6 + $0xc8] sm:$0xff]  ;;  %v8255_v27 = vld [vmem:[%s17362_s5 + $0xe8] sm:$0xff] }
 0x4d1   : > { %v7573_v25 = vld [vmem:[#allocation6 + $0xc0] sm:$0xff]  ;;  %v7863_v56 = vrot.slane %v10339_v8, %v15839_v15  ;;  %v8254_v17 = vld [vmem:[%s17362_s5 + $0xe0] sm:$0xff]  ;;  %8111 = vst.msk [vmem:[#allocation8 + $0x13] sm:$0x1] %vm15849_vm7, %v8110_v2  ;;  %7957 = vst.msk [vmem:[#allocation8 + $0xc] sm:$0x1] %vm15849_vm7, %v7956_v45 }
 0x4d2   : > { %v7653_v54 = vmax.f32 %v7621_v29, %v7623_v36  ;;  %v7598_v12 = vld [vmem:[#allocation6 + $0xb9] sm:$0xff]  ;;  %v7599_v0 = vld [vmem:[#allocation6 + $0xc1] sm:$0xff]  ;;  %v7868_v29 = vld [vmem:[#allocation7 + $0x44] sm:$0x1]  ;;  %v12244_v10 = vpack.c.bf16 %v8255_v27, %v8254_v17 }
 0x4d3   : > { %v7624_v19 = vmax.f32 %v7572_v44, %v7598_v12  ;;  %v7625_v62 = vmax.f32 %v7573_v25, %v7599_v0  ;;  %v10337_v59 = vld.sshfl [vmem:[#allocation7 + $0x82] sm:$0x1 pattern:$0x75316420]  ;;  %v7890_v37 = vld [vmem:[#allocation7 + $0x84] sm:$0x1]  ;;  %12239 = vmatpush3.bf16.msra.mxu1 %v12238_v35 }
 0x4d4   : > { %7679 = vst.msk [vmem:[#allocation7 + $0xa0] sm:$0xff] %vm4199_vm5, %v7653_v54  ;;  %v7819_v61 = vrot.slane %v10337_v59, %v15839_v15  ;;  %v7736_v28 = vld [vmem:[#allocation7 + $0x80] sm:$0x1]  ;;  %12241 = vmatprep.subr.bf16.mxu1 %v12240_v13  ;;  %v8256_v34 = vld [vmem:[%s17362_s5 + $0xf0] sm:$0xff]  ;;  %v8257_v7 = vld [vmem:[%s17362_s5 + $0xf8] sm:$0xff] }
 0x4d5   : > { %7891 = vst.msk [vmem:[#allocation8 + $0x9] sm:$0x1] %vm15849_vm7, %v7890_v37  ;;  %v7628_v1 = vld [vmem:[#allocation6 + $0xd8] sm:$0xff]  ;;  %v7654_v14 = vmax.f32 %v7622_v43, %v7624_v19  ;;  %7737 = vst.msk [vmem:[#allocation8 + $0x2] sm:$0x1] %vm15849_vm7, %v7736_v28  ;;  %v7600_v55 = vld [vmem:[#allocation6 + $0xc9] sm:$0xff]  ;;  %v12248_v54 = vpack.c.bf16 %v8257_v7, %v8256_v34 }
 0x4d6   : > { %v7630_v40 = vld [vmem:[#allocation6 + $0xd9] sm:$0xff]  ;;  %v7627_v32 = vld [vmem:[#allocation6 + $0xd0] sm:$0xff]  ;;  %7820 = vrot.lane.b32.xlu1 %v7819_v61, %s13072_s21  ;;  %v7626_v26 = vmax.f32 %v7574_v51, %v7600_v55  ;;  %7869 = vst.msk [vmem:[#allocation8 + $0x8] sm:$0x1] %vm15849_vm7, %v7868_v29  ;;  %v8044_v39 = vld [vmem:[#allocation7 + $0x88] sm:$0x1] }
 0x4d7   : > { %v7632_v30 = vmax.f32 %v7628_v1, %v7630_v40  ;;  %v7629_v50 = vld [vmem:[#allocation6 + $0xd1] sm:$0xff]  ;;  %7680 = vst.msk [vmem:[#allocation7 + $0xa8] sm:$0xff] %vm4199_vm5, %v7654_v14  ;;  %12243 = vmatpush3.bf16.msra.mxu1 %v12242_v46  ;;  %v8198_v36 = vld [vmem:[#allocation7 + $0x8c] sm:$0x1]  ;;  %v8240_v44 = vld [vmem:[%s17362_s5 + $0x70] sm:$0xff] }
 0x4d8   : > { %v7631_v52 = vmax.f32 %v7627_v32, %v7629_v50  ;;  %v8238_v49 = vld [vmem:[%s17362_s5 + $0x60] sm:$0xff]  ;;  %12245 = vmatprep.subr.bf16.mxu1 %v12244_v10  ;;  %v8239_v43 = vld [vmem:[%s17362_s5 + $0x68] sm:$0xff]  ;;  %8199 = vst.msk [vmem:[#allocation8 + $0x17] sm:$0x1] %vm15849_vm7, %v8198_v36  ;;  %8045 = vst.msk [vmem:[#allocation8 + $0x10] sm:$0x1] %vm15849_vm7, %v8044_v39 }
 0x4d9   : > { %v7658_v33 = vmax.f32 %v7626_v26, %v7632_v30  ;;  %v10343_v11 = vld.sshfl [vmem:[#allocation7 + $0x46] sm:$0x1 pattern:$0x75316420]  ;;  %v12246_v21 = vpack.c.bf16 %v8239_v43, %v8238_v49  ;;  %v8241_v35 = vld [vmem:[%s17362_s5 + $0x78] sm:$0xff]  ;;  %v8275_v40 = vld [vmem:[%s17362_s5 + $0x188] sm:$0xff] }
 0x4da   : > { %v7657_v6 = vmax.f32 %v7625_v62, %v7631_v52  ;;  %7864 = vrot.lane.b32.xlu1 %v7863_v56, %s13072_s21  ;;  %v12250_v42 = vpack.c.bf16 %v8241_v35, %v8240_v44  ;;  %v8088_v38 = vld [vmem:[#allocation7 + $0x2a] sm:$0x1]  ;;  %v7951_v25 = vrot.slane %v10343_v11, %v15839_v15  ;;  %v8176_v0 = vld [vmem:[#allocation7 + $0x4c] sm:$0x1]  ;;  %v8274_v1 = vld [vmem:[%s17362_s5 + $0x180] sm:$0xff] }
 0x4db   : > { %v10341_v16 = vld.sshfl [vmem:[#allocation7 + $0xa4] sm:$0x1 pattern:$0x75316420]  ;;  %v7978_v63 = vld [vmem:[#allocation7 + $0xa6] sm:$0x1]  ;;  %12247 = vmatpush3.bf16.msra.mxu1 %v12246_v21  ;;  %v12252_v14 = vpack.c.bf16 %v8275_v40, %v8274_v1 }
 0x4dc   : > { %v7907_v24 = vrot.slane %v10341_v16, %v15839_v15  ;;  %v10334_v3 = vld.sshfl [vmem:[#allocation7 + $0xa0] sm:$0x1 pattern:$0x75316420]  ;;  %7683 = vst.msk [vmem:[#allocation7 + $0xc0] sm:$0xff] %vm4199_vm5, %v7657_v6  ;;  %7684 = vst.msk [vmem:[#allocation7 + $0xc8] sm:$0xff] %vm4199_vm5, %v7658_v33  ;;  %12249 = vmatprep.subr.bf16.mxu1 %v12248_v54 }
 0x4dd   : > { %7979 = vst.msk [vmem:[#allocation8 + $0xd] sm:$0x1] %vm15849_vm7, %v7978_v63  ;;  %v7824_v5 = vld [vmem:[#allocation7 + $0xa2] sm:$0x1]  ;;  %v7753_v41 = vrot.slane %v10334_v3, %v15839_v15  ;;  %8089 = vst.msk [vmem:[#allocation8 + $0x12] sm:$0x1] %vm15849_vm7, %v8088_v38 }
 0x4de   : > { %7825 = vst.msk [vmem:[#allocation8 + $0x6] sm:$0x1] %vm15849_vm7, %v7824_v5  ;;  %7908 = vrot.lane.b32.xlu1 %v7907_v24, %s13072_s21  ;;  %v8132_v12 = vld [vmem:[#allocation7 + $0xaa] sm:$0x1]  ;;  %8177 = vst.msk [vmem:[#allocation8 + $0x16] sm:$0x1] %vm15849_vm7, %v8176_v0 }
 0x4df   : > { %7754 = vrot.lane.b32.xlu0 %v7753_v41, %s13072_s21  ;;  %8133 = vst.msk [vmem:[#allocation8 + $0x14] sm:$0x1] %vm15849_vm7, %v8132_v12  ;;  %12251 = vmatpush3.bf16.msra.mxu1 %v12250_v42  ;;  %v10340_v51 = vld.sshfl [vmem:[#allocation7 + $0x64] sm:$0x1 pattern:$0x75316420] }
 0x4e0   : > { %v10347_v28 = vld.sshfl [vmem:[#allocation7 + $0x68] sm:$0x1 pattern:$0x75316420]  ;;  %v7885_v55 = vrot.slane %v10340_v51, %v15839_v15  ;;  %12253 = vmatprep.subr.bf16.mxu1 %v12252_v14  ;;  %v8258_v38 = vld [vmem:[%s17362_s5 + $0x100] sm:$0xff]  ;;  %v8276_v12 = vld [vmem:[%s17362_s5 + $0x190] sm:$0xff] }
 0x4e1   : > { %v8039_v30 = vrot.slane %v10347_v28, %v15839_v15  ;;  %v10342_v32 = vld.sshfl [vmem:[#allocation7 + $0x6] sm:$0x1 pattern:$0x75316420]  ;;  %v8277_v0 = vld [vmem:[%s17362_s5 + $0x198] sm:$0xff]  ;;  %v8279_v14 = vld [vmem:[%s17362_s5 + $0x1a8] sm:$0xff] }
 0x4e2   : > { %7952 = vrot.lane.b32.xlu1 %v7951_v25, %s13072_s21  ;;  %v10349_v50 = vld.sshfl [vmem:[#allocation7 + $0xa] sm:$0x1 pattern:$0x75316420]  ;;  %v7929_v52 = vrot.slane %v10342_v32, %v15839_v15  ;;  %v12256_v51 = vpack.c.bf16 %v8277_v0, %v8276_v12  ;;  %v8261_v28 = vld [vmem:[%s17362_s5 + $0x118] sm:$0xff]  ;;  %v8278_v40 = vld [vmem:[%s17362_s5 + $0x1a0] sm:$0xff] }
 0x4e3   : > { %v10345_v13 = vld.sshfl [vmem:[#allocation7 + $0xc6] sm:$0x1 pattern:$0x75316420]  ;;  %v7758_v19 = vld [vmem:[#allocation7 + $0xc0] sm:$0x1]  ;;  %v8083_v26 = vrot.slane %v10349_v50, %v15839_v15  ;;  %v12260_v32 = vpack.c.bf16 %v8279_v14, %v8278_v40 }
 0x4e4   : > { %v7995_v62 = vrot.slane %v10345_v13, %v15839_v15  ;;  %v10338_v59 = vld.sshfl [vmem:[#allocation7 + $0xc2] sm:$0x1 pattern:$0x75316420]  ;;  %7759 = vst.msk [vmem:[#allocation8 + $0x3] sm:$0x1] %vm15849_vm7, %v7758_v19 }
 0x4e5   : > { %v8066_v8 = vld [vmem:[#allocation7 + $0xc8] sm:$0x1]  ;;  %v7841_v37 = vrot.slane %v10338_v59, %v15839_v15  ;;  %v7912_v61 = vld [vmem:[#allocation7 + $0xc4] sm:$0x1]  ;;  %v8220_v20 = vld [vmem:[#allocation7 + $0xcc] sm:$0x1] }
 0x4e6   : > { %8067 = vst.msk [vmem:[#allocation8 + $0x11] sm:$0x1] %vm15849_vm7, %v8066_v8  ;;  %7913 = vst.msk [vmem:[#allocation8 + $0xa] sm:$0x1] %vm15849_vm7, %v7912_v61  ;;  %7996 = vrot.lane.b32.xlu1 %v7995_v62, %s13072_s21  ;;  %v8259_v25 = vld [vmem:[%s17362_s5 + $0x108] sm:$0xff]  ;;  %v8260_v61 = vld [vmem:[%s17362_s5 + $0x110] sm:$0xff] }
 0x4e7   : > { %7842 = vrot.lane.b32.xlu0 %v7841_v37, %s13072_s21  ;;  %8221 = vst.msk [vmem:[#allocation8 + $0x18] sm:$0x1] %vm15849_vm7, %v8220_v20  ;;  %v10344_v48 = vld.sshfl [vmem:[#allocation7 + $0x86] sm:$0x1 pattern:$0x75316420]  ;;  %v12254_v37 = vpack.c.bf16 %v8259_v25, %v8258_v38 }
 0x4e8   : > { %v10351_v56 = vld.sshfl [vmem:[#allocation7 + $0x8a] sm:$0x1 pattern:$0x75316420]  ;;  %v7973_v46 = vrot.slane %v10344_v48, %v15839_v15  ;;  %v8262_v50 = vld [vmem:[%s17362_s5 + $0x120] sm:$0xff]  ;;  %v8281_v48 = vld [vmem:[%s17362_s5 + $0x1b8] sm:$0xff] }
 0x4e9   : > { %v8127_v9 = vrot.slane %v10351_v56, %v15839_v15  ;;  %v10353_v29 = vld.sshfl [vmem:[#allocation7 + $0x2c] sm:$0x1 pattern:$0x75316420]  ;;  %v8272_v0 = vld [vmem:[%s17362_s5 + $0x170] sm:$0xff] }
 0x4ea   : > { %8040 = vrot.lane.b32.xlu1 %v8039_v30, %s13072_s21  ;;  %v10346_v2 = vld.sshfl [vmem:[#allocation7 + $0x28] sm:$0x1 pattern:$0x75316420]  ;;  %v8171_v45 = vrot.slane %v10353_v29, %v15839_v15 }
 0x4eb   : > { %7886 = vrot.lane.b32.xlu0 %v7885_v55, %s13072_s21  ;;  %v8017_v6 = vrot.slane %v10346_v2, %v15839_v15  ;;  %v10355_v33 = vld.sshfl [vmem:[#allocation7 + $0xac] sm:$0x1 pattern:$0x75316420]  ;;  %v12258_v55 = vpack.c.bf16 %v8261_v28, %v8260_v61  ;;  %v8264_v2 = vld [vmem:[%s17362_s5 + $0x130] sm:$0xff]  ;;  %v8309_v28 = vld [vmem:[%s17362_s5 + $0x298] sm:$0xff] }
 0x4ec   : > { %v10348_v17 = vld.sshfl [vmem:[#allocation7 + $0xa8] sm:$0x1 pattern:$0x75316420]  ;;  %v8215_v27 = vrot.slane %v10355_v33, %v15839_v15  ;;  %v8308_v61 = vld [vmem:[%s17362_s5 + $0x290] sm:$0xff] }
 0x4ed   : > { %v8061_v49 = vrot.slane %v10348_v17, %v15839_v15  ;;  %v10350_v16 = vld.sshfl [vmem:[#allocation7 + $0x4a] sm:$0x1 pattern:$0x75316420]  ;;  %v12288_v14 = vpack.c.bf16 %v8309_v28, %v8308_v61  ;;  %v8324_v28 = vld [vmem:[%s17362_s5 + $0x310] sm:$0xff] }
 0x4ee   : > { %8084 = vrot.lane.b32.xlu1 %v8083_v26, %s13072_s21  ;;  %v8105_v63 = vrot.slane %v10350_v16, %v15839_v15  ;;  %v10352_v10 = vld.sshfl [vmem:[#allocation7 + $0xca] sm:$0x1 pattern:$0x75316420] }
 0x4ef   : > { %7930 = vrot.lane.b32.xlu0 %v7929_v52, %s13072_s21  ;;  %v8149_v24 = vrot.slane %v10352_v10, %v15839_v15  ;;  %v10354_v3 = vld.sshfl [vmem:[#allocation7 + $0x6c] sm:$0x1 pattern:$0x75316420]  ;;  %v8280_v52 = vld [vmem:[%s17362_s5 + $0x1b0] sm:$0xff] }
 0x4f0   : > { %v8193_v11 = vrot.slane %v10354_v3, %v15839_v15  ;;  %v8263_v26 = vld [vmem:[%s17362_s5 + $0x128] sm:$0xff]  ;;  %v12264_v29 = vpack.c.bf16 %v8281_v48, %v8280_v52  ;;  %v8285_v3 = vld [vmem:[%s17362_s5 + $0x1d8] sm:$0xff]  ;;  %v8294_v48 = vld [vmem:[%s17362_s5 + $0x220] sm:$0xff] }
 0x4f1   : > { %v8283_v33 = vld [vmem:[%s17362_s5 + $0x1c8] sm:$0xff] }
 0x4f2   : > { %8128 = vrot.lane.b32.xlu1 %v8127_v9, %s13072_s21  ;;  %v8267_v10 = vld [vmem:[%s17362_s5 + $0x148] sm:$0xff] }
 0x4f3   : > { %7974 = vrot.lane.b32.xlu0 %v7973_v46, %s13072_s21  ;;  %v12262_v46 = vpack.c.bf16 %v8263_v26, %v8262_v50  ;;  %v8307_v5 = vld [vmem:[%s17362_s5 + $0x288] sm:$0xff] }
 0x4f4   : > { %v8311_v50 = vld [vmem:[%s17362_s5 + $0x2a8] sm:$0xff] }
 0x4f6   : > { %8172 = vrot.lane.b32.xlu1 %v8171_v45, %s13072_s21  ;;  %v8265_v45 = vld [vmem:[%s17362_s5 + $0x138] sm:$0xff] }
 0x4f7   : > { %8018 = vrot.lane.b32.xlu0 %v8017_v6, %s13072_s21  ;;  %v8282_v6 = vld [vmem:[%s17362_s5 + $0x1c0] sm:$0xff] }
 0x4f8   : > { %v12268_v16 = vpack.c.bf16 %v8283_v33, %v8282_v6  ;;  %v8297_v6 = vld [vmem:[%s17362_s5 + $0x238] sm:$0xff]  ;;  %v8314_v33 = vld [vmem:[%s17362_s5 + $0x2c0] sm:$0xff] }
 0x4fa   : > { %8216 = vrot.lane.b32.xlu1 %v8215_v27, %s13072_s21 }
 0x4fb   : > { %8062 = vrot.lane.b32.xlu0 %v8061_v49, %s13072_s21  ;;  %v12266_v49 = vpack.c.bf16 %v8265_v45, %v8264_v2  ;;  %v8296_v45 = vld [vmem:[%s17362_s5 + $0x230] sm:$0xff] }
 0x4ff   : > { %8106 = vrot.lane.b32.xlu0 %v8105_v63, %s13072_s21  ;;  %v8266_v63 = vld [vmem:[%s17362_s5 + $0x140] sm:$0xff] }
 0x503   : > { %8150 = vrot.lane.b32.xlu0 %v8149_v24, %s13072_s21  ;;  %v8284_v24 = vld [vmem:[%s17362_s5 + $0x1d0] sm:$0xff] }
 0x507   : > { %8194 = vrot.lane.b32.xlu0 %v8193_v11, %s13072_s21  ;;  %s13012_s21 = scalar_lea.vmem %s13011_s20, 32 }
 0x508   : > { %p13014_p1 = scmp.lt.s32.totalorder %s13012_s21, %s13006_s19 }
 0x50a   : > { %p13015_p2 = por %p13014_p1, %p13013_p0 }
 0x50c   : > { %p13016_p3 = pnand %p13015_p2, %p13009_p13 }
 0x525   : > { %v7777_v41 = vpop.permute.xlu1 %7776 }
 0x526   : > { %7779 = vst.msk [vmem:[#allocation8 + $0x3] sm:$0x1] %vm16113_vm10, %v7777_v41  ;;  %v12270_v41 = vpack.c.bf16 %v8267_v10, %v8266_v63  ;;  %v8299_v63 = vld [vmem:[%s17362_s5 + $0x248] sm:$0xff]  ;;  %v8316_v10 = vld [vmem:[%s17362_s5 + $0x2d0] sm:$0xff] }
 0x52d   : > { %v7708_v43 = vpop.permute.xlu0 %7707 }
 0x52e   : > { %7713 = vst.msk [vmem:[#allocation8] sm:$0x1] %vm16113_vm10, %v7708_v43  ;;  %v12272_v43 = vpack.c.bf16 %v8285_v3, %v8284_v24  ;;  %v8317_v24 = vld [vmem:[%s17362_s5 + $0x2d8] sm:$0xff] }
 0x538   : > { %v7799_v36 = vpop.permute.xlu0 %7798 }
 0x539   : > { %7801 = vst.msk [vmem:[#allocation8 + $0x4] sm:$0x1] %vm16113_vm10, %v7799_v36  ;;  %v8268_v36 = vld [vmem:[%s17362_s5 + $0x150] sm:$0xff] }
 0x540   : > { %v7733_v15 = vpop.permute.xlu1 %7732 }
 0x541   : > { %7735 = vst.msk [vmem:[#allocation8 + $0x1] sm:$0x1] %vm16113_vm10, %v7733_v15  ;;  %v8269_v15 = vld [vmem:[%s17362_s5 + $0x158] sm:$0xff] }
 0x548   : > { %v7821_v31 = vpop.permute.xlu1 %7820 }
 0x549   : > { %7823 = vst.msk [vmem:[#allocation8 + $0x5] sm:$0x1] %vm16113_vm10, %v7821_v31  ;;  %v8286_v31 = vld [vmem:[%s17362_s5 + $0x1e0] sm:$0xff] }
 0x54c   : > { %v7865_v39 = vpop.permute.xlu1 %7864 }
 0x54d   : > { %7867 = vst.msk [vmem:[#allocation8 + $0x7] sm:$0x1] %vm16113_vm10, %v7865_v39  ;;  %v8287_v39 = vld [vmem:[%s17362_s5 + $0x1e8] sm:$0xff] }
 0x550   : > { %v7909_v21 = vpop.permute.xlu1 %7908 }
 0x551   : > { %v7755_v34 = vpop.permute.xlu0 %7754  ;;  %7911 = vst.msk [vmem:[#allocation8 + $0x9] sm:$0x1] %vm16113_vm10, %v7909_v21 }
 0x552   : > { %7757 = vst.msk [vmem:[#allocation8 + $0x2] sm:$0x1] %vm16113_vm10, %v7755_v34  ;;  %v12274_v34 = vpack.c.bf16 %v8269_v15, %v8268_v36  ;;  %v8318_v36 = vld [vmem:[%s17362_s5 + $0x2e0] sm:$0xff]  ;;  %v8319_v15 = vld [vmem:[%s17362_s5 + $0x2e8] sm:$0xff] }
 0x554   : > { %v7953_v7 = vpop.permute.xlu1 %7952 }
 0x555   : > { %7955 = vst.msk [vmem:[#allocation8 + $0xb] sm:$0x1] %vm16113_vm10, %v7953_v7  ;;  %v12276_v7 = vpack.c.bf16 %v8287_v39, %v8286_v31  ;;  %v12308_v39 = vpack.c.bf16 %v8319_v15, %v8318_v36  ;;  %v8334_v36 = vld [vmem:[%s17362_s5 + $0x360] sm:$0xff]  ;;  %v8335_v15 = vld [vmem:[%s17362_s5 + $0x368] sm:$0xff] }
 0x558   : > { %v7997_v44 = vpop.permute.xlu1 %7996 }
 0x559   : > { %v7843_v54 = vpop.permute.xlu0 %7842  ;;  %7999 = vst.msk [vmem:[#allocation8 + $0xd] sm:$0x1] %vm16113_vm10, %v7997_v44  ;;  %v8270_v44 = vld [vmem:[%s17362_s5 + $0x160] sm:$0xff] }
 0x55a   : > { %7845 = vst.msk [vmem:[#allocation8 + $0x6] sm:$0x1] %vm16113_vm10, %v7843_v54  ;;  %v8271_v54 = vld [vmem:[%s17362_s5 + $0x168] sm:$0xff] }
 0x55b   : > { %v12278_v25 = vpack.c.bf16 %v8271_v54, %v8270_v44  ;;  %v8321_v44 = vld [vmem:[%s17362_s5 + $0x2f8] sm:$0xff] }
 0x55c   : > { %v8041_v35 = vpop.permute.xlu1 %8040 }
 0x55d   : > { %v7887_v42 = vpop.permute.xlu0 %7886  ;;  %8043 = vst.msk [vmem:[#allocation8 + $0xf] sm:$0x1] %vm16113_vm10, %v8041_v35  ;;  %v8288_v35 = vld [vmem:[%s17362_s5 + $0x1f0] sm:$0xff] }
 0x55e   : > { %7889 = vst.msk [vmem:[#allocation8 + $0x8] sm:$0x1] %vm16113_vm10, %v7887_v42  ;;  %v8289_v42 = vld [vmem:[%s17362_s5 + $0x1f8] sm:$0xff] }
 0x55f   : > { %v12280_v12 = vpack.c.bf16 %v8289_v42, %v8288_v35  ;;  %v8304_v42 = vld [vmem:[%s17362_s5 + $0x270] sm:$0xff] }
 0x560   : > { %v8085_v13 = vpop.permute.xlu1 %8084 }
 0x561   : > { %v7931_v19 = vpop.permute.xlu0 %7930  ;;  %v16155_v62 = vld [vmem:[#allocation8] sm:$0xff]  ;;  %8087 = vst.msk [vmem:[#allocation8 + $0x11] sm:$0x1] %vm16113_vm10, %v8085_v13  ;;  %v8273_v13 = vld [vmem:[%s17362_s5 + $0x178] sm:$0xff] }
 0x562   : > { %7933 = vst.msk [vmem:[#allocation8 + $0xa] sm:$0x1] %vm16113_vm10, %v7931_v19  ;;  %v8630_v59 = vrot.slane %v16155_v62, %v14700_v23  ;;  %v8626_v8 = vrot.slane %v16155_v62, %v14697_v53  ;;  %v8638_v1 = vrot.slane %v16155_v62, %v14676_v18  ;;  %v8306_v19 = vld [vmem:[%s17362_s5 + $0x280] sm:$0xff]  ;;  %v8634_v40 = vrot.slane %v16155_v62, %v14673_v4 }
 0x564   : > { %8813 = vmatprep.mubr.f32.mxu1 %v8630_v59  ;;  %v8129_v20 = vpop.permute.xlu1 %8128  ;;  %v12282_v59 = vpack.c.bf16 %v8273_v13, %v8272_v0 }
 0x565   : > { %v7975_v30 = vpop.permute.xlu0 %7974  ;;  %8814 = vmatmul.mubr.f32.vlgmr.msra.gmra.mrb[52].mxu1 %v8626_v8  ;;  %8131 = vst.msk [vmem:[#allocation8 + $0x13] sm:$0x1] %vm16113_vm10, %v8129_v20  ;;  %v12284_v8 = vpack.c.bf16 %v8307_v5, %v8306_v19  ;;  %v8292_v20 = vld [vmem:[%s17362_s5 + $0x210] sm:$0xff]  ;;  %v8322_v19 = vld [vmem:[%s17362_s5 + $0x300] sm:$0xff]  ;;  %v8323_v5 = vld [vmem:[%s17362_s5 + $0x308] sm:$0xff] }
 0x566   : > { %7977 = vst.msk [vmem:[#allocation8 + $0xc] sm:$0x1] %vm16113_vm10, %v7975_v30  ;;  %12255 = vmatpush3.bf16.msra.mxu1 %v12254_v37  ;;  %8883 = vmatprep.mubr.f32.mxu1 %v8638_v1  ;;  %v8290_v37 = vld [vmem:[%s17362_s5 + $0x200] sm:$0xff]  ;;  %v8293_v30 = vld [vmem:[%s17362_s5 + $0x218] sm:$0xff] }
 0x567   : > { %12257 = vmatprep.subr.bf16.mxu1 %v12256_v51  ;;  %v8291_v51 = vld [vmem:[%s17362_s5 + $0x208] sm:$0xff]  ;;  %v12290_v26 = vpack.c.bf16 %v8293_v30, %v8292_v20 }
 0x568   : > { %v8173_v56 = vpop.permute.xlu1 %8172  ;;  %v12286_v1 = vpack.c.bf16 %v8291_v51, %v8290_v37  ;;  %v12318_v37 = vpack.c.bf16 %v8323_v5, %v8322_v19  ;;  %v8642_v51 = vrot.slane %v16155_v62, %v14732_v57  ;;  %v8343_v20 = vld [vmem:[%s17362_s5 + $0x3a8] sm:$0xff] }
 0x569   : > { %v8019_v9 = vpop.permute.xlu0 %8018  ;;  %8175 = vst.msk [vmem:[#allocation8 + $0x15] sm:$0x1] %vm16113_vm10, %v8173_v56  ;;  %v8295_v56 = vld [vmem:[%s17362_s5 + $0x228] sm:$0xff] }
 0x56a   : > { %8021 = vst.msk [vmem:[#allocation8 + $0xe] sm:$0x1] %vm16113_vm10, %v8019_v9  ;;  %12259 = vmatpush3.bf16.msra.mxu1 %v12258_v55  ;;  %v8646_v55 = vrot.slane %v16155_v62, %v14738_v60  ;;  %v8312_v9 = vld [vmem:[%s17362_s5 + $0x2b0] sm:$0xff] }
 0x56b   : > { %12261 = vmatprep.subr.bf16.mxu1 %v12260_v32  ;;  %v8310_v32 = vld [vmem:[%s17362_s5 + $0x2a0] sm:$0xff] }
 0x56c   : > { %v8217_v17 = vpop.permute.xlu1 %8216  ;;  %v12292_v52 = vpack.c.bf16 %v8311_v50, %v8310_v32  ;;  %v8326_v32 = vld [vmem:[%s17362_s5 + $0x320] sm:$0xff]  ;;  %v8327_v50 = vld [vmem:[%s17362_s5 + $0x328] sm:$0xff] }
 0x56d   : > { %v8063_v27 = vpop.permute.xlu0 %8062  ;;  %8219 = vst.msk [vmem:[#allocation8 + $0x17] sm:$0x1] %vm16113_vm10, %v8217_v17  ;;  %v8315_v17 = vld [vmem:[%s17362_s5 + $0x2c8] sm:$0xff] }
 0x56e   : > { %8065 = vst.msk [vmem:[#allocation8 + $0x10] sm:$0x1] %vm16113_vm10, %v8063_v27  ;;  %12263 = vmatpush3.bf16.msra.mxu1 %v12262_v46  ;;  %v8313_v46 = vld [vmem:[%s17362_s5 + $0x2b8] sm:$0xff]  ;;  %v12298_v27 = vpack.c.bf16 %v8297_v6, %v8296_v45 }
 0x56f   : > { %12265 = vmatprep.subr.bf16.mxu1 %v12264_v29  ;;  %v12294_v29 = vpack.c.bf16 %v8295_v56, %v8294_v48  ;;  %v12296_v2 = vpack.c.bf16 %v8313_v46, %v8312_v9  ;;  %v12326_v48 = vpack.c.bf16 %v8327_v50, %v8326_v32  ;;  %v8328_v9 = vld [vmem:[%s17362_s5 + $0x330] sm:$0xff]  ;;  %v8329_v46 = vld [vmem:[%s17362_s5 + $0x338] sm:$0xff] }
 0x570   : > { %v12330_v45 = vpack.c.bf16 %v8329_v46, %v8328_v9 }
 0x571   : > { %v8107_v11 = vpop.permute.xlu0 %8106  ;;  %v16481_v19 = vld [vmem:[#allocation8 + $0x8] sm:$0xff] }
 0x572   : > { %8109 = vst.msk [vmem:[#allocation8 + $0x12] sm:$0x1] %vm16113_vm10, %v8107_v11  ;;  %12267 = vmatpush3.bf16.msra.mxu1 %v12266_v49  ;;  %v12300_v49 = vpack.c.bf16 %v8315_v17, %v8314_v33  ;;  %v12304_v11 = vpack.c.bf16 %v8317_v24, %v8316_v10  ;;  %v8330_v33 = vld [vmem:[%s17362_s5 + $0x340] sm:$0xff]  ;;  %v8331_v17 = vld [vmem:[%s17362_s5 + $0x348] sm:$0xff]  ;;  %v8332_v10 = vld [vmem:[%s17362_s5 + $0x350] sm:$0xff] }
 0x573   : > { %12269 = vmatprep.subr.bf16.mxu1 %v12268_v16  ;;  %v8298_v16 = vld [vmem:[%s17362_s5 + $0x240] sm:$0xff]  ;;  %v8333_v24 = vld [vmem:[%s17362_s5 + $0x358] sm:$0xff] }
 0x574   : > { %v12302_v3 = vpack.c.bf16 %v8299_v63, %v8298_v16  ;;  %v12334_v16 = vpack.c.bf16 %v8331_v17, %v8330_v33 }
 0x575   : > { %v8151_v21 = vpop.permute.xlu0 %8150 }
 0x576   : > { %12271 = vmatpush3.bf16.msra.mxu1 %v12270_v41  ;;  %8153 = vst.msk [vmem:[#allocation8 + $0x14] sm:$0x1] %vm16113_vm10, %v8151_v21  ;;  %v8300_v41 = vld [vmem:[%s17362_s5 + $0x250] sm:$0xff]  ;;  %v8302_v21 = vld [vmem:[%s17362_s5 + $0x260] sm:$0xff] }
 0x577   : > { %12273 = vmatprep.subr.bf16.mxu1 %v12272_v43  ;;  %v8301_v43 = vld [vmem:[%s17362_s5 + $0x258] sm:$0xff] }
 0x578   : > { %v12306_v31 = vpack.c.bf16 %v8301_v43, %v8300_v41  ;;  %v12338_v41 = vpack.c.bf16 %v8333_v24, %v8332_v10 }
 0x579   : > { %v8195_v38 = vpop.permute.xlu0 %8194 }
 0x57a   : > { %12275 = vmatpush3.bf16.msra.mxu1 %v12274_v34  ;;  %8197 = vst.msk [vmem:[#allocation8 + $0x16] sm:$0x1] %vm16113_vm10, %v8195_v38  ;;  %v8303_v34 = vld [vmem:[%s17362_s5 + $0x268] sm:$0xff]  ;;  %v8305_v38 = vld [vmem:[%s17362_s5 + $0x278] sm:$0xff] }
 0x57b   : > { %12277 = vmatprep.subr.bf16.mxu1 %v12276_v7  ;;  %v8320_v7 = vld [vmem:[%s17362_s5 + $0x2f0] sm:$0xff]  ;;  %v12310_v54 = vpack.c.bf16 %v8303_v34, %v8302_v21  ;;  %v12314_v0 = vpack.c.bf16 %v8305_v38, %v8304_v42  ;;  %v12342_v21 = vpack.c.bf16 %v8335_v15, %v8334_v36 }
 0x57c   : > { %v12312_v35 = vpack.c.bf16 %v8321_v44, %v8320_v7  ;;  %v8336_v7 = vld [vmem:[%s17362_s5 + $0x370] sm:$0xff]  ;;  %v8337_v44 = vld [vmem:[%s17362_s5 + $0x378] sm:$0xff] }
 0x57d   : > { %v12346_v42 = vpack.c.bf16 %v8337_v44, %v8336_v7 }
 0x57e   : > { %12279 = vmatpush3.bf16.msra.mxu1 %v12278_v25  ;;  %v8338_v25 = vld [vmem:[%s17362_s5 + $0x380] sm:$0xff] }
 0x57f   : > { %12281 = vmatprep.subr.bf16.mxu1 %v12280_v12  ;;  %v8339_v12 = vld [vmem:[%s17362_s5 + $0x388] sm:$0xff] }
 0x580   : > { %v12316_v13 = vpack.c.bf16 %v8339_v12, %v8338_v25  ;;  %v8354_v25 = vld [vmem:[%s17362_s5 + $0x400] sm:$0xff]  ;;  %v8355_v12 = vld [vmem:[%s17362_s5 + $0x408] sm:$0xff] }
 0x581   : > { %v12350_v5 = vpack.c.bf16 %v8355_v12, %v8354_v25  ;;  %v8658_v12 = vrot.slane %v16481_v19, %v14697_v53 }
 0x582   : > { %12283 = vmatpush3.bf16.msra.mxu1 %v12282_v59  ;;  %v8340_v59 = vld [vmem:[%s17362_s5 + $0x390] sm:$0xff] }
 0x583   : > { %12285 = vmatprep.subr.bf16.mxu1 %v12284_v8  ;;  %v8341_v8 = vld [vmem:[%s17362_s5 + $0x398] sm:$0xff] }
 0x584   : > { %v12320_v61 = vpack.c.bf16 %v8341_v8, %v8340_v59  ;;  %v8650_v59 = vrot.slane %v16155_v62, %v14651_v58 }
 0x585   : > { %8884 = vmatmul.mubr.f32.vlgmr.msra.gmra.mrb[54].mxu1 %v8634_v40  ;;  %v8654_v40 = vrot.slane %v16155_v62, %v14654_v22  ;;  %v8375_v62 = vld [vmem:[%s17362_s5 + $0x4a8] sm:$0xff] }
 0x586   : > { %12287 = vmatpush3.bf16.msra.mxu1 %v12286_v1  ;;  %8953 = vmatprep.mubr.f32.mxu1 %v8646_v55  ;;  %v8325_v1 = vld [vmem:[%s17362_s5 + $0x318] sm:$0xff] }
 0x587   : > { %12289 = vmatprep.subr.bf16.mxu1 %v12288_v14  ;;  %v8342_v14 = vld [vmem:[%s17362_s5 + $0x3a0] sm:$0xff]  ;;  %v12322_v30 = vpack.c.bf16 %v8325_v1, %v8324_v28 }
 0x588   : > { %v12324_v55 = vpack.c.bf16 %v8343_v20, %v8342_v14  ;;  %v8374_v28 = vld [vmem:[%s17362_s5 + $0x4a0] sm:$0xff]  ;;  %v8359_v20 = vld [vmem:[%s17362_s5 + $0x428] sm:$0xff] }
 0x589   : > { %v8358_v14 = vld [vmem:[%s17362_s5 + $0x420] sm:$0xff] }
 0x58a   : > { %12291 = vmatpush3.bf16.msra.mxu1 %v12290_v26  ;;  %v8344_v26 = vld [vmem:[%s17362_s5 + $0x3b0] sm:$0xff]  ;;  %v12358_v32 = vpack.c.bf16 %v8359_v20, %v8358_v14 }
 0x58b   : > { %12293 = vmatprep.subr.bf16.mxu1 %v12292_v52  ;;  %v8345_v52 = vld [vmem:[%s17362_s5 + $0x3b8] sm:$0xff] }
 0x58c   : > { %v12328_v56 = vpack.c.bf16 %v8345_v52, %v8344_v26  ;;  %v8360_v26 = vld [vmem:[%s17362_s5 + $0x430] sm:$0xff]  ;;  %v8361_v52 = vld [vmem:[%s17362_s5 + $0x438] sm:$0xff] }
 0x58d   : > { %v12362_v9 = vpack.c.bf16 %v8361_v52, %v8360_v26 }
 0x58e   : > { %12295 = vmatpush3.bf16.msra.mxu1 %v12294_v29  ;;  %v8346_v29 = vld [vmem:[%s17362_s5 + $0x3c0] sm:$0xff] }
 0x58f   : > { %12297 = vmatprep.subr.bf16.mxu1 %v12296_v2  ;;  %v8347_v2 = vld [vmem:[%s17362_s5 + $0x3c8] sm:$0xff] }
 0x590   : > { %v12332_v6 = vpack.c.bf16 %v8347_v2, %v8346_v29  ;;  %v8362_v29 = vld [vmem:[%s17362_s5 + $0x440] sm:$0xff]  ;;  %v8363_v2 = vld [vmem:[%s17362_s5 + $0x448] sm:$0xff] }
 0x591   : > { %v12366_v33 = vpack.c.bf16 %v8363_v2, %v8362_v29 }
 0x592   : > { %12299 = vmatpush3.bf16.msra.mxu1 %v12298_v27  ;;  %v8348_v27 = vld [vmem:[%s17362_s5 + $0x3d0] sm:$0xff] }
 0x593   : > { %12301 = vmatprep.subr.bf16.mxu1 %v12300_v49  ;;  %v8349_v49 = vld [vmem:[%s17362_s5 + $0x3d8] sm:$0xff] }
 0x594   : > { %v12336_v63 = vpack.c.bf16 %v8349_v49, %v8348_v27  ;;  %v8364_v27 = vld [vmem:[%s17362_s5 + $0x450] sm:$0xff]  ;;  %v8365_v49 = vld [vmem:[%s17362_s5 + $0x458] sm:$0xff] }
 0x595   : > { %v12370_v10 = vpack.c.bf16 %v8365_v49, %v8364_v27 }
 0x596   : > { %12303 = vmatpush3.bf16.msra.mxu1 %v12302_v3  ;;  %v8350_v3 = vld [vmem:[%s17362_s5 + $0x3e0] sm:$0xff] }
 0x597   : > { %12305 = vmatprep.subr.bf16.mxu1 %v12304_v11  ;;  %v8351_v11 = vld [vmem:[%s17362_s5 + $0x3e8] sm:$0xff] }
 0x598   : > { %v12340_v43 = vpack.c.bf16 %v8351_v11, %v8350_v3  ;;  %v8366_v3 = vld [vmem:[%s17362_s5 + $0x460] sm:$0xff]  ;;  %v8367_v11 = vld [vmem:[%s17362_s5 + $0x468] sm:$0xff] }
 0x599   : > { %v12374_v36 = vpack.c.bf16 %v8367_v11, %v8366_v3 }
 0x59a   : > { %12307 = vmatpush3.bf16.msra.mxu1 %v12306_v31  ;;  %v8352_v31 = vld [vmem:[%s17362_s5 + $0x3f0] sm:$0xff] }
 0x59b   : > { %12309 = vmatprep.subr.bf16.mxu1 %v12308_v39  ;;  %v8353_v39 = vld [vmem:[%s17362_s5 + $0x3f8] sm:$0xff] }
 0x59c   : > { %v12344_v34 = vpack.c.bf16 %v8353_v39, %v8352_v31  ;;  %v8368_v31 = vld [vmem:[%s17362_s5 + $0x470] sm:$0xff]  ;;  %v8369_v39 = vld [vmem:[%s17362_s5 + $0x478] sm:$0xff] }
 0x59d   : > { %v12378_v7 = vpack.c.bf16 %v8369_v39, %v8368_v31 }
 0x59e   : > { %12311 = vmatpush3.bf16.msra.mxu1 %v12310_v54  ;;  %v8370_v54 = vld [vmem:[%s17362_s5 + $0x480] sm:$0xff] }
 0x59f   : > { %12313 = vmatprep.subr.bf16.mxu1 %v12312_v35  ;;  %v8371_v35 = vld [vmem:[%s17362_s5 + $0x488] sm:$0xff] }
 0x5a0   : > { %v12348_v38 = vpack.c.bf16 %v8371_v35, %v8370_v54  ;;  %v8386_v54 = vld [vmem:[%s17362_s5 + $0x500] sm:$0xff]  ;;  %v8387_v35 = vld [vmem:[%s17362_s5 + $0x508] sm:$0xff] }
 0x5a1   : > { %v12382_v25 = vpack.c.bf16 %v8387_v35, %v8386_v54  ;;  %v8666_v35 = vrot.slane %v16481_v19, %v14673_v4 }
 0x5a2   : > { %12315 = vmatpush3.bf16.msra.mxu1 %v12314_v0  ;;  %v8372_v0 = vld [vmem:[%s17362_s5 + $0x490] sm:$0xff] }
 0x5a3   : > { %12317 = vmatprep.subr.bf16.mxu1 %v12316_v13  ;;  %v8373_v13 = vld [vmem:[%s17362_s5 + $0x498] sm:$0xff] }
 0x5a4   : > { %v12352_v8 = vpack.c.bf16 %v8373_v13, %v8372_v0  ;;  %v8388_v13 = vld [vmem:[%s17362_s5 + $0x510] sm:$0xff] }
 0x5a5   : > { %8954 = vmatmul.mubr.f32.vlgmr.msra.gmra.mrb[56].mxu1 %v8642_v51  ;;  %v8357_v51 = vld [vmem:[%s17362_s5 + $0x418] sm:$0xff] }
 0x5a6   : > { %12319 = vmatpush3.bf16.msra.mxu1 %v12318_v37  ;;  %9023 = vmatprep.mubr.f32.mxu1 %v8654_v40  ;;  %v8356_v37 = vld [vmem:[%s17362_s5 + $0x410] sm:$0xff]  ;;  %v12356_v40 = vpack.c.bf16 %v8375_v62, %v8374_v28  ;;  %v8390_v28 = vld [vmem:[%s17362_s5 + $0x520] sm:$0xff]  ;;  %v8391_v62 = vld [vmem:[%s17362_s5 + $0x528] sm:$0xff] }
 0x5a7   : > { %12321 = vmatprep.subr.bf16.mxu1 %v12320_v61  ;;  %v8662_v61 = vrot.slane %v16481_v19, %v14700_v23  ;;  %v12354_v1 = vpack.c.bf16 %v8357_v51, %v8356_v37  ;;  %v8407_v37 = vld [vmem:[%s17362_s5 + $0x5a8] sm:$0xff]  ;;  %v12390_v14 = vpack.c.bf16 %v8391_v62, %v8390_v28 }
 0x5aa   : > { %12323 = vmatpush3.bf16.msra.mxu1 %v12322_v30  ;;  %v8376_v30 = vld [vmem:[%s17362_s5 + $0x4b0] sm:$0xff] }
 0x5ab   : > { %12325 = vmatprep.subr.bf16.mxu1 %v12324_v55  ;;  %v8377_v55 = vld [vmem:[%s17362_s5 + $0x4b8] sm:$0xff] }
 0x5ac   : > { %v12360_v50 = vpack.c.bf16 %v8377_v55, %v8376_v30  ;;  %v8392_v30 = vld [vmem:[%s17362_s5 + $0x530] sm:$0xff]  ;;  %v8393_v55 = vld [vmem:[%s17362_s5 + $0x538] sm:$0xff] }
 0x5ad   : > { %v12394_v26 = vpack.c.bf16 %v8393_v55, %v8392_v30 }
 0x5ae   : > { %12327 = vmatpush3.bf16.msra.mxu1 %v12326_v48  ;;  %v8378_v48 = vld [vmem:[%s17362_s5 + $0x4c0] sm:$0xff] }
 0x5af   : > { %12329 = vmatprep.subr.bf16.mxu1 %v12328_v56  ;;  %v8379_v56 = vld [vmem:[%s17362_s5 + $0x4c8] sm:$0xff] }
 0x5b0   : > { %v12364_v46 = vpack.c.bf16 %v8379_v56, %v8378_v48  ;;  %v8394_v48 = vld [vmem:[%s17362_s5 + $0x540] sm:$0xff]  ;;  %v8395_v56 = vld [vmem:[%s17362_s5 + $0x548] sm:$0xff] }
 0x5b1   : > { %v12398_v29 = vpack.c.bf16 %v8395_v56, %v8394_v48 }
 0x5b2   : > { %12331 = vmatpush3.bf16.msra.mxu1 %v12330_v45  ;;  %v8380_v45 = vld [vmem:[%s17362_s5 + $0x4d0] sm:$0xff] }
 0x5b3   : > { %12333 = vmatprep.subr.bf16.mxu1 %v12332_v6  ;;  %v8381_v6 = vld [vmem:[%s17362_s5 + $0x4d8] sm:$0xff] }
 0x5b4   : > { %v12368_v17 = vpack.c.bf16 %v8381_v6, %v8380_v45  ;;  %v8396_v45 = vld [vmem:[%s17362_s5 + $0x550] sm:$0xff]  ;;  %v8397_v6 = vld [vmem:[%s17362_s5 + $0x558] sm:$0xff] }
 0x5b5   : > { %v12402_v27 = vpack.c.bf16 %v8397_v6, %v8396_v45 }
 0x5b6   : > { %12335 = vmatpush3.bf16.msra.mxu1 %v12334_v16  ;;  %v8382_v16 = vld [vmem:[%s17362_s5 + $0x4e0] sm:$0xff] }
 0x5b7   : > { %12337 = vmatprep.subr.bf16.mxu1 %v12336_v63  ;;  %v8383_v63 = vld [vmem:[%s17362_s5 + $0x4e8] sm:$0xff] }
 0x5b8   : > { %v12372_v24 = vpack.c.bf16 %v8383_v63, %v8382_v16  ;;  %v8398_v16 = vld [vmem:[%s17362_s5 + $0x560] sm:$0xff]  ;;  %v8399_v63 = vld [vmem:[%s17362_s5 + $0x568] sm:$0xff] }
 0x5b9   : > { %v12406_v3 = vpack.c.bf16 %v8399_v63, %v8398_v16 }
 0x5ba   : > { %12339 = vmatpush3.bf16.msra.mxu1 %v12338_v41  ;;  %v8384_v41 = vld [vmem:[%s17362_s5 + $0x4f0] sm:$0xff] }
 0x5bb   : > { %12341 = vmatprep.subr.bf16.mxu1 %v12340_v43  ;;  %v8385_v43 = vld [vmem:[%s17362_s5 + $0x4f8] sm:$0xff] }
 0x5bc   : > { %v12376_v15 = vpack.c.bf16 %v8385_v43, %v8384_v41  ;;  %v8400_v41 = vld [vmem:[%s17362_s5 + $0x570] sm:$0xff]  ;;  %v8401_v43 = vld [vmem:[%s17362_s5 + $0x578] sm:$0xff] }
 0x5bd   : > { %v12410_v31 = vpack.c.bf16 %v8401_v43, %v8400_v41 }
 0x5be   : > { %12343 = vmatpush3.bf16.msra.mxu1 %v12342_v21  ;;  %v8402_v21 = vld [vmem:[%s17362_s5 + $0x580] sm:$0xff] }
 0x5bf   : > { %12345 = vmatprep.subr.bf16.mxu1 %v12344_v34  ;;  %v8403_v34 = vld [vmem:[%s17362_s5 + $0x588] sm:$0xff] }
 0x5c0   : > { %v12380_v44 = vpack.c.bf16 %v8403_v34, %v8402_v21  ;;  %v8418_v21 = vld [vmem:[%s17362_s5 + $0x600] sm:$0xff]  ;;  %v8419_v34 = vld [vmem:[%s17362_s5 + $0x608] sm:$0xff] }
 0x5c1   : > { %v12414_v54 = vpack.c.bf16 %v8419_v34, %v8418_v21  ;;  %v8674_v34 = vrot.slane %v16481_v19, %v14732_v57 }
 0x5c2   : > { %12347 = vmatpush3.bf16.msra.mxu1 %v12346_v42  ;;  %v8404_v42 = vld [vmem:[%s17362_s5 + $0x590] sm:$0xff] }
 0x5c3   : > { %12349 = vmatprep.subr.bf16.mxu1 %v12348_v38  ;;  %v8405_v38 = vld [vmem:[%s17362_s5 + $0x598] sm:$0xff] }
 0x5c4   : > { %v12384_v0 = vpack.c.bf16 %v8405_v38, %v8404_v42  ;;  %v8420_v38 = vld [vmem:[%s17362_s5 + $0x610] sm:$0xff] }
 0x5c5   : > { %9024 = vmatmul.mubr.f32.vlgmr.msra.gmra.mrb[58].mxu1 %v8650_v59  ;;  %v8670_v59 = vrot.slane %v16481_v19, %v14676_v18 }
 0x5c6   : > { %12351 = vmatpush3.bf16.msra.mxu1 %v12350_v5  ;;  %9093 = vmatprep.mubr.f32.mxu1 %v8662_v61  ;;  %v8389_v5 = vld [vmem:[%s17362_s5 + $0x518] sm:$0xff] }
 0x5c7   : > { %12353 = vmatprep.subr.bf16.mxu1 %v12352_v8  ;;  %v8406_v8 = vld [vmem:[%s17362_s5 + $0x5a0] sm:$0xff]  ;;  %v12386_v51 = vpack.c.bf16 %v8389_v5, %v8388_v13  ;;  %v8439_v13 = vld [vmem:[%s17362_s5 + $0x6a8] sm:$0xff] }
 0x5c8   : > { %v12388_v61 = vpack.c.bf16 %v8407_v37, %v8406_v8  ;;  %v8422_v8 = vld [vmem:[%s17362_s5 + $0x620] sm:$0xff]  ;;  %v8423_v37 = vld [vmem:[%s17362_s5 + $0x628] sm:$0xff] }
 0x5c9   : > { %v12422_v28 = vpack.c.bf16 %v8423_v37, %v8422_v8 }
 0x5ca   : > { %12355 = vmatpush3.bf16.msra.mxu1 %v12354_v1  ;;  %v8408_v1 = vld [vmem:[%s17362_s5 + $0x5b0] sm:$0xff] }
 0x5cb   : > { %12357 = vmatprep.subr.bf16.mxu1 %v12356_v40  ;;  %v8409_v40 = vld [vmem:[%s17362_s5 + $0x5b8] sm:$0xff] }
 0x5cc   : > { %v12392_v20 = vpack.c.bf16 %v8409_v40, %v8408_v1  ;;  %v8424_v1 = vld [vmem:[%s17362_s5 + $0x630] sm:$0xff]  ;;  %v8425_v40 = vld [vmem:[%s17362_s5 + $0x638] sm:$0xff] }
 0x5cd   : > { %v12426_v30 = vpack.c.bf16 %v8425_v40, %v8424_v1 }
 0x5ce   : > { %12359 = vmatpush3.bf16.msra.mxu1 %v12358_v32  ;;  %v8410_v32 = vld [vmem:[%s17362_s5 + $0x5c0] sm:$0xff] }
 0x5cf   : > { %12361 = vmatprep.subr.bf16.mxu1 %v12360_v50  ;;  %v8411_v50 = vld [vmem:[%s17362_s5 + $0x5c8] sm:$0xff] }
 0x5d0   : > { %v12396_v52 = vpack.c.bf16 %v8411_v50, %v8410_v32  ;;  %v8426_v32 = vld [vmem:[%s17362_s5 + $0x640] sm:$0xff]  ;;  %v8427_v50 = vld [vmem:[%s17362_s5 + $0x648] sm:$0xff] }
 0x5d1   : > { %v12430_v48 = vpack.c.bf16 %v8427_v50, %v8426_v32 }
 0x5d2   : > { %12363 = vmatpush3.bf16.msra.mxu1 %v12362_v9  ;;  %v8412_v9 = vld [vmem:[%s17362_s5 + $0x5d0] sm:$0xff] }
 0x5d3   : > { %12365 = vmatprep.subr.bf16.mxu1 %v12364_v46  ;;  %v8413_v46 = vld [vmem:[%s17362_s5 + $0x5d8] sm:$0xff] }
 0x5d4   : > { %v12400_v2 = vpack.c.bf16 %v8413_v46, %v8412_v9  ;;  %v8428_v9 = vld [vmem:[%s17362_s5 + $0x650] sm:$0xff]  ;;  %v8429_v46 = vld [vmem:[%s17362_s5 + $0x658] sm:$0xff] }
 0x5d5   : > { %v12434_v45 = vpack.c.bf16 %v8429_v46, %v8428_v9 }
 0x5d6   : > { %12367 = vmatpush3.bf16.msra.mxu1 %v12366_v33  ;;  %v8414_v33 = vld [vmem:[%s17362_s5 + $0x5e0] sm:$0xff] }
 0x5d7   : > { %12369 = vmatprep.subr.bf16.mxu1 %v12368_v17  ;;  %v8415_v17 = vld [vmem:[%s17362_s5 + $0x5e8] sm:$0xff] }
 0x5d8   : > { %v12404_v49 = vpack.c.bf16 %v8415_v17, %v8414_v33  ;;  %v8430_v33 = vld [vmem:[%s17362_s5 + $0x660] sm:$0xff]  ;;  %v8431_v17 = vld [vmem:[%s17362_s5 + $0x668] sm:$0xff] }
 0x5d9   : > { %v12438_v16 = vpack.c.bf16 %v8431_v17, %v8430_v33  ;;  %v8481_v33 = vld [vmem:[%s17362_s5 + $0x7f8] sm:$0xff] }
 0x5da   : > { %12371 = vmatpush3.bf16.msra.mxu1 %v12370_v10  ;;  %v8416_v10 = vld [vmem:[%s17362_s5 + $0x5f0] sm:$0xff] }
 0x5db   : > { %12373 = vmatprep.subr.bf16.mxu1 %v12372_v24  ;;  %v8417_v24 = vld [vmem:[%s17362_s5 + $0x5f8] sm:$0xff] }
 0x5dc   : > { %v12408_v11 = vpack.c.bf16 %v8417_v24, %v8416_v10  ;;  %v8432_v10 = vld [vmem:[%s17362_s5 + $0x670] sm:$0xff]  ;;  %v8433_v24 = vld [vmem:[%s17362_s5 + $0x678] sm:$0xff] }
 0x5dd   : > { %v12442_v41 = vpack.c.bf16 %v8433_v24, %v8432_v10  ;;  %v8465_v10 = vld [vmem:[%s17362_s5 + $0x778] sm:$0xff]  ;;  %v8498_v24 = vld [vmem:[%s17362_s5 + $0x880] sm:$0xff] }
 0x5de   : > { %12375 = vmatpush3.bf16.msra.mxu1 %v12374_v36  ;;  %v8434_v36 = vld [vmem:[%s17362_s5 + $0x680] sm:$0xff] }
 0x5df   : > { %12377 = vmatprep.subr.bf16.mxu1 %v12376_v15  ;;  %v8435_v15 = vld [vmem:[%s17362_s5 + $0x688] sm:$0xff] }
 0x5e0   : > { %v12412_v39 = vpack.c.bf16 %v8435_v15, %v8434_v36  ;;  %v8450_v36 = vld [vmem:[%s17362_s5 + $0x700] sm:$0xff]  ;;  %v8451_v15 = vld [vmem:[%s17362_s5 + $0x708] sm:$0xff] }
 0x5e1   : > { %v12446_v21 = vpack.c.bf16 %v8451_v15, %v8450_v36  ;;  %v8483_v36 = vld [vmem:[%s17362_s5 + $0x808] sm:$0xff]  ;;  %v8500_v15 = vld [vmem:[%s17362_s5 + $0x890] sm:$0xff] }
 0x5e2   : > { %12379 = vmatpush3.bf16.msra.mxu1 %v12378_v7  ;;  %v8436_v7 = vld [vmem:[%s17362_s5 + $0x690] sm:$0xff] }
 0x5e3   : > { %12381 = vmatprep.subr.bf16.mxu1 %v12380_v44  ;;  %v8437_v44 = vld [vmem:[%s17362_s5 + $0x698] sm:$0xff] }
 0x5e4   : > { %v12416_v42 = vpack.c.bf16 %v8437_v44, %v8436_v7  ;;  %v8452_v44 = vld [vmem:[%s17362_s5 + $0x710] sm:$0xff] }
 0x5e5   : > { %9094 = vmatmul.mubr.f32.vlgmr.msra.gmra.mrb[60].mxu1 %v8658_v12  ;;  %v8678_v12 = vrot.slane %v16481_v19, %v14738_v60 }
 0x5e6   : > { %12383 = vmatpush3.bf16.msra.mxu1 %v12382_v25  ;;  %9163 = vmatprep.mubr.f32.mxu1 %v8670_v59  ;;  %v8421_v25 = vld [vmem:[%s17362_s5 + $0x618] sm:$0xff] }
 0x5e7   : > { %12385 = vmatprep.subr.bf16.mxu1 %v12384_v0  ;;  %v8438_v0 = vld [vmem:[%s17362_s5 + $0x6a0] sm:$0xff]  ;;  %v12418_v5 = vpack.c.bf16 %v8421_v25, %v8420_v38  ;;  %v8471_v38 = vld [vmem:[%s17362_s5 + $0x7a8] sm:$0xff] }
 0x5e8   : > { %v12420_v59 = vpack.c.bf16 %v8439_v13, %v8438_v0  ;;  %v8454_v0 = vld [vmem:[%s17362_s5 + $0x720] sm:$0xff]  ;;  %v8455_v13 = vld [vmem:[%s17362_s5 + $0x728] sm:$0xff] }
 0x5e9   : > { %v12454_v8 = vpack.c.bf16 %v8455_v13, %v8454_v0  ;;  %v8504_v0 = vld [vmem:[%s17362_s5 + $0x8b0] sm:$0xff]  ;;  %v8505_v13 = vld [vmem:[%s17362_s5 + $0x8b8] sm:$0xff] }
 0x5ea   : > { %12387 = vmatpush3.bf16.msra.mxu1 %v12386_v51  ;;  %v8440_v51 = vld [vmem:[%s17362_s5 + $0x6b0] sm:$0xff] }
 0x5eb   : > { %12389 = vmatprep.subr.bf16.mxu1 %v12388_v61  ;;  %v8441_v61 = vld [vmem:[%s17362_s5 + $0x6b8] sm:$0xff] }
 0x5ec   : > { %v12424_v62 = vpack.c.bf16 %v8441_v61, %v8440_v51  ;;  %v8456_v51 = vld [vmem:[%s17362_s5 + $0x730] sm:$0xff]  ;;  %v8457_v61 = vld [vmem:[%s17362_s5 + $0x738] sm:$0xff] }
 0x5ed   : > { %v12458_v1 = vpack.c.bf16 %v8457_v61, %v8456_v51  ;;  %v8506_v51 = vld [vmem:[%s17362_s5 + $0x8c0] sm:$0xff]  ;;  %v8507_v61 = vld [vmem:[%s17362_s5 + $0x8c8] sm:$0xff] }
 0x5ee   : > { %12391 = vmatpush3.bf16.msra.mxu1 %v12390_v14  ;;  %v8442_v14 = vld [vmem:[%s17362_s5 + $0x6c0] sm:$0xff] }
 0x5ef   : > { %12393 = vmatprep.subr.bf16.mxu1 %v12392_v20  ;;  %v8443_v20 = vld [vmem:[%s17362_s5 + $0x6c8] sm:$0xff] }
 0x5f0   : > { %v12428_v55 = vpack.c.bf16 %v8443_v20, %v8442_v14  ;;  %v8458_v14 = vld [vmem:[%s17362_s5 + $0x740] sm:$0xff]  ;;  %v8459_v20 = vld [vmem:[%s17362_s5 + $0x748] sm:$0xff] }
 0x5f1   : > { %v12462_v32 = vpack.c.bf16 %v8459_v20, %v8458_v14  ;;  %v8508_v14 = vld [vmem:[%s17362_s5 + $0x8d0] sm:$0xff]  ;;  %v8509_v20 = vld [vmem:[%s17362_s5 + $0x8d8] sm:$0xff] }
 0x5f2   : > { %12395 = vmatpush3.bf16.msra.mxu1 %v12394_v26  ;;  %v8444_v26 = vld [vmem:[%s17362_s5 + $0x6d0] sm:$0xff] }
 0x5f3   : > { %12397 = vmatprep.subr.bf16.mxu1 %v12396_v52  ;;  %v8445_v52 = vld [vmem:[%s17362_s5 + $0x6d8] sm:$0xff] }
 0x5f4   : > { %v12432_v56 = vpack.c.bf16 %v8445_v52, %v8444_v26  ;;  %v8460_v26 = vld [vmem:[%s17362_s5 + $0x750] sm:$0xff]  ;;  %v8461_v52 = vld [vmem:[%s17362_s5 + $0x758] sm:$0xff] }
 0x5f5   : > { %v12466_v9 = vpack.c.bf16 %v8461_v52, %v8460_v26  ;;  %v8510_v26 = vld [vmem:[%s17362_s5 + $0x8e0] sm:$0xff]  ;;  %v8511_v52 = vld [vmem:[%s17362_s5 + $0x8e8] sm:$0xff] }
 0x5f6   : > { %12399 = vmatpush3.bf16.msra.mxu1 %v12398_v29  ;;  %v8446_v29 = vld [vmem:[%s17362_s5 + $0x6e0] sm:$0xff] }
 0x5f7   : > { %12401 = vmatprep.subr.bf16.mxu1 %v12400_v2  ;;  %v8447_v2 = vld [vmem:[%s17362_s5 + $0x6e8] sm:$0xff] }
 0x5f8   : > { %v12436_v6 = vpack.c.bf16 %v8447_v2, %v8446_v29  ;;  %v8462_v29 = vld [vmem:[%s17362_s5 + $0x760] sm:$0xff]  ;;  %v8463_v2 = vld [vmem:[%s17362_s5 + $0x768] sm:$0xff] }
 0x5fa   : > { %12403 = vmatpush3.bf16.msra.mxu1 %v12402_v27  ;;  %v8448_v27 = vld [vmem:[%s17362_s5 + $0x6f0] sm:$0xff] }
 0x5fb   : > { %12405 = vmatprep.subr.bf16.mxu1 %v12404_v49  ;;  %v8449_v49 = vld [vmem:[%s17362_s5 + $0x6f8] sm:$0xff] }
 0x5fc   : > { %v12440_v63 = vpack.c.bf16 %v8449_v49, %v8448_v27  ;;  %v12470_v49 = vpack.c.bf16 %v8463_v2, %v8462_v29  ;;  %v8495_v29 = vld [vmem:[%s17362_s5 + $0x868] sm:$0xff] }
 0x5fe   : > { %12407 = vmatpush3.bf16.msra.mxu1 %v12406_v3  ;;  %v8466_v3 = vld [vmem:[%s17362_s5 + $0x780] sm:$0xff] }
 0x5ff   : > { %12409 = vmatprep.subr.bf16.mxu1 %v12408_v11  ;;  %v8467_v11 = vld [vmem:[%s17362_s5 + $0x788] sm:$0xff] }
 0x600   : > { %v12444_v43 = vpack.c.bf16 %v8467_v11, %v8466_v3  ;;  %v8499_v3 = vld [vmem:[%s17362_s5 + $0x888] sm:$0xff] }
 0x602   : > { %12411 = vmatpush3.bf16.msra.mxu1 %v12410_v31  ;;  %v8468_v31 = vld [vmem:[%s17362_s5 + $0x790] sm:$0xff] }
 0x603   : > { %12413 = vmatprep.subr.bf16.mxu1 %v12412_v39  ;;  %v8469_v39 = vld [vmem:[%s17362_s5 + $0x798] sm:$0xff] }
 0x604   : > { %v12448_v7 = vpack.c.bf16 %v8469_v39, %v8468_v31  ;;  %v8501_v31 = vld [vmem:[%s17362_s5 + $0x898] sm:$0xff]  ;;  %v16885_v39 = vld [vmem:[#allocation8 + $0x10] sm:$0xff] }
 0x605   : > { %9164 = vmatmul.mubr.f32.vlgmr.msra.gmra.mrb[62].mxu1 %v8666_v35  ;;  %v8686_v35 = vrot.slane %v16481_v19, %v14654_v22 }
 0x606   : > { %12415 = vmatpush3.bf16.msra.mxu1 %v12414_v54  ;;  %9233 = vmatprep.mubr.f32.mxu1 %v8678_v12  ;;  %v8453_v54 = vld [vmem:[%s17362_s5 + $0x718] sm:$0xff] }
 0x607   : > { %12417 = vmatprep.subr.bf16.mxu1 %v12416_v42  ;;  %v8470_v42 = vld [vmem:[%s17362_s5 + $0x7a0] sm:$0xff]  ;;  %v12450_v25 = vpack.c.bf16 %v8453_v54, %v8452_v44  ;;  %v8484_v44 = vld [vmem:[%s17362_s5 + $0x810] sm:$0xff]  ;;  %v8485_v54 = vld [vmem:[%s17362_s5 + $0x818] sm:$0xff] }
 0x608   : > { %v12452_v12 = vpack.c.bf16 %v8471_v38, %v8470_v42  ;;  %v8502_v42 = vld [vmem:[%s17362_s5 + $0x8a0] sm:$0xff]  ;;  %v12482_v38 = vpack.c.bf16 %v8485_v54, %v8484_v44  ;;  %v8516_v54 = vld [vmem:[%s17362_s5 + $0x910] sm:$0xff] }
 0x60a   : > { %12419 = vmatpush3.bf16.msra.mxu1 %v12418_v5  ;;  %v8472_v5 = vld [vmem:[%s17362_s5 + $0x7b0] sm:$0xff] }
 0x60b   : > { %12421 = vmatprep.subr.bf16.mxu1 %v12420_v59  ;;  %v8473_v59 = vld [vmem:[%s17362_s5 + $0x7b8] sm:$0xff] }
 0x60c   : > { %v12456_v37 = vpack.c.bf16 %v8473_v59, %v8472_v5  ;;  %v12488_v59 = vpack.c.bf16 %v8505_v13, %v8504_v0  ;;  %v8537_v0 = vld [vmem:[%s17362_s5 + $0x9b8] sm:$0xff] }
 0x60e   : > { %12423 = vmatpush3.bf16.msra.mxu1 %v12422_v28  ;;  %v8474_v28 = vld [vmem:[%s17362_s5 + $0x7c0] sm:$0xff] }
 0x60f   : > { %12425 = vmatprep.subr.bf16.mxu1 %v12424_v62  ;;  %v8475_v62 = vld [vmem:[%s17362_s5 + $0x7c8] sm:$0xff] }
 0x610   : > { %v12460_v40 = vpack.c.bf16 %v8475_v62, %v8474_v28  ;;  %v12492_v62 = vpack.c.bf16 %v8507_v61, %v8506_v51  ;;  %v8539_v51 = vld [vmem:[%s17362_s5 + $0x9c8] sm:$0xff] }
 0x612   : > { %12427 = vmatpush3.bf16.msra.mxu1 %v12426_v30  ;;  %v8476_v30 = vld [vmem:[%s17362_s5 + $0x7d0] sm:$0xff] }
 0x613   : > { %12429 = vmatprep.subr.bf16.mxu1 %v12428_v55  ;;  %v8477_v55 = vld [vmem:[%s17362_s5 + $0x7d8] sm:$0xff] }
 0x614   : > { %v12464_v50 = vpack.c.bf16 %v8477_v55, %v8476_v30  ;;  %v12496_v55 = vpack.c.bf16 %v8509_v20, %v8508_v14  ;;  %v8541_v14 = vld [vmem:[%s17362_s5 + $0x9d8] sm:$0xff] }
 0x616   : > { %12431 = vmatpush3.bf16.msra.mxu1 %v12430_v48  ;;  %v8478_v48 = vld [vmem:[%s17362_s5 + $0x7e0] sm:$0xff] }
 0x617   : > { %12433 = vmatprep.subr.bf16.mxu1 %v12432_v56  ;;  %v8479_v56 = vld [vmem:[%s17362_s5 + $0x7e8] sm:$0xff] }
 0x618   : > { %v12468_v46 = vpack.c.bf16 %v8479_v56, %v8478_v48  ;;  %v8618_v56 = vld [vmem:[%s17363_s6] sm:$0x1] }
 0x61a   : > { %12435 = vmatpush3.bf16.msra.mxu1 %v12434_v45 }
 0x61b   : > { %12437 = vmatprep.subr.bf16.mxu1 %v12436_v6  ;;  %v8480_v6 = vld [vmem:[%s17362_s5 + $0x7f0] sm:$0xff] }
 0x61e   : > { %12439 = vmatpush3.bf16.msra.mxu1 %v12438_v16  ;;  %v12472_v16 = vpack.c.bf16 %v8481_v33, %v8480_v6  ;;  %v8513_v6 = vld [vmem:[%s17362_s5 + $0x8f8] sm:$0xff] }
 0x61f   : > { %12441 = vmatprep.subr.bf16.mxu1 %v12440_v63  ;;  %v8464_v63 = vld [vmem:[%s17362_s5 + $0x770] sm:$0xff] }
 0x620   : > { %v12474_v11 = vpack.c.bf16 %v8465_v10, %v8464_v63  ;;  %v8496_v10 = vld [vmem:[%s17362_s5 + $0x870] sm:$0xff] }
 0x622   : > { %12443 = vmatpush3.bf16.msra.mxu1 %v12442_v41  ;;  %v12476_v41 = vpack.c.bf16 %v8499_v3, %v8498_v24  ;;  %v8497_v24 = vld [vmem:[%s17362_s5 + $0x878] sm:$0xff] }
 0x623   : > { %12445 = vmatprep.subr.bf16.mxu1 %v12444_v43  ;;  %v8482_v43 = vld [vmem:[%s17362_s5 + $0x800] sm:$0xff] }
 0x625   : > { %9234 = vmatmul.mubr.f32.vlgmr.msra.gmra.mrb[64].mxu1 %v8674_v34  ;;  %v8682_v34 = vrot.slane %v16481_v19, %v14651_v58  ;;  %v8503_v19 = vld [vmem:[%s17362_s5 + $0x8a8] sm:$0xff] }
 0x626   : > { %12447 = vmatpush3.bf16.msra.mxu1 %v12446_v21  ;;  %9303 = vmatprep.mubr.f32.mxu1 %v8686_v35  ;;  %v12478_v21 = vpack.c.bf16 %v8483_v36, %v8482_v43  ;;  %v8694_v35 = vrot.slane %v16885_v39, %v14700_v23  ;;  %v8487_v23 = vld [vmem:[%s17362_s5 + $0x828] sm:$0xff]  ;;  %v8514_v36 = vld [vmem:[%s17362_s5 + $0x900] sm:$0xff] }
 0x627   : > { %12449 = vmatprep.subr.bf16.mxu1 %v12448_v7  ;;  %v12480_v7 = vpack.c.bf16 %v8501_v31, %v8500_v15  ;;  %v8515_v15 = vld [vmem:[%s17362_s5 + $0x908] sm:$0xff]  ;;  %v8532_v31 = vld [vmem:[%s17362_s5 + $0x990] sm:$0xff] }
 0x62a   : > { %12451 = vmatpush3.bf16.msra.mxu1 %v12450_v25  ;;  %v12484_v25 = vpack.c.bf16 %v8503_v19, %v8502_v42  ;;  %v8702_v42 = vrot.slane %v16885_v39, %v14676_v18  ;;  %v8534_v19 = vld [vmem:[%s17362_s5 + $0x9a0] sm:$0xff]  ;;  %v8519_v18 = vld [vmem:[%s17362_s5 + $0x928] sm:$0xff] }
 0x62b   : > { %12453 = vmatprep.subr.bf16.mxu1 %v12452_v12  ;;  %v8486_v12 = vld [vmem:[%s17362_s5 + $0x820] sm:$0xff] }
 0x62c   : > { %v12486_v5 = vpack.c.bf16 %v8487_v23, %v8486_v12  ;;  %v8518_v12 = vld [vmem:[%s17362_s5 + $0x920] sm:$0xff]  ;;  %v8536_v23 = vld [vmem:[%s17362_s5 + $0x9b0] sm:$0xff] }
 0x62d   : > { %v12518_v13 = vpack.c.bf16 %v8519_v18, %v8518_v12  ;;  %v8552_v18 = vld [vmem:[%s17362_s5 + $0xa30] sm:$0xff] }
 0x62e   : > { %12455 = vmatpush3.bf16.msra.mxu1 %v12454_v8  ;;  %v8488_v8 = vld [vmem:[%s17362_s5 + $0x830] sm:$0xff] }
 0x62f   : > { %12457 = vmatprep.subr.bf16.mxu1 %v12456_v37  ;;  %v8489_v37 = vld [vmem:[%s17362_s5 + $0x838] sm:$0xff] }
 0x630   : > { %v12490_v28 = vpack.c.bf16 %v8489_v37, %v8488_v8  ;;  %v8521_v8 = vld [vmem:[%s17362_s5 + $0x938] sm:$0xff]  ;;  %v8538_v37 = vld [vmem:[%s17362_s5 + $0x9c0] sm:$0xff] }
 0x632   : > { %12459 = vmatpush3.bf16.msra.mxu1 %v12458_v1  ;;  %v8490_v1 = vld [vmem:[%s17362_s5 + $0x840] sm:$0xff] }
 0x633   : > { %12461 = vmatprep.subr.bf16.mxu1 %v12460_v40  ;;  %v8491_v40 = vld [vmem:[%s17362_s5 + $0x848] sm:$0xff] }
 0x634   : > { %v12494_v30 = vpack.c.bf16 %v8491_v40, %v8490_v1  ;;  %v8523_v1 = vld [vmem:[%s17362_s5 + $0x948] sm:$0xff]  ;;  %v8540_v40 = vld [vmem:[%s17362_s5 + $0x9d0] sm:$0xff] }
 0x636   : > { %12463 = vmatpush3.bf16.msra.mxu1 %v12462_v32  ;;  %v8492_v32 = vld [vmem:[%s17362_s5 + $0x850] sm:$0xff] }
 0x637   : > { %12465 = vmatprep.subr.bf16.mxu1 %v12464_v50  ;;  %v8493_v50 = vld [vmem:[%s17362_s5 + $0x858] sm:$0xff] }
 0x638   : > { %v10718_v45 = vpop.f32.mrb[52].mxu1  ;;  %v12498_v48 = vpack.c.bf16 %v8493_v50, %v8492_v32  ;;  %v8525_v32 = vld [vmem:[%s17362_s5 + $0x958] sm:$0xff]  ;;  %v8542_v50 = vld [vmem:[%s17362_s5 + $0x9e0] sm:$0xff] }
 0x639   : > { %v10719_v17 = vpop.f32.mrb[53].mxu1 }
 0x63a   : > { %v16859_v27 = vadd.f32 %v10719_v17, %v10718_v45  ;;  %12467 = vmatpush3.bf16.msra.mxu1 %v12466_v9  ;;  %v12500_v9 = vpack.c.bf16 %v8511_v52, %v8510_v26  ;;  %v8512_v45 = vld [vmem:[%s17362_s5 + $0x8f0] sm:$0xff]  ;;  %v8543_v26 = vld [vmem:[%s17362_s5 + $0x9e8] sm:$0xff] }
 0x63b   : > { %12469 = vmatprep.subr.bf16.mxu1 %v12468_v46  ;;  %v8494_v46 = vld [vmem:[%s17362_s5 + $0x860] sm:$0xff]  ;;  %v12504_v63 = vpack.c.bf16 %v8513_v6, %v8512_v45 }
 0x63c   : > { %v8816_v17 = vadd.f32 %v16859_v27, %v8618_v56  ;;  %v8531_v27 = vld [vmem:[%s17362_s5 + $0x988] sm:$0xff]  ;;  %v8526_v56 = vld [vmem:[%s17362_s5 + $0x960] sm:$0xff] }
 0x63e   : > { %12471 = vmatpush3.bf16.msra.mxu1 %v12470_v49 }
 0x63f   : > { %12473 = vmatprep.subr.bf16.mxu1 %v12472_v16  ;;  %v12502_v16 = vpack.c.bf16 %v8495_v29, %v8494_v46  ;;  %v8544_v29 = vld [vmem:[%s17362_s5 + $0x9f0] sm:$0xff] }
 0x642   : > { %12475 = vmatpush3.bf16.msra.mxu1 %v12474_v11  ;;  %v8530_v11 = vld [vmem:[%s17362_s5 + $0x980] sm:$0xff] }
 0x643   : > { %12477 = vmatprep.subr.bf16.mxu1 %v12476_v41  ;;  %v12506_v41 = vpack.c.bf16 %v8497_v24, %v8496_v10  ;;  %v12508_v43 = vpack.c.bf16 %v8531_v27, %v8530_v11  ;;  %v8562_v10 = vld [vmem:[%s17362_s5 + $0xa80] sm:$0xff]  ;;  %v8563_v24 = vld [vmem:[%s17362_s5 + $0xa88] sm:$0xff] }
 0x644   : > { %v12540_v27 = vpack.c.bf16 %v8563_v24, %v8562_v10  ;;  %v8578_v10 = vld [vmem:[%s17362_s5 + $0xb00] sm:$0xff]  ;;  %v8596_v24 = vld [vmem:[%s17362_s5 + $0xb90] sm:$0xff] }
 0x645   : > { %9304 = vmatmul.mubr.f32.vlgmr.msra.gmra.mrb[66].mxu1 %v8682_v34  ;;  %v12510_v34 = vpack.c.bf16 %v8515_v15, %v8514_v36  ;;  %v8565_v36 = vld [vmem:[%s17362_s5 + $0xa98] sm:$0xff] }
 0x646   : > { %12479 = vmatpush3.bf16.msra.mxu1 %v12478_v21  ;;  %9373 = vmatprep.mubr.f32.mxu1 %v8694_v35  ;;  %v8533_v21 = vld [vmem:[%s17362_s5 + $0x998] sm:$0xff] }
 0x647   : > { %12481 = vmatprep.subr.bf16.mxu1 %v12480_v7  ;;  %v8690_v7 = vrot.slane %v16885_v39, %v14697_v53  ;;  %v12512_v44 = vpack.c.bf16 %v8533_v21, %v8532_v31  ;;  %v8517_v35 = vld [vmem:[%s17362_s5 + $0x918] sm:$0xff]  ;;  %v8535_v53 = vld [vmem:[%s17362_s5 + $0x9a8] sm:$0xff]  ;;  %v8698_v31 = vrot.slane %v16885_v39, %v14673_v4 }
 0x648   : > { %v8567_v4 = vld [vmem:[%s17362_s5 + $0xaa8] sm:$0xff] }
 0x64a   : > { %12483 = vmatpush3.bf16.msra.mxu1 %v12482_v38  ;;  %v12514_v38 = vpack.c.bf16 %v8517_v35, %v8516_v54  ;;  %v8566_v54 = vld [vmem:[%s17362_s5 + $0xaa0] sm:$0xff] }
 0x64b   : > { %12485 = vmatprep.subr.bf16.mxu1 %v12484_v25  ;;  %v12516_v25 = vpack.c.bf16 %v8535_v53, %v8534_v19  ;;  %v8550_v19 = vld [vmem:[%s17362_s5 + $0xa20] sm:$0xff]  ;;  %v8568_v53 = vld [vmem:[%s17362_s5 + $0xab0] sm:$0xff] }
 0x64e   : > { %12487 = vmatpush3.bf16.msra.mxu1 %v12486_v5  ;;  %v12520_v5 = vpack.c.bf16 %v8537_v0, %v8536_v23  ;;  %v8553_v23 = vld [vmem:[%s17362_s5 + $0xa38] sm:$0xff]  ;;  %v8570_v0 = vld [vmem:[%s17362_s5 + $0xac0] sm:$0xff] }
 0x64f   : > { %12489 = vmatprep.subr.bf16.mxu1 %v12488_v59  ;;  %v8520_v59 = vld [vmem:[%s17362_s5 + $0x930] sm:$0xff] }
 0x650   : > { %v12522_v61 = vpack.c.bf16 %v8521_v8, %v8520_v59  ;;  %v8554_v8 = vld [vmem:[%s17362_s5 + $0xa40] sm:$0xff] }
 0x652   : > { %12491 = vmatpush3.bf16.msra.mxu1 %v12490_v28  ;;  %v12524_v28 = vpack.c.bf16 %v8539_v51, %v8538_v37  ;;  %v8555_v37 = vld [vmem:[%s17362_s5 + $0xa48] sm:$0xff]  ;;  %v8572_v51 = vld [vmem:[%s17362_s5 + $0xad0] sm:$0xff] }
 0x653   : > { %12493 = vmatprep.subr.bf16.mxu1 %v12492_v62  ;;  %v8522_v62 = vld [vmem:[%s17362_s5 + $0x940] sm:$0xff] }
 0x654   : > { %v12526_v20 = vpack.c.bf16 %v8523_v1, %v8522_v62  ;;  %v8556_v1 = vld [vmem:[%s17362_s5 + $0xa50] sm:$0xff] }
 0x656   : > { %12495 = vmatpush3.bf16.msra.mxu1 %v12494_v30  ;;  %v12528_v30 = vpack.c.bf16 %v8541_v14, %v8540_v40  ;;  %v8557_v40 = vld [vmem:[%s17362_s5 + $0xa58] sm:$0xff]  ;;  %v8574_v14 = vld [vmem:[%s17362_s5 + $0xae0] sm:$0xff] }
 0x657   : > { %12497 = vmatprep.subr.bf16.mxu1 %v12496_v55  ;;  %v8524_v55 = vld [vmem:[%s17362_s5 + $0x950] sm:$0xff] }
 0x658   : > { %v10753_v2 = vpop.f32.mrb[54].mxu1  ;;  %v12530_v52 = vpack.c.bf16 %v8525_v32, %v8524_v55  ;;  %v8558_v32 = vld [vmem:[%s17362_s5 + $0xa60] sm:$0xff] }
 0x659   : > { %v10754_v33 = vpop.f32.mrb[55].mxu1 }
 0x65a   : > { %v10755_v49 = vadd.f32 %v10754_v33, %v10753_v2  ;;  %12499 = vmatpush3.bf16.msra.mxu1 %v12498_v48  ;;  %v12532_v48 = vpack.c.bf16 %v8543_v26, %v8542_v50  ;;  %v8545_v2 = vld [vmem:[%s17362_s5 + $0x9f8] sm:$0xff]  ;;  %v8559_v50 = vld [vmem:[%s17362_s5 + $0xa68] sm:$0xff] }
 0x65b   : > { %12501 = vmatprep.subr.bf16.mxu1 %v12500_v9  ;;  %v8527_v9 = vld [vmem:[%s17362_s5 + $0x968] sm:$0xff] }
 0x65c   : > { %v16973_v3 = vadd.f32 %v10755_v49, %v8816_v17  ;;  %v12534_v33 = vpack.c.bf16 %v8527_v9, %v8526_v56  ;;  %v12536_v17 = vpack.c.bf16 %v8545_v2, %v8544_v29  ;;  %v8528_v49 = vld [vmem:[%s17362_s5 + $0x970] sm:$0xff] }
 0x65d   : > { %v8560_v2 = vld [vmem:[%s17362_s5 + $0xa70] sm:$0xff] }
 0x65e   : > { %12503 = vmatpush3.bf16.msra.mxu1 %v12502_v16  ;;  %v8529_v16 = vld [vmem:[%s17362_s5 + $0x978] sm:$0xff] }
 0x65f   : > { %12505 = vmatprep.subr.bf16.mxu1 %v12504_v63  ;;  %v12538_v11 = vpack.c.bf16 %v8529_v16, %v8528_v49 }
 0x662   : > { %12507 = vmatpush3.bf16.msra.mxu1 %v12506_v41  ;;  %v8546_v41 = vld [vmem:[%s17362_s5 + $0xa00] sm:$0xff] }
 0x663   : > { %12509 = vmatprep.subr.bf16.mxu1 %v12508_v43  ;;  %v8564_v43 = vld [vmem:[%s17362_s5 + $0xa90] sm:$0xff] }
 0x664   : > { %v12544_v21 = vpack.c.bf16 %v8565_v36, %v8564_v43  ;;  %v8580_v43 = vld [vmem:[%s17362_s5 + $0xb10] sm:$0xff]  ;;  %v8581_v36 = vld [vmem:[%s17362_s5 + $0xb18] sm:$0xff] }
 0x665   : > { %9374 = vmatmul.mubr.f32.vlgmr.msra.gmra.mrb[68].mxu1 %v8690_v7  ;;  %v8549_v7 = vld [vmem:[%s17362_s5 + $0xa18] sm:$0xff] }
 0x666   : > { %12511 = vmatpush3.bf16.msra.mxu1 %v12510_v34  ;;  %9443 = vmatprep.mubr.f32.mxu1 %v8702_v42  ;;  %v8548_v34 = vld [vmem:[%s17362_s5 + $0xa10] sm:$0xff]  ;;  %v12548_v42 = vpack.c.bf16 %v8567_v4, %v8566_v54  ;;  %v8601_v54 = vld [vmem:[%s17362_s5 + $0xbb8] sm:$0xff] }
 0x667   : > { %12513 = vmatprep.subr.bf16.mxu1 %v12512_v44  ;;  %v8710_v44 = vrot.slane %v16885_v39, %v14738_v60  ;;  %v12546_v35 = vpack.c.bf16 %v8549_v7, %v8548_v34  ;;  %v8551_v60 = vld [vmem:[%s17362_s5 + $0xa28] sm:$0xff]  ;;  %v8582_v7 = vld [vmem:[%s17362_s5 + $0xb20] sm:$0xff] }
 0x66a   : > { %12515 = vmatpush3.bf16.msra.mxu1 %v12514_v38  ;;  %v8569_v38 = vld [vmem:[%s17362_s5 + $0xab8] sm:$0xff] }
 0x66b   : > { %12517 = vmatprep.subr.bf16.mxu1 %v12516_v25  ;;  %v12550_v25 = vpack.c.bf16 %v8551_v60, %v8550_v19  ;;  %v12552_v12 = vpack.c.bf16 %v8569_v38, %v8568_v53  ;;  %v8585_v19 = vld [vmem:[%s17362_s5 + $0xb38] sm:$0xff]  ;;  %v8602_v60 = vld [vmem:[%s17362_s5 + $0xbc0] sm:$0xff]  ;;  %v8603_v53 = vld [vmem:[%s17362_s5 + $0xbc8] sm:$0xff] }
 0x66e   : > { %12519 = vmatpush3.bf16.msra.mxu1 %v12518_v13  ;;  %v8571_v13 = vld [vmem:[%s17362_s5 + $0xac8] sm:$0xff] }
 0x66f   : > { %12521 = vmatprep.subr.bf16.mxu1 %v12520_v5  ;;  %v12554_v5 = vpack.c.bf16 %v8553_v23, %v8552_v18  ;;  %v12556_v59 = vpack.c.bf16 %v8571_v13, %v8570_v0  ;;  %v8587_v18 = vld [vmem:[%s17362_s5 + $0xb48] sm:$0xff]  ;;  %v8604_v23 = vld [vmem:[%s17362_s5 + $0xbd0] sm:$0xff]  ;;  %v8605_v0 = vld [vmem:[%s17362_s5 + $0xbd8] sm:$0xff] }
 0x672   : > { %12523 = vmatpush3.bf16.msra.mxu1 %v12522_v61  ;;  %v8573_v61 = vld [vmem:[%s17362_s5 + $0xad8] sm:$0xff] }
 0x673   : > { %12525 = vmatprep.subr.bf16.mxu1 %v12524_v28  ;;  %v12558_v28 = vpack.c.bf16 %v8555_v37, %v8554_v8  ;;  %v12560_v62 = vpack.c.bf16 %v8573_v61, %v8572_v51  ;;  %v8589_v8 = vld [vmem:[%s17362_s5 + $0xb58] sm:$0xff]  ;;  %v8606_v37 = vld [vmem:[%s17362_s5 + $0xbe0] sm:$0xff]  ;;  %v8607_v51 = vld [vmem:[%s17362_s5 + $0xbe8] sm:$0xff] }
 0x676   : > { %12527 = vmatpush3.bf16.msra.mxu1 %v12526_v20  ;;  %v8575_v20 = vld [vmem:[%s17362_s5 + $0xae8] sm:$0xff] }
 0x677   : > { %12529 = vmatprep.subr.bf16.mxu1 %v12528_v30  ;;  %v12562_v30 = vpack.c.bf16 %v8557_v40, %v8556_v1  ;;  %v12564_v55 = vpack.c.bf16 %v8575_v20, %v8574_v14  ;;  %v8591_v1 = vld [vmem:[%s17362_s5 + $0xb68] sm:$0xff]  ;;  %v8608_v14 = vld [vmem:[%s17362_s5 + $0xbf0] sm:$0xff]  ;;  %v8609_v20 = vld [vmem:[%s17362_s5 + $0xbf8] sm:$0xff] }
 0x678   : > { %v10788_v46 = vpop.f32.mrb[56].mxu1 }
 0x679   : > { %v10789_v45 = vpop.f32.mrb[57].mxu1 }
 0x67a   : > { %v10790_v6 = vadd.f32 %v10789_v45, %v10788_v46  ;;  %12531 = vmatpush3.bf16.msra.mxu1 %v12530_v52  ;;  %v8576_v52 = vld [vmem:[%s17362_s5 + $0xaf0] sm:$0xff]  ;;  %v12566_v46 = vpack.c.bf16 %v8559_v50, %v8558_v32  ;;  %v8561_v45 = vld [vmem:[%s17362_s5 + $0xa78] sm:$0xff]  ;;  %v12600_v50 = vpack.c.bf16 %v8609_v20, %v8608_v14 }
 0x67b   : > { %12533 = vmatprep.subr.bf16.mxu1 %v12532_v48  ;;  %v8577_v48 = vld [vmem:[%s17362_s5 + $0xaf8] sm:$0xff]  ;;  %v12570_v49 = vpack.c.bf16 %v8561_v45, %v8560_v2  ;;  %v8714_v2 = vrot.slane %v16885_v39, %v14651_v58  ;;  %v13074_v45 = vmov 0.0|0.0   ;;  %v8614_v58 = vld [vmem:[%s17362_s5 + $0xc20] sm:$0xff] }
 0x67c   : > { %v17076_v63 = vadd.f32 %v10790_v6, %v16973_v3  ;;  %v8547_v3 = vld [vmem:[%s17362_s5 + $0xa08] sm:$0xff]  ;;  %v12568_v29 = vpack.c.bf16 %v8577_v48, %v8576_v52  ;;  %v8593_v52 = vld [vmem:[%s17362_s5 + $0xb78] sm:$0xff] }
 0x67d   : > { %v12542_v15 = vpack.c.bf16 %v8547_v3, %v8546_v41  ;;  %v8706_v41 = vrot.slane %v16885_v39, %v14732_v57  ;;  %v8599_v57 = vld [vmem:[%s17362_s5 + $0xba8] sm:$0xff] }
 0x67e   : > { %12535 = vmatpush3.bf16.msra.mxu1 %v12534_v33  ;;  %v8594_v33 = vld [vmem:[%s17362_s5 + $0xb80] sm:$0xff] }
 0x67f   : > { %12537 = vmatprep.subr.bf16.mxu1 %v12536_v17  ;;  %v8595_v17 = vld [vmem:[%s17362_s5 + $0xb88] sm:$0xff] }
 0x680   : > { %v12572_v16 = vpack.c.bf16 %v8595_v17, %v8594_v33  ;;  %v8613_v33 = vld [vmem:[%s17362_s5 + $0xc18] sm:$0xff] }
 0x682   : > { %12539 = vmatpush3.bf16.msra.mxu1 %v12538_v11  ;;  %v8597_v11 = vld [vmem:[%s17362_s5 + $0xb98] sm:$0xff] }
 0x683   : > { %12541 = vmatprep.subr.bf16.mxu1 %v12540_v27  ;;  %v12576_v3 = vpack.c.bf16 %v8597_v11, %v8596_v24 }
 0x685   : > { %9444 = vmatmul.mubr.f32.vlgmr.msra.gmra.mrb[70].mxu1 %v8698_v31  ;;  %v8598_v31 = vld [vmem:[%s17362_s5 + $0xba0] sm:$0xff] }
 0x686   : > { %12543 = vmatpush3.bf16.msra.mxu1 %v12542_v15  ;;  %9513 = vmatprep.mubr.f32.mxu1 %v8710_v44  ;;  %v8718_v15 = vrot.slane %v16885_v39, %v14654_v22  ;;  %v12580_v34 = vpack.c.bf16 %v8599_v57, %v8598_v31  ;;  %v8583_v22 = vld [vmem:[%s17362_s5 + $0xb28] sm:$0xff]  ;;  %v8600_v44 = vld [vmem:[%s17362_s5 + $0xbb0] sm:$0xff] }
 0x687   : > { %12545 = vmatprep.subr.bf16.mxu1 %v12544_v21  ;;  %v12578_v21 = vpack.c.bf16 %v8581_v36, %v8580_v43  ;;  %v12582_v4 = vpack.c.bf16 %v8583_v22, %v8582_v7  ;;  %v8615_v39 = vld [vmem:[%s17362_s5 + $0xc28] sm:$0xff] }
 0x68a   : > { %12547 = vmatpush3.bf16.msra.mxu1 %v12546_v35  ;;  %v12584_v35 = vpack.c.bf16 %v8601_v54, %v8600_v44 }
 0x68b   : > { %12549 = vmatprep.subr.bf16.mxu1 %v12548_v42  ;;  %v8584_v42 = vld [vmem:[%s17362_s5 + $0xb30] sm:$0xff] }
 0x68c   : > { %v12586_v38 = vpack.c.bf16 %v8585_v19, %v8584_v42 }
 0x68e   : > { %12551 = vmatpush3.bf16.msra.mxu1 %v12550_v25  ;;  %v12588_v25 = vpack.c.bf16 %v8603_v53, %v8602_v60 }
 0x68f   : > { %12553 = vmatprep.subr.bf16.mxu1 %v12552_v12  ;;  %v8586_v12 = vld [vmem:[%s17362_s5 + $0xb40] sm:$0xff] }
 0x690   : > { %v12590_v13 = vpack.c.bf16 %v8587_v18, %v8586_v12 }
 0x692   : > { %12555 = vmatpush3.bf16.msra.mxu1 %v12554_v5  ;;  %v12592_v5 = vpack.c.bf16 %v8605_v0, %v8604_v23 }
 0x693   : > { %12557 = vmatprep.subr.bf16.mxu1 %v12556_v59  ;;  %v8588_v59 = vld [vmem:[%s17362_s5 + $0xb50] sm:$0xff] }
 0x694   : > { %v12594_v61 = vpack.c.bf16 %v8589_v8, %v8588_v59 }
 0x696   : > { %12559 = vmatpush3.bf16.msra.mxu1 %v12558_v28  ;;  %v12596_v28 = vpack.c.bf16 %v8607_v51, %v8606_v37 }
 0x697   : > { %12561 = vmatprep.subr.bf16.mxu1 %v12560_v62  ;;  %v8590_v62 = vld [vmem:[%s17362_s5 + $0xb60] sm:$0xff] }
 0x698   : > { %v10823_v26 = vpop.f32.mrb[58].mxu1  ;;  %v12598_v32 = vpack.c.bf16 %v8591_v1, %v8590_v62 }
 0x699   : > { %v10824_v56 = vpop.f32.mrb[59].mxu1 }
 0x69a   : > { %v10825_v9 = vadd.f32 %v10824_v56, %v10823_v26  ;;  %12563 = vmatpush3.bf16.msra.mxu1 %v12562_v30  ;;  %v8592_v26 = vld [vmem:[%s17362_s5 + $0xb70] sm:$0xff] }
 0x69b   : > { %12565 = vmatprep.subr.bf16.mxu1 %v12564_v55  ;;  %v12602_v56 = vpack.c.bf16 %v8593_v52, %v8592_v26 }
 0x69c   : > { %v17179_v6 = vadd.f32 %v10825_v9, %v17076_v63  ;;  %v8579_v63 = vld [vmem:[%s17362_s5 + $0xb08] sm:$0xff]  ;;  %v8610_v9 = vld [vmem:[%s17362_s5 + $0xc00] sm:$0xff] }
 0x69d   : > { %v12574_v27 = vpack.c.bf16 %v8579_v63, %v8578_v10  ;;  %v10356_v63 = vld [vmem:[#allocation8 + $0x18] ss:$0 sm:$0xff] }
 0x69e   : > { %12567 = vmatpush3.bf16.msra.mxu1 %v12566_v46  ;;  %v8611_v46 = vld [vmem:[%s17362_s5 + $0xc08] sm:$0xff] }
 0x69f   : > { %12569 = vmatprep.subr.bf16.mxu1 %v12568_v29  ;;  %v12605_v29 = vpack.c.bf16 %v8611_v46, %v8610_v9 }
 0x6a2   : > { %12571 = vmatpush3.bf16.msra.mxu1 %v12570_v49  ;;  %v12611_v49 = vpack.c.bf16 %v8615_v39, %v8614_v58 }
 0x6a3   : > { %12573 = vmatprep.subr.bf16.mxu1 %v12572_v16  ;;  %v8616_v16 = vld [vmem:[%s17362_s5 + $0xc30] sm:$0xff] }
 0x6a5   : > { %9514 = vmatmul.mubr.f32.vlgmr.msra.gmra.mrb[72].mxu1 %v8706_v41 }
 0x6a6   : > { %12575 = vmatpush3.bf16.msra.mxu1 %v12574_v27  ;;  %9583 = vmatprep.mubr.f32.mxu1 %v8718_v15 }
 0x6a7   : > { %12577 = vmatprep.subr.bf16.mxu1 %v12576_v3 }
 0x6aa   : > { %12579 = vmatpush3.bf16.msra.mxu1 %v12578_v21 }
 0x6ab   : > { %12581 = vmatprep.subr.bf16.mxu1 %v12580_v34 }
 0x6ae   : > { %12583 = vmatpush3.bf16.msra.mxu1 %v12582_v4 }
 0x6af   : > { %12585 = vmatprep.subr.bf16.mxu1 %v12584_v35 }
 0x6b2   : > { %12587 = vmatpush3.bf16.msra.mxu1 %v12586_v38 }
 0x6b3   : > { %12589 = vmatprep.subr.bf16.mxu1 %v12588_v25 }
 0x6b6   : > { %12591 = vmatpush3.bf16.msra.mxu1 %v12590_v13 }
 0x6b7   : > { %12593 = vmatprep.subr.bf16.mxu1 %v12592_v5 }
 0x6b8   : > { %v10858_v40 = vpop.f32.mrb[60].mxu1 }
 0x6b9   : > { %v10859_v30 = vpop.f32.mrb[61].mxu1 }
 0x6ba   : > { %v10860_v55 = vadd.f32 %v10859_v30, %v10858_v40  ;;  %12595 = vmatpush3.bf16.msra.mxu1 %v12594_v61 }
 0x6bb   : > { %12597 = vmatprep.subr.bf16.mxu1 %v12596_v28 }
 0x6bc   : > { %v9096_v48 = vadd.f32 %v10860_v55, %v17179_v6  ;;  %v8612_v6 = vld [vmem:[%s17362_s5 + $0xc10] sm:$0xff] }
 0x6bd   : > { %v12608_v17 = vpack.c.bf16 %v8613_v33, %v8612_v6 }
 0x6be   : > { %12599 = vmatpush3.bf16.msra.mxu1 %v12598_v32 }
 0x6bf   : > { %12601 = vmatprep.subr.bf16.mxu1 %v12600_v50 }
 0x6c2   : > { %12603 = vmatpush3.bf16.msra.mxu1 %v12602_v56 }
 0x6c3   : > { %12604 = vmatprep.subr.bf16.mxu1 %v13074_v45 }
 0x6c5   : > { %9584 = vmatmul.mubr.f32.vlgmr.msra.gmra.mrb[74].mxu1 %v8714_v2 }
 0x6c6   : > { %12606 = vmatpush3.bf16.msra.mxu1 %v12605_v29  ;;  %11653 = vmatprep.mubr.msk.f32.mxu1 %vm13075_vm11, %v17407_v47  ;;  %v8617_v47 = vld [vmem:[%s17362_s5 + $0xc38] sm:$0xff] }
 0x6c7   : > { %12607 = vmatprep.subr.bf16.mxu1 %v13074_v45  ;;  %v12614_v10 = vpack.c.bf16 %v8617_v47, %v8616_v16 }
 0x6ca   : > { %12609 = vmatpush3.bf16.msra.mxu1 %v12608_v17 }
 0x6cb   : > { %12610 = vmatprep.subr.bf16.mxu1 %v13074_v45 }
 0x6ce   : > { %12612 = vmatpush3.bf16.msra.mxu1 %v12611_v49 }
 0x6cf   : > { %12613 = vmatprep.subr.bf16.mxu1 %v13074_v45 }
 0x6d2   : > { %12615 = vmatpush3.bf16.msra.mxu1 %v12614_v10 }
 0x6d5   : > { %11654 = vmatmul.mubr.msk.f32.vlgmr.msra.gmra.mrb[76].mxu1 %vm4199_vm5, %v10356_v63 }
 0x6d8   : > { %v10893_v24 = vpop.f32.mrb[62].mxu1 }
 0x6d9   : > { %v10894_v11 = vpop.f32.mrb[63].mxu1 }
 0x6da   : > { %v10895_v27 = vadd.f32 %v10894_v11, %v10893_v24 }
 0x6dc   : > { %v9166_v41 = vadd.f32 %v10895_v27, %v9096_v48 }
 0x6f8   : > { %v10928_v3 = vpop.f32.mrb[64].mxu1 }
 0x6f9   : > { %v10929_v43 = vpop.f32.mrb[65].mxu1 }
 0x6fa   : > { %v10930_v36 = vadd.f32 %v10929_v43, %v10928_v3 }
 0x6fc   : > { %v9236_v15 = vadd.f32 %v10930_v36, %v9166_v41 }
 0x718   : > { %v10963_v31 = vpop.f32.mrb[66].mxu1 }
 0x719   : > { %v10964_v57 = vpop.f32.mrb[67].mxu1 }
 0x71a   : > { %v10965_v21 = vadd.f32 %v10964_v57, %v10963_v31 }
 0x71c   : > { %v9306_v34 = vadd.f32 %v10965_v21, %v9236_v15 }
 0x738   : > { %v10998_v7 = vpop.f32.mrb[68].mxu1 }
 0x739   : > { %v10999_v22 = vpop.f32.mrb[69].mxu1 }
 0x73a   : > { %v11000_v44 = vadd.f32 %v10999_v22, %v10998_v7 }
 0x73c   : > { %v9376_v54 = vadd.f32 %v11000_v44, %v9306_v34 }
 0x758   : > { %v11033_v4 = vpop.f32.mrb[70].mxu1 }
 0x759   : > { %v11034_v35 = vpop.f32.mrb[71].mxu1 }
 0x75a   : > { %v11035_v42 = vadd.f32 %v11034_v35, %v11033_v4 }
 0x75c   : > { %v9446_v19 = vadd.f32 %v11035_v42, %v9376_v54 }
 0x778   : > { %v11068_v60 = vpop.f32.mrb[72].mxu1 }
 0x779   : > { %v11069_v53 = vpop.f32.mrb[73].mxu1 }
 0x77a   : > { %v11070_v38 = vadd.f32 %v11069_v53, %v11068_v60 }
 0x77c   : > { %v9516_v25 = vadd.f32 %v11070_v38, %v9446_v19 }
 0x798   : > { %v11103_v12 = vpop.f32.mrb[74].mxu1 }
 0x799   : > { %v11104_v18 = vpop.f32.mrb[75].mxu1 }
 0x79a   : > { %v11105_v23 = vadd.f32 %v11104_v18, %v11103_v12 }
 0x79c   : > { %v9586_v0 = vadd.f32 %v11105_v23, %v9516_v25 }
 0x7a8   : > { %v9655_v13 = vpop.f32.mrb[76].mxu1 }
 0x7a9   : > { %v9656_v5 = vadd.f32 %v9655_v13, %v9586_v0  ;;  %v11655_v59 = vpop.f32.mrb[77].mxu1 }
 0x7ab   : > { %9660 = vst.msk [vmem:[%s270_s14] sm:$0x1] %vm9659_vm12, %v9656_v5 }
 0x7ac   : > { %13019 = shalt.err (!%p13016_p3)
}
 0x7ad   : > { %s13020_s22 = scalar_lea.hbm %s17315_s17, 16  ;;  %s13024_s8 = scalar_lea.hbm %s17364_s7, 32 }
 0x7ae   : > { %p13021_p4 = scmp.ne.s32.totalorder %s17315_s17, %s13020_s22  ;;  %p13025_p9 = scmp.lt.u32.totalorder %s17315_s17, %s17364_s7 }
 0x7af   : > { %p13026_p10 = scmp.lt.u32.totalorder %s13024_s8, %s13020_s22  ;;  %p13028_p12 = scmp.lt.u32.totalorder %s13020_s22, %s17315_s17 }
 0x7b0   : > { %p13022_p7 = pnand %p13021_p4, %p13155_p5 }
 0x7b1   : > { %p13027_p11 = por %p13026_p10, %p13025_p9 }
 0x7b2   : > { %p13023_p8 = pneg %p13022_p7 }
 0x7b3   : > { %p13029_p13 = por %p13028_p12, %p13027_p11 }
 0x7b5   : > { %p13030_p0 = pnand %p13029_p13, %p13023_p8 }
 0x7b7   : > { %13033 = shalt.err (!%p13030_p0)
}
 0x7b8   : > { %12960 = dma.vmem_to_hbm [thread:$0]  (%p13155_p5), %s17317_s15, 16, %s17315_s17, %s9662_s18  }
 0x7b9 PF: > { %p12966_p1 = scmp.ge.s32.totalorder %s13068_s27, 2  ;;  %s9686_s9 = sand.u32 1, %s13056_s24  }
 0x7ba   : > { %s9687_s16 = scalar_lea.sflag [#allocation10], %s9686_s9 }
 0x7bb   : > { %p12963_p2 = pnand %p12966_p1, %p13159_p6 }
 0x7bd   : > { %13051 = dma.done.wait (!%p12963_p2), %s9687_s16, 16  }
 0x7be   : > { %13053 = vsyncadd (!%p12963_p2), %s9687_s16, 4294967280  ;;  %p17_p3 = scmp.ge.s32.totalorder %s13142_s30, 4   ;;  %s17449_s24 = smov %s13060_s25 }
 0x7bf   : > { %s17450_s25 = smov %s13064_s26  ;;  %s17451_s26 = smov %s13153_s10 }
 0x7c0   : > { %s17452_s27 = smov %s13142_s30  ;;  %19 = sbr.rel (!%p17_p3) target bundleno = 3 (0x3), region = 93 }
 0x7c7   :  { %9691 = vsyncpa [#allocation10], 1 }
 0x7c8   :  { %9693 = vsyncpa [#allocation10 + $0x1], 1 }

</bundles_post_ra>
